<compile_context>
chip_gen: v6e
topology: v6e:2x2x1
jax: 0.10.0
libtpu: 0.0.40
codegen_flags: <defaults>
</compile_context>

<pallas_src>
import functools

import jax
import jax.numpy as jnp
from jax.experimental import pallas as pl
from jax.experimental.pallas import tpu as pltpu


# ---------------------------------------------------------------------------
# Fused Pallas kernel: stem matmul + all head conv stacks, one image per grid step
# ---------------------------------------------------------------------------
def _ctrbox_fused_kernel(*refs, Ho, Wo, c_mid, head_conv, head_meta, C_pad, PMAX):
    """refs = [patches, stem_w, stem_b,
               (w1, scale1, shift1, w2, b2) * n_heads,          # inputs
               out_slab,                                        # output
               feat_pad_scratch, h1_pad_scratch]                # VMEM scratch
    """
    HW = Ho * Wo
    n_heads = len(head_meta)
    patches_ref, stem_w_ref, stem_b_ref = refs[0:3]
    head_refs = refs[3:3 + 5 * n_heads]
    o_ref = refs[3 + 5 * n_heads]
    feat_pad = refs[3 + 5 * n_heads + 1]
    h1_pad = refs[3 + 5 * n_heads + 2]

    # --- stem (backbone/decoder stand-in): patchify matmul + bias + ReLU -----
    feat = jnp.dot(patches_ref[0], stem_w_ref[...],
                   preferred_element_type=jnp.float32)            # (HW, c_mid)
    feat = jnp.maximum(feat + stem_b_ref[...], 0.0)

    # zero-halo'd copy of the feature map, kept entirely in VMEM
    feat_pad[...] = jnp.zeros_like(feat_pad)
    feat_pad[PMAX:PMAX + Ho, PMAX:PMAX + Wo, :] = feat.reshape(Ho, Wo, c_mid)
    if any(K2 > 1 for (_, K2, _, _) in head_meta):
        h1_pad[...] = jnp.zeros_like(h1_pad)

    outs = []
    for hi, (K1, K2, classes, act) in enumerate(head_meta):
        w1_ref, s1_ref, t1_ref, w2_ref, b2_ref = head_refs[5 * hi:5 * hi + 5]

        # conv1 (KxK, 'same' padding) as ONE im2col matmul
        off1 = PMAX - K1 // 2
        cols = []
        for dy in range(K1):
            for dx in range(K1):
                blk = feat_pad[off1 + dy:off1 + dy + Ho,
                               off1 + dx:off1 + dx + Wo, :]
                cols.append(blk.reshape(HW, c_mid))
        pat1 = cols[0] if len(cols) == 1 else jnp.concatenate(cols, axis=-1)
        h1 = jnp.dot(pat1.astype(jnp.bfloat16), w1_ref[...],
                     preferred_element_type=jnp.float32)          # (HW, head_conv)
        # fused conv bias + BatchNorm(eval) (folded into scale/shift) + ReLU
        h1 = jnp.maximum(h1 * s1_ref[...] + t1_ref[...], 0.0)

        # conv2 (KxK or 1x1) + bias (+ sigmoid for 'hm'/'cls' heads)
        if K2 == 1:
            pat2 = h1
        else:
            off2 = PMAX - K2 // 2
            h1_pad[PMAX:PMAX + Ho, PMAX:PMAX + Wo, :] = h1.reshape(Ho, Wo, head_conv)
            cols2 = []
            for dy in range(K2):
                for dx in range(K2):
                    blk = h1_pad[off2 + dy:off2 + dy + Ho,
                                 off2 + dx:off2 + dx + Wo, :]
                    cols2.append(blk.reshape(HW, head_conv))
            pat2 = jnp.concatenate(cols2, axis=-1)
        y = jnp.dot(pat2.astype(jnp.bfloat16), w2_ref[...],
                    preferred_element_type=jnp.float32) + b2_ref[...]
        if act == "sigmoid":
            y = jax.nn.sigmoid(y)
        outs.append(y)

    total = sum(m[2] for m in head_meta)
    if total < C_pad:
        outs.append(jnp.zeros((HW, C_pad - total), jnp.float32))
    # single lane-dense (HW, 128) store
    o_ref[0] = jnp.concatenate(outs, axis=-1)


# ---------------------------------------------------------------------------
# Parameter construction (deterministic, synthetic)
# ---------------------------------------------------------------------------
def init_params(heads, down_ratio, final_kernel, head_conv, key):
    channels = [3, 64, 256, 512, 1024, 2048]
    l1 = {2: 1, 4: 2, 8: 3, 16: 4}[down_ratio]
    c_mid = channels[l1]

    keys = iter(jax.random.split(key, 64))

    def nrm(shape, std=0.05):
        return std * jax.random.normal(next(keys), shape, jnp.float32)

    params = {
        "down_ratio": down_ratio,
        "c_mid": c_mid,
        "head_conv": head_conv,
        # stem stand-in for resnet101 backbone + CombinationModule decoders
        "stem_w": nrm((down_ratio * down_ratio * 3, c_mid)),
        "stem_b": nrm((c_mid,)),
        "heads": {},
    }
    for head, classes in heads.items():
        k1 = 7 if head == "wh" else 3
        k2 = 7 if head == "wh" else final_kernel
        params["heads"][head] = {
            "k1": k1, "k2": k2,
            "w1": nrm((k1, k1, c_mid, head_conv)),
            "b1": nrm((head_conv,)),
            "bn_gamma": 1.0 + nrm((head_conv,), 0.01),
            "bn_beta": nrm((head_conv,), 0.01),
            "bn_mean": nrm((head_conv,), 0.01),
            "bn_var": 1.0 + jnp.abs(nrm((head_conv,), 0.01)),
            "w2": nrm((k2, k2, head_conv, classes)),
            "b2": (jnp.full((classes,), -2.19, jnp.float32)
                   if "hm" in head else jnp.zeros((classes,), jnp.float32)),
        }
    return params


def _fold_bn(gamma, beta, mean, var, conv_bias, eps=1e-5):
    rstd = 1.0 / jnp.sqrt(var + eps)
    scale = gamma * rstd
    shift = beta + (conv_bias - mean) * scale
    return scale, shift


# ---------------------------------------------------------------------------
# Forward pass (mirrors CTRBOX_Origin.forward)
# ---------------------------------------------------------------------------
def ctrbox_forward(x_nchw, params, heads):
    x = jnp.transpose(x_nchw, (0, 2, 3, 1)).astype(jnp.float32)   # NCHW -> NHWC
    N, H, W, Cimg = x.shape
    dr = params["down_ratio"]
    c_mid = params["c_mid"]
    head_conv = params["head_conv"]
    Ho, Wo = H // dr, W // dr
    HW = Ho * Wo
    Kin = dr * dr * Cimg

    # Patchify front-end of the backbone stand-in (tiny relayout; the matmul itself
    # is fused into the Pallas kernel so c2_combine never leaves VMEM).
    patches = (x.reshape(N, Ho, dr, Wo, dr, Cimg)
                .transpose(0, 1, 3, 2, 4, 5)
                .reshape(N, HW, Kin)).astype(jnp.bfloat16)

    head_meta = []
    flat_inputs = [patches,
                   params["stem_w"].astype(jnp.bfloat16),
                   params["stem_b"].reshape(1, c_mid).astype(jnp.float32)]
    in_specs = [
        pl.BlockSpec((1, HW, Kin), lambda n: (n, 0, 0)),
        pl.BlockSpec((Kin, c_mid), lambda n: (0, 0)),
        pl.BlockSpec((1, c_mid), lambda n: (0, 0)),
    ]

    for head, classes in heads.items():
        p = params["heads"][head]
        K1, K2 = p["k1"], p["k2"]
        act = "sigmoid" if ("hm" in head or "cls" in head) else "none"
        head_meta.append((K1, K2, int(classes), act))

        scale1, shift1 = _fold_bn(p["bn_gamma"], p["bn_beta"],
                                  p["bn_mean"], p["bn_var"], p["b1"])
        w1f = p["w1"].reshape(K1 * K1 * c_mid, head_conv).astype(jnp.bfloat16)
        w2f = p["w2"].reshape(K2 * K2 * head_conv, classes).astype(jnp.bfloat16)
        flat_inputs += [w1f,
                        scale1.reshape(1, head_conv).astype(jnp.float32),
                        shift1.reshape(1, head_conv).astype(jnp.float32),
                        w2f,
                        p["b2"].reshape(1, classes).astype(jnp.float32)]
        in_specs += [
            pl.BlockSpec((K1 * K1 * c_mid, head_conv), lambda n: (0, 0)),
            pl.BlockSpec((1, head_conv), lambda n: (0, 0)),
            pl.BlockSpec((1, head_conv), lambda n: (0, 0)),
            pl.BlockSpec((K2 * K2 * head_conv, int(classes)), lambda n: (0, 0)),
            pl.BlockSpec((1, int(classes)), lambda n: (0, 0)),
        ]

    total = sum(m[2] for m in head_meta)
    C_pad = max(128, pl.cdiv(total, 128) * 128)
    PMAX = max(max(K1, K2) // 2 for (K1, K2, _, _) in head_meta)

    # Advisory cost estimate so XLA schedules around the fused custom call.
    flops = 2 * N * HW * Kin * c_mid
    transc = 0
    for (K1, K2, classes, act) in head_meta:
        flops += 2 * N * HW * (K1 * K1 * c_mid * head_conv
                               + K2 * K2 * head_conv * classes)
        if act == "sigmoid":
            transc += N * HW * classes
    bytes_accessed = int(sum(a.size * a.dtype.itemsize for a in flat_inputs)
                         + N * HW * C_pad * 4)

    kernel = functools.partial(
        _ctrbox_fused_kernel, Ho=Ho, Wo=Wo, c_mid=c_mid, head_conv=head_conv,
        head_meta=tuple(head_meta), C_pad=C_pad, PMAX=PMAX)

    out_slab = pl.pallas_call(
        kernel,
        out_shape=jax.ShapeDtypeStruct((N, HW, C_pad), jnp.float32),
        grid_spec=pltpu.PrefetchScalarGridSpec(
            num_scalar_prefetch=0,
            grid=(N,),
            in_specs=in_specs,
            out_specs=pl.BlockSpec((1, HW, C_pad), lambda n: (n, 0, 0)),
            scratch_shapes=[
                pltpu.VMEM((Ho + 2 * PMAX, Wo + 2 * PMAX, c_mid), jnp.float32),
                pltpu.VMEM((Ho + 2 * PMAX, Wo + 2 * PMAX, head_conv), jnp.float32),
            ]),
        compiler_params=pltpu.CompilerParams(
            dimension_semantics=("parallel",)),
        cost_estimate=pl.CostEstimate(flops=flops, transcendentals=transc,
                                      bytes_accessed=bytes_accessed),
    )(*flat_inputs)

    # Slice the lane-dense slab back into per-head NCHW outputs (cheap XLA ops).
    dec_dict = {}
    off = 0
    for head, classes in heads.items():
        y = out_slab[:, :, off:off + classes].reshape(N, Ho, Wo, classes)
        dec_dict[head] = jnp.transpose(y, (0, 3, 1, 2))
        off += classes
    return dec_dict


# ---------------------------------------------------------------------------
if __name__ == "__main__":
    heads = {"hm": 2, "wh": 10, "reg": 2, "cls_theta": 1}
    down_ratio = 2
    final_kernel = 1
    head_conv = 32

    N, H, W = 2, 16, 16
    key = jax.random.PRNGKey(0)
    k_x, k_p = jax.random.split(key)
    x = jax.random.normal(k_x, (N, 3, H, W), jnp.float32)

    params = init_params(heads, down_ratio, final_kernel, head_conv, k_p)

    fwd = jax.jit(lambda xx: ctrbox_forward(xx, params, heads))
    out = jax.block_until_ready(fwd(x))

    # sanity checks: shapes, finiteness, sigmoid ranges
    Ho, Wo = H // down_ratio, W // down_ratio
    for head, classes in heads.items():
        assert out[head].shape == (N, classes, Ho, Wo), (head, out[head].shape)
        assert bool(jnp.all(jnp.isfinite(out[head]))), head
    assert float(out["hm"].min()) >= 0.0 and float(out["hm"].max()) <= 1.0
    assert float(out["cls_theta"].min()) >= 0.0 and float(out["cls_theta"].max()) <= 1.0

    print("KERNEL_OK")
</pallas_src>

<mosaic_0001>
module attributes {stable_mosaic.version = 11 : i64} {
  func.func @_ctrbox_fused_kernel(%arg0: i32, %arg1: memref<1x64x12xbf16, #tpu.memory_space<vmem>>, %arg2: memref<12x64xbf16, #tpu.memory_space<vmem>>, %arg3: memref<1x64xf32, #tpu.memory_space<vmem>>, %arg4: memref<576x32xbf16, #tpu.memory_space<vmem>>, %arg5: memref<1x32xf32, #tpu.memory_space<vmem>>, %arg6: memref<1x32xf32, #tpu.memory_space<vmem>>, %arg7: memref<32x2xbf16, #tpu.memory_space<vmem>>, %arg8: memref<1x2xf32, #tpu.memory_space<vmem>>, %arg9: memref<3136x32xbf16, #tpu.memory_space<vmem>>, %arg10: memref<1x32xf32, #tpu.memory_space<vmem>>, %arg11: memref<1x32xf32, #tpu.memory_space<vmem>>, %arg12: memref<1568x10xbf16, #tpu.memory_space<vmem>>, %arg13: memref<1x10xf32, #tpu.memory_space<vmem>>, %arg14: memref<576x32xbf16, #tpu.memory_space<vmem>>, %arg15: memref<1x32xf32, #tpu.memory_space<vmem>>, %arg16: memref<1x32xf32, #tpu.memory_space<vmem>>, %arg17: memref<32x2xbf16, #tpu.memory_space<vmem>>, %arg18: memref<1x2xf32, #tpu.memory_space<vmem>>, %arg19: memref<576x32xbf16, #tpu.memory_space<vmem>>, %arg20: memref<1x32xf32, #tpu.memory_space<vmem>>, %arg21: memref<1x32xf32, #tpu.memory_space<vmem>>, %arg22: memref<32x1xbf16, #tpu.memory_space<vmem>>, %arg23: memref<1x1xf32, #tpu.memory_space<vmem>>, %arg24: memref<1x64x128xf32, #tpu.memory_space<vmem>>, %arg25: memref<14x14x64xf32, #tpu.memory_space<vmem>>, %arg26: memref<14x14x32xf32, #tpu.memory_space<vmem>>) attributes {dimension_semantics = [#tpu.dimension_semantics<parallel>], iteration_bounds = array<i64: 2>, scalar_prefetch = 0 : i64, scratch_operands = 2 : i64, tpu.core_type = #tpu.core_type<tc>, window_params = [{transform_indices = @transform_0, window_bounds = array<i64: 1, 64, 12>}, {pipeline_mode = #tpu.pipeline_mode<synchronous>, transform_indices = @transform_1, window_bounds = array<i64: 12, 64>}, {pipeline_mode = #tpu.pipeline_mode<synchronous>, transform_indices = @transform_2, window_bounds = array<i64: 1, 64>}, {pipeline_mode = #tpu.pipeline_mode<synchronous>, transform_indices = @transform_3, window_bounds = array<i64: 576, 32>}, {pipeline_mode = #tpu.pipeline_mode<synchronous>, transform_indices = @transform_4, window_bounds = array<i64: 1, 32>}, {pipeline_mode = #tpu.pipeline_mode<synchronous>, transform_indices = @transform_5, window_bounds = array<i64: 1, 32>}, {pipeline_mode = #tpu.pipeline_mode<synchronous>, transform_indices = @transform_6, window_bounds = array<i64: 32, 2>}, {pipeline_mode = #tpu.pipeline_mode<synchronous>, transform_indices = @transform_7, window_bounds = array<i64: 1, 2>}, {pipeline_mode = #tpu.pipeline_mode<synchronous>, transform_indices = @transform_8, window_bounds = array<i64: 3136, 32>}, {pipeline_mode = #tpu.pipeline_mode<synchronous>, transform_indices = @transform_9, window_bounds = array<i64: 1, 32>}, {pipeline_mode = #tpu.pipeline_mode<synchronous>, transform_indices = @transform_10, window_bounds = array<i64: 1, 32>}, {pipeline_mode = #tpu.pipeline_mode<synchronous>, transform_indices = @transform_11, window_bounds = array<i64: 1568, 10>}, {pipeline_mode = #tpu.pipeline_mode<synchronous>, transform_indices = @transform_12, window_bounds = array<i64: 1, 10>}, {pipeline_mode = #tpu.pipeline_mode<synchronous>, transform_indices = @transform_13, window_bounds = array<i64: 576, 32>}, {pipeline_mode = #tpu.pipeline_mode<synchronous>, transform_indices = @transform_14, window_bounds = array<i64: 1, 32>}, {pipeline_mode = #tpu.pipeline_mode<synchronous>, transform_indices = @transform_15, window_bounds = array<i64: 1, 32>}, {pipeline_mode = #tpu.pipeline_mode<synchronous>, transform_indices = @transform_16, window_bounds = array<i64: 32, 2>}, {pipeline_mode = #tpu.pipeline_mode<synchronous>, transform_indices = @transform_17, window_bounds = array<i64: 1, 2>}, {pipeline_mode = #tpu.pipeline_mode<synchronous>, transform_indices = @transform_18, window_bounds = array<i64: 576, 32>}, {pipeline_mode = #tpu.pipeline_mode<synchronous>, transform_indices = @transform_19, window_bounds = array<i64: 1, 32>}, {pipeline_mode = #tpu.pipeline_mode<synchronous>, transform_indices = @transform_20, window_bounds = array<i64: 1, 32>}, {pipeline_mode = #tpu.pipeline_mode<synchronous>, transform_indices = @transform_21, window_bounds = array<i64: 32, 1>}, {pipeline_mode = #tpu.pipeline_mode<synchronous>, transform_indices = @transform_22, window_bounds = array<i64: 1, 1>}, {transform_indices = @transform_23, window_bounds = array<i64: 1, 64, 128>}]} {
    %c0 = arith.constant 0 : index
    %c0_0 = arith.constant 0 : index
    %c0_1 = arith.constant 0 : index
    %0 = vector.load %arg1[%c0, %c0_0, %c0_1] : memref<1x64x12xbf16, #tpu.memory_space<vmem>>, vector<1x64x12xbf16>
    %1 = vector.shape_cast %0 : vector<1x64x12xbf16> to vector<64x12xbf16>
    %c0_2 = arith.constant 0 : index
    %c0_3 = arith.constant 0 : index
    %2 = vector.load %arg2[%c0_2, %c0_3] : memref<12x64xbf16, #tpu.memory_space<vmem>>, vector<12x64xbf16>
    %cst = arith.constant dense<0.000000e+00> : vector<64x64xf32>
    %3 = tpu.matmul %1, %2, %cst {dimension_numbers = #tpu.dot_dimension_numbers<[1], [0], [0], [1], [0, 0, 1, 1], [], []>} : vector<64x12xbf16>, vector<12x64xbf16>, vector<64x64xf32> -> vector<64x64xf32>
    %c0_4 = arith.constant 0 : index
    %c0_5 = arith.constant 0 : index
    %4 = vector.load %arg3[%c0_4, %c0_5] : memref<1x64xf32, #tpu.memory_space<vmem>>, vector<1x64xf32>
    %5 = vector.broadcast %4 : vector<1x64xf32> to vector<64x64xf32>
    %6 = arith.addf %3, %5 : vector<64x64xf32>
    %cst_6 = arith.constant 0.000000e+00 : f32
    %7 = vector.broadcast %cst_6 : f32 to vector<64x64xf32>
    %8 = arith.maximumf %6, %7 : vector<64x64xf32>
    %cst_7 = arith.constant 0.000000e+00 : f32
    %9 = vector.broadcast %cst_7 : f32 to vector<14x14x64xf32>
    %c0_8 = arith.constant 0 : index
    %c0_9 = arith.constant 0 : index
    %c0_10 = arith.constant 0 : index
    %10 = vector.load %arg25[%c0_8, %c0_9, %c0_10] : memref<14x14x64xf32, #tpu.memory_space<vmem>>, vector<14x14x64xf32>
    tpu.vector_store %arg25[%c0_8, %c0_9, %c0_10], %9 {strides = array<i32>} : memref<14x14x64xf32, #tpu.memory_space<vmem>>, vector<14x14x64xf32>,
    %11 = vector.shape_cast %8 : vector<64x64xf32> to vector<8x8x64xf32>
    %c3 = arith.constant 3 : index
    %c3_11 = arith.constant 3 : index
    %c0_12 = arith.constant 0 : index
    %12 = vector.load %arg25[%c3, %c3_11, %c0_12] : memref<14x14x64xf32, #tpu.memory_space<vmem>>, vector<8x8x64xf32>
    tpu.vector_store %arg25[%c3, %c3_11, %c0_12], %11 {strides = array<i32>} : memref<14x14x64xf32, #tpu.memory_space<vmem>>, vector<8x8x64xf32>,
    %cst_13 = arith.constant 0.000000e+00 : f32
    %13 = vector.broadcast %cst_13 : f32 to vector<14x14x32xf32>
    %c0_14 = arith.constant 0 : index
    %c0_15 = arith.constant 0 : index
    %c0_16 = arith.constant 0 : index
    %14 = vector.load %arg26[%c0_14, %c0_15, %c0_16] : memref<14x14x32xf32, #tpu.memory_space<vmem>>, vector<14x14x32xf32>
    tpu.vector_store %arg26[%c0_14, %c0_15, %c0_16], %13 {strides = array<i32>} : memref<14x14x32xf32, #tpu.memory_space<vmem>>, vector<14x14x32xf32>,
    %c2 = arith.constant 2 : index
    %c2_17 = arith.constant 2 : index
    %c0_18 = arith.constant 0 : index
    %15 = vector.load %arg25[%c2, %c2_17, %c0_18] : memref<14x14x64xf32, #tpu.memory_space<vmem>>, vector<8x8x64xf32>
    %16 = vector.shape_cast %15 : vector<8x8x64xf32> to vector<64x64xf32>
    %c2_19 = arith.constant 2 : index
    %c3_20 = arith.constant 3 : index
    %c0_21 = arith.constant 0 : index
    %17 = vector.load %arg25[%c2_19, %c3_20, %c0_21] : memref<14x14x64xf32, #tpu.memory_space<vmem>>, vector<8x8x64xf32>
    %18 = vector.shape_cast %17 : vector<8x8x64xf32> to vector<64x64xf32>
    %c2_22 = arith.constant 2 : index
    %c4 = arith.constant 4 : index
    %c0_23 = arith.constant 0 : index
    %19 = vector.load %arg25[%c2_22, %c4, %c0_23] : memref<14x14x64xf32, #tpu.memory_space<vmem>>, vector<8x8x64xf32>
    %20 = vector.shape_cast %19 : vector<8x8x64xf32> to vector<64x64xf32>
    %c3_24 = arith.constant 3 : index
    %c2_25 = arith.constant 2 : index
    %c0_26 = arith.constant 0 : index
    %21 = vector.load %arg25[%c3_24, %c2_25, %c0_26] : memref<14x14x64xf32, #tpu.memory_space<vmem>>, vector<8x8x64xf32>
    %22 = vector.shape_cast %21 : vector<8x8x64xf32> to vector<64x64xf32>
    %c3_27 = arith.constant 3 : index
    %c3_28 = arith.constant 3 : index
    %c0_29 = arith.constant 0 : index
    %23 = vector.load %arg25[%c3_27, %c3_28, %c0_29] : memref<14x14x64xf32, #tpu.memory_space<vmem>>, vector<8x8x64xf32>
    %24 = vector.shape_cast %23 : vector<8x8x64xf32> to vector<64x64xf32>
    %c3_30 = arith.constant 3 : index
    %c4_31 = arith.constant 4 : index
    %c0_32 = arith.constant 0 : index
    %25 = vector.load %arg25[%c3_30, %c4_31, %c0_32] : memref<14x14x64xf32, #tpu.memory_space<vmem>>, vector<8x8x64xf32>
    %26 = vector.shape_cast %25 : vector<8x8x64xf32> to vector<64x64xf32>
    %c4_33 = arith.constant 4 : index
    %c2_34 = arith.constant 2 : index
    %c0_35 = arith.constant 0 : index
    %27 = vector.load %arg25[%c4_33, %c2_34, %c0_35] : memref<14x14x64xf32, #tpu.memory_space<vmem>>, vector<8x8x64xf32>
    %28 = vector.shape_cast %27 : vector<8x8x64xf32> to vector<64x64xf32>
    %c4_36 = arith.constant 4 : index
    %c3_37 = arith.constant 3 : index
    %c0_38 = arith.constant 0 : index
    %29 = vector.load %arg25[%c4_36, %c3_37, %c0_38] : memref<14x14x64xf32, #tpu.memory_space<vmem>>, vector<8x8x64xf32>
    %30 = vector.shape_cast %29 : vector<8x8x64xf32> to vector<64x64xf32>
    %c4_39 = arith.constant 4 : index
    %c4_40 = arith.constant 4 : index
    %c0_41 = arith.constant 0 : index
    %31 = vector.load %arg25[%c4_39, %c4_40, %c0_41] : memref<14x14x64xf32, #tpu.memory_space<vmem>>, vector<8x8x64xf32>
    %32 = vector.shape_cast %31 : vector<8x8x64xf32> to vector<64x64xf32>
    %33 = tpu.concatenate %16, %18, %20, %22, %24, %26, %28, %30, %32 in 1 : vector<64x64xf32>, vector<64x64xf32>, vector<64x64xf32>, vector<64x64xf32>, vector<64x64xf32>, vector<64x64xf32>, vector<64x64xf32>, vector<64x64xf32>, vector<64x64xf32> -> vector<64x576xf32>
    %34 = arith.truncf %33 : vector<64x576xf32> to vector<64x576xbf16>
    %c0_42 = arith.constant 0 : index
    %c0_43 = arith.constant 0 : index
    %35 = vector.load %arg4[%c0_42, %c0_43] : memref<576x32xbf16, #tpu.memory_space<vmem>>, vector<576x32xbf16>
    %cst_44 = arith.constant dense<0.000000e+00> : vector<64x32xf32>
    %36 = tpu.matmul %34, %35, %cst_44 {dimension_numbers = #tpu.dot_dimension_numbers<[1], [0], [0], [1], [0, 0, 1, 1], [], []>} : vector<64x576xbf16>, vector<576x32xbf16>, vector<64x32xf32> -> vector<64x32xf32>
    %c0_45 = arith.constant 0 : index
    %c0_46 = arith.constant 0 : index
    %37 = vector.load %arg5[%c0_45, %c0_46] : memref<1x32xf32, #tpu.memory_space<vmem>>, vector<1x32xf32>
    %38 = vector.broadcast %37 : vector<1x32xf32> to vector<64x32xf32>
    %39 = arith.mulf %36, %38 : vector<64x32xf32>
    %c0_47 = arith.constant 0 : index
    %c0_48 = arith.constant 0 : index
    %40 = vector.load %arg6[%c0_47, %c0_48] : memref<1x32xf32, #tpu.memory_space<vmem>>, vector<1x32xf32>
    %41 = vector.broadcast %40 : vector<1x32xf32> to vector<64x32xf32>
    %42 = arith.addf %39, %41 : vector<64x32xf32>
    %cst_49 = arith.constant 0.000000e+00 : f32
    %43 = vector.broadcast %cst_49 : f32 to vector<64x32xf32>
    %44 = arith.maximumf %42, %43 : vector<64x32xf32>
    %45 = arith.truncf %44 : vector<64x32xf32> to vector<64x32xbf16>
    %c0_50 = arith.constant 0 : index
    %c0_51 = arith.constant 0 : index
    %46 = vector.load %arg7[%c0_50, %c0_51] : memref<32x2xbf16, #tpu.memory_space<vmem>>, vector<32x2xbf16>
    %cst_52 = arith.constant dense<0.000000e+00> : vector<64x2xf32>
    %47 = tpu.matmul %45, %46, %cst_52 {dimension_numbers = #tpu.dot_dimension_numbers<[1], [0], [0], [1], [0, 0, 1, 1], [], []>} : vector<64x32xbf16>, vector<32x2xbf16>, vector<64x2xf32> -> vector<64x2xf32>
    %c0_53 = arith.constant 0 : index
    %c0_54 = arith.constant 0 : index
    %48 = vector.load %arg8[%c0_53, %c0_54] : memref<1x2xf32, #tpu.memory_space<vmem>>, vector<1x2xf32>
    %49 = vector.broadcast %48 : vector<1x2xf32> to vector<64x2xf32>
    %50 = arith.addf %47, %49 : vector<64x2xf32>
    %51 = arith.negf %50 : vector<64x2xf32>
    %52 = math.exp %51 : vector<64x2xf32>
    %cst_55 = arith.constant 1.000000e+00 : f32
    %53 = vector.broadcast %cst_55 : f32 to vector<64x2xf32>
    %54 = arith.addf %53, %52 : vector<64x2xf32>
    %55 = arith.divf %53, %54 : vector<64x2xf32>
    %c0_56 = arith.constant 0 : index
    %c0_57 = arith.constant 0 : index
    %c0_58 = arith.constant 0 : index
    %56 = vector.load %arg25[%c0_56, %c0_57, %c0_58] : memref<14x14x64xf32, #tpu.memory_space<vmem>>, vector<8x8x64xf32>
    %57 = vector.shape_cast %56 : vector<8x8x64xf32> to vector<64x64xf32>
    %c0_59 = arith.constant 0 : index
    %c1 = arith.constant 1 : index
    %c0_60 = arith.constant 0 : index
    %58 = vector.load %arg25[%c0_59, %c1, %c0_60] : memref<14x14x64xf32, #tpu.memory_space<vmem>>, vector<8x8x64xf32>
    %59 = vector.shape_cast %58 : vector<8x8x64xf32> to vector<64x64xf32>
    %c0_61 = arith.constant 0 : index
    %c2_62 = arith.constant 2 : index
    %c0_63 = arith.constant 0 : index
    %60 = vector.load %arg25[%c0_61, %c2_62, %c0_63] : memref<14x14x64xf32, #tpu.memory_space<vmem>>, vector<8x8x64xf32>
    %61 = vector.shape_cast %60 : vector<8x8x64xf32> to vector<64x64xf32>
    %c0_64 = arith.constant 0 : index
    %c3_65 = arith.constant 3 : index
    %c0_66 = arith.constant 0 : index
    %62 = vector.load %arg25[%c0_64, %c3_65, %c0_66] : memref<14x14x64xf32, #tpu.memory_space<vmem>>, vector<8x8x64xf32>
    %63 = vector.shape_cast %62 : vector<8x8x64xf32> to vector<64x64xf32>
    %c0_67 = arith.constant 0 : index
    %c4_68 = arith.constant 4 : index
    %c0_69 = arith.constant 0 : index
    %64 = vector.load %arg25[%c0_67, %c4_68, %c0_69] : memref<14x14x64xf32, #tpu.memory_space<vmem>>, vector<8x8x64xf32>
    %65 = vector.shape_cast %64 : vector<8x8x64xf32> to vector<64x64xf32>
    %c0_70 = arith.constant 0 : index
    %c5 = arith.constant 5 : index
    %c0_71 = arith.constant 0 : index
    %66 = vector.load %arg25[%c0_70, %c5, %c0_71] : memref<14x14x64xf32, #tpu.memory_space<vmem>>, vector<8x8x64xf32>
    %67 = vector.shape_cast %66 : vector<8x8x64xf32> to vector<64x64xf32>
    %c0_72 = arith.constant 0 : index
    %c6 = arith.constant 6 : index
    %c0_73 = arith.constant 0 : index
    %68 = vector.load %arg25[%c0_72, %c6, %c0_73] : memref<14x14x64xf32, #tpu.memory_space<vmem>>, vector<8x8x64xf32>
    %69 = vector.shape_cast %68 : vector<8x8x64xf32> to vector<64x64xf32>
    %c1_74 = arith.constant 1 : index
    %c0_75 = arith.constant 0 : index
    %c0_76 = arith.constant 0 : index
    %70 = vector.load %arg25[%c1_74, %c0_75, %c0_76] : memref<14x14x64xf32, #tpu.memory_space<vmem>>, vector<8x8x64xf32>
    %71 = vector.shape_cast %70 : vector<8x8x64xf32> to vector<64x64xf32>
    %c1_77 = arith.constant 1 : index
    %c1_78 = arith.constant 1 : index
    %c0_79 = arith.constant 0 : index
    %72 = vector.load %arg25[%c1_77, %c1_78, %c0_79] : memref<14x14x64xf32, #tpu.memory_space<vmem>>, vector<8x8x64xf32>
    %73 = vector.shape_cast %72 : vector<8x8x64xf32> to vector<64x64xf32>
    %c1_80 = arith.constant 1 : index
    %c2_81 = arith.constant 2 : index
    %c0_82 = arith.constant 0 : index
    %74 = vector.load %arg25[%c1_80, %c2_81, %c0_82] : memref<14x14x64xf32, #tpu.memory_space<vmem>>, vector<8x8x64xf32>
    %75 = vector.shape_cast %74 : vector<8x8x64xf32> to vector<64x64xf32>
    %c1_83 = arith.constant 1 : index
    %c3_84 = arith.constant 3 : index
    %c0_85 = arith.constant 0 : index
    %76 = vector.load %arg25[%c1_83, %c3_84, %c0_85] : memref<14x14x64xf32, #tpu.memory_space<vmem>>, vector<8x8x64xf32>
    %77 = vector.shape_cast %76 : vector<8x8x64xf32> to vector<64x64xf32>
    %c1_86 = arith.constant 1 : index
    %c4_87 = arith.constant 4 : index
    %c0_88 = arith.constant 0 : index
    %78 = vector.load %arg25[%c1_86, %c4_87, %c0_88] : memref<14x14x64xf32, #tpu.memory_space<vmem>>, vector<8x8x64xf32>
    %79 = vector.shape_cast %78 : vector<8x8x64xf32> to vector<64x64xf32>
    %c1_89 = arith.constant 1 : index
    %c5_90 = arith.constant 5 : index
    %c0_91 = arith.constant 0 : index
    %80 = vector.load %arg25[%c1_89, %c5_90, %c0_91] : memref<14x14x64xf32, #tpu.memory_space<vmem>>, vector<8x8x64xf32>
    %81 = vector.shape_cast %80 : vector<8x8x64xf32> to vector<64x64xf32>
    %c1_92 = arith.constant 1 : index
    %c6_93 = arith.constant 6 : index
    %c0_94 = arith.constant 0 : index
    %82 = vector.load %arg25[%c1_92, %c6_93, %c0_94] : memref<14x14x64xf32, #tpu.memory_space<vmem>>, vector<8x8x64xf32>
    %83 = vector.shape_cast %82 : vector<8x8x64xf32> to vector<64x64xf32>
    %c2_95 = arith.constant 2 : index
    %c0_96 = arith.constant 0 : index
    %c0_97 = arith.constant 0 : index
    %84 = vector.load %arg25[%c2_95, %c0_96, %c0_97] : memref<14x14x64xf32, #tpu.memory_space<vmem>>, vector<8x8x64xf32>
    %85 = vector.shape_cast %84 : vector<8x8x64xf32> to vector<64x64xf32>
    %c2_98 = arith.constant 2 : index
    %c1_99 = arith.constant 1 : index
    %c0_100 = arith.constant 0 : index
    %86 = vector.load %arg25[%c2_98, %c1_99, %c0_100] : memref<14x14x64xf32, #tpu.memory_space<vmem>>, vector<8x8x64xf32>
    %87 = vector.shape_cast %86 : vector<8x8x64xf32> to vector<64x64xf32>
    %c2_101 = arith.constant 2 : index
    %c2_102 = arith.constant 2 : index
    %c0_103 = arith.constant 0 : index
    %88 = vector.load %arg25[%c2_101, %c2_102, %c0_103] : memref<14x14x64xf32, #tpu.memory_space<vmem>>, vector<8x8x64xf32>
    %89 = vector.shape_cast %88 : vector<8x8x64xf32> to vector<64x64xf32>
    %c2_104 = arith.constant 2 : index
    %c3_105 = arith.constant 3 : index
    %c0_106 = arith.constant 0 : index
    %90 = vector.load %arg25[%c2_104, %c3_105, %c0_106] : memref<14x14x64xf32, #tpu.memory_space<vmem>>, vector<8x8x64xf32>
    %91 = vector.shape_cast %90 : vector<8x8x64xf32> to vector<64x64xf32>
    %c2_107 = arith.constant 2 : index
    %c4_108 = arith.constant 4 : index
    %c0_109 = arith.constant 0 : index
    %92 = vector.load %arg25[%c2_107, %c4_108, %c0_109] : memref<14x14x64xf32, #tpu.memory_space<vmem>>, vector<8x8x64xf32>
    %93 = vector.shape_cast %92 : vector<8x8x64xf32> to vector<64x64xf32>
    %c2_110 = arith.constant 2 : index
    %c5_111 = arith.constant 5 : index
    %c0_112 = arith.constant 0 : index
    %94 = vector.load %arg25[%c2_110, %c5_111, %c0_112] : memref<14x14x64xf32, #tpu.memory_space<vmem>>, vector<8x8x64xf32>
    %95 = vector.shape_cast %94 : vector<8x8x64xf32> to vector<64x64xf32>
    %c2_113 = arith.constant 2 : index
    %c6_114 = arith.constant 6 : index
    %c0_115 = arith.constant 0 : index
    %96 = vector.load %arg25[%c2_113, %c6_114, %c0_115] : memref<14x14x64xf32, #tpu.memory_space<vmem>>, vector<8x8x64xf32>
    %97 = vector.shape_cast %96 : vector<8x8x64xf32> to vector<64x64xf32>
    %c3_116 = arith.constant 3 : index
    %c0_117 = arith.constant 0 : index
    %c0_118 = arith.constant 0 : index
    %98 = vector.load %arg25[%c3_116, %c0_117, %c0_118] : memref<14x14x64xf32, #tpu.memory_space<vmem>>, vector<8x8x64xf32>
    %99 = vector.shape_cast %98 : vector<8x8x64xf32> to vector<64x64xf32>
    %c3_119 = arith.constant 3 : index
    %c1_120 = arith.constant 1 : index
    %c0_121 = arith.constant 0 : index
    %100 = vector.load %arg25[%c3_119, %c1_120, %c0_121] : memref<14x14x64xf32, #tpu.memory_space<vmem>>, vector<8x8x64xf32>
    %101 = vector.shape_cast %100 : vector<8x8x64xf32> to vector<64x64xf32>
    %c3_122 = arith.constant 3 : index
    %c2_123 = arith.constant 2 : index
    %c0_124 = arith.constant 0 : index
    %102 = vector.load %arg25[%c3_122, %c2_123, %c0_124] : memref<14x14x64xf32, #tpu.memory_space<vmem>>, vector<8x8x64xf32>
    %103 = vector.shape_cast %102 : vector<8x8x64xf32> to vector<64x64xf32>
    %c3_125 = arith.constant 3 : index
    %c3_126 = arith.constant 3 : index
    %c0_127 = arith.constant 0 : index
    %104 = vector.load %arg25[%c3_125, %c3_126, %c0_127] : memref<14x14x64xf32, #tpu.memory_space<vmem>>, vector<8x8x64xf32>
    %105 = vector.shape_cast %104 : vector<8x8x64xf32> to vector<64x64xf32>
    %c3_128 = arith.constant 3 : index
    %c4_129 = arith.constant 4 : index
    %c0_130 = arith.constant 0 : index
    %106 = vector.load %arg25[%c3_128, %c4_129, %c0_130] : memref<14x14x64xf32, #tpu.memory_space<vmem>>, vector<8x8x64xf32>
    %107 = vector.shape_cast %106 : vector<8x8x64xf32> to vector<64x64xf32>
    %c3_131 = arith.constant 3 : index
    %c5_132 = arith.constant 5 : index
    %c0_133 = arith.constant 0 : index
    %108 = vector.load %arg25[%c3_131, %c5_132, %c0_133] : memref<14x14x64xf32, #tpu.memory_space<vmem>>, vector<8x8x64xf32>
    %109 = vector.shape_cast %108 : vector<8x8x64xf32> to vector<64x64xf32>
    %c3_134 = arith.constant 3 : index
    %c6_135 = arith.constant 6 : index
    %c0_136 = arith.constant 0 : index
    %110 = vector.load %arg25[%c3_134, %c6_135, %c0_136] : memref<14x14x64xf32, #tpu.memory_space<vmem>>, vector<8x8x64xf32>
    %111 = vector.shape_cast %110 : vector<8x8x64xf32> to vector<64x64xf32>
    %c4_137 = arith.constant 4 : index
    %c0_138 = arith.constant 0 : index
    %c0_139 = arith.constant 0 : index
    %112 = vector.load %arg25[%c4_137, %c0_138, %c0_139] : memref<14x14x64xf32, #tpu.memory_space<vmem>>, vector<8x8x64xf32>
    %113 = vector.shape_cast %112 : vector<8x8x64xf32> to vector<64x64xf32>
    %c4_140 = arith.constant 4 : index
    %c1_141 = arith.constant 1 : index
    %c0_142 = arith.constant 0 : index
    %114 = vector.load %arg25[%c4_140, %c1_141, %c0_142] : memref<14x14x64xf32, #tpu.memory_space<vmem>>, vector<8x8x64xf32>
    %115 = vector.shape_cast %114 : vector<8x8x64xf32> to vector<64x64xf32>
    %c4_143 = arith.constant 4 : index
    %c2_144 = arith.constant 2 : index
    %c0_145 = arith.constant 0 : index
    %116 = vector.load %arg25[%c4_143, %c2_144, %c0_145] : memref<14x14x64xf32, #tpu.memory_space<vmem>>, vector<8x8x64xf32>
    %117 = vector.shape_cast %116 : vector<8x8x64xf32> to vector<64x64xf32>
    %c4_146 = arith.constant 4 : index
    %c3_147 = arith.constant 3 : index
    %c0_148 = arith.constant 0 : index
    %118 = vector.load %arg25[%c4_146, %c3_147, %c0_148] : memref<14x14x64xf32, #tpu.memory_space<vmem>>, vector<8x8x64xf32>
    %119 = vector.shape_cast %118 : vector<8x8x64xf32> to vector<64x64xf32>
    %c4_149 = arith.constant 4 : index
    %c4_150 = arith.constant 4 : index
    %c0_151 = arith.constant 0 : index
    %120 = vector.load %arg25[%c4_149, %c4_150, %c0_151] : memref<14x14x64xf32, #tpu.memory_space<vmem>>, vector<8x8x64xf32>
    %121 = vector.shape_cast %120 : vector<8x8x64xf32> to vector<64x64xf32>
    %c4_152 = arith.constant 4 : index
    %c5_153 = arith.constant 5 : index
    %c0_154 = arith.constant 0 : index
    %122 = vector.load %arg25[%c4_152, %c5_153, %c0_154] : memref<14x14x64xf32, #tpu.memory_space<vmem>>, vector<8x8x64xf32>
    %123 = vector.shape_cast %122 : vector<8x8x64xf32> to vector<64x64xf32>
    %c4_155 = arith.constant 4 : index
    %c6_156 = arith.constant 6 : index
    %c0_157 = arith.constant 0 : index
    %124 = vector.load %arg25[%c4_155, %c6_156, %c0_157] : memref<14x14x64xf32, #tpu.memory_space<vmem>>, vector<8x8x64xf32>
    %125 = vector.shape_cast %124 : vector<8x8x64xf32> to vector<64x64xf32>
    %c5_158 = arith.constant 5 : index
    %c0_159 = arith.constant 0 : index
    %c0_160 = arith.constant 0 : index
    %126 = vector.load %arg25[%c5_158, %c0_159, %c0_160] : memref<14x14x64xf32, #tpu.memory_space<vmem>>, vector<8x8x64xf32>
    %127 = vector.shape_cast %126 : vector<8x8x64xf32> to vector<64x64xf32>
    %c5_161 = arith.constant 5 : index
    %c1_162 = arith.constant 1 : index
    %c0_163 = arith.constant 0 : index
    %128 = vector.load %arg25[%c5_161, %c1_162, %c0_163] : memref<14x14x64xf32, #tpu.memory_space<vmem>>, vector<8x8x64xf32>
    %129 = vector.shape_cast %128 : vector<8x8x64xf32> to vector<64x64xf32>
    %c5_164 = arith.constant 5 : index
    %c2_165 = arith.constant 2 : index
    %c0_166 = arith.constant 0 : index
    %130 = vector.load %arg25[%c5_164, %c2_165, %c0_166] : memref<14x14x64xf32, #tpu.memory_space<vmem>>, vector<8x8x64xf32>
    %131 = vector.shape_cast %130 : vector<8x8x64xf32> to vector<64x64xf32>
    %c5_167 = arith.constant 5 : index
    %c3_168 = arith.constant 3 : index
    %c0_169 = arith.constant 0 : index
    %132 = vector.load %arg25[%c5_167, %c3_168, %c0_169] : memref<14x14x64xf32, #tpu.memory_space<vmem>>, vector<8x8x64xf32>
    %133 = vector.shape_cast %132 : vector<8x8x64xf32> to vector<64x64xf32>
    %c5_170 = arith.constant 5 : index
    %c4_171 = arith.constant 4 : index
    %c0_172 = arith.constant 0 : index
    %134 = vector.load %arg25[%c5_170, %c4_171, %c0_172] : memref<14x14x64xf32, #tpu.memory_space<vmem>>, vector<8x8x64xf32>
    %135 = vector.shape_cast %134 : vector<8x8x64xf32> to vector<64x64xf32>
    %c5_173 = arith.constant 5 : index
    %c5_174 = arith.constant 5 : index
    %c0_175 = arith.constant 0 : index
    %136 = vector.load %arg25[%c5_173, %c5_174, %c0_175] : memref<14x14x64xf32, #tpu.memory_space<vmem>>, vector<8x8x64xf32>
    %137 = vector.shape_cast %136 : vector<8x8x64xf32> to vector<64x64xf32>
    %c5_176 = arith.constant 5 : index
    %c6_177 = arith.constant 6 : index
    %c0_178 = arith.constant 0 : index
    %138 = vector.load %arg25[%c5_176, %c6_177, %c0_178] : memref<14x14x64xf32, #tpu.memory_space<vmem>>, vector<8x8x64xf32>
    %139 = vector.shape_cast %138 : vector<8x8x64xf32> to vector<64x64xf32>
    %c6_179 = arith.constant 6 : index
    %c0_180 = arith.constant 0 : index
    %c0_181 = arith.constant 0 : index
    %140 = vector.load %arg25[%c6_179, %c0_180, %c0_181] : memref<14x14x64xf32, #tpu.memory_space<vmem>>, vector<8x8x64xf32>
    %141 = vector.shape_cast %140 : vector<8x8x64xf32> to vector<64x64xf32>
    %c6_182 = arith.constant 6 : index
    %c1_183 = arith.constant 1 : index
    %c0_184 = arith.constant 0 : index
    %142 = vector.load %arg25[%c6_182, %c1_183, %c0_184] : memref<14x14x64xf32, #tpu.memory_space<vmem>>, vector<8x8x64xf32>
    %143 = vector.shape_cast %142 : vector<8x8x64xf32> to vector<64x64xf32>
    %c6_185 = arith.constant 6 : index
    %c2_186 = arith.constant 2 : index
    %c0_187 = arith.constant 0 : index
    %144 = vector.load %arg25[%c6_185, %c2_186, %c0_187] : memref<14x14x64xf32, #tpu.memory_space<vmem>>, vector<8x8x64xf32>
    %145 = vector.shape_cast %144 : vector<8x8x64xf32> to vector<64x64xf32>
    %c6_188 = arith.constant 6 : index
    %c3_189 = arith.constant 3 : index
    %c0_190 = arith.constant 0 : index
    %146 = vector.load %arg25[%c6_188, %c3_189, %c0_190] : memref<14x14x64xf32, #tpu.memory_space<vmem>>, vector<8x8x64xf32>
    %147 = vector.shape_cast %146 : vector<8x8x64xf32> to vector<64x64xf32>
    %c6_191 = arith.constant 6 : index
    %c4_192 = arith.constant 4 : index
    %c0_193 = arith.constant 0 : index
    %148 = vector.load %arg25[%c6_191, %c4_192, %c0_193] : memref<14x14x64xf32, #tpu.memory_space<vmem>>, vector<8x8x64xf32>
    %149 = vector.shape_cast %148 : vector<8x8x64xf32> to vector<64x64xf32>
    %c6_194 = arith.constant 6 : index
    %c5_195 = arith.constant 5 : index
    %c0_196 = arith.constant 0 : index
    %150 = vector.load %arg25[%c6_194, %c5_195, %c0_196] : memref<14x14x64xf32, #tpu.memory_space<vmem>>, vector<8x8x64xf32>
    %151 = vector.shape_cast %150 : vector<8x8x64xf32> to vector<64x64xf32>
    %c6_197 = arith.constant 6 : index
    %c6_198 = arith.constant 6 : index
    %c0_199 = arith.constant 0 : index
    %152 = vector.load %arg25[%c6_197, %c6_198, %c0_199] : memref<14x14x64xf32, #tpu.memory_space<vmem>>, vector<8x8x64xf32>
    %153 = vector.shape_cast %152 : vector<8x8x64xf32> to vector<64x64xf32>
    %154 = tpu.concatenate %57, %59, %61, %63, %65, %67, %69, %71, %73, %75, %77, %79, %81, %83, %85, %87 in 1 : vector<64x64xf32>, vector<64x64xf32>, vector<64x64xf32>, vector<64x64xf32>, vector<64x64xf32>, vector<64x64xf32>, vector<64x64xf32>, vector<64x64xf32>, vector<64x64xf32>, vector<64x64xf32>, vector<64x64xf32>, vector<64x64xf32>, vector<64x64xf32>, vector<64x64xf32>, vector<64x64xf32>, vector<64x64xf32> -> vector<64x1024xf32>
    %155 = tpu.concatenate %89, %91, %93, %95, %97, %99, %101, %103, %105, %107, %109, %111, %113, %115, %117, %119 in 1 : vector<64x64xf32>, vector<64x64xf32>, vector<64x64xf32>, vector<64x64xf32>, vector<64x64xf32>, vector<64x64xf32>, vector<64x64xf32>, vector<64x64xf32>, vector<64x64xf32>, vector<64x64xf32>, vector<64x64xf32>, vector<64x64xf32>, vector<64x64xf32>, vector<64x64xf32>, vector<64x64xf32>, vector<64x64xf32> -> vector<64x1024xf32>
    %156 = tpu.concatenate %121, %123, %125, %127, %129, %131, %133, %135, %137, %139, %141, %143, %145, %147, %149, %151 in 1 : vector<64x64xf32>, vector<64x64xf32>, vector<64x64xf32>, vector<64x64xf32>, vector<64x64xf32>, vector<64x64xf32>, vector<64x64xf32>, vector<64x64xf32>, vector<64x64xf32>, vector<64x64xf32>, vector<64x64xf32>, vector<64x64xf32>, vector<64x64xf32>, vector<64x64xf32>, vector<64x64xf32>, vector<64x64xf32> -> vector<64x1024xf32>
    %157 = tpu.concatenate %154, %155, %156, %153 in 1 : vector<64x1024xf32>, vector<64x1024xf32>, vector<64x1024xf32>, vector<64x64xf32> -> vector<64x3136xf32>
    %158 = arith.truncf %157 : vector<64x3136xf32> to vector<64x3136xbf16>
    %c0_200 = arith.constant 0 : index
    %c0_201 = arith.constant 0 : index
    %159 = vector.load %arg9[%c0_200, %c0_201] : memref<3136x32xbf16, #tpu.memory_space<vmem>>, vector<3136x32xbf16>
    %cst_202 = arith.constant dense<0.000000e+00> : vector<64x32xf32>
    %160 = tpu.matmul %158, %159, %cst_202 {dimension_numbers = #tpu.dot_dimension_numbers<[1], [0], [0], [1], [0, 0, 1, 1], [], []>} : vector<64x3136xbf16>, vector<3136x32xbf16>, vector<64x32xf32> -> vector<64x32xf32>
    %c0_203 = arith.constant 0 : index
    %c0_204 = arith.constant 0 : index
    %161 = vector.load %arg10[%c0_203, %c0_204] : memref<1x32xf32, #tpu.memory_space<vmem>>, vector<1x32xf32>
    %162 = vector.broadcast %161 : vector<1x32xf32> to vector<64x32xf32>
    %163 = arith.mulf %160, %162 : vector<64x32xf32>
    %c0_205 = arith.constant 0 : index
    %c0_206 = arith.constant 0 : index
    %164 = vector.load %arg11[%c0_205, %c0_206] : memref<1x32xf32, #tpu.memory_space<vmem>>, vector<1x32xf32>
    %165 = vector.broadcast %164 : vector<1x32xf32> to vector<64x32xf32>
    %166 = arith.addf %163, %165 : vector<64x32xf32>
    %cst_207 = arith.constant 0.000000e+00 : f32
    %167 = vector.broadcast %cst_207 : f32 to vector<64x32xf32>
    %168 = arith.maximumf %166, %167 : vector<64x32xf32>
    %169 = vector.shape_cast %168 : vector<64x32xf32> to vector<8x8x32xf32>
    %c3_208 = arith.constant 3 : index
    %c3_209 = arith.constant 3 : index
    %c0_210 = arith.constant 0 : index
    %170 = vector.load %arg26[%c3_208, %c3_209, %c0_210] : memref<14x14x32xf32, #tpu.memory_space<vmem>>, vector<8x8x32xf32>
    tpu.vector_store %arg26[%c3_208, %c3_209, %c0_210], %169 {strides = array<i32>} : memref<14x14x32xf32, #tpu.memory_space<vmem>>, vector<8x8x32xf32>,
    %c0_211 = arith.constant 0 : index
    %c0_212 = arith.constant 0 : index
    %c0_213 = arith.constant 0 : index
    %171 = vector.load %arg26[%c0_211, %c0_212, %c0_213] : memref<14x14x32xf32, #tpu.memory_space<vmem>>, vector<8x8x32xf32>
    %172 = vector.shape_cast %171 : vector<8x8x32xf32> to vector<64x32xf32>
    %c0_214 = arith.constant 0 : index
    %c1_215 = arith.constant 1 : index
    %c0_216 = arith.constant 0 : index
    %173 = vector.load %arg26[%c0_214, %c1_215, %c0_216] : memref<14x14x32xf32, #tpu.memory_space<vmem>>, vector<8x8x32xf32>
    %174 = vector.shape_cast %173 : vector<8x8x32xf32> to vector<64x32xf32>
    %c0_217 = arith.constant 0 : index
    %c2_218 = arith.constant 2 : index
    %c0_219 = arith.constant 0 : index
    %175 = vector.load %arg26[%c0_217, %c2_218, %c0_219] : memref<14x14x32xf32, #tpu.memory_space<vmem>>, vector<8x8x32xf32>
    %176 = vector.shape_cast %175 : vector<8x8x32xf32> to vector<64x32xf32>
    %c0_220 = arith.constant 0 : index
    %c3_221 = arith.constant 3 : index
    %c0_222 = arith.constant 0 : index
    %177 = vector.load %arg26[%c0_220, %c3_221, %c0_222] : memref<14x14x32xf32, #tpu.memory_space<vmem>>, vector<8x8x32xf32>
    %178 = vector.shape_cast %177 : vector<8x8x32xf32> to vector<64x32xf32>
    %c0_223 = arith.constant 0 : index
    %c4_224 = arith.constant 4 : index
    %c0_225 = arith.constant 0 : index
    %179 = vector.load %arg26[%c0_223, %c4_224, %c0_225] : memref<14x14x32xf32, #tpu.memory_space<vmem>>, vector<8x8x32xf32>
    %180 = vector.shape_cast %179 : vector<8x8x32xf32> to vector<64x32xf32>
    %c0_226 = arith.constant 0 : index
    %c5_227 = arith.constant 5 : index
    %c0_228 = arith.constant 0 : index
    %181 = vector.load %arg26[%c0_226, %c5_227, %c0_228] : memref<14x14x32xf32, #tpu.memory_space<vmem>>, vector<8x8x32xf32>
    %182 = vector.shape_cast %181 : vector<8x8x32xf32> to vector<64x32xf32>
    %c0_229 = arith.constant 0 : index
    %c6_230 = arith.constant 6 : index
    %c0_231 = arith.constant 0 : index
    %183 = vector.load %arg26[%c0_229, %c6_230, %c0_231] : memref<14x14x32xf32, #tpu.memory_space<vmem>>, vector<8x8x32xf32>
    %184 = vector.shape_cast %183 : vector<8x8x32xf32> to vector<64x32xf32>
    %c1_232 = arith.constant 1 : index
    %c0_233 = arith.constant 0 : index
    %c0_234 = arith.constant 0 : index
    %185 = vector.load %arg26[%c1_232, %c0_233, %c0_234] : memref<14x14x32xf32, #tpu.memory_space<vmem>>, vector<8x8x32xf32>
    %186 = vector.shape_cast %185 : vector<8x8x32xf32> to vector<64x32xf32>
    %c1_235 = arith.constant 1 : index
    %c1_236 = arith.constant 1 : index
    %c0_237 = arith.constant 0 : index
    %187 = vector.load %arg26[%c1_235, %c1_236, %c0_237] : memref<14x14x32xf32, #tpu.memory_space<vmem>>, vector<8x8x32xf32>
    %188 = vector.shape_cast %187 : vector<8x8x32xf32> to vector<64x32xf32>
    %c1_238 = arith.constant 1 : index
    %c2_239 = arith.constant 2 : index
    %c0_240 = arith.constant 0 : index
    %189 = vector.load %arg26[%c1_238, %c2_239, %c0_240] : memref<14x14x32xf32, #tpu.memory_space<vmem>>, vector<8x8x32xf32>
    %190 = vector.shape_cast %189 : vector<8x8x32xf32> to vector<64x32xf32>
    %c1_241 = arith.constant 1 : index
    %c3_242 = arith.constant 3 : index
    %c0_243 = arith.constant 0 : index
    %191 = vector.load %arg26[%c1_241, %c3_242, %c0_243] : memref<14x14x32xf32, #tpu.memory_space<vmem>>, vector<8x8x32xf32>
    %192 = vector.shape_cast %191 : vector<8x8x32xf32> to vector<64x32xf32>
    %c1_244 = arith.constant 1 : index
    %c4_245 = arith.constant 4 : index
    %c0_246 = arith.constant 0 : index
    %193 = vector.load %arg26[%c1_244, %c4_245, %c0_246] : memref<14x14x32xf32, #tpu.memory_space<vmem>>, vector<8x8x32xf32>
    %194 = vector.shape_cast %193 : vector<8x8x32xf32> to vector<64x32xf32>
    %c1_247 = arith.constant 1 : index
    %c5_248 = arith.constant 5 : index
    %c0_249 = arith.constant 0 : index
    %195 = vector.load %arg26[%c1_247, %c5_248, %c0_249] : memref<14x14x32xf32, #tpu.memory_space<vmem>>, vector<8x8x32xf32>
    %196 = vector.shape_cast %195 : vector<8x8x32xf32> to vector<64x32xf32>
    %c1_250 = arith.constant 1 : index
    %c6_251 = arith.constant 6 : index
    %c0_252 = arith.constant 0 : index
    %197 = vector.load %arg26[%c1_250, %c6_251, %c0_252] : memref<14x14x32xf32, #tpu.memory_space<vmem>>, vector<8x8x32xf32>
    %198 = vector.shape_cast %197 : vector<8x8x32xf32> to vector<64x32xf32>
    %c2_253 = arith.constant 2 : index
    %c0_254 = arith.constant 0 : index
    %c0_255 = arith.constant 0 : index
    %199 = vector.load %arg26[%c2_253, %c0_254, %c0_255] : memref<14x14x32xf32, #tpu.memory_space<vmem>>, vector<8x8x32xf32>
    %200 = vector.shape_cast %199 : vector<8x8x32xf32> to vector<64x32xf32>
    %c2_256 = arith.constant 2 : index
    %c1_257 = arith.constant 1 : index
    %c0_258 = arith.constant 0 : index
    %201 = vector.load %arg26[%c2_256, %c1_257, %c0_258] : memref<14x14x32xf32, #tpu.memory_space<vmem>>, vector<8x8x32xf32>
    %202 = vector.shape_cast %201 : vector<8x8x32xf32> to vector<64x32xf32>
    %c2_259 = arith.constant 2 : index
    %c2_260 = arith.constant 2 : index
    %c0_261 = arith.constant 0 : index
    %203 = vector.load %arg26[%c2_259, %c2_260, %c0_261] : memref<14x14x32xf32, #tpu.memory_space<vmem>>, vector<8x8x32xf32>
    %204 = vector.shape_cast %203 : vector<8x8x32xf32> to vector<64x32xf32>
    %c2_262 = arith.constant 2 : index
    %c3_263 = arith.constant 3 : index
    %c0_264 = arith.constant 0 : index
    %205 = vector.load %arg26[%c2_262, %c3_263, %c0_264] : memref<14x14x32xf32, #tpu.memory_space<vmem>>, vector<8x8x32xf32>
    %206 = vector.shape_cast %205 : vector<8x8x32xf32> to vector<64x32xf32>
    %c2_265 = arith.constant 2 : index
    %c4_266 = arith.constant 4 : index
    %c0_267 = arith.constant 0 : index
    %207 = vector.load %arg26[%c2_265, %c4_266, %c0_267] : memref<14x14x32xf32, #tpu.memory_space<vmem>>, vector<8x8x32xf32>
    %208 = vector.shape_cast %207 : vector<8x8x32xf32> to vector<64x32xf32>
    %c2_268 = arith.constant 2 : index
    %c5_269 = arith.constant 5 : index
    %c0_270 = arith.constant 0 : index
    %209 = vector.load %arg26[%c2_268, %c5_269, %c0_270] : memref<14x14x32xf32, #tpu.memory_space<vmem>>, vector<8x8x32xf32>
    %210 = vector.shape_cast %209 : vector<8x8x32xf32> to vector<64x32xf32>
    %c2_271 = arith.constant 2 : index
    %c6_272 = arith.constant 6 : index
    %c0_273 = arith.constant 0 : index
    %211 = vector.load %arg26[%c2_271, %c6_272, %c0_273] : memref<14x14x32xf32, #tpu.memory_space<vmem>>, vector<8x8x32xf32>
    %212 = vector.shape_cast %211 : vector<8x8x32xf32> to vector<64x32xf32>
    %c3_274 = arith.constant 3 : index
    %c0_275 = arith.constant 0 : index
    %c0_276 = arith.constant 0 : index
    %213 = vector.load %arg26[%c3_274, %c0_275, %c0_276] : memref<14x14x32xf32, #tpu.memory_space<vmem>>, vector<8x8x32xf32>
    %214 = vector.shape_cast %213 : vector<8x8x32xf32> to vector<64x32xf32>
    %c3_277 = arith.constant 3 : index
    %c1_278 = arith.constant 1 : index
    %c0_279 = arith.constant 0 : index
    %215 = vector.load %arg26[%c3_277, %c1_278, %c0_279] : memref<14x14x32xf32, #tpu.memory_space<vmem>>, vector<8x8x32xf32>
    %216 = vector.shape_cast %215 : vector<8x8x32xf32> to vector<64x32xf32>
    %c3_280 = arith.constant 3 : index
    %c2_281 = arith.constant 2 : index
    %c0_282 = arith.constant 0 : index
    %217 = vector.load %arg26[%c3_280, %c2_281, %c0_282] : memref<14x14x32xf32, #tpu.memory_space<vmem>>, vector<8x8x32xf32>
    %218 = vector.shape_cast %217 : vector<8x8x32xf32> to vector<64x32xf32>
    %c3_283 = arith.constant 3 : index
    %c3_284 = arith.constant 3 : index
    %c0_285 = arith.constant 0 : index
    %219 = vector.load %arg26[%c3_283, %c3_284, %c0_285] : memref<14x14x32xf32, #tpu.memory_space<vmem>>, vector<8x8x32xf32>
    %220 = vector.shape_cast %219 : vector<8x8x32xf32> to vector<64x32xf32>
    %c3_286 = arith.constant 3 : index
    %c4_287 = arith.constant 4 : index
    %c0_288 = arith.constant 0 : index
    %221 = vector.load %arg26[%c3_286, %c4_287, %c0_288] : memref<14x14x32xf32, #tpu.memory_space<vmem>>, vector<8x8x32xf32>
    %222 = vector.shape_cast %221 : vector<8x8x32xf32> to vector<64x32xf32>
    %c3_289 = arith.constant 3 : index
    %c5_290 = arith.constant 5 : index
    %c0_291 = arith.constant 0 : index
    %223 = vector.load %arg26[%c3_289, %c5_290, %c0_291] : memref<14x14x32xf32, #tpu.memory_space<vmem>>, vector<8x8x32xf32>
    %224 = vector.shape_cast %223 : vector<8x8x32xf32> to vector<64x32xf32>
    %c3_292 = arith.constant 3 : index
    %c6_293 = arith.constant 6 : index
    %c0_294 = arith.constant 0 : index
    %225 = vector.load %arg26[%c3_292, %c6_293, %c0_294] : memref<14x14x32xf32, #tpu.memory_space<vmem>>, vector<8x8x32xf32>
    %226 = vector.shape_cast %225 : vector<8x8x32xf32> to vector<64x32xf32>
    %c4_295 = arith.constant 4 : index
    %c0_296 = arith.constant 0 : index
    %c0_297 = arith.constant 0 : index
    %227 = vector.load %arg26[%c4_295, %c0_296, %c0_297] : memref<14x14x32xf32, #tpu.memory_space<vmem>>, vector<8x8x32xf32>
    %228 = vector.shape_cast %227 : vector<8x8x32xf32> to vector<64x32xf32>
    %c4_298 = arith.constant 4 : index
    %c1_299 = arith.constant 1 : index
    %c0_300 = arith.constant 0 : index
    %229 = vector.load %arg26[%c4_298, %c1_299, %c0_300] : memref<14x14x32xf32, #tpu.memory_space<vmem>>, vector<8x8x32xf32>
    %230 = vector.shape_cast %229 : vector<8x8x32xf32> to vector<64x32xf32>
    %c4_301 = arith.constant 4 : index
    %c2_302 = arith.constant 2 : index
    %c0_303 = arith.constant 0 : index
    %231 = vector.load %arg26[%c4_301, %c2_302, %c0_303] : memref<14x14x32xf32, #tpu.memory_space<vmem>>, vector<8x8x32xf32>
    %232 = vector.shape_cast %231 : vector<8x8x32xf32> to vector<64x32xf32>
    %c4_304 = arith.constant 4 : index
    %c3_305 = arith.constant 3 : index
    %c0_306 = arith.constant 0 : index
    %233 = vector.load %arg26[%c4_304, %c3_305, %c0_306] : memref<14x14x32xf32, #tpu.memory_space<vmem>>, vector<8x8x32xf32>
    %234 = vector.shape_cast %233 : vector<8x8x32xf32> to vector<64x32xf32>
    %c4_307 = arith.constant 4 : index
    %c4_308 = arith.constant 4 : index
    %c0_309 = arith.constant 0 : index
    %235 = vector.load %arg26[%c4_307, %c4_308, %c0_309] : memref<14x14x32xf32, #tpu.memory_space<vmem>>, vector<8x8x32xf32>
    %236 = vector.shape_cast %235 : vector<8x8x32xf32> to vector<64x32xf32>
    %c4_310 = arith.constant 4 : index
    %c5_311 = arith.constant 5 : index
    %c0_312 = arith.constant 0 : index
    %237 = vector.load %arg26[%c4_310, %c5_311, %c0_312] : memref<14x14x32xf32, #tpu.memory_space<vmem>>, vector<8x8x32xf32>
    %238 = vector.shape_cast %237 : vector<8x8x32xf32> to vector<64x32xf32>
    %c4_313 = arith.constant 4 : index
    %c6_314 = arith.constant 6 : index
    %c0_315 = arith.constant 0 : index
    %239 = vector.load %arg26[%c4_313, %c6_314, %c0_315] : memref<14x14x32xf32, #tpu.memory_space<vmem>>, vector<8x8x32xf32>
    %240 = vector.shape_cast %239 : vector<8x8x32xf32> to vector<64x32xf32>
    %c5_316 = arith.constant 5 : index
    %c0_317 = arith.constant 0 : index
    %c0_318 = arith.constant 0 : index
    %241 = vector.load %arg26[%c5_316, %c0_317, %c0_318] : memref<14x14x32xf32, #tpu.memory_space<vmem>>, vector<8x8x32xf32>
    %242 = vector.shape_cast %241 : vector<8x8x32xf32> to vector<64x32xf32>
    %c5_319 = arith.constant 5 : index
    %c1_320 = arith.constant 1 : index
    %c0_321 = arith.constant 0 : index
    %243 = vector.load %arg26[%c5_319, %c1_320, %c0_321] : memref<14x14x32xf32, #tpu.memory_space<vmem>>, vector<8x8x32xf32>
    %244 = vector.shape_cast %243 : vector<8x8x32xf32> to vector<64x32xf32>
    %c5_322 = arith.constant 5 : index
    %c2_323 = arith.constant 2 : index
    %c0_324 = arith.constant 0 : index
    %245 = vector.load %arg26[%c5_322, %c2_323, %c0_324] : memref<14x14x32xf32, #tpu.memory_space<vmem>>, vector<8x8x32xf32>
    %246 = vector.shape_cast %245 : vector<8x8x32xf32> to vector<64x32xf32>
    %c5_325 = arith.constant 5 : index
    %c3_326 = arith.constant 3 : index
    %c0_327 = arith.constant 0 : index
    %247 = vector.load %arg26[%c5_325, %c3_326, %c0_327] : memref<14x14x32xf32, #tpu.memory_space<vmem>>, vector<8x8x32xf32>
    %248 = vector.shape_cast %247 : vector<8x8x32xf32> to vector<64x32xf32>
    %c5_328 = arith.constant 5 : index
    %c4_329 = arith.constant 4 : index
    %c0_330 = arith.constant 0 : index
    %249 = vector.load %arg26[%c5_328, %c4_329, %c0_330] : memref<14x14x32xf32, #tpu.memory_space<vmem>>, vector<8x8x32xf32>
    %250 = vector.shape_cast %249 : vector<8x8x32xf32> to vector<64x32xf32>
    %c5_331 = arith.constant 5 : index
    %c5_332 = arith.constant 5 : index
    %c0_333 = arith.constant 0 : index
    %251 = vector.load %arg26[%c5_331, %c5_332, %c0_333] : memref<14x14x32xf32, #tpu.memory_space<vmem>>, vector<8x8x32xf32>
    %252 = vector.shape_cast %251 : vector<8x8x32xf32> to vector<64x32xf32>
    %c5_334 = arith.constant 5 : index
    %c6_335 = arith.constant 6 : index
    %c0_336 = arith.constant 0 : index
    %253 = vector.load %arg26[%c5_334, %c6_335, %c0_336] : memref<14x14x32xf32, #tpu.memory_space<vmem>>, vector<8x8x32xf32>
    %254 = vector.shape_cast %253 : vector<8x8x32xf32> to vector<64x32xf32>
    %c6_337 = arith.constant 6 : index
    %c0_338 = arith.constant 0 : index
    %c0_339 = arith.constant 0 : index
    %255 = vector.load %arg26[%c6_337, %c0_338, %c0_339] : memref<14x14x32xf32, #tpu.memory_space<vmem>>, vector<8x8x32xf32>
    %256 = vector.shape_cast %255 : vector<8x8x32xf32> to vector<64x32xf32>
    %c6_340 = arith.constant 6 : index
    %c1_341 = arith.constant 1 : index
    %c0_342 = arith.constant 0 : index
    %257 = vector.load %arg26[%c6_340, %c1_341, %c0_342] : memref<14x14x32xf32, #tpu.memory_space<vmem>>, vector<8x8x32xf32>
    %258 = vector.shape_cast %257 : vector<8x8x32xf32> to vector<64x32xf32>
    %c6_343 = arith.constant 6 : index
    %c2_344 = arith.constant 2 : index
    %c0_345 = arith.constant 0 : index
    %259 = vector.load %arg26[%c6_343, %c2_344, %c0_345] : memref<14x14x32xf32, #tpu.memory_space<vmem>>, vector<8x8x32xf32>
    %260 = vector.shape_cast %259 : vector<8x8x32xf32> to vector<64x32xf32>
    %c6_346 = arith.constant 6 : index
    %c3_347 = arith.constant 3 : index
    %c0_348 = arith.constant 0 : index
    %261 = vector.load %arg26[%c6_346, %c3_347, %c0_348] : memref<14x14x32xf32, #tpu.memory_space<vmem>>, vector<8x8x32xf32>
    %262 = vector.shape_cast %261 : vector<8x8x32xf32> to vector<64x32xf32>
    %c6_349 = arith.constant 6 : index
    %c4_350 = arith.constant 4 : index
    %c0_351 = arith.constant 0 : index
    %263 = vector.load %arg26[%c6_349, %c4_350, %c0_351] : memref<14x14x32xf32, #tpu.memory_space<vmem>>, vector<8x8x32xf32>
    %264 = vector.shape_cast %263 : vector<8x8x32xf32> to vector<64x32xf32>
    %c6_352 = arith.constant 6 : index
    %c5_353 = arith.constant 5 : index
    %c0_354 = arith.constant 0 : index
    %265 = vector.load %arg26[%c6_352, %c5_353, %c0_354] : memref<14x14x32xf32, #tpu.memory_space<vmem>>, vector<8x8x32xf32>
    %266 = vector.shape_cast %265 : vector<8x8x32xf32> to vector<64x32xf32>
    %c6_355 = arith.constant 6 : index
    %c6_356 = arith.constant 6 : index
    %c0_357 = arith.constant 0 : index
    %267 = vector.load %arg26[%c6_355, %c6_356, %c0_357] : memref<14x14x32xf32, #tpu.memory_space<vmem>>, vector<8x8x32xf32>
    %268 = vector.shape_cast %267 : vector<8x8x32xf32> to vector<64x32xf32>
    %269 = tpu.concatenate %172, %174, %176, %178, %180, %182, %184, %186, %188, %190, %192, %194, %196, %198, %200, %202 in 1 : vector<64x32xf32>, vector<64x32xf32>, vector<64x32xf32>, vector<64x32xf32>, vector<64x32xf32>, vector<64x32xf32>, vector<64x32xf32>, vector<64x32xf32>, vector<64x32xf32>, vector<64x32xf32>, vector<64x32xf32>, vector<64x32xf32>, vector<64x32xf32>, vector<64x32xf32>, vector<64x32xf32>, vector<64x32xf32> -> vector<64x512xf32>
    %270 = tpu.concatenate %204, %206, %208, %210, %212, %214, %216, %218, %220, %222, %224, %226, %228, %230, %232, %234 in 1 : vector<64x32xf32>, vector<64x32xf32>, vector<64x32xf32>, vector<64x32xf32>, vector<64x32xf32>, vector<64x32xf32>, vector<64x32xf32>, vector<64x32xf32>, vector<64x32xf32>, vector<64x32xf32>, vector<64x32xf32>, vector<64x32xf32>, vector<64x32xf32>, vector<64x32xf32>, vector<64x32xf32>, vector<64x32xf32> -> vector<64x512xf32>
    %271 = tpu.concatenate %236, %238, %240, %242, %244, %246, %248, %250, %252, %254, %256, %258, %260, %262, %264, %266 in 1 : vector<64x32xf32>, vector<64x32xf32>, vector<64x32xf32>, vector<64x32xf32>, vector<64x32xf32>, vector<64x32xf32>, vector<64x32xf32>, vector<64x32xf32>, vector<64x32xf32>, vector<64x32xf32>, vector<64x32xf32>, vector<64x32xf32>, vector<64x32xf32>, vector<64x32xf32>, vector<64x32xf32>, vector<64x32xf32> -> vector<64x512xf32>
    %272 = tpu.concatenate %269, %270, %271, %268 in 1 : vector<64x512xf32>, vector<64x512xf32>, vector<64x512xf32>, vector<64x32xf32> -> vector<64x1568xf32>
    %273 = arith.truncf %272 : vector<64x1568xf32> to vector<64x1568xbf16>
    %c0_358 = arith.constant 0 : index
    %c0_359 = arith.constant 0 : index
    %274 = vector.load %arg12[%c0_358, %c0_359] : memref<1568x10xbf16, #tpu.memory_space<vmem>>, vector<1568x10xbf16>
    %cst_360 = arith.constant dense<0.000000e+00> : vector<64x10xf32>
    %275 = tpu.matmul %273, %274, %cst_360 {dimension_numbers = #tpu.dot_dimension_numbers<[1], [0], [0], [1], [0, 0, 1, 1], [], []>} : vector<64x1568xbf16>, vector<1568x10xbf16>, vector<64x10xf32> -> vector<64x10xf32>
    %c0_361 = arith.constant 0 : index
    %c0_362 = arith.constant 0 : index
    %276 = vector.load %arg13[%c0_361, %c0_362] : memref<1x10xf32, #tpu.memory_space<vmem>>, vector<1x10xf32>
    %277 = vector.broadcast %276 : vector<1x10xf32> to vector<64x10xf32>
    %278 = arith.addf %275, %277 : vector<64x10xf32>
    %c2_363 = arith.constant 2 : index
    %c2_364 = arith.constant 2 : index
    %c0_365 = arith.constant 0 : index
    %279 = vector.load %arg25[%c2_363, %c2_364, %c0_365] : memref<14x14x64xf32, #tpu.memory_space<vmem>>, vector<8x8x64xf32>
    %280 = vector.shape_cast %279 : vector<8x8x64xf32> to vector<64x64xf32>
    %c2_366 = arith.constant 2 : index
    %c3_367 = arith.constant 3 : index
    %c0_368 = arith.constant 0 : index
    %281 = vector.load %arg25[%c2_366, %c3_367, %c0_368] : memref<14x14x64xf32, #tpu.memory_space<vmem>>, vector<8x8x64xf32>
    %282 = vector.shape_cast %281 : vector<8x8x64xf32> to vector<64x64xf32>
    %c2_369 = arith.constant 2 : index
    %c4_370 = arith.constant 4 : index
    %c0_371 = arith.constant 0 : index
    %283 = vector.load %arg25[%c2_369, %c4_370, %c0_371] : memref<14x14x64xf32, #tpu.memory_space<vmem>>, vector<8x8x64xf32>
    %284 = vector.shape_cast %283 : vector<8x8x64xf32> to vector<64x64xf32>
    %c3_372 = arith.constant 3 : index
    %c2_373 = arith.constant 2 : index
    %c0_374 = arith.constant 0 : index
    %285 = vector.load %arg25[%c3_372, %c2_373, %c0_374] : memref<14x14x64xf32, #tpu.memory_space<vmem>>, vector<8x8x64xf32>
    %286 = vector.shape_cast %285 : vector<8x8x64xf32> to vector<64x64xf32>
    %c3_375 = arith.constant 3 : index
    %c3_376 = arith.constant 3 : index
    %c0_377 = arith.constant 0 : index
    %287 = vector.load %arg25[%c3_375, %c3_376, %c0_377] : memref<14x14x64xf32, #tpu.memory_space<vmem>>, vector<8x8x64xf32>
    %288 = vector.shape_cast %287 : vector<8x8x64xf32> to vector<64x64xf32>
    %c3_378 = arith.constant 3 : index
    %c4_379 = arith.constant 4 : index
    %c0_380 = arith.constant 0 : index
    %289 = vector.load %arg25[%c3_378, %c4_379, %c0_380] : memref<14x14x64xf32, #tpu.memory_space<vmem>>, vector<8x8x64xf32>
    %290 = vector.shape_cast %289 : vector<8x8x64xf32> to vector<64x64xf32>
    %c4_381 = arith.constant 4 : index
    %c2_382 = arith.constant 2 : index
    %c0_383 = arith.constant 0 : index
    %291 = vector.load %arg25[%c4_381, %c2_382, %c0_383] : memref<14x14x64xf32, #tpu.memory_space<vmem>>, vector<8x8x64xf32>
    %292 = vector.shape_cast %291 : vector<8x8x64xf32> to vector<64x64xf32>
    %c4_384 = arith.constant 4 : index
    %c3_385 = arith.constant 3 : index
    %c0_386 = arith.constant 0 : index
    %293 = vector.load %arg25[%c4_384, %c3_385, %c0_386] : memref<14x14x64xf32, #tpu.memory_space<vmem>>, vector<8x8x64xf32>
    %294 = vector.shape_cast %293 : vector<8x8x64xf32> to vector<64x64xf32>
    %c4_387 = arith.constant 4 : index
    %c4_388 = arith.constant 4 : index
    %c0_389 = arith.constant 0 : index
    %295 = vector.load %arg25[%c4_387, %c4_388, %c0_389] : memref<14x14x64xf32, #tpu.memory_space<vmem>>, vector<8x8x64xf32>
    %296 = vector.shape_cast %295 : vector<8x8x64xf32> to vector<64x64xf32>
    %297 = tpu.concatenate %280, %282, %284, %286, %288, %290, %292, %294, %296 in 1 : vector<64x64xf32>, vector<64x64xf32>, vector<64x64xf32>, vector<64x64xf32>, vector<64x64xf32>, vector<64x64xf32>, vector<64x64xf32>, vector<64x64xf32>, vector<64x64xf32> -> vector<64x576xf32>
    %298 = arith.truncf %297 : vector<64x576xf32> to vector<64x576xbf16>
    %c0_390 = arith.constant 0 : index
    %c0_391 = arith.constant 0 : index
    %299 = vector.load %arg14[%c0_390, %c0_391] : memref<576x32xbf16, #tpu.memory_space<vmem>>, vector<576x32xbf16>
    %cst_392 = arith.constant dense<0.000000e+00> : vector<64x32xf32>
    %300 = tpu.matmul %298, %299, %cst_392 {dimension_numbers = #tpu.dot_dimension_numbers<[1], [0], [0], [1], [0, 0, 1, 1], [], []>} : vector<64x576xbf16>, vector<576x32xbf16>, vector<64x32xf32> -> vector<64x32xf32>
    %c0_393 = arith.constant 0 : index
    %c0_394 = arith.constant 0 : index
    %301 = vector.load %arg15[%c0_393, %c0_394] : memref<1x32xf32, #tpu.memory_space<vmem>>, vector<1x32xf32>
    %302 = vector.broadcast %301 : vector<1x32xf32> to vector<64x32xf32>
    %303 = arith.mulf %300, %302 : vector<64x32xf32>
    %c0_395 = arith.constant 0 : index
    %c0_396 = arith.constant 0 : index
    %304 = vector.load %arg16[%c0_395, %c0_396] : memref<1x32xf32, #tpu.memory_space<vmem>>, vector<1x32xf32>
    %305 = vector.broadcast %304 : vector<1x32xf32> to vector<64x32xf32>
    %306 = arith.addf %303, %305 : vector<64x32xf32>
    %cst_397 = arith.constant 0.000000e+00 : f32
    %307 = vector.broadcast %cst_397 : f32 to vector<64x32xf32>
    %308 = arith.maximumf %306, %307 : vector<64x32xf32>
    %309 = arith.truncf %308 : vector<64x32xf32> to vector<64x32xbf16>
    %c0_398 = arith.constant 0 : index
    %c0_399 = arith.constant 0 : index
    %310 = vector.load %arg17[%c0_398, %c0_399] : memref<32x2xbf16, #tpu.memory_space<vmem>>, vector<32x2xbf16>
    %cst_400 = arith.constant dense<0.000000e+00> : vector<64x2xf32>
    %311 = tpu.matmul %309, %310, %cst_400 {dimension_numbers = #tpu.dot_dimension_numbers<[1], [0], [0], [1], [0, 0, 1, 1], [], []>} : vector<64x32xbf16>, vector<32x2xbf16>, vector<64x2xf32> -> vector<64x2xf32>
    %c0_401 = arith.constant 0 : index
    %c0_402 = arith.constant 0 : index
    %312 = vector.load %arg18[%c0_401, %c0_402] : memref<1x2xf32, #tpu.memory_space<vmem>>, vector<1x2xf32>
    %313 = vector.broadcast %312 : vector<1x2xf32> to vector<64x2xf32>
    %314 = arith.addf %311, %313 : vector<64x2xf32>
    %c2_403 = arith.constant 2 : index
    %c2_404 = arith.constant 2 : index
    %c0_405 = arith.constant 0 : index
    %315 = vector.load %arg25[%c2_403, %c2_404, %c0_405] : memref<14x14x64xf32, #tpu.memory_space<vmem>>, vector<8x8x64xf32>
    %316 = vector.shape_cast %315 : vector<8x8x64xf32> to vector<64x64xf32>
    %c2_406 = arith.constant 2 : index
    %c3_407 = arith.constant 3 : index
    %c0_408 = arith.constant 0 : index
    %317 = vector.load %arg25[%c2_406, %c3_407, %c0_408] : memref<14x14x64xf32, #tpu.memory_space<vmem>>, vector<8x8x64xf32>
    %318 = vector.shape_cast %317 : vector<8x8x64xf32> to vector<64x64xf32>
    %c2_409 = arith.constant 2 : index
    %c4_410 = arith.constant 4 : index
    %c0_411 = arith.constant 0 : index
    %319 = vector.load %arg25[%c2_409, %c4_410, %c0_411] : memref<14x14x64xf32, #tpu.memory_space<vmem>>, vector<8x8x64xf32>
    %320 = vector.shape_cast %319 : vector<8x8x64xf32> to vector<64x64xf32>
    %c3_412 = arith.constant 3 : index
    %c2_413 = arith.constant 2 : index
    %c0_414 = arith.constant 0 : index
    %321 = vector.load %arg25[%c3_412, %c2_413, %c0_414] : memref<14x14x64xf32, #tpu.memory_space<vmem>>, vector<8x8x64xf32>
    %322 = vector.shape_cast %321 : vector<8x8x64xf32> to vector<64x64xf32>
    %c3_415 = arith.constant 3 : index
    %c3_416 = arith.constant 3 : index
    %c0_417 = arith.constant 0 : index
    %323 = vector.load %arg25[%c3_415, %c3_416, %c0_417] : memref<14x14x64xf32, #tpu.memory_space<vmem>>, vector<8x8x64xf32>
    %324 = vector.shape_cast %323 : vector<8x8x64xf32> to vector<64x64xf32>
    %c3_418 = arith.constant 3 : index
    %c4_419 = arith.constant 4 : index
    %c0_420 = arith.constant 0 : index
    %325 = vector.load %arg25[%c3_418, %c4_419, %c0_420] : memref<14x14x64xf32, #tpu.memory_space<vmem>>, vector<8x8x64xf32>
    %326 = vector.shape_cast %325 : vector<8x8x64xf32> to vector<64x64xf32>
    %c4_421 = arith.constant 4 : index
    %c2_422 = arith.constant 2 : index
    %c0_423 = arith.constant 0 : index
    %327 = vector.load %arg25[%c4_421, %c2_422, %c0_423] : memref<14x14x64xf32, #tpu.memory_space<vmem>>, vector<8x8x64xf32>
    %328 = vector.shape_cast %327 : vector<8x8x64xf32> to vector<64x64xf32>
    %c4_424 = arith.constant 4 : index
    %c3_425 = arith.constant 3 : index
    %c0_426 = arith.constant 0 : index
    %329 = vector.load %arg25[%c4_424, %c3_425, %c0_426] : memref<14x14x64xf32, #tpu.memory_space<vmem>>, vector<8x8x64xf32>
    %330 = vector.shape_cast %329 : vector<8x8x64xf32> to vector<64x64xf32>
    %c4_427 = arith.constant 4 : index
    %c4_428 = arith.constant 4 : index
    %c0_429 = arith.constant 0 : index
    %331 = vector.load %arg25[%c4_427, %c4_428, %c0_429] : memref<14x14x64xf32, #tpu.memory_space<vmem>>, vector<8x8x64xf32>
    %332 = vector.shape_cast %331 : vector<8x8x64xf32> to vector<64x64xf32>
    %333 = tpu.concatenate %316, %318, %320, %322, %324, %326, %328, %330, %332 in 1 : vector<64x64xf32>, vector<64x64xf32>, vector<64x64xf32>, vector<64x64xf32>, vector<64x64xf32>, vector<64x64xf32>, vector<64x64xf32>, vector<64x64xf32>, vector<64x64xf32> -> vector<64x576xf32>
    %334 = arith.truncf %333 : vector<64x576xf32> to vector<64x576xbf16>
    %c0_430 = arith.constant 0 : index
    %c0_431 = arith.constant 0 : index
    %335 = vector.load %arg19[%c0_430, %c0_431] : memref<576x32xbf16, #tpu.memory_space<vmem>>, vector<576x32xbf16>
    %cst_432 = arith.constant dense<0.000000e+00> : vector<64x32xf32>
    %336 = tpu.matmul %334, %335, %cst_432 {dimension_numbers = #tpu.dot_dimension_numbers<[1], [0], [0], [1], [0, 0, 1, 1], [], []>} : vector<64x576xbf16>, vector<576x32xbf16>, vector<64x32xf32> -> vector<64x32xf32>
    %c0_433 = arith.constant 0 : index
    %c0_434 = arith.constant 0 : index
    %337 = vector.load %arg20[%c0_433, %c0_434] : memref<1x32xf32, #tpu.memory_space<vmem>>, vector<1x32xf32>
    %338 = vector.broadcast %337 : vector<1x32xf32> to vector<64x32xf32>
    %339 = arith.mulf %336, %338 : vector<64x32xf32>
    %c0_435 = arith.constant 0 : index
    %c0_436 = arith.constant 0 : index
    %340 = vector.load %arg21[%c0_435, %c0_436] : memref<1x32xf32, #tpu.memory_space<vmem>>, vector<1x32xf32>
    %341 = vector.broadcast %340 : vector<1x32xf32> to vector<64x32xf32>
    %342 = arith.addf %339, %341 : vector<64x32xf32>
    %cst_437 = arith.constant 0.000000e+00 : f32
    %343 = vector.broadcast %cst_437 : f32 to vector<64x32xf32>
    %344 = arith.maximumf %342, %343 : vector<64x32xf32>
    %345 = arith.truncf %344 : vector<64x32xf32> to vector<64x32xbf16>
    %c0_438 = arith.constant 0 : index
    %c0_439 = arith.constant 0 : index
    %346 = vector.load %arg22[%c0_438, %c0_439] : memref<32x1xbf16, #tpu.memory_space<vmem>>, vector<32x1xbf16>
    %cst_440 = arith.constant dense<0.000000e+00> : vector<64x1xf32>
    %347 = tpu.matmul %345, %346, %cst_440 {dimension_numbers = #tpu.dot_dimension_numbers<[1], [0], [0], [1], [0, 0, 1, 1], [], []>} : vector<64x32xbf16>, vector<32x1xbf16>, vector<64x1xf32> -> vector<64x1xf32>
    %c0_441 = arith.constant 0 : index
    %c0_442 = arith.constant 0 : index
    %348 = vector.load %arg23[%c0_441, %c0_442] : memref<1x1xf32, #tpu.memory_space<vmem>>, vector<1x1xf32>
    %349 = vector.broadcast %348 : vector<1x1xf32> to vector<64x1xf32>
    %350 = arith.addf %347, %349 : vector<64x1xf32>
    %351 = arith.negf %350 : vector<64x1xf32>
    %352 = math.exp %351 : vector<64x1xf32>
    %cst_443 = arith.constant 1.000000e+00 : f32
    %353 = vector.broadcast %cst_443 : f32 to vector<64x1xf32>
    %354 = arith.addf %353, %352 : vector<64x1xf32>
    %355 = arith.divf %353, %354 : vector<64x1xf32>
    %cst_444 = arith.constant 0.000000e+00 : f32
    %356 = vector.broadcast %cst_444 : f32 to vector<64x113xf32>
    %357 = tpu.concatenate %55, %278, %314, %355, %356 in 1 : vector<64x2xf32>, vector<64x10xf32>, vector<64x2xf32>, vector<64x1xf32>, vector<64x113xf32> -> vector<64x128xf32>
    %c0_445 = arith.constant 0 : index
    %c0_446 = arith.constant 0 : index
    %c0_447 = arith.constant 0 : index
    %358 = vector.load %arg24[%c0_445, %c0_446, %c0_447] : memref<1x64x128xf32, #tpu.memory_space<vmem>>, vector<1x64x128xf32>
    %359 = vector.shape_cast %358 : vector<1x64x128xf32> to vector<64x128xf32>
    %360 = vector.shape_cast %357 : vector<64x128xf32> to vector<1x64x128xf32>
    tpu.vector_store %arg24[%c0_445, %c0_446, %c0_447], %360 {strides = array<i32>} : memref<1x64x128xf32, #tpu.memory_space<vmem>>, vector<1x64x128xf32>,
    return
  }
  func.func @transform_0(%arg0: i32) -> (i32, i32, i32) {
    %c0_i32 = arith.constant 0 : i32
    %c0_i32_0 = arith.constant 0 : i32
    %c0_i32_1 = arith.constant 0 : i32
    return %arg0, %c0_i32, %c0_i32_0 : i32, i32, i32
  }
  func.func @transform_1(%arg0: i32) -> (i32, i32) {
    %c0_i32 = arith.constant 0 : i32
    %c0_i32_0 = arith.constant 0 : i32
    %c0_i32_1 = arith.constant 0 : i32
    return %c0_i32, %c0_i32_0 : i32, i32
  }
  func.func @transform_2(%arg0: i32) -> (i32, i32) {
    %c0_i32 = arith.constant 0 : i32
    %c0_i32_0 = arith.constant 0 : i32
    %c0_i32_1 = arith.constant 0 : i32
    return %c0_i32, %c0_i32_0 : i32, i32
  }
  func.func @transform_3(%arg0: i32) -> (i32, i32) {
    %c0_i32 = arith.constant 0 : i32
    %c0_i32_0 = arith.constant 0 : i32
    %c0_i32_1 = arith.constant 0 : i32
    return %c0_i32, %c0_i32_0 : i32, i32
  }
  func.func @transform_4(%arg0: i32) -> (i32, i32) {
    %c0_i32 = arith.constant 0 : i32
    %c0_i32_0 = arith.constant 0 : i32
    %c0_i32_1 = arith.constant 0 : i32
    return %c0_i32, %c0_i32_0 : i32, i32
  }
  func.func @transform_5(%arg0: i32) -> (i32, i32) {
    %c0_i32 = arith.constant 0 : i32
    %c0_i32_0 = arith.constant 0 : i32
    %c0_i32_1 = arith.constant 0 : i32
    return %c0_i32, %c0_i32_0 : i32, i32
  }
  func.func @transform_6(%arg0: i32) -> (i32, i32) {
    %c0_i32 = arith.constant 0 : i32
    %c0_i32_0 = arith.constant 0 : i32
    %c0_i32_1 = arith.constant 0 : i32
    return %c0_i32, %c0_i32_0 : i32, i32
  }
  func.func @transform_7(%arg0: i32) -> (i32, i32) {
    %c0_i32 = arith.constant 0 : i32
    %c0_i32_0 = arith.constant 0 : i32
    %c0_i32_1 = arith.constant 0 : i32
    return %c0_i32, %c0_i32_0 : i32, i32
  }
  func.func @transform_8(%arg0: i32) -> (i32, i32) {
    %c0_i32 = arith.constant 0 : i32
    %c0_i32_0 = arith.constant 0 : i32
    %c0_i32_1 = arith.constant 0 : i32
    return %c0_i32, %c0_i32_0 : i32, i32
  }
  func.func @transform_9(%arg0: i32) -> (i32, i32) {
    %c0_i32 = arith.constant 0 : i32
    %c0_i32_0 = arith.constant 0 : i32
    %c0_i32_1 = arith.constant 0 : i32
    return %c0_i32, %c0_i32_0 : i32, i32
  }
  func.func @transform_10(%arg0: i32) -> (i32, i32) {
    %c0_i32 = arith.constant 0 : i32
    %c0_i32_0 = arith.constant 0 : i32
    %c0_i32_1 = arith.constant 0 : i32
    return %c0_i32, %c0_i32_0 : i32, i32
  }
  func.func @transform_11(%arg0: i32) -> (i32, i32) {
    %c0_i32 = arith.constant 0 : i32
    %c0_i32_0 = arith.constant 0 : i32
    %c0_i32_1 = arith.constant 0 : i32
    return %c0_i32, %c0_i32_0 : i32, i32
  }
  func.func @transform_12(%arg0: i32) -> (i32, i32) {
    %c0_i32 = arith.constant 0 : i32
    %c0_i32_0 = arith.constant 0 : i32
    %c0_i32_1 = arith.constant 0 : i32
    return %c0_i32, %c0_i32_0 : i32, i32
  }
  func.func @transform_13(%arg0: i32) -> (i32, i32) {
    %c0_i32 = arith.constant 0 : i32
    %c0_i32_0 = arith.constant 0 : i32
    %c0_i32_1 = arith.constant 0 : i32
    return %c0_i32, %c0_i32_0 : i32, i32
  }
  func.func @transform_14(%arg0: i32) -> (i32, i32) {
    %c0_i32 = arith.constant 0 : i32
    %c0_i32_0 = arith.constant 0 : i32
    %c0_i32_1 = arith.constant 0 : i32
    return %c0_i32, %c0_i32_0 : i32, i32
  }
  func.func @transform_15(%arg0: i32) -> (i32, i32) {
    %c0_i32 = arith.constant 0 : i32
    %c0_i32_0 = arith.constant 0 : i32
    %c0_i32_1 = arith.constant 0 : i32
    return %c0_i32, %c0_i32_0 : i32, i32
  }
  func.func @transform_16(%arg0: i32) -> (i32, i32) {
    %c0_i32 = arith.constant 0 : i32
    %c0_i32_0 = arith.constant 0 : i32
    %c0_i32_1 = arith.constant 0 : i32
    return %c0_i32, %c0_i32_0 : i32, i32
  }
  func.func @transform_17(%arg0: i32) -> (i32, i32) {
    %c0_i32 = arith.constant 0 : i32
    %c0_i32_0 = arith.constant 0 : i32
    %c0_i32_1 = arith.constant 0 : i32
    return %c0_i32, %c0_i32_0 : i32, i32
  }
  func.func @transform_18(%arg0: i32) -> (i32, i32) {
    %c0_i32 = arith.constant 0 : i32
    %c0_i32_0 = arith.constant 0 : i32
    %c0_i32_1 = arith.constant 0 : i32
    return %c0_i32, %c0_i32_0 : i32, i32
  }
  func.func @transform_19(%arg0: i32) -> (i32, i32) {
    %c0_i32 = arith.constant 0 : i32
    %c0_i32_0 = arith.constant 0 : i32
    %c0_i32_1 = arith.constant 0 : i32
    return %c0_i32, %c0_i32_0 : i32, i32
  }
  func.func @transform_20(%arg0: i32) -> (i32, i32) {
    %c0_i32 = arith.constant 0 : i32
    %c0_i32_0 = arith.constant 0 : i32
    %c0_i32_1 = arith.constant 0 : i32
    return %c0_i32, %c0_i32_0 : i32, i32
  }
  func.func @transform_21(%arg0: i32) -> (i32, i32) {
    %c0_i32 = arith.constant 0 : i32
    %c0_i32_0 = arith.constant 0 : i32
    %c0_i32_1 = arith.constant 0 : i32
    return %c0_i32, %c0_i32_0 : i32, i32
  }
  func.func @transform_22(%arg0: i32) -> (i32, i32) {
    %c0_i32 = arith.constant 0 : i32
    %c0_i32_0 = arith.constant 0 : i32
    %c0_i32_1 = arith.constant 0 : i32
    return %c0_i32, %c0_i32_0 : i32, i32
  }
  func.func @transform_23(%arg0: i32) -> (i32, i32, i32) {
    %c0_i32 = arith.constant 0 : i32
    %c0_i32_0 = arith.constant 0 : i32
    %c0_i32_1 = arith.constant 0 : i32
    return %arg0, %c0_i32, %c0_i32_0 : i32, i32, i32
  }
}

</mosaic_0001>

<bundles_post_ra>
// kernel: _lambda_.1
= control target key start
LH: loop header
LB: loop body
LE: loop exit
PB: predicated region body
PF: predicated region fallthrough
CT: control target
= control target key end

     0   :  { %s18129_s0 = inlined_call_operand.vmem [shape: bf16[2,64,12], index: 0, kind: input, shape index: {}]   ;;  %s18130_s1 = inlined_call_operand.vmem [shape: bf16[12,64], index: 1, kind: input, shape index: {}]   ;;  %s18131_s2 = inlined_call_operand.vmem [shape: f32[1,64], index: 2, kind: input, shape index: {}]   ;;  %s18132_s3 = inlined_call_operand.hbm [shape: bf16[576,32], index: 3, kind: input, shape index: {}]   ;;  %s18133_s4 = inlined_call_operand.vmem [shape: f32[1,32], index: 4, kind: input, shape index: {}]   ;;  %s18134_s5 = inlined_call_operand.vmem [shape: f32[1,32], index: 5, kind: input, shape index: {}]   ;;  %s18135_s6 = inlined_call_operand.vmem [shape: bf16[32,2], index: 6, kind: input, shape index: {}]   ;;  %s18136_s7 = inlined_call_operand.vmem [shape: f32[1,2], index: 7, kind: input, shape index: {}]   ;;  %s18137_s8 = inlined_call_operand.hbm [shape: bf16[3136,32], index: 8, kind: input, shape index: {}]   ;;  %s18138_s9 = inlined_call_operand.vmem [shape: f32[1,32], index: 9, kind: input, shape index: {}]   ;;  %s18139_s10 = inlined_call_operand.vmem [shape: f32[1,32], index: 10, kind: input, shape index: {}]   ;;  %s18140_s11 = inlined_call_operand.vmem [shape: bf16[1568,10], index: 11, kind: input, shape index: {}]   ;;  %s18141_s12 = inlined_call_operand.vmem [shape: f32[1,10], index: 12, kind: input, shape index: {}]   ;;  %s18142_s13 = inlined_call_operand.hbm [shape: bf16[576,32], index: 13, kind: input, shape index: {}]   ;;  %s18143_s14 = inlined_call_operand.vmem [shape: f32[1,32], index: 14, kind: input, shape index: {}]   ;;  %s18144_s15 = inlined_call_operand.vmem [shape: f32[1,32], index: 15, kind: input, shape index: {}]   ;;  %s18145_s16 = inlined_call_operand.vmem [shape: bf16[32,2], index: 16, kind: input, shape index: {}]   ;;  %s18146_s17 = inlined_call_operand.vmem [shape: f32[1,2], index: 17, kind: input, shape index: {}]   ;;  %s18147_s18 = inlined_call_operand.vmem [shape: bf16[576,32], index: 18, kind: input, shape index: {}]   ;;  %s18148_s19 = inlined_call_operand.vmem [shape: f32[1,32], index: 19, kind: input, shape index: {}]   ;;  %s18149_s20 = inlined_call_operand.vmem [shape: f32[1,32], index: 20, kind: input, shape index: {}]   ;;  %s18150_s21 = inlined_call_operand.vmem [shape: bf16[32,1], index: 21, kind: input, shape index: {}]   ;;  %s18151_s22 = inlined_call_operand.<no memory space> [shape: f32[1,1], index: 22, kind: input, shape index: {}]   ;;  %s18152_s23 = inlined_call_operand.vmem [shape: f32[2,64,128], index: 23, kind: output, shape index: {}]  }
   0x1   :  { %18218 = sst [smem:[#allocation49_spill]] %s18129_s0  ;;  %v28_v0 = vstv %s18151_s22 }
   0x2   :  { %18219 = sst [smem:[#allocation50_spill]] %s18130_s1  ;;  %29 = vst [vmem:[#allocation4] sm:$0x1] %v28_v0 }
   0x3   :  { %18220 = sst [smem:[#allocation51_spill]] %s18131_s2 }
   0x4   :  { %18221 = sst [smem:[#allocation52_spill]] %s18132_s3 }
   0x5   :  { %18222 = sst [smem:[#allocation53_spill]] %s18133_s4 }
   0x6   :  { %18223 = sst [smem:[#allocation54_spill]] %s18134_s5 }
   0x7   :  { %18224 = sst [smem:[#allocation55_spill]] %s18135_s6 }
   0x8   :  { %18225 = sst [smem:[#allocation56_spill]] %s18136_s7 }
   0x9   :  { %30 = vsyncpa [#allocation6], 0 }
   0xa   :  { %31 = vsyncpa [#allocation8], 0  ;;  %s14233_s24 = smov 0  }
   0xb LB: > { %s14239_s25 = sadd.s32 4294967295, %s14096_s24   ;;  %p10526_p0 = scmp.ge.s32.totalorder %s14096_s24, 1  ;;  %s14096_s24 = sphi %s14233_s24, %s37_s24  }
   0xc   : > { %p556_p1 = scmp.lt.s32.totalorder %s14096_s24, 3  ;;  %p12187_p2 = scmp.eq.s32.totalorder %s14239_s25, 0 }
   0xd   : > { %s14098_s5 = smov [#allocation7]   ;;  %s14099_s26 = smov [#allocation5]  }
   0xe   : > { %p14244_p3 = pnand %p10526_p0, %p556_p1  ;;  %s599_s1 = sshll.u32 %s14098_s5, 4  ;;  %s600_s1 = int_to_ptr.vmem [resolvable:$true] %s599_s1 }
   0xf   : > { %s574_s2 = sshll.u32 %s14099_s26, 4  ;;  %s14100_s27 = smov [#allocation9]   ;;  %s575_s2 = int_to_ptr.vmem [resolvable:$true] %s574_s2 }
  0x10   : > { %p12177_p4 = pneg %p14244_p3  ;;  %s624_s7 = sshll.u32 %s14100_s27, 4  ;;  %s14256_s7 = int_to_ptr.vmem [resolvable:$true] %s624_s7 }
  0x11   : > { %s14015_s28 = scalar_lea.vmem %s600_s1, 25088  ;;  %p14023_p10 = scmp.lt.s32.totalorder %s600_s1, %s600_s1 }
  0x12   : > { %p14252_p5 = pnand %p12187_p2, %p12177_p4  ;;  %p14016_p7 = scmp.ne.s32.totalorder %s600_s1, %s14015_s28 }
  0x13   : > { %p14024_p11 = scmp.lt.s32.totalorder %s14015_s28, %s14015_s28 }
  0x14   : > { %p14006_p6 = pneg %p14252_p5 }
  0x15   : > { %p14025_p12 = por %p14024_p11, %p14023_p10 }
  0x16   : > { %p14018_p8 = pnand %p14016_p7, %p14006_p6 }
  0x18   : > { %p14019_p9 = pneg %p14018_p8 }
  0x1a   : > { %p14026_p13 = pnand %p14025_p12, %p14019_p9 }
  0x1c   : > { %14029 = shalt.err (!%p14026_p13)
}
  0x1d   : > { %s14101_s29 = smov 64   ;;  %s14102_s3 = smov 4  }
  0x1e   : > { %12183 = dma.hbm_to_vmem [thread:$0]  (!%p14252_p5), %s18137_s8, 25088, %s600_s1, [#allocation8], %s14101_s29, %s14101_s29, %s14102_s3  }
  0x1f   : > { %s14041_s30 = scalar_lea.vmem %s575_s2, 4608  ;;  %p14049_p7 = scmp.lt.s32.totalorder %s575_s2, %s575_s2 }
  0x20   : > { %p14042_p0 = scmp.ne.s32.totalorder %s575_s2, %s14041_s30  ;;  %p14050_p8 = scmp.lt.s32.totalorder %s14041_s30, %s14041_s30 }
  0x22   : > { %p14044_p1 = pnand %p14042_p0, %p14006_p6  ;;  %p14051_p10 = por %p14050_p8, %p14049_p7 }
  0x24   : > { %p14045_p4 = pneg %p14044_p1 }
  0x26   : > { %p14052_p9 = pnand %p14051_p10, %p14045_p4 }
  0x28   : > { %14055 = shalt.err (!%p14052_p9)
}
  0x29   : > { %s18228_s27 = sld [smem:[#allocation52_spill]]  ;;  %s14067_s1 = scalar_lea.vmem %s14256_s7, 4608 }
  0x2a   : > { %p14068_p11 = scmp.ne.s32.totalorder %s14256_s7, %s14067_s1  ;;  %p14075_p0 = scmp.lt.s32.totalorder %s14256_s7, %s14256_s7 }
  0x2b   : > { %p14076_p1 = scmp.lt.s32.totalorder %s14067_s1, %s14067_s1 }
  0x2c   : > { %p14070_p12 = pnand %p14068_p11, %p14006_p6 }
  0x2d   : > { %p14077_p4 = por %p14076_p1, %p14075_p0 }
  0x2e   : > { %p14071_p13 = pneg %p14070_p12 }
  0x2f   : > { %12180 = dma.hbm_to_vmem [thread:$0]  (!%p14252_p5), %s18228_s27, 4608, %s575_s2, [#allocation6], %s14101_s29, %s14101_s29, %s14102_s3  }
  0x30   : > { %p14078_p7 = pnand %p14077_p4, %p14071_p13 }
  0x32   : > { %14081 = shalt.err (!%p14078_p7)
}
  0x33   : > { %12186 = dma.hbm_to_vmem [thread:$0]  (!%p14252_p5), %s18142_s13, 4608, %s14256_s7, [#allocation8], %s14101_s29, %s14101_s29, %s14102_s3  }
  0x34   : > { %675 = sbr.rel (%p14244_p3) target bundleno = 2311 (0x907), region = 112 }
  0x39   : > { %14087 = dma.done.wait (%p12187_p2), [#allocation6], 4608  }
  0x3a   : > { %14089 = vsyncadd (%p12187_p2), [#allocation6], 4294962688 }
  0x3b   : > { %14091 = dma.done.wait (%p12187_p2), [#allocation8], 29696  }
  0x3c   : > { %14093 = vsyncadd (%p12187_p2), [#allocation8], 4294937600  ;;  %p747_p6 = scmp.lt.s32.totalorder %s14239_s25, 1  ;;  %s18229_s7 = sld [smem:[#allocation49_spill]]  ;;  %vm813_vm0 = vcmask 1045504   ;;  %vm800_vm1 = vcmask 97280  }
  0x3d   : > { %s18230_s30 = sld [smem:[#allocation50_spill]]  ;;  %vm890_vm2 = vcmask 523264   ;;  %vm892_vm3 = vcmask 521216   ;;  %v18154_v7 = vmov 0.0   ;;  %v13498_v8 = vld [vmem:[#allocation5 + $0x78] sm:$0xff]   ;;  %v13500_v10 = vld [vmem:[#allocation5 + $0x70] sm:$0xff]  }
  0x3e   : > { %s18479_s25 = smov (!%p747_p6, %s14239_s25), 1  ;;  %902 = vst.msk [vmem:[#allocation2 + $0x50] sm:$0xff] %vm890_vm2, %v18154_v7  ;;  %891 = vst.msk [vmem:[#allocation2] sm:$0xff] %vm890_vm2, %v18154_v7  ;;  %11026 = vmatprep.subr.bf16.mxu1 %v13498_v8  ;;  %v13499_v9 = vld [vmem:[#allocation5 + $0x38] sm:$0xff]   ;;  %v13501_v11 = vld [vmem:[#allocation5 + $0x30] sm:$0xff]   ;;  %s18231_s27 = sld [smem:[#allocation51_spill]] }
  0x3f   : > { %s11019_s22 = sshll.u32 %s18479_s25, 5  ;;  %903 = vst.msk [vmem:[#allocation2 + $0x58] sm:$0x3f] %vm892_vm3, %v18154_v7  ;;  %893 = vst.msk [vmem:[#allocation2 + $0x8] sm:$0x3f] %vm892_vm3, %v18154_v7  ;;  %11027 = vmatpush3.bf16.msra.mxu1 %v13499_v9  ;;  %v13502_v12 = vld [vmem:[#allocation5 + $0x68] sm:$0xff]  }
  0x40   : > { %894 = vst.msk [vmem:[#allocation2 + $0x10] sm:$0xff] %vm890_vm2, %v18154_v7  ;;  %896 = vst.msk [vmem:[#allocation2 + $0x20] sm:$0xff] %vm890_vm2, %v18154_v7  ;;  %11028 = vmatprep.subr.bf16.mxu1 %v13500_v10  ;;  %v13503_v13 = vld [vmem:[#allocation5 + $0x28] sm:$0xff]   ;;  %v13504_v14 = vld [vmem:[#allocation5 + $0xf8] sm:$0xff]   ;;  %s14104_s1 = smov 64   ;;  %vm929_vm4 = vcmask 261120  }
  0x41   : > { %895 = vst.msk [vmem:[#allocation2 + $0x18] sm:$0x3f] %vm892_vm3, %v18154_v7  ;;  %897 = vst.msk [vmem:[#allocation2 + $0x28] sm:$0x3f] %vm892_vm3, %v18154_v7  ;;  %v13505_v15 = vld [vmem:[#allocation5 + $0xb8] sm:$0xff]   ;;  %v13506_v16 = vld [vmem:[#allocation5 + $0x60] sm:$0xff]  }
  0x42   : > { %s751_s29 = scalar_lea.vmem %s18229_s7, %s11019_s22  ;;  %898 = vst.msk [vmem:[#allocation2 + $0x30] sm:$0xff] %vm890_vm2, %v18154_v7  ;;  %900 = vst.msk [vmem:[#allocation2 + $0x40] sm:$0xff] %vm890_vm2, %v18154_v7  ;;  %v13507_v18 = vld [vmem:[#allocation5 + $0x20] sm:$0xff]   ;;  %v13508_v19 = vld [vmem:[#allocation5 + $0xf0] sm:$0xff]   ;;  %s18250_s22 = sld [smem:[#allocation55_spill]]  ;;  %vm931_vm5 = vcmask 259072  }
  0x43   : > { %v13493_v1 = vld [vmem:[%s18230_s30] sm:$0x3f]   ;;  %v13495_v4 = vld [vmem:[%s751_s29 + $0x8] sm:$0xff]   ;;  %v13496_v5 = vld [vmem:[%s751_s29 + $0x10] sm:$0xff]   ;;  %899 = vst.msk [vmem:[#allocation2 + $0x38] sm:$0x3f] %vm892_vm3, %v18154_v7  ;;  %11029 = vmatpush3.bf16.msra.mxu1 %v13501_v11 }
  0x44   : > { %v13494_v2 = vld [vmem:[%s751_s29] sm:$0xff]   ;;  %12164 = vmatprep.subr.msk.bf16.mxu0 %vm813_vm0, %v13493_v1  ;;  %v815_v3 = vsel %vm813_vm0, %v13493_v1, 0  ;;  %v13497_v6 = vld [vmem:[%s751_s29 + $0x18] sm:$0xff]   ;;  %901 = vst.msk [vmem:[#allocation2 + $0x48] sm:$0x3f] %vm892_vm3, %v18154_v7  ;;  %11030 = vmatprep.subr.bf16.mxu1 %v13502_v12  ;;  %v13512_v25 = vld [vmem:[#allocation5 + $0xe8] sm:$0xff]  }
  0x45   : > { %12043 = vmatpush3.bf16.msra.mxu0 %v815_v3  ;;  %12044 = vmatprep.mubr.msk.bf16.mxu0 %vm800_vm1, %v13494_v2  ;;  %904 = vst.msk [vmem:[#allocation2 + $0x60] sm:$0xff] %vm890_vm2, %v18154_v7  ;;  %906 = vst.msk [vmem:[#allocation2 + $0x70] sm:$0xff] %vm890_vm2, %v18154_v7  ;;  %v10539_v17 = vld [vmem:[%s18231_s27] ss:$0 sm:$0xff]  ;;  %v13509_v20 = vld [vmem:[#allocation5 + $0xb0] sm:$0xff]   ;;  %s18271_s3 = sld [smem:[#allocation53_spill]] }
  0x46   : > { %905 = vst.msk [vmem:[#allocation2 + $0x68] sm:$0x3f] %vm892_vm3, %v18154_v7  ;;  %907 = vst.msk [vmem:[#allocation2 + $0x78] sm:$0x3f] %vm892_vm3, %v18154_v7  ;;  %11066 = vmatprep.subr.bf16.mxu0 %v13504_v14  ;;  %v13510_v21 = vld [vmem:[#allocation5 + $0x58] sm:$0xff]   ;;  %v13513_v26 = vld [vmem:[#allocation5 + $0xa8] sm:$0xff]  }
  0x47   : > { %908 = vst.msk [vmem:[#allocation2 + $0x80] sm:$0xff] %vm890_vm2, %v18154_v7  ;;  %910 = vst.msk [vmem:[#allocation2 + $0x90] sm:$0xff] %vm890_vm2, %v18154_v7  ;;  %11031 = vmatpush3.bf16.msra.mxu1 %v13503_v13  ;;  %v13511_v24 = vld [vmem:[#allocation5 + $0x18] sm:$0xff]   ;;  %v13514_v30 = vld [vmem:[#allocation5 + $0x50] sm:$0xff]   ;;  %s18272_s5 = sld [smem:[#allocation54_spill]]  ;;  %s14105_s26 = smov 32  }
  0x48   : > { %12045 = vmatmul.mubr.msk.bf16.vlgmr.msra.gmra.mxu0 %vm800_vm1, %v13495_v4  ;;  %909 = vst.msk [vmem:[#allocation2 + $0x88] sm:$0x3f] %vm892_vm3, %v18154_v7  ;;  %911 = vst.msk [vmem:[#allocation2 + $0x98] sm:$0x3f] %vm892_vm3, %v18154_v7  ;;  %11032 = vmatprep.subr.bf16.mxu1 %v13506_v16  ;;  %v13515_v35 = vld [vmem:[#allocation5 + $0x10] sm:$0xff]   ;;  %v13516_v36 = vld [vmem:[#allocation5 + $0xe0] sm:$0xff]  }
  0x49   : > { %12048 = vmatprep.mubr.msk.bf16.mxu0 %vm800_vm1, %v13496_v5  ;;  %912 = vst.msk [vmem:[#allocation2 + $0xa0] sm:$0xff] %vm890_vm2, %v18154_v7  ;;  %914 = vst.msk [vmem:[#allocation2 + $0xb0] sm:$0xff] %vm890_vm2, %v18154_v7  ;;  %11067 = vmatpush3.bf16.msra.mxu0 %v13505_v15  ;;  %v13517_v37 = vld [vmem:[#allocation5 + $0xa0] sm:$0xff]   ;;  %v13518_v41 = vld [vmem:[#allocation5 + $0x48] sm:$0xff]   ;;  %s14106_s27 = smov 96   ;;  %vm6386_vm6 = vcmask 785408  }
  0x4a   : > { %913 = vst.msk [vmem:[#allocation2 + $0xa8] sm:$0x3f] %vm892_vm3, %v18154_v7  ;;  %915 = vst.msk [vmem:[#allocation2 + $0xb8] sm:$0x3f] %vm892_vm3, %v18154_v7  ;;  %11068 = vmatprep.subr.bf16.mxu0 %v13508_v19  ;;  %v13519_v45 = vld [vmem:[#allocation5 + $0x8] sm:$0xff]   ;;  %v13520_v46 = vld [vmem:[#allocation5 + $0xd8] sm:$0xff]  }
  0x4b   : > { %916 = vst.msk [vmem:[#allocation2 + $0xc0] sm:$0xff] %vm890_vm2, %v18154_v7  ;;  %918 = vst.msk [vmem:[#allocation2 + $0xd0] sm:$0xff] %vm890_vm2, %v18154_v7  ;;  %11033 = vmatpush3.bf16.msra.mxu1 %v13507_v18  ;;  %v13521_v47 = vld [vmem:[#allocation5 + $0x98] sm:$0xff]   ;;  %v968_v1 = vld [vmem:[#allocation2 + $0x23] sm:$0xff]  ;;  %s14107_s7 = smov 2   ;;  %s18469_s2 = sld [smem:[#allocation56_spill]] }
  0x4c   : > { %917 = vst.msk [vmem:[#allocation2 + $0xc8] sm:$0x3f] %vm892_vm3, %v18154_v7  ;;  %919 = vst.msk [vmem:[#allocation2 + $0xd8] sm:$0x3f] %vm892_vm3, %v18154_v7  ;;  %11034 = vmatprep.subr.bf16.mxu1 %v13510_v21  ;;  %v13523_v18 = vld [vmem:[#allocation5] sm:$0xff]   ;;  %v13524_v19 = vld [vmem:[#allocation5 + $0xd0] sm:$0xff]  }
  0x4d   : > { %11069 = vmatpush3.bf16.msra.mxu0 %v13509_v20  ;;  %v13525_v21 = vld [vmem:[#allocation5 + $0x90] sm:$0xff]   ;;  %vm10395_vm7 = vcmask 15360   ;;  %s11020_s6 = sshll.u32 %s18479_s25, 6  ;;  %vm10412_vm8 = vcmask 113664   ;;  %vm10421_vm9 = vcmask 121856  }
  0x4e   : > { %11070 = vmatprep.subr.bf16.mxu0 %v13512_v25  ;;  %s18078_s29 = scalar_lea.vmem %s18152_s23, %s11020_s6 }
  0x4f   : > { %11035 = vmatpush3.bf16.msra.mxu1 %v13511_v24 }
  0x50   : > { %12049 = vmatmul.mubr.msk.bf16.gmra.mxu0 %vm800_vm1, %v13497_v6  ;;  %11036 = vmatprep.subr.bf16.mxu1 %v13514_v30 }
  0x51   : > { %11071 = vmatpush3.bf16.msra.mxu0 %v13513_v26 }
  0x52   : > { %11072 = vmatprep.subr.bf16.mxu0 %v13516_v36 }
  0x53   : > { %11037 = vmatpush3.bf16.msra.mxu1 %v13515_v35 }
  0x54   : > { %11038 = vmatprep.subr.bf16.mxu1 %v13518_v41  ;;  %v1907_v41 = vld [vmem:[#allocation2 + $0x11] sm:$0xff] }
  0x55   : > { %11073 = vmatpush3.bf16.msra.mxu0 %v13517_v37 }
  0x56   : > { %11074 = vmatprep.subr.bf16.mxu0 %v13520_v46 }
  0x57   : > { %11039 = vmatpush3.bf16.msra.mxu1 %v13519_v45 }
  0x59   : > { %11075 = vmatpush3.bf16.msra.mxu0 %v13521_v47 }
  0x5a   : > { %11076 = vmatprep.subr.bf16.mxu0 %v13524_v19  ;;  %v1940_v19 = vld [vmem:[#allocation2 + $0x25] sm:$0xff] }
  0x5d   : > { %11077 = vmatpush3.bf16.msra.mxu0 %v13525_v21 }
 0x108   : > { %v12046_v22 = vpop.f32.mrf.mxu0 }
 0x109   : > { %v860_v23 = vadd.f32 %v12046_v22, %v10539_v17  ;;  %v14433_v22 = vld [vmem:[#allocation5 + $0x118] sm:$0xff]  }
 0x10a   : > { %v851_v27 = vpop.f32.mrf.mxu0 }
 0x10b   : > { %v884_v28 = vmax.f32 %v860_v23, 0.0  ;;  %v852_v29 = vadd.f32 %v10539_v17, %v851_v27  ;;  %v13527_v23 = vld [vmem:[#allocation5 + $0xc8] sm:$0xff]  }
 0x10c   : > { %v12047_v31 = vpop.f32.mrf.mxu0  ;;  %v13528_v27 = vld [vmem:[#allocation5 + $0x88] sm:$0xff]   ;;  %11078 = vmatprep.subr.bf16.mxu0 %v13527_v23 }
 0x10d   : > { %923 = vst.msk [vmem:[#allocation2 + $0x53] sm:$0xff] %vm890_vm2, %v884_v28  ;;  %v882_v32 = vmax.f32 %v852_v29, 0.0  ;;  %v863_v33 = vadd.f32 %v12047_v31, %v10539_v17  ;;  %v13529_v29 = vld [vmem:[#allocation5 + $0xc0] sm:$0xff]   ;;  %11079 = vmatpush3.bf16.msra.mxu0 %v13528_v27 }
 0x10e   : > { %v854_v34 = vpop.f32.mrf.mxu0  ;;  %11080 = vmatprep.subr.bf16.mxu0 %v13529_v29 }
 0x10f   : > { %921 = vst.msk [vmem:[#allocation2 + $0x33] sm:$0xff] %vm890_vm2, %v882_v32  ;;  %v885_v38 = vmax.f32 %v863_v33, 0.0  ;;  %v855_v39 = vadd.f32 %v10539_v17, %v854_v34  ;;  %v13530_v34 = vld [vmem:[#allocation5 + $0x80] sm:$0xff]  }
 0x110   : > { %v12050_v40 = vpop.f32.mrf.mxu0 }
 0x111   : > { %924 = vst.msk [vmem:[#allocation2 + $0x63] sm:$0xff] %vm890_vm2, %v885_v38  ;;  %v883_v42 = vmax.f32 %v855_v39, 0.0  ;;  %v876_v43 = vadd.f32 %v12050_v40, %v10539_v17  ;;  %11081 = vmatpush3.bf16.msra.mxu0 %v13530_v34  ;;  %v1024_v38 = vld [vmem:[#allocation2 + $0xb3] sm:$0xff]  ;;  %v1906_v40 = vld [vmem:[#allocation2 + $0x1] sm:$0xff] }
 0x112   : > { %v867_v44 = vpop.f32.mrf.mxu0  ;;  %v12298_v46 = vpack.i.bf16 %v1907_v41, %v1906_v40 }
 0x113   : > { %922 = vst.msk [vmem:[#allocation2 + $0x43] sm:$0xff] %vm890_vm2, %v883_v42  ;;  %v888_v48 = vmax.f32 %v876_v43, 0.0  ;;  %v868_v49 = vadd.f32 %v10539_v17, %v867_v44  ;;  %v1922_v43 = vld [vmem:[#allocation2 + $0x3] sm:$0xff]  ;;  %v1923_v44 = vld [vmem:[#allocation2 + $0x13] sm:$0xff] }
 0x114   : > { %v12051_v50 = vpop.f32.mrf.mxu0  ;;  %v14379_v56 = vld [vmem:[#allocation2 + $0x52] sm:$0xff]  ;;  %v12293_v47 = vpack.i.bf16 %v1923_v44, %v1922_v43  ;;  %v2004_v43 = vld [vmem:[#allocation2 + $0x26] sm:$0xff] }
 0x115   : > { %927 = vst.msk [vmem:[#allocation2 + $0x93] sm:$0xff] %vm890_vm2, %v888_v48  ;;  %v886_v51 = vmax.f32 %v868_v49, 0.0  ;;  %v879_v52 = vadd.f32 %v12051_v50, %v10539_v17  ;;  %v971_v0 = vld [vmem:[#allocation2 + $0x53] sm:$0xff]  ;;  %v1908_v48 = vld [vmem:[#allocation2 + $0x21] sm:$0xff] }
 0x116   : > { %v870_v53 = vpop.f32.mrf.mxu0  ;;  %v14385_v60 = vld [vmem:[#allocation2 + $0x32] sm:$0xff] }
 0x117   : > { %925 = vst.msk [vmem:[#allocation2 + $0x73] sm:$0xff] %vm890_vm2, %v886_v51  ;;  %v889_v54 = vmax.f32 %v879_v52, 0.0  ;;  %v871_v55 = vadd.f32 %v10539_v17, %v870_v53  ;;  %v14398_v2 = vld [vmem:[#allocation2 + $0x33] sm:$0xff]  ;;  %v13522_v17 = vld [vmem:[#allocation5 + $0x40] sm:$0xff]  }
 0x118   : > { %v987_v57 = vld [vmem:[#allocation2 + $0x62] sm:$0xff]  ;;  %v14408_v5 = vpack.i.bf16 %v14398_v2, %v968_v1  ;;  %v14423_v13 = vld [vmem:[#allocation2 + $0x34] sm:$0xff]  ;;  %11040 = vmatprep.subr.bf16.mxu1 %v13522_v17 }
 0x119   : > { %928 = vst.msk [vmem:[#allocation2 + $0xa3] sm:$0xff] %vm890_vm2, %v889_v54  ;;  %v887_v58 = vmax.f32 %v871_v55, 0.0  ;;  %v14383_v59 = vpack.i.bf16 %v987_v57, %v14379_v56  ;;  %v972_v6 = vld [vmem:[#allocation2 + $0x63] sm:$0xff]  ;;  %11041 = vmatpush3.bf16.msra.mxu1 %v13523_v18  ;;  %v14441_v30 = vld [vmem:[#allocation2 + $0x54] sm:$0xff] }
 0x11a   : > { %v14387_v61 = vld [vmem:[#allocation2 + $0x42] sm:$0xff]  ;;  %12052 = vmatprep.subr.bf16.mxu1 %v14433_v22  ;;  %v1909_v49 = vld [vmem:[#allocation2 + $0x31] sm:$0xff] }
 0x11b   : > { %v14389_v62 = vld [vmem:[#allocation2 + $0x43] sm:$0xff]  ;;  %926 = vst.msk [vmem:[#allocation2 + $0x83] sm:$0xff] %vm890_vm2, %v887_v58  ;;  %12224 = vrot.lane.b32.xlu1 %v14383_v59, %s14104_s1  ;;  %v14396_v63 = vpack.i.bf16 %v14387_v61, %v14385_v60  ;;  %v12308_v50 = vpack.i.bf16 %v1909_v49, %v1908_v48  ;;  %v1911_v52 = vld [vmem:[#allocation2 + $0x51] sm:$0xff] }
 0x11c   : > { %v14403_v3 = vpack.i.bf16 %v971_v0, %v14389_v62  ;;  %v14416_v11 = vld [vmem:[#allocation2 + $0x44] sm:$0xff]  ;;  %v975_v15 = vld [vmem:[#allocation2 + $0x93] sm:$0xff] }
 0x11d   : > { %12214 = vrot.lane.b32.xlu0 %v14396_v63, %s14104_s1  ;;  %v14429_v16 = vpack.i.bf16 %v14416_v11, %v14423_v13  ;;  %v990_v24 = vld [vmem:[#allocation2 + $0x92] sm:$0xff]  ;;  %v14437_v26 = vld [vmem:[#allocation2 + $0x64] sm:$0xff] }
 0x11e   : > { %v973_v4 = vld [vmem:[#allocation2 + $0x73] sm:$0xff]  ;;  %v14446_v31 = vpack.i.bf16 %v14437_v26, %v14441_v30  ;;  %v1910_v51 = vld [vmem:[#allocation2 + $0x41] sm:$0xff] }
 0x11f   : > { %12229 = vrot.lane.b32.xlu1 %v14403_v3, %s14104_s1  ;;  %v14410_v8 = vld [vmem:[#allocation2 + $0x72] sm:$0xff]  ;;  %v14414_v9 = vpack.i.bf16 %v973_v4, %v972_v6  ;;  %v14473_v53 = vpack.i.bf16 %v1911_v52, %v1910_v51  ;;  %v1912_v55 = vld [vmem:[#allocation2 + $0x61] sm:$0xff] }
 0x120   : > { %v991_v25 = vld [vmem:[#allocation2 + $0xa2] sm:$0xff]  ;;  %v14448_v32 = vld [vmem:[#allocation2 + $0x74] sm:$0xff] }
 0x121   : > { %12219 = vrot.lane.b32.xlu0 %v14408_v5, %s14104_s1  ;;  %v12253_v28 = vpack.i.bf16 %v991_v25, %v990_v24  ;;  %v14460_v36 = vld [vmem:[#allocation2 + $0x94] sm:$0xff]  ;;  %v1007_v37 = vld [vmem:[#allocation2 + $0xa4] sm:$0xff] }
 0x122   : > { %v989_v10 = vld [vmem:[#allocation2 + $0x82] sm:$0xff]  ;;  %v12288_v42 = vpack.i.bf16 %v1007_v37, %v14460_v36  ;;  %v1913_v54 = vld [vmem:[#allocation2 + $0x71] sm:$0xff] }
 0x123   : > { %12234 = vrot.lane.b32.xlu1 %v14414_v9, %s14104_s1  ;;  %v14421_v12 = vpack.i.bf16 %v989_v10, %v14410_v8  ;;  %v974_v14 = vld [vmem:[#allocation2 + $0x83] sm:$0xff]  ;;  %v1939_v58 = vld [vmem:[#allocation2 + $0x15] sm:$0xff]  ;;  %v14479_v0 = vpack.i.bf16 %v1913_v54, %v1912_v55 }
 0x124   : > { %v12258_v20 = vpack.i.bf16 %v975_v15, %v974_v14  ;;  %v14450_v33 = vld [vmem:[#allocation2 + $0x84] sm:$0xff]  ;;  %v1955_v1 = vld [vmem:[#allocation2 + $0x10] sm:$0xff] }
 0x125   : > { %12239 = vrot.lane.b32.xlu0 %v14421_v12, %s14104_s1  ;;  %v14458_v35 = vpack.i.bf16 %v14450_v33, %v14448_v32  ;;  %v1023_v39 = vld [vmem:[#allocation2 + $0xa3] sm:$0xff]  ;;  %v1971_v6 = vld [vmem:[#allocation2 + $0x12] sm:$0xff] }
 0x126   : > { %v12283_v45 = vpack.i.bf16 %v1024_v38, %v1023_v39  ;;  %v1938_v57 = vld [vmem:[#allocation2 + $0x5] sm:$0xff]  ;;  %v1987_v15 = vld [vmem:[#allocation2 + $0x14] sm:$0xff] }
 0x127   : > { %12249 = vrot.lane.b32.xlu1 %v14429_v16, %s14104_s1  ;;  %v1956_v4 = vld [vmem:[#allocation2 + $0x20] sm:$0xff]  ;;  %v1957_v23 = vld [vmem:[#allocation2 + $0x30] sm:$0xff] }
 0x128   : > { %v14483_v10 = vld [vmem:[#allocation2 + $0x22] sm:$0xff]  ;;  %v12333_v14 = vpack.i.bf16 %v1956_v4, %v1955_v1  ;;  %v1943_v27 = vld [vmem:[#allocation2 + $0x55] sm:$0xff] }
 0x129   : > { %12244 = vrot.lane.b32.xlu0 %v14403_v3, %s14104_s1  ;;  %v14487_v17 = vld [vmem:[#allocation2 + $0x24] sm:$0xff]  ;;  %v1959_v34 = vld [vmem:[#allocation2 + $0x50] sm:$0xff] }
 0x12a   : > { %v12343_v18 = vpack.i.bf16 %v14487_v17, %v1987_v15  ;;  %v1958_v21 = vld [vmem:[#allocation2 + $0x40] sm:$0xff]  ;;  %v1945_v38 = vld [vmem:[#allocation2 + $0x75] sm:$0xff] }
 0x12b   : > { %12259 = vrot.lane.b32.xlu1 %v12258_v20, %s14104_s1  ;;  %v12353_v24 = vpack.i.bf16 %v1958_v21, %v1957_v23  ;;  %v1942_v25 = vld [vmem:[#allocation2 + $0x45] sm:$0xff]  ;;  %v1961_v39 = vld [vmem:[#allocation2 + $0x70] sm:$0xff] }
 0x12c   : > { %v14501_v29 = vpack.i.bf16 %v1943_v27, %v1942_v25  ;;  %v1962_v40 = vld [vmem:[#allocation2 + $0x80] sm:$0xff]  ;;  %v2005_v44 = vld [vmem:[#allocation2 + $0x36] sm:$0xff] }
 0x12d   : > { %12254 = vrot.lane.b32.xlu0 %v12253_v28, %s14104_s1  ;;  %v1960_v28 = vld [vmem:[#allocation2 + $0x60] sm:$0xff]  ;;  %v14517_v41 = vpack.i.bf16 %v1962_v40, %v1961_v39  ;;  %v2026_v48 = vld [vmem:[#allocation2 + $0x91] sm:$0xff] }
 0x12e   : > { %v14505_v37 = vpack.i.bf16 %v1960_v28, %v1959_v34  ;;  %v2033_v49 = vld [vmem:[#allocation2 + $0x85] sm:$0xff]  ;;  %v2009_v52 = vld [vmem:[#allocation2 + $0x76] sm:$0xff] }
 0x12f   : > { %12269 = vrot.lane.b32.xlu1 %v14446_v31, %s14104_s1  ;;  %v2010_v54 = vld [vmem:[#allocation2 + $0x86] sm:$0xff]  ;;  %v2049_v4 = vld [vmem:[#allocation2 + $0x90] sm:$0xff] }
 0x130   : > { %v2074_v1 = vld [vmem:[#allocation2 + $0xa6] sm:$0xff]  ;;  %v2051_v25 = vld [vmem:[#allocation2 + $0x31] sm:$0xff] }
 0x131   : > { %12264 = vrot.lane.b32.xlu0 %v14414_v9, %s14104_s1  ;;  %v2054_v21 = vld [vmem:[#allocation2 + $0x61] sm:$0xff] }
 0x133   : > { %12279 = vrot.lane.b32.xlu1 %v14458_v35, %s14104_s1 }
 0x135   : > { %12274 = vrot.lane.b32.xlu0 %v12258_v20, %s14104_s1  ;;  %v1941_v20 = vld [vmem:[#allocation2 + $0x35] sm:$0xff] }
 0x137   : > { %12289 = vrot.lane.b32.xlu1 %v12288_v42, %s14104_s1  ;;  %v2003_v42 = vld [vmem:[#allocation2 + $0x16] sm:$0xff] }
 0x139   : > { %12284 = vrot.lane.b32.xlu0 %v12283_v45, %s14104_s1  ;;  %v2008_v45 = vld [vmem:[#allocation2 + $0x66] sm:$0xff] }
 0x13b   : > { %12299 = vrot.lane.b32.xlu1 %v12298_v46, %s14104_s1  ;;  %v2007_v46 = vld [vmem:[#allocation2 + $0x56] sm:$0xff] }
 0x13d   : > { %12294 = vrot.lane.b32.xlu0 %v12293_v47, %s14104_s1  ;;  %v2025_v47 = vld [vmem:[#allocation2 + $0x81] sm:$0xff] }
 0x13e   : > { %v14539_v51 = vpack.i.bf16 %v2026_v48, %v2025_v47  ;;  %v13531_v47 = vld [vmem:[#allocation5 + $0x110] sm:$0xff]  }
 0x13f   : > { %12309 = vrot.lane.b32.xlu1 %v12308_v50, %s14104_s1 }
 0x141   : > { %12304 = vrot.lane.b32.xlu0 %v14408_v5, %s14104_s1  ;;  %v12338_v5 = vpack.i.bf16 %v1939_v58, %v1938_v57  ;;  %v14549_v57 = vpack.i.bf16 %v2010_v54, %v2009_v52  ;;  %v2073_v58 = vld [vmem:[#allocation2 + $0x96] sm:$0xff] }
 0x143   : > { %12319 = vrot.lane.b32.xlu1 %v14473_v53, %s14104_s1 }
 0x145   : > { %12314 = vrot.lane.b32.xlu0 %v14403_v3, %s14104_s1  ;;  %v12348_v3 = vpack.i.bf16 %v14483_v10, %v1971_v6 }
 0x147   : > { %12329 = vrot.lane.b32.xlu1 %v14479_v0, %s14104_s1 }
 0x149   : > { %12324 = vrot.lane.b32.xlu0 %v14414_v9, %s14104_s1  ;;  %v12358_v9 = vpack.i.bf16 %v1941_v20, %v1940_v19  ;;  %v2053_v20 = vld [vmem:[#allocation2 + $0x51] sm:$0xff] }
 0x14b   : > { %12339 = vrot.lane.b32.xlu1 %v12338_v5, %s14104_s1  ;;  %v2050_v5 = vld [vmem:[#allocation2 + $0xa0] sm:$0xff] }
 0x14c   : > { %v14567_v19 = vpack.i.bf16 %v2050_v5, %v2049_v4  ;;  %v2056_v4 = vld [vmem:[#allocation2 + $0x81] sm:$0xff] }
 0x14d   : > { %12334 = vrot.lane.b32.xlu0 %v12333_v14, %s14104_s1  ;;  %v14563_v14 = vpack.i.bf16 %v2074_v1, %v2073_v58 }
 0x14f   : > { %12349 = vrot.lane.b32.xlu1 %v12348_v3, %s14104_s1 }
 0x151   : > { %12344 = vrot.lane.b32.xlu0 %v12343_v18, %s14104_s1 }
 0x153   : > { %12359 = vrot.lane.b32.xlu1 %v12358_v9, %s14104_s1 }
 0x155   : > { %12354 = vrot.lane.b32.xlu0 %v12353_v24, %s14104_s1 }
 0x157   : > { %12369 = vrot.lane.b32.xlu1 %v14396_v63, %s14104_s1  ;;  %v1944_v63 = vld [vmem:[#allocation2 + $0x65] sm:$0xff] }
 0x159   : > { %12364 = vrot.lane.b32.xlu0 %v14429_v16, %s14104_s1  ;;  %v14513_v16 = vpack.i.bf16 %v1945_v38, %v1944_v63  ;;  %v2052_v63 = vld [vmem:[#allocation2 + $0x41] sm:$0xff] }
 0x15b   : > { %12379 = vrot.lane.b32.xlu1 %v14501_v29, %s14104_s1 }
 0x15d   : > { %12374 = vrot.lane.b32.xlu0 %v14505_v37, %s14104_s1 }
 0x15f   : > { %12389 = vrot.lane.b32.xlu1 %v14383_v59, %s14104_s1  ;;  %v12418_v59 = vpack.i.bf16 %v2004_v43, %v2003_v42 }
 0x161   : > { %12384 = vrot.lane.b32.xlu0 %v14446_v31, %s14104_s1  ;;  %v2006_v31 = vld [vmem:[#allocation2 + $0x46] sm:$0xff] }
 0x163   : > { %12394 = vrot.lane.b32.xlu1 %v14513_v16, %s14104_s1 }
 0x165   : > { %12399 = vrot.lane.b32.xlu0 %v14517_v41, %s14104_s1 }
 0x167   : > { %12414 = vrot.lane.b32.xlu1 %v14421_v12, %s14104_s1  ;;  %v12433_v12 = vpack.i.bf16 %v2006_v31, %v2005_v44 }
 0x169   : > { %12404 = vrot.lane.b32.xlu0 %v14458_v35, %s14104_s1  ;;  %v14533_v35 = vpack.i.bf16 %v2008_v45, %v2007_v46  ;;  %v14849_v45 = vld [vmem:[#allocation2 + $0x56] sm:$0xff] }
 0x16b   : > { %12419 = vrot.lane.b32.xlu1 %v12418_v59, %s14104_s1 }
 0x16d   : > { %12409 = vrot.lane.b32.xlu0 %v12308_v50, %s14104_s1  ;;  %v2034_v50 = vld [vmem:[#allocation2 + $0x95] sm:$0xff] }
 0x16e   : > { %v14545_v55 = vpack.i.bf16 %v2034_v50, %v2033_v49 }
 0x16f   : > { %12429 = vrot.lane.b32.xlu1 %v14473_v53, %s14104_s1 }
 0x171   : > { %12424 = vrot.lane.b32.xlu0 %v12358_v9, %s14104_s1 }
 0x173   : > { %12439 = vrot.lane.b32.xlu1 %v14501_v29, %s14104_s1 }
 0x175   : > { %12434 = vrot.lane.b32.xlu0 %v12433_v12, %s14104_s1 }
 0x177   : > { %12449 = vrot.lane.b32.xlu1 %v14533_v35, %s14104_s1 }
 0x179   : > { %12444 = vrot.lane.b32.xlu0 %v14479_v0, %s14104_s1 }
 0x17b   : > { %12459 = vrot.lane.b32.xlu1 %v14539_v51, %s14104_s1 }
 0x17d   : > { %12454 = vrot.lane.b32.xlu0 %v14513_v16, %s14104_s1 }
 0x17f   : > { %12469 = vrot.lane.b32.xlu1 %v14545_v55, %s14104_s1 }
 0x181   : > { %12464 = vrot.lane.b32.xlu0 %v14549_v57, %s14104_s1 }
 0x183   : > { %12479 = vrot.lane.b32.xlu1 %v12433_v12, %s14104_s1 }
 0x185   : > { %12474 = vrot.lane.b32.xlu0 %v12353_v24, %s14104_s1 }
 0x187   : > { %12489 = vrot.lane.b32.xlu1 %v14533_v35, %s14104_s1 }
 0x189   : > { %12484 = vrot.lane.b32.xlu0 %v14505_v37, %s14104_s1 }
 0x18b   : > { %12499 = vrot.lane.b32.xlu1 %v14549_v57, %s14104_s1 }
 0x18d   : > { %v12225_v6 = vpop.permute.xlu1 %12224  ;;  %12494 = vrot.lane.b32.xlu0 %v14517_v41, %s14104_s1 }
 0x18e   : > { %v12227_v15 = vunpack.i.h.bf16 %v12225_v6  ;;  %v12226_v3 = vunpack.i.l.bf16 %v12225_v6 }
 0x18f   : > { %12509 = vrot.lane.b32.xlu1 %v14563_v14, %s14104_s1  ;;  %v12215_v18 = vpop.permute.xlu0 %12214 }
 0x190   : > { %v12217_v9 = vunpack.i.h.bf16 %v12215_v18  ;;  %v12216_v23 = vunpack.i.l.bf16 %v12215_v18  ;;  %v14572_v27 = vsel %vm890_vm2, %v2053_v20, %v12226_v3  ;;  %v14575_v28 = vsel %vm890_vm2, %v2054_v21, %v12227_v15  ;;  %v2089_v20 = vld [vmem:[#allocation2 + $0xa1] sm:$0xff]  ;;  %v2090_v21 = vld [vmem:[#allocation2 + $0xb1] sm:$0xff] }
 0x191   : > { %v12230_v24 = vpop.permute.xlu1 %12229  ;;  %12504 = vrot.lane.b32.xlu0 %v14567_v19, %s14104_s1  ;;  %18232 = vst [vmem:[#allocation12_spill] sm:$0xff] %v14572_v27  ;;  %18233 = vst [vmem:[#allocation13_spill] sm:$0xff] %v14575_v28  ;;  %v1172_v44 = vsel %vm890_vm2, %v14441_v30, %v12227_v15 }
 0x192   : > { %v1169_v34 = vsel %vm890_vm2, %v14487_v17, %v12216_v23  ;;  %v1170_v38 = vsel %vm890_vm2, %v14423_v13, %v12217_v9  ;;  %v14584_v42 = vsel %vm890_vm2, %v2051_v25, %v12216_v23  ;;  %v14587_v43 = vsel %vm890_vm2, %v2052_v63, %v12217_v9  ;;  %v2098_v25 = vld [vmem:[#allocation2 + $0xb5] sm:$0xff] }
 0x193   : > { %12519 = vrot.lane.b32.xlu1 %v14505_v37, %s14104_s1  ;;  %v12220_v39 = vpop.permute.xlu0 %12219  ;;  %v1194_v40 = vpack.c.bf16 %v1170_v38, %v1169_v34  ;;  %18234 = vst [vmem:[#allocation14_spill] sm:$0xff] %v14584_v42  ;;  %18235 = vst [vmem:[#allocation15_spill] sm:$0xff] %v14587_v43  ;;  %v1171_v13 = vsel %vm890_vm2, %v14416_v11, %v12226_v3  ;;  %v12232_v49 = vunpack.i.h.bf16 %v12230_v24  ;;  %v12231_v50 = vunpack.i.l.bf16 %v12230_v24  ;;  %v2097_v24 = vld [vmem:[#allocation2 + $0xa5] sm:$0xff] }
 0x194   : > { %v12222_v31 = vunpack.i.h.bf16 %v12220_v39  ;;  %v12221_v17 = vunpack.i.l.bf16 %v12220_v39  ;;  %v1199_v48 = vpack.c.bf16 %v1172_v44, %v1171_v13 }
 0x195   : > { %v14595_v37 = vpop.permute.xlu1 %12234  ;;  %1545 = vmatprep.mubr.bf16.mxu1 %v1194_v40  ;;  %12514 = vrot.lane.b32.xlu0 %v14473_v53, %s14104_s1  ;;  %v1163_v18 = vsel %vm890_vm2, %v14387_v61, %v12231_v50  ;;  %v14664_v50 = vpack.i.bf16 %v2098_v25, %v2097_v24 }
 0x196   : > { %v1161_v12 = vsel %vm890_vm2, %v14483_v10, %v12221_v17  ;;  %v1162_v46 = vsel %vm890_vm2, %v14385_v60, %v12222_v31  ;;  %v14612_v10 = vld [vmem:[#allocation5 + $0x108] sm:$0xff]   ;;  %v2055_v60 = vld [vmem:[#allocation2 + $0x71] sm:$0xff] }
 0x197   : > { %12529 = vrot.lane.b32.xlu1 %v14479_v0, %s14104_s1  ;;  %v12240_v11 = vpop.permute.xlu0 %12239  ;;  %v14607_v30 = vpack.c.bf16 %v1162_v46, %v1161_v12  ;;  %v14661_v46 = vld [vmem:[#allocation2 + $0x62] sm:$0xff] }
 0x198   : > { %v12242_v53 = vunpack.i.h.bf16 %v12240_v11  ;;  %v12241_v52 = vunpack.i.l.bf16 %v12240_v11  ;;  %v2057_v11 = vld [vmem:[#allocation2 + $0x91] sm:$0xff] }
 0x199   : > { %v12250_v54 = vpop.permute.xlu1 %12249  ;;  %12524 = vrot.lane.b32.xlu0 %v14501_v29, %s14104_s1  ;;  %1546 = vmatmul.mubr.bf16.vlgmr.msra.gmra.mxu1 %v14607_v30 }
 0x19a   : > { %v12252_v58 = vunpack.i.h.bf16 %v12250_v54  ;;  %v12251_v1 = vunpack.i.l.bf16 %v12250_v54  ;;  %1553 = vmatprep.mubr.bf16.mxu1 %v1199_v48  ;;  %12053 = vmatpush3.bf16.msra.mxu1 %v14433_v22  ;;  %v14618_v6 = vsel %vm890_vm2, %v2055_v60, %v12241_v52  ;;  %v14621_v29 = vsel %vm890_vm2, %v2056_v4, %v12242_v53  ;;  %v2058_v48 = vld [vmem:[#allocation2 + $0xa1] sm:$0xff] }
 0x19b   : > { %12539 = vrot.lane.b32.xlu1 %v14513_v16, %s14104_s1  ;;  %v12245_v5 = vpop.permute.xlu0 %12244  ;;  %12054 = vmatprep.subr.bf16.mxu1 %v13531_v47  ;;  %18236 = vst [vmem:[#allocation16_spill] sm:$0xff] %v14618_v6  ;;  %18237 = vst [vmem:[#allocation17_spill] sm:$0xff] %v14621_v29  ;;  %v1164_v22 = vsel %vm890_vm2, %v14379_v56, %v12232_v49  ;;  %v1173_v16 = vsel %vm890_vm2, %v14437_v26, %v12241_v52  ;;  %v1981_v6 = vld [vmem:[#allocation2 + $0x33] sm:$0xff] }
 0x19c   : > { %v12247_v15 = vunpack.i.h.bf16 %v12245_v5  ;;  %v12246_v3 = vunpack.i.l.bf16 %v12245_v5  ;;  %v1174_v23 = vsel %vm890_vm2, %v14448_v32, %v12242_v53  ;;  %v1178_v38 = vsel %vm890_vm2, %v14389_v62, %v12252_v58  ;;  %v2114_v62 = vld [vmem:[#allocation2 + $0xb0] sm:$0xff] }
 0x19d   : > { %v14627_v9 = vpop.permute.xlu1 %12259  ;;  %12534 = vrot.lane.b32.xlu0 %v14517_v41, %s14104_s1  ;;  %v1177_v63 = vsel %vm890_vm2, %v14398_v2, %v12251_v1  ;;  %v12237_v32 = vunpack.i.h.bf16 %v14595_v37  ;;  %v14648_v40 = vpack.c.bf16 %v1164_v22, %v1163_v18  ;;  %v12236_v2 = vunpack.i.l.bf16 %v14595_v37  ;;  %v994_v22 = vld [vmem:[#allocation2 + $0x53] sm:$0xff] }
 0x19e   : > { %v1185_v41 = vsel %vm890_vm2, %v14387_v61, %v12246_v3  ;;  %v1186_v26 = vsel %vm890_vm2, %v14379_v56, %v12247_v15  ;;  %12055 = vmatpush3.bf16.msra.mxu1 %v13531_v47  ;;  %v1204_v13 = vpack.c.bf16 %v1174_v23, %v1173_v16  ;;  %v2115_v56 = vld [vmem:[#allocation2 + $0xc0] sm:$0xff]  ;;  %v14654_v44 = vpack.c.bf16 %v1178_v38, %v1177_v63  ;;  %v14697_v23 = vld [vmem:[#allocation2 + $0x52] sm:$0xff] }
 0x19f   : > { %12544 = vrot.lane.b32.xlu1 %v14567_v19, %s14104_s1  ;;  %v12255_v39 = vpop.permute.xlu0 %12254  ;;  %v14650_v31 = vpack.c.bf16 %v1186_v26, %v1185_v41  ;;  %12056 = vmatprep.subr.bf16.mxu1 %v14612_v10  ;;  %v14659_v19 = vpack.i.bf16 %v2090_v21, %v2089_v20  ;;  %v13533_v47 = vld [vmem:[#allocation5 + $0x100] sm:$0xff]   ;;  %v12563_v52 = vpack.i.bf16 %v2115_v56, %v2114_v62  ;;  %v12261_v63 = vunpack.i.l.bf16 %v14627_v9  ;;  %v1032_v21 = vld [vmem:[#allocation2 + $0xb4] sm:$0xff] }
 0x1a0   : > { %v12257_v61 = vunpack.i.h.bf16 %v12255_v39  ;;  %v12256_v17 = vunpack.i.l.bf16 %v12255_v39  ;;  %v1165_v4 = vsel %vm890_vm2, %v14661_v46, %v12236_v2  ;;  %v1166_v5 = vsel %vm890_vm2, %v14410_v8, %v12237_v32  ;;  %v14686_v20 = vld [vmem:[#allocation2 + $0x63] sm:$0xff]  ;;  %v13534_v39 = vld [vmem:[#allocation7 + $0x78] sm:$0xff]  }
 0x1a1   : > { %18238 = vst [vmem:[#allocation18_spill] sm:$0xff] %v14650_v31  ;;  %v12270_v12 = vpop.permute.xlu1 %12269  ;;  %12549 = vrot.lane.b32.xlu0 %v14539_v51, %s14104_s1  ;;  %1554 = vmatmul.mubr.bf16.gmra.mxu1 %v14648_v40  ;;  %v14702_v25 = vpack.c.bf16 %v1166_v5, %v1165_v4  ;;  %v14707_v32 = vld [vmem:[#allocation2 + $0x64] sm:$0xff] }
 0x1a2   : > { %v12272_v37 = vunpack.i.h.bf16 %v12270_v12  ;;  %v12271_v49 = vunpack.i.l.bf16 %v12270_v12  ;;  %1610 = vmatprep.mubr.bf16.mxu0 %v14650_v31  ;;  %1561 = vmatprep.mubr.bf16.mxu1 %v1204_v13  ;;  %v14670_v54 = vsel %vm890_vm2, %v2057_v11, %v12256_v17  ;;  %v14673_v60 = vsel %vm890_vm2, %v2058_v48, %v12257_v61  ;;  %v2140_v12 = vld [vmem:[#allocation2 + $0x54] sm:$0xff] }
 0x1a3   : > { %1611 = vmatmul.mubr.bf16.vlgmr.msra.gmra.mxu0 %v14654_v44  ;;  %12559 = vrot.lane.b32.xlu1 %v14659_v19, %s14104_s1  ;;  %v12265_v53 = vpop.permute.xlu0 %12264  ;;  %18239 = vst [vmem:[#allocation19_spill] sm:$0xff] %v14670_v54  ;;  %18240 = vst [vmem:[#allocation20_spill] sm:$0xff] %v14673_v60  ;;  %v1175_v3 = vsel %vm890_vm2, %v14450_v33, %v12256_v17  ;;  %v1176_v18 = vsel %vm890_vm2, %v14460_v36, %v12257_v61  ;;  %v12262_v36 = vunpack.i.h.bf16 %v14627_v9  ;;  %v1013_v17 = vld [vmem:[#allocation2 + $0x82] sm:$0xff]  ;;  %v14717_v9 = vld [vmem:[#allocation2 + $0x92] sm:$0xff] }
 0x1a4   : > { %v12267_v58 = vunpack.i.h.bf16 %v12265_v53  ;;  %v12266_v1 = vunpack.i.l.bf16 %v12265_v53  ;;  %12057 = vmatpush3.bf16.msra.mxu1 %v14612_v10  ;;  %v1180_v33 = vsel %vm890_vm2, %v14686_v20, %v12272_v37  ;;  %v1209_v26 = vpack.c.bf16 %v1176_v18, %v1175_v3  ;;  %v14728_v53 = vld [vmem:[#allocation2 + $0x73] sm:$0xff] }
 0x1a5   : > { %v12280_v15 = vpop.permute.xlu1 %12279  ;;  %12554 = vrot.lane.b32.xlu0 %v14545_v55, %s14104_s1  ;;  %12058 = vmatprep.subr.bf16.mxu1 %v13533_v47  ;;  %v1179_v55 = vsel %vm890_vm2, %v994_v22, %v12271_v49  ;;  %v12578_v61 = vpack.i.bf16 %v14661_v46, %v14697_v23  ;;  %v12573_v37 = vpack.i.bf16 %v14707_v32, %v2140_v12  ;;  %v14735_v3 = vld [vmem:[#allocation2 + $0x72] sm:$0xff] }
 0x1a6   : > { %v1187_v10 = vsel %vm890_vm2, %v14661_v46, %v12266_v1  ;;  %v1188_v16 = vsel %vm890_vm2, %v14410_v8, %v12267_v58  ;;  %v14713_v2 = vpack.c.bf16 %v1180_v33, %v1179_v55  ;;  %v12282_v13 = vunpack.i.h.bf16 %v12280_v15  ;;  %v1025_v58 = vld [vmem:[#allocation2 + $0x44] sm:$0xff]  ;;  %v14737_v18 = vld [vmem:[#allocation2 + $0xb2] sm:$0xff] }
 0x1a7   : > { %12569 = vrot.lane.b32.xlu1 %v14664_v50, %s14104_s1  ;;  %v12275_v24 = vpop.permute.xlu0 %12274  ;;  %v14704_v38 = vpack.c.bf16 %v1188_v16, %v1187_v10  ;;  %v12281_v56 = vunpack.i.l.bf16 %v12280_v15  ;;  %v1167_v5 = vsel %vm890_vm2, %v1013_v17, %v12261_v63  ;;  %v1168_v15 = vsel %vm890_vm2, %v14717_v9, %v12262_v36  ;;  %v1015_v55 = vld [vmem:[#allocation2 + $0xa2] sm:$0xff]  ;;  %v14938_v60 = vld [vmem:[#allocation2 + $0x90] sm:$0xff] }
 0x1a8   : > { %v12277_v8 = vunpack.i.h.bf16 %v12275_v24  ;;  %v12276_v41 = vunpack.i.l.bf16 %v12275_v24  ;;  %12059 = vmatpush3.bf16.msra.mxu1 %v13533_v47  ;;  %v14749_v36 = vpack.c.bf16 %v1168_v15, %v1167_v5  ;;  %v2145_v5 = vld [vmem:[#allocation2 + $0xa4] sm:$0xff] }
 0x1a9   : > { %18241 = vst [vmem:[#allocation21_spill] sm:$0xff] %v14704_v38  ;;  %v14709_v62 = vpop.permute.xlu1 %12289  ;;  %12564 = vrot.lane.b32.xlu0 %v12563_v52, %s14104_s1  ;;  %1562 = vmatmul.mubr.bf16.gmra.mxu1 %v14702_v25  ;;  %v14730_v52 = vld [vmem:[#allocation2 + $0x83] sm:$0xff]  ;;  %v1181_v10 = vsel %vm890_vm2, %v14728_v53, %v12281_v56 }
 0x1aa   : > { %1618 = vmatprep.mubr.bf16.mxu0 %v14704_v38  ;;  %1569 = vmatprep.mubr.bf16.mxu1 %v1209_v26  ;;  %v1189_v47 = vsel %vm890_vm2, %v1013_v17, %v12276_v41  ;;  %v1190_v11 = vsel %vm890_vm2, %v14717_v9, %v12277_v8  ;;  %v1182_v16 = vsel %vm890_vm2, %v14730_v52, %v12282_v13  ;;  %v2143_v41 = vld [vmem:[#allocation2 + $0x84] sm:$0xff]  ;;  %v12291_v13 = vunpack.i.l.bf16 %v14709_v62 }
 0x1ab   : > { %1619 = vmatmul.mubr.bf16.gmra.mxu0 %v14713_v2  ;;  %12579 = vrot.lane.b32.xlu1 %v12578_v61, %s14104_s1  ;;  %v12285_v48 = vpop.permute.xlu0 %12284  ;;  %v14726_v49 = vpack.c.bf16 %v1190_v11, %v1189_v47  ;;  %v1197_v8 = vpack.c.bf16 %v2140_v12, %v1025_v58  ;;  %v12292_v61 = vunpack.i.h.bf16 %v14709_v62  ;;  %v2142_v12 = vld [vmem:[#allocation2 + $0x74] sm:$0xff]  ;;  %v1914_v15 = vld [vmem:[#allocation2 + $0x2] sm:$0xff] }
 0x1ac   : > { %v12287_v1 = vunpack.i.h.bf16 %v12285_v48  ;;  %v12286_v4 = vunpack.i.l.bf16 %v12285_v48  ;;  %11120 = vmatprep.subr.bf16.mxu1 %v13534_v39  ;;  %v14759_v39 = vpack.c.bf16 %v1182_v16, %v1181_v10  ;;  %v12593_v47 = vpack.i.bf16 %v2143_v41, %v2142_v12  ;;  %v14772_v11 = vld [vmem:[#allocation2 + $0x93] sm:$0xff]  ;;  %v13562_v38 = vld [vmem:[#allocation7 + $0x148] sm:$0xff]  }
 0x1ad   : > { %18242 = vst [vmem:[#allocation22_spill] sm:$0xff] %v14726_v49  ;;  %v14739_v22 = vpop.permute.xlu1 %12299  ;;  %12574 = vrot.lane.b32.xlu0 %v12573_v37, %s14104_s1  ;;  %1626 = vmatprep.mubr.bf16.mxu0 %v14726_v49  ;;  %v13535_v62 = vld [vmem:[#allocation7 + $0x38] sm:$0xff]   ;;  %v1183_v58 = vsel %vm890_vm2, %v14772_v11, %v12291_v13  ;;  %v12618_v13 = vpack.i.bf16 %v1015_v55, %v14717_v9  ;;  %v2131_v9 = vld [vmem:[#allocation2 + $0xc2] sm:$0xff] }
 0x1ae   : > { %v1191_v24 = vsel %vm890_vm2, %v1015_v55, %v12286_v4  ;;  %v1192_v63 = vsel %vm890_vm2, %v14737_v18, %v12287_v1  ;;  %v1030_v37 = vld [vmem:[#allocation2 + $0x94] sm:$0xff] }
 0x1af   : > { %12589 = vrot.lane.b32.xlu1 %v14533_v35, %s14104_s1  ;;  %v12295_v33 = vpop.permute.xlu0 %12294  ;;  %v12598_v35 = vpack.i.bf16 %v1013_v17, %v14735_v3  ;;  %v14765_v56 = vpack.c.bf16 %v1192_v63, %v1191_v24  ;;  %v14774_v17 = vld [vmem:[#allocation2 + $0xa3] sm:$0xff]  ;;  %v13536_v4 = vld [vmem:[#allocation7 + $0x70] sm:$0xff]  }
 0x1b0   : > { %v1184_v1 = vsel %vm890_vm2, %v14774_v17, %v12292_v61  ;;  %v1915_v10 = vld [vmem:[#allocation2 + $0x12] sm:$0xff]  ;;  %v12297_v16 = vunpack.i.h.bf16 %v12295_v33  ;;  %v12296_v24 = vunpack.i.l.bf16 %v12295_v33 }
 0x1b1   : > { %v14754_v26 = vpop.permute.xlu1 %12309  ;;  %12584 = vrot.lane.b32.xlu0 %v14479_v0, %s14104_s1  ;;  %1570 = vmatmul.mubr.bf16.gmra.mxu1 %v14749_v36  ;;  %18243 = vst [vmem:[#allocation23_spill] sm:$0xff] %v14765_v56  ;;  %v14793_v61 = vpack.c.bf16 %v1184_v1, %v1183_v58  ;;  %v13537_v33 = vld [vmem:[#allocation7 + $0x30] sm:$0xff]   ;;  %v13539_v58 = vld [vmem:[#allocation7 + $0x28] sm:$0xff]  }
 0x1b2   : > { %12060 = vmatprep.mubr.msk.bf16.mxu1 %vm890_vm2, %v1197_v8  ;;  %v1202_v8 = vpack.c.bf16 %v2142_v12, %v14707_v32  ;;  %v2486_v12 = vsel %vm890_vm2, %v1915_v10, %v12297_v16  ;;  %v2147_v1 = vld [vmem:[#allocation2 + $0xc4] sm:$0xff] }
 0x1b3   : > { %1627 = vmatmul.mubr.bf16.gmra.mxu0 %v14759_v39  ;;  %12599 = vrot.lane.b32.xlu1 %v12598_v35, %s14104_s1  ;;  %v14769_v0 = vpop.permute.xlu0 %12304  ;;  %v1207_v35 = vpack.c.bf16 %v1030_v37, %v2143_v41  ;;  %v12608_v41 = vpack.i.bf16 %v2145_v5, %v1030_v37  ;;  %v13541_v10 = vld [vmem:[#allocation7 + $0x20] sm:$0xff]  }
 0x1b4   : > { %1634 = vmatprep.mubr.bf16.mxu0 %v14765_v56  ;;  %v12306_v59 = vunpack.i.l.bf16 %v14769_v0 }
 0x1b5   : > { %v14776_v48 = vpop.permute.xlu1 %12319  ;;  %12594 = vrot.lane.b32.xlu0 %v12593_v47, %s14104_s1 }
 0x1b6   : > { %v12322_v49 = vunpack.i.h.bf16 %v14776_v48 }
 0x1b7   : > { %12614 = vrot.lane.b32.xlu1 %v14549_v57, %s14104_s1  ;;  %v14785_v63 = vpop.permute.xlu0 %12314  ;;  %v13538_v57 = vld [vmem:[#allocation7 + $0x68] sm:$0xff]  }
 0x1b9   : > { %v14788_v47 = vpop.permute.xlu1 %12329  ;;  %12604 = vrot.lane.b32.xlu0 %v14539_v51, %s14104_s1  ;;  %12061 = vmatmul.mubr.msk.bf16.vlgmr.msra.gmra.mxu1 %vm890_vm2, %v1202_v8  ;;  %v2485_v51 = vsel %vm890_vm2, %v1914_v15, %v12296_v24  ;;  %v2162_v8 = vld [vmem:[#allocation2 + $0xb6] sm:$0xff]  ;;  %v1212_v15 = vpack.c.bf16 %v1032_v21, %v2145_v5  ;;  %v12633_v24 = vpack.i.bf16 %v2147_v1, %v1032_v21  ;;  %v2205_v1 = vld [vmem:[#allocation2 + $0x65] sm:$0xff] }
 0x1ba   : > { %11121 = vmatpush3.bf16.msra.mxu1 %v13535_v62  ;;  %12064 = vmatprep.mubr.msk.bf16.mxu1 %vm890_vm2, %v1207_v35  ;;  %v13540_v62 = vld [vmem:[#allocation7 + $0x60] sm:$0xff]   ;;  %v13543_v5 = vld [vmem:[#allocation7 + $0x18] sm:$0xff]  }
 0x1bb   : > { %1635 = vmatmul.mubr.bf16.gmra.mxu0 %v14793_v61  ;;  %12619 = vrot.lane.b32.xlu1 %v12618_v13, %s14104_s1  ;;  %v14799_v32 = vpop.permute.xlu0 %12324  ;;  %v2163_v35 = vld [vmem:[#allocation2 + $0xc6] sm:$0xff]  ;;  %v3030_v13 = vpack.c.bf16 %v2486_v12, %v2485_v51  ;;  %v2180_v51 = vld [vmem:[#allocation2 + $0xd1] sm:$0xff] }
 0x1bc   : > { %11122 = vmatprep.subr.bf16.mxu1 %v13536_v4  ;;  %v12638_v4 = vpack.i.bf16 %v2131_v9, %v14737_v18  ;;  %v12648_v18 = vpack.i.bf16 %v2163_v35, %v2162_v8  ;;  %v13544_v12 = vld [vmem:[#allocation7 + $0x50] sm:$0xff]   ;;  %v2207_v35 = vld [vmem:[#allocation2 + $0x85] sm:$0xff] }
 0x1bd   : > { %v14803_v55 = vpop.permute.xlu1 %12339  ;;  %12609 = vrot.lane.b32.xlu0 %v12608_v41, %s14104_s1  ;;  %v2179_v41 = vld [vmem:[#allocation2 + $0xc1] sm:$0xff]  ;;  %v13545_v8 = vld [vmem:[#allocation7 + $0x10] sm:$0xff]  }
 0x1be   : > { %11123 = vmatpush3.bf16.msra.mxu1 %v13537_v33  ;;  %v13542_v33 = vld [vmem:[#allocation7 + $0x58] sm:$0xff]  }
 0x1bf   : > { %12629 = vrot.lane.b32.xlu1 %v14563_v14, %s14104_s1  ;;  %v14808_v37 = vpop.permute.xlu0 %12334  ;;  %11124 = vmatprep.subr.bf16.mxu1 %v13538_v57 }
 0x1c1   : > { %v14811_v16 = vpop.permute.xlu1 %12349  ;;  %12624 = vrot.lane.b32.xlu0 %v14659_v19, %s14104_s1  ;;  %12065 = vmatmul.mubr.msk.bf16.gmra.mxu1 %vm890_vm2, %v1212_v15  ;;  %v12643_v19 = vpack.i.bf16 %v2180_v51, %v2179_v41  ;;  %v1898_v41 = vld [vmem:[#allocation2] sm:$0xff] }
 0x1c2   : > { %11125 = vmatpush3.bf16.msra.mxu1 %v13539_v58  ;;  %4729 = vmatprep.mubr.bf16.mxu1 %v3030_v13  ;;  %v2206_v58 = vld [vmem:[#allocation2 + $0x75] sm:$0xff] }
 0x1c3   : > { %12639 = vrot.lane.b32.xlu1 %v12638_v4, %s14104_s1  ;;  %v14817_v14 = vpop.permute.xlu0 %12344  ;;  %11126 = vmatprep.subr.bf16.mxu1 %v13540_v62  ;;  %v12658_v62 = vpack.i.bf16 %v14728_v53, %v14686_v20  ;;  %v2208_v13 = vld [vmem:[#allocation2 + $0x95] sm:$0xff]  ;;  %v12653_v4 = vpack.i.bf16 %v2206_v58, %v2205_v1  ;;  %v12668_v20 = vpack.i.bf16 %v14772_v11, %v14730_v52 }
 0x1c4   : > { %v12663_v58 = vpack.i.bf16 %v2208_v13, %v2207_v35 }
 0x1c5   : > { %v14819_v57 = vpop.permute.xlu1 %12359  ;;  %12634 = vrot.lane.b32.xlu0 %v12633_v24, %s14104_s1  ;;  %v13547_v24 = vld [vmem:[#allocation7 + $0x8] sm:$0xff]  }
 0x1c6   : > { %11127 = vmatpush3.bf16.msra.mxu1 %v13541_v10  ;;  %v13546_v10 = vld [vmem:[#allocation7 + $0x48] sm:$0xff]  }
 0x1c7   : > { %12649 = vrot.lane.b32.xlu1 %v12648_v18, %s14104_s1  ;;  %v14823_v21 = vpop.permute.xlu0 %12354  ;;  %11128 = vmatprep.subr.bf16.mxu1 %v13542_v33  ;;  %v2194_v33 = vld [vmem:[#allocation2 + $0xb3] sm:$0xff]  ;;  %v13548_v18 = vld [vmem:[#allocation7 + $0x40] sm:$0xff]  }
 0x1c9   : > { %v14825_v9 = vpop.permute.xlu1 %12369  ;;  %12644 = vrot.lane.b32.xlu0 %v12643_v19, %s14104_s1  ;;  %v12301_v19 = vunpack.i.l.bf16 %v14739_v22 }
 0x1ca   : > { %11129 = vmatpush3.bf16.msra.mxu1 %v13543_v5  ;;  %v12302_v5 = vunpack.i.h.bf16 %v14739_v22  ;;  %v12678_v22 = vpack.i.bf16 %v2194_v33, %v14774_v17  ;;  %v13550_v33 = vld [vmem:[#allocation7 + $0x178] sm:$0xff]  }
 0x1cb   : > { %12659 = vrot.lane.b32.xlu1 %v12658_v62, %s14104_s1  ;;  %v14831_v15 = vpop.permute.xlu0 %12364  ;;  %11130 = vmatprep.subr.bf16.mxu1 %v13544_v12  ;;  %v14841_v62 = vld [vmem:[#allocation2 + $0x46] sm:$0xff]  ;;  %v2477_v13 = vsel %vm890_vm2, %v1898_v41, %v12301_v19  ;;  %v12311_v41 = vunpack.i.l.bf16 %v14754_v26 }
 0x1cd   : > { %v14833_v51 = vpop.permute.xlu1 %12379  ;;  %12654 = vrot.lane.b32.xlu0 %v12653_v4, %s14104_s1  ;;  %v12307_v4 = vunpack.i.h.bf16 %v14769_v0 }
 0x1ce   : > { %11131 = vmatpush3.bf16.msra.mxu1 %v13545_v8  ;;  %v1916_v8 = vld [vmem:[#allocation2 + $0x22] sm:$0xff] }
 0x1cf   : > { %12669 = vrot.lane.b32.xlu1 %v12668_v20, %s14104_s1  ;;  %v12375_v12 = vpop.permute.xlu0 %12374  ;;  %11132 = vmatprep.subr.bf16.mxu1 %v13546_v10  ;;  %v13970_v20 = vld [vmem:[#allocation2 + $0x10] sm:$0xff]  ;;  %v13549_v10 = vld [vmem:[#allocation7] sm:$0xff]  }
 0x1d0   : > { %v12377_v1 = vunpack.i.h.bf16 %v12375_v12  ;;  %v12376_v34 = vunpack.i.l.bf16 %v12375_v12  ;;  %v2478_v35 = vsel %vm890_vm2, %v13970_v20, %v12302_v5  ;;  %v1917_v12 = vld [vmem:[#allocation2 + $0x32] sm:$0xff] }
 0x1d1   : > { %v14845_v11 = vpop.permute.xlu1 %12389  ;;  %12664 = vrot.lane.b32.xlu0 %v12663_v58, %s14104_s1  ;;  %v3029_v5 = vpack.c.bf16 %v2478_v35, %v2477_v13  ;;  %v13552_v20 = vld [vmem:[#allocation7 + $0x170] sm:$0xff]   ;;  %v12317_v35 = vunpack.i.h.bf16 %v14785_v63  ;;  %v12316_v13 = vunpack.i.l.bf16 %v14785_v63 }
 0x1d2   : > { %11133 = vmatpush3.bf16.msra.mxu1 %v13547_v24  ;;  %v14855_v0 = vsel %vm890_vm2, %v14841_v62, %v12376_v34  ;;  %v14859_v58 = vsel %vm890_vm2, %v14849_v45, %v12377_v1  ;;  %v13551_v24 = vld [vmem:[#allocation7 + $0x138] sm:$0xff]   ;;  %v2487_v34 = vsel %vm890_vm2, %v1916_v8, %v12306_v59  ;;  %v2488_v1 = vsel %vm890_vm2, %v1917_v12, %v12307_v4  ;;  %v13553_v4 = vld [vmem:[#allocation7 + $0x130] sm:$0xff]   ;;  %v13554_v12 = vld [vmem:[#allocation7 + $0x168] sm:$0xff]  }
 0x1d3   : > { %12679 = vrot.lane.b32.xlu1 %v12678_v22, %s14104_s1  ;;  %v14862_v17 = vpop.permute.xlu0 %12384  ;;  %11134 = vmatprep.subr.bf16.mxu1 %v13548_v18  ;;  %v12312_v18 = vunpack.i.h.bf16 %v14754_v26  ;;  %v3052_v7 = vpack.c.bf16 %v2488_v1, %v2487_v34  ;;  %v1900_v59 = vld [vmem:[#allocation2 + $0x20] sm:$0xff] }
 0x1d4   : > { %v1918_v34 = vld [vmem:[#allocation2 + $0x42] sm:$0xff] }
 0x1d5   : > { %v14866_v19 = vpop.permute.xlu1 %12394  ;;  %12674 = vrot.lane.b32.xlu0 %v14664_v50, %s14104_s1  ;;  %v2489_v63 = vsel %vm890_vm2, %v1918_v34, %v12316_v13 }
 0x1d6   : > { %18244 = vst [vmem:[#allocation24_spill] sm:$0xff] %v14866_v19  ;;  %11135 = vmatpush3.bf16.msra.mxu1 %v13549_v10  ;;  %v1901_v10 = vld [vmem:[#allocation2 + $0x30] sm:$0xff] }
 0x1d7   : > { %v14872_v22 = vpop.permute.xlu0 %12399  ;;  %11200 = vmatprep.subr.bf16.mxu1 %v13550_v33  ;;  %v2479_v33 = vsel %vm890_vm2, %v1900_v59, %v12311_v41  ;;  %v2480_v26 = vsel %vm890_vm2, %v1901_v10, %v12312_v18  ;;  %v12321_v41 = vunpack.i.l.bf16 %v14776_v48  ;;  %v12327_v59 = vunpack.i.h.bf16 %v14799_v32 }
 0x1d8   : > { %v3051_v56 = vpack.c.bf16 %v2480_v26, %v2479_v33  ;;  %v12326_v10 = vunpack.i.l.bf16 %v14799_v32  ;;  %v13558_v33 = vld [vmem:[#allocation7 + $0x158] sm:$0xff]  }
 0x1d9   : > { %4730 = vmatmul.mubr.bf16.vlgmr.msra.gmra.mxu1 %v3029_v5  ;;  %v14878_v50 = vpop.permute.xlu1 %12414  ;;  %v2490_v5 = vsel %vm890_vm2, %v14697_v23, %v12317_v35  ;;  %v13557_v23 = vld [vmem:[#allocation7 + $0x120] sm:$0xff]   ;;  %v2492_v32 = vsel %vm890_vm2, %v14735_v3, %v12327_v59 }
 0x1da   : > { %4737 = vmatprep.mubr.bf16.mxu1 %v3052_v7  ;;  %11201 = vmatpush3.bf16.msra.mxu1 %v13551_v24  ;;  %v13555_v7 = vld [vmem:[#allocation7 + $0x128] sm:$0xff]   ;;  %v3074_v18 = vpack.c.bf16 %v2490_v5, %v2489_v63  ;;  %v12347_v63 = vunpack.i.h.bf16 %v14817_v14  ;;  %v12346_v5 = vunpack.i.l.bf16 %v14817_v14  ;;  %v13561_v14 = vld [vmem:[#allocation7 + $0x110] sm:$0xff]  }
 0x1db   : > { %v14880_v8 = vpop.permute.xlu0 %12404  ;;  %11202 = vmatprep.subr.bf16.mxu1 %v13552_v20  ;;  %v13556_v20 = vld [vmem:[#allocation7 + $0x160] sm:$0xff]  }
 0x1dd   : > { %v14884_v1 = vpop.permute.xlu1 %12419 }
 0x1de   : > { %18245 = vst [vmem:[#allocation25_spill] sm:$0xff] %v14884_v1  ;;  %11203 = vmatpush3.bf16.msra.mxu1 %v13553_v4  ;;  %v1902_v4 = vld [vmem:[#allocation2 + $0x40] sm:$0xff] }
 0x1df   : > { %v14889_v24 = vpop.permute.xlu0 %12409  ;;  %11204 = vmatprep.subr.bf16.mxu1 %v13554_v12  ;;  %v1903_v12 = vld [vmem:[#allocation2 + $0x50] sm:$0xff]  ;;  %v2481_v26 = vsel %vm890_vm2, %v1902_v4, %v12321_v41  ;;  %v1980_v4 = vld [vmem:[#allocation2 + $0x23] sm:$0xff] }
 0x1e0   : > { %18246 = vst [vmem:[#allocation26_spill] sm:$0xff] %v14889_v24  ;;  %v2482_v48 = vsel %vm890_vm2, %v1903_v12, %v12322_v49  ;;  %v13560_v41 = vld [vmem:[#allocation7 + $0x150] sm:$0xff]   ;;  %v12332_v12 = vunpack.i.h.bf16 %v14788_v47 }
 0x1e1   : > { %4738 = vmatmul.mubr.bf16.gmra.mxu1 %v3051_v56  ;;  %v14895_v13 = vpop.permute.xlu1 %12429  ;;  %v2491_v56 = vsel %vm890_vm2, %v14661_v46, %v12326_v10  ;;  %v1979_v49 = vld [vmem:[#allocation2 + $0x13] sm:$0xff]  ;;  %v12331_v46 = vunpack.i.l.bf16 %v14788_v47 }
 0x1e2   : > { %18247 = vst [vmem:[#allocation27_spill] sm:$0xff] %v14895_v13  ;;  %4745 = vmatprep.mubr.bf16.mxu1 %v3074_v18  ;;  %11205 = vmatpush3.bf16.msra.mxu1 %v13555_v7  ;;  %v13559_v7 = vld [vmem:[#allocation7 + $0x118] sm:$0xff]   ;;  %v3073_v18 = vpack.c.bf16 %v2482_v48, %v2481_v26  ;;  %v3096_v10 = vpack.c.bf16 %v2492_v32, %v2491_v56  ;;  %v1905_v48 = vld [vmem:[#allocation2 + $0x70] sm:$0xff]  ;;  %v13624_v32 = vld [vmem:[%s18250_s22 + $0x8] sm:$0xff]  }
 0x1e3   : > { %v14897_v35 = vpop.permute.xlu0 %12424  ;;  %11206 = vmatprep.subr.bf16.mxu1 %v13556_v20  ;;  %v2517_v59 = vsel %vm890_vm2, %v1979_v49, %v12346_v5  ;;  %v2484_v56 = vsel %vm890_vm2, %v1905_v48, %v12332_v12  ;;  %v12351_v5 = vunpack.i.l.bf16 %v14811_v16  ;;  %v14926_v49 = vld [vmem:[#allocation2 + $0x70] sm:$0xff]  ;;  %12068 = vmatprep.subr.bf16.mxu0 %v13624_v32  ;;  %v14936_v48 = vld [vmem:[#allocation2 + $0x80] sm:$0xff] }
 0x1e4   : > { %v13563_v12 = vld [vmem:[#allocation7 + $0x108] sm:$0xff]   ;;  %12069 = vmatpush3.bf16.msra.mxu0 %v13624_v32 }
 0x1e5   : > { %v14901_v34 = vpop.permute.xlu1 %12439  ;;  %v13987_v13 = vld [vmem:[#allocation2 + $0x65] sm:$0xff] }
 0x1e6   : > { %11207 = vmatpush3.bf16.msra.mxu1 %v13557_v23  ;;  %v2518_v23 = vsel %vm890_vm2, %v1980_v4, %v12347_v63  ;;  %v1963_v4 = vld [vmem:[#allocation2 + $0x11] sm:$0xff] }
 0x1e7   : > { %v14909_v20 = vpop.permute.xlu0 %12434  ;;  %11208 = vmatprep.subr.bf16.mxu1 %v13558_v33  ;;  %v1904_v33 = vld [vmem:[#allocation2 + $0x60] sm:$0xff]  ;;  %v2509_v32 = vsel %vm890_vm2, %v1963_v4, %v12351_v5  ;;  %v12371_v5 = vunpack.i.l.bf16 %v14825_v9 }
 0x1e8   : > { %18248 = vst [vmem:[#allocation28_spill] sm:$0xff] %v14909_v20  ;;  %v2483_v47 = vsel %vm890_vm2, %v1904_v33, %v12331_v46 }
 0x1e9   : > { %4746 = vmatmul.mubr.bf16.gmra.mxu1 %v3073_v18  ;;  %v14913_v3 = vpop.permute.xlu1 %12449  ;;  %v3034_v18 = vpack.c.bf16 %v2518_v23, %v2517_v59  ;;  %v3095_v59 = vpack.c.bf16 %v2484_v56, %v2483_v47  ;;  %v13564_v23 = vld [vmem:[#allocation7 + $0x140] sm:$0xff]   ;;  %v13568_v47 = vld [vmem:[#allocation7 + $0x270] sm:$0xff]  }
 0x1ea   : > { %18249 = vst [vmem:[#allocation29_spill] sm:$0xff] %v14913_v3  ;;  %4753 = vmatprep.mubr.bf16.mxu1 %v3096_v10  ;;  %11209 = vmatpush3.bf16.msra.mxu1 %v13559_v7  ;;  %v12352_v7 = vunpack.i.h.bf16 %v14811_v16  ;;  %v1964_v10 = vld [vmem:[#allocation2 + $0x21] sm:$0xff] }
 0x1eb   : > { %v12445_v26 = vpop.permute.xlu0 %12444  ;;  %11210 = vmatprep.subr.bf16.mxu1 %v13560_v41  ;;  %v14924_v41 = vld [vmem:[#allocation2 + $0x60] sm:$0xff] }
 0x1ec   : > { %v12447_v31 = vunpack.i.h.bf16 %v12445_v26  ;;  %v12446_v54 = vunpack.i.l.bf16 %v12445_v26  ;;  %v2510_v56 = vsel %vm890_vm2, %v1964_v10, %v12352_v7  ;;  %v12372_v7 = vunpack.i.h.bf16 %v14825_v9 }
 0x1ed   : > { %v12460_v63 = vpop.permute.xlu1 %12459  ;;  %v3033_v29 = vpack.c.bf16 %v2510_v56, %v2509_v32  ;;  %v12386_v10 = vunpack.i.l.bf16 %v14862_v17  ;;  %v1983_v56 = vld [vmem:[#allocation2 + $0x53] sm:$0xff]  ;;  %v1984_v32 = vld [vmem:[#allocation2 + $0x63] sm:$0xff] }
 0x1ee   : > { %v12462_v26 = vunpack.i.h.bf16 %v12460_v63  ;;  %v12461_v46 = vunpack.i.l.bf16 %v12460_v63  ;;  %11211 = vmatpush3.bf16.msra.mxu1 %v13561_v14  ;;  %v14930_v33 = vsel %vm890_vm2, %v14924_v41, %v12446_v54  ;;  %v14934_v16 = vsel %vm890_vm2, %v14926_v49, %v12447_v31  ;;  %v13565_v14 = vld [vmem:[#allocation7 + $0x100] sm:$0xff]  }
 0x1ef   : > { %18251 = vst [vmem:[#allocation30_spill] sm:$0xff] %v14930_v33  ;;  %18252 = vst [vmem:[#allocation31_spill] sm:$0xff] %v14934_v16  ;;  %11212 = vmatprep.subr.bf16.mxu1 %v13562_v38  ;;  %v12367_v31 = vunpack.i.h.bf16 %v14831_v15  ;;  %v12366_v38 = vunpack.i.l.bf16 %v14831_v15  ;;  %v13985_v33 = vld [vmem:[#allocation2 + $0xa4] sm:$0xff]  ;;  %v13986_v16 = vld [vmem:[#allocation2 + $0xb4] sm:$0xff] }
 0x1f0   : > { %v14944_v63 = vsel %vm890_vm2, %v14936_v48, %v12461_v46  ;;  %v14948_v54 = vsel %vm890_vm2, %v14938_v60, %v12462_v26  ;;  %v13566_v46 = vld [vmem:[#allocation7 + $0x278] sm:$0xff]   ;;  %v1982_v26 = vld [vmem:[#allocation2 + $0x43] sm:$0xff] }
 0x1f1   : > { %18253 = vst [vmem:[#allocation32_spill] sm:$0xff] %v14944_v63  ;;  %18254 = vst [vmem:[#allocation33_spill] sm:$0xff] %v14948_v54  ;;  %4754 = vmatmul.mubr.bf16.gmra.mxu1 %v3095_v59  ;;  %v2519_v27 = vsel %vm890_vm2, %v1981_v6, %v12366_v38  ;;  %v2520_v15 = vsel %vm890_vm2, %v1982_v26, %v12367_v31  ;;  %v13567_v59 = vld [vmem:[#allocation7 + $0x238] sm:$0xff]   ;;  %v1965_v6 = vld [vmem:[#allocation2 + $0x31] sm:$0xff]  ;;  %v12391_v26 = vunpack.i.l.bf16 %v14845_v11 }
 0x1f2   : > { %11213 = vmatpush3.bf16.msra.mxu1 %v13563_v12  ;;  %4859 = vmatprep.mubr.bf16.mxu1 %v3034_v18  ;;  %v3056_v4 = vpack.c.bf16 %v2520_v15, %v2519_v27  ;;  %v12387_v18 = vunpack.i.h.bf16 %v14862_v17  ;;  %v13569_v12 = vld [vmem:[#allocation7 + $0x230] sm:$0xff]   ;;  %v2511_v31 = vsel %vm890_vm2, %v1965_v6, %v12371_v5  ;;  %v2521_v27 = vsel %vm890_vm2, %v1983_v56, %v12386_v10  ;;  %v13571_v17 = vld [vmem:[#allocation7 + $0x228] sm:$0xff]   ;;  %v13573_v5 = vld [vmem:[#allocation7 + $0x220] sm:$0xff]  }
 0x1f3   : > { %11214 = vmatprep.subr.bf16.mxu1 %v13564_v23  ;;  %v1966_v23 = vld [vmem:[#allocation2 + $0x41] sm:$0xff]  ;;  %v12417_v56 = vunpack.i.h.bf16 %v14878_v50 }
 0x1f4   : > { %v2512_v38 = vsel %vm890_vm2, %v1966_v23, %v12372_v7  ;;  %v2522_v9 = vsel %vm890_vm2, %v1984_v32, %v12387_v18  ;;  %v12406_v7 = vunpack.i.l.bf16 %v14880_v8  ;;  %v1967_v18 = vld [vmem:[#allocation2 + $0x51] sm:$0xff]  ;;  %v1968_v10 = vld [vmem:[#allocation2 + $0x61] sm:$0xff]  ;;  %v12416_v32 = vunpack.i.l.bf16 %v14878_v50 }
 0x1f5   : > { %v3078_v15 = vpack.c.bf16 %v2522_v9, %v2521_v27  ;;  %v2513_v6 = vsel %vm890_vm2, %v1967_v18, %v12391_v26  ;;  %v14981_v27 = vpop.permute.xlu0 %12454  ;;  %v13971_v50 = vld [vmem:[#allocation2 + $0x24] sm:$0xff]  ;;  %v13633_v18 = vld [vmem:[#allocation7 + $0xf8] sm:$0xff]  }
 0x1f6   : > { %11215 = vmatpush3.bf16.msra.mxu1 %v13565_v14  ;;  %v13570_v14 = vld [vmem:[#allocation7 + $0x268] sm:$0xff]  }
 0x1f7   : > { %11280 = vmatprep.subr.bf16.mxu1 %v13566_v46  ;;  %v13572_v46 = vld [vmem:[#allocation7 + $0x260] sm:$0xff]  }
 0x1f8   : > { %v2211_v63 = vld [vmem:[#allocation2 + $0xc5] sm:$0xff] }
 0x1f9   : > { %4860 = vmatmul.mubr.bf16.vlgmr.msra.gmra.mxu1 %v3033_v29  ;;  %v3055_v29 = vpack.c.bf16 %v2512_v38, %v2511_v31  ;;  %v13576_v38 = vld [vmem:[#allocation7 + $0x250] sm:$0xff]  }
 0x1fa   : > { %4867 = vmatprep.mubr.bf16.mxu1 %v3056_v4  ;;  %11281 = vmatpush3.bf16.msra.mxu1 %v13567_v59  ;;  %v12407_v59 = vunpack.i.h.bf16 %v14880_v8  ;;  %v13631_v4 = vld [vmem:[%s18250_s22] sm:$0xff]   ;;  %v2523_v8 = vsel %vm890_vm2, %v14728_v53, %v12406_v7  ;;  %v12426_v53 = vunpack.i.l.bf16 %v14897_v35  ;;  %v13972_v7 = vld [vmem:[#allocation2 + $0x34] sm:$0xff] }
 0x1fb   : > { %11282 = vmatprep.subr.bf16.mxu1 %v13568_v47  ;;  %v12392_v47 = vunpack.i.h.bf16 %v14845_v11  ;;  %12070 = vmatprep.subr.bf16.mxu0 %v13631_v4 }
 0x1fc   : > { %v2524_v23 = vsel %vm890_vm2, %v14730_v52, %v12407_v59  ;;  %12071 = vmatpush3.bf16.msra.mxu0 %v13631_v4  ;;  %v13577_v52 = vld [vmem:[#allocation7 + $0x210] sm:$0xff]   ;;  %v2669_v59 = vsel %vm890_vm2, %v13971_v50, %v12426_v53  ;;  %v14989_v4 = vpop.permute.xlu0 %12464  ;;  %v12470_v53 = vpop.permute.xlu1 %12469  ;;  %v13586_v50 = vld [vmem:[#allocation7 + $0x368] sm:$0xff]  }
 0x1fd   : > { %v2514_v11 = vsel %vm890_vm2, %v1968_v10, %v12392_v47  ;;  %v3100_v9 = vpack.c.bf16 %v2524_v23, %v2523_v8  ;;  %v13578_v47 = vld [vmem:[#allocation7 + $0x248] sm:$0xff]   ;;  %18255 = vst [vmem:[#allocation34_spill] sm:$0xff] %v14989_v4  ;;  %11160 = vmatprep.subr.bf16.mxu0 %v13633_v18  ;;  %v12442_v8 = vunpack.i.h.bf16 %v14901_v34  ;;  %v12441_v23 = vunpack.i.l.bf16 %v14901_v34 }
 0x1fe   : > { %11283 = vmatpush3.bf16.msra.mxu1 %v13569_v12  ;;  %v13574_v12 = vld [vmem:[#allocation7 + $0x258] sm:$0xff]   ;;  %v3077_v31 = vpack.c.bf16 %v2514_v11, %v2513_v6  ;;  %v18256_v11 = vmov 0.0  }
 0x1ff   : > { %11284 = vmatprep.subr.bf16.mxu1 %v13570_v14  ;;  %v13575_v14 = vld [vmem:[#allocation7 + $0x218] sm:$0xff]   ;;  %930 = vst.msk [vmem:[#allocation3] sm:$0xff] %vm929_vm4, %v18256_v11  ;;  %933 = vst.msk [vmem:[#allocation3 + $0x10] sm:$0xff] %vm929_vm4, %v18256_v11 }
 0x200   : > { %935 = vst.msk [vmem:[#allocation3 + $0x20] sm:$0xff] %vm929_vm4, %v18256_v11  ;;  %937 = vst.msk [vmem:[#allocation3 + $0x30] sm:$0xff] %vm929_vm4, %v18256_v11 }
 0x201   : > { %4868 = vmatmul.mubr.bf16.gmra.mxu1 %v3055_v29  ;;  %v1969_v29 = vld [vmem:[#allocation2 + $0x71] sm:$0xff]  ;;  %939 = vst.msk [vmem:[#allocation3 + $0x40] sm:$0xff] %vm929_vm4, %v18256_v11  ;;  %941 = vst.msk [vmem:[#allocation3 + $0x50] sm:$0xff] %vm929_vm4, %v18256_v11 }
 0x202   : > { %4875 = vmatprep.mubr.bf16.mxu1 %v3078_v15  ;;  %11285 = vmatpush3.bf16.msra.mxu1 %v13571_v17  ;;  %v12427_v17 = vunpack.i.h.bf16 %v14897_v35  ;;  %v2515_v26 = vsel %vm890_vm2, %v1969_v29, %v12416_v32  ;;  %v13579_v35 = vld [vmem:[#allocation7 + $0x208] sm:$0xff]   ;;  %943 = vst.msk [vmem:[#allocation3 + $0x60] sm:$0xff] %vm929_vm4, %v18256_v11  ;;  %945 = vst.msk [vmem:[#allocation3 + $0x70] sm:$0xff] %vm929_vm4, %v18256_v11  ;;  %v13584_v29 = vld [vmem:[#allocation7 + $0x370] sm:$0xff]  }
 0x203   : > { %11286 = vmatprep.subr.bf16.mxu1 %v13572_v46  ;;  %v1970_v46 = vld [vmem:[#allocation2 + $0x81] sm:$0xff]  ;;  %947 = vst.msk [vmem:[#allocation3 + $0x80] sm:$0xff] %vm929_vm4, %v18256_v11  ;;  %949 = vst.msk [vmem:[#allocation3 + $0x90] sm:$0xff] %vm929_vm4, %v18256_v11 }
 0x204   : > { %v2516_v15 = vsel %vm890_vm2, %v1970_v46, %v12417_v56  ;;  %951 = vst.msk [vmem:[#allocation3 + $0xa0] sm:$0xff] %vm929_vm4, %v18256_v11  ;;  %953 = vst.msk [vmem:[#allocation3 + $0xb0] sm:$0xff] %vm929_vm4, %v18256_v11  ;;  %v13973_v56 = vld [vmem:[#allocation2 + $0x44] sm:$0xff]  ;;  %v12457_v46 = vunpack.i.h.bf16 %v14981_v27 }
 0x205   : > { %v3099_v10 = vpack.c.bf16 %v2516_v15, %v2515_v26  ;;  %955 = vst.msk [vmem:[#allocation3 + $0xc0] sm:$0xff] %vm929_vm4, %v18256_v11  ;;  %957 = vst.msk [vmem:[#allocation3 + $0xd0] sm:$0xff] %vm929_vm4, %v18256_v11  ;;  %v2671_v32 = vsel %vm890_vm2, %v13973_v56, %v12441_v23  ;;  %v13585_v15 = vld [vmem:[#allocation7 + $0x330] sm:$0xff]   ;;  %v13977_v56 = vld [vmem:[#allocation2 + $0x84] sm:$0xff] }
 0x206   : > { %11287 = vmatpush3.bf16.msra.mxu1 %v13573_v5  ;;  %v2670_v5 = vsel %vm890_vm2, %v13972_v7, %v12427_v17  ;;  %v13975_v7 = vld [vmem:[#allocation2 + $0x64] sm:$0xff] }
 0x207   : > { %11288 = vmatprep.subr.bf16.mxu1 %v13574_v12  ;;  %v13580_v12 = vld [vmem:[#allocation7 + $0x240] sm:$0xff]   ;;  %v3037_v6 = vpack.c.bf16 %v2670_v5, %v2669_v59  ;;  %v12480_v59 = vpop.permute.xlu1 %12479 }
 0x209   : > { %4876 = vmatmul.mubr.bf16.gmra.mxu1 %v3077_v31  ;;  %v13582_v31 = vld [vmem:[#allocation7 + $0x378] sm:$0xff]  }
 0x20a   : > { %4883 = vmatprep.mubr.bf16.mxu1 %v3100_v9  ;;  %11289 = vmatpush3.bf16.msra.mxu1 %v13575_v14  ;;  %v13581_v14 = vld [vmem:[#allocation7 + $0x200] sm:$0xff]   ;;  %v13974_v9 = vld [vmem:[#allocation2 + $0x54] sm:$0xff] }
 0x20b   : > { %11290 = vmatprep.subr.bf16.mxu1 %v13576_v38  ;;  %v15021_v38 = vpop.permute.xlu0 %12474  ;;  %v2672_v17 = vsel %vm890_vm2, %v13974_v9, %v12442_v8  ;;  %v12471_v8 = vunpack.i.l.bf16 %v12470_v53  ;;  %v12490_v23 = vpop.permute.xlu1 %12489  ;;  %v13978_v9 = vld [vmem:[#allocation2 + $0x94] sm:$0xff] }
 0x20c   : > { %18257 = vst [vmem:[#allocation35_spill] sm:$0xff] %v15021_v38  ;;  %v3059_v34 = vpack.c.bf16 %v2672_v17, %v2671_v32 }
 0x20d   : > { %v2675_v32 = vsel %vm890_vm2, %v13977_v56, %v12471_v8  ;;  %v12491_v8 = vunpack.i.l.bf16 %v12490_v23  ;;  %v13598_v56 = vld [vmem:[#allocation7 + $0x478] sm:$0xff]  }
 0x20e   : > { %11291 = vmatpush3.bf16.msra.mxu1 %v13577_v52  ;;  %v13583_v52 = vld [vmem:[#allocation7 + $0x338] sm:$0xff]  }
 0x20f   : > { %11292 = vmatprep.subr.bf16.mxu1 %v13578_v47  ;;  %v12456_v47 = vunpack.i.l.bf16 %v14981_v27  ;;  %v15028_v26 = vpop.permute.xlu0 %12484  ;;  %v13588_v27 = vld [vmem:[#allocation7 + $0x360] sm:$0xff]  }
 0x210   : > { %18258 = vst [vmem:[#allocation36_spill] sm:$0xff] %v15028_v26 }
 0x211   : > { %4884 = vmatmul.mubr.bf16.gmra.mxu1 %v3099_v10  ;;  %v2673_v5 = vsel %vm890_vm2, %v13975_v7, %v12456_v47  ;;  %v13587_v10 = vld [vmem:[#allocation7 + $0x328] sm:$0xff]   ;;  %v12481_v47 = vunpack.i.l.bf16 %v12480_v59 }
 0x212   : > { %11293 = vmatpush3.bf16.msra.mxu1 %v13579_v35  ;;  %4989 = vmatprep.mubr.bf16.mxu1 %v3037_v6  ;;  %v13976_v35 = vld [vmem:[#allocation2 + $0x74] sm:$0xff]  ;;  %v12472_v6 = vunpack.i.h.bf16 %v12470_v53 }
 0x213   : > { %11294 = vmatprep.subr.bf16.mxu1 %v13580_v12  ;;  %v2674_v18 = vsel %vm890_vm2, %v13976_v35, %v12457_v46  ;;  %v15032_v12 = vpop.permute.xlu0 %12494  ;;  %v13592_v53 = vld [vmem:[#allocation7 + $0x350] sm:$0xff]   ;;  %v12482_v46 = vunpack.i.h.bf16 %v12480_v59  ;;  %v2060_v35 = vld [vmem:[#allocation2 + $0x45] sm:$0xff] }
 0x214   : > { %18259 = vst [vmem:[#allocation37_spill] sm:$0xff] %v15032_v12  ;;  %v2676_v17 = vsel %vm890_vm2, %v13978_v9, %v12472_v6  ;;  %v13596_v59 = vld [vmem:[#allocation7 + $0x340] sm:$0xff]   ;;  %v15049_v9 = vld [vmem:[#allocation2 + $0x55] sm:$0xff] }
 0x215   : > { %v13623_v12 = vld [vmem:[#allocation7 + $0x518] sm:$0xff]  }
 0x216   : > { %11295 = vmatpush3.bf16.msra.mxu1 %v13581_v14  ;;  %v13589_v14 = vld [vmem:[#allocation7 + $0x320] sm:$0xff]  }
 0x217   : > { %11360 = vmatprep.subr.bf16.mxu1 %v13582_v31  ;;  %v13590_v31 = vld [vmem:[#allocation7 + $0x358] sm:$0xff]  }
 0x219   : > { %4990 = vmatmul.mubr.bf16.vlgmr.msra.gmra.mxu1 %v14607_v30  ;;  %v3081_v30 = vpack.c.bf16 %v2674_v18, %v2673_v5  ;;  %v2059_v5 = vld [vmem:[#allocation2 + $0x35] sm:$0xff] }
 0x21a   : > { %4997 = vmatprep.mubr.bf16.mxu1 %v3059_v34  ;;  %11361 = vmatpush3.bf16.msra.mxu1 %v13583_v52  ;;  %v15037_v52 = vpop.permute.xlu0 %12504  ;;  %v12500_v34 = vpop.permute.xlu1 %12499  ;;  %v2693_v18 = vsel %vm890_vm2, %v2059_v5, %v12481_v47  ;;  %v13601_v5 = vld [vmem:[#allocation7 + $0x430] sm:$0xff]  }
 0x21b   : > { %11362 = vmatprep.subr.bf16.mxu1 %v13584_v29  ;;  %18260 = vst [vmem:[#allocation38_spill] sm:$0xff] %v15037_v52  ;;  %v13591_v29 = vld [vmem:[#allocation7 + $0x318] sm:$0xff]   ;;  %v12502_v47 = vunpack.i.h.bf16 %v12500_v34 }
 0x21c   : > { %v15159_v52 = vld [vmem:[#allocation2 + $0xb6] sm:$0xff] }
 0x21e   : > { %11363 = vmatpush3.bf16.msra.mxu1 %v13585_v15  ;;  %v13593_v15 = vld [vmem:[#allocation7 + $0x310] sm:$0xff]   ;;  %v15040_v7 = vpop.permute.xlu0 %12514 }
 0x21f   : > { %11364 = vmatprep.subr.bf16.mxu1 %v13586_v50  ;;  %v13594_v50 = vld [vmem:[#allocation7 + $0x348] sm:$0xff]   ;;  %18261 = vst [vmem:[#allocation39_spill] sm:$0xff] %v15040_v7 }
 0x220   : > { %v15157_v7 = vld [vmem:[#allocation2 + $0xa6] sm:$0xff] }
 0x221   : > { %4998 = vmatmul.mubr.bf16.gmra.mxu1 %v14648_v40  ;;  %v3103_v40 = vpack.c.bf16 %v2676_v17, %v2675_v32  ;;  %v2062_v17 = vld [vmem:[#allocation2 + $0x65] sm:$0xff] }
 0x222   : > { %5005 = vmatprep.mubr.bf16.mxu1 %v3081_v30  ;;  %11365 = vmatpush3.bf16.msra.mxu1 %v13587_v10  ;;  %v2694_v10 = vsel %vm890_vm2, %v2060_v35, %v12482_v46  ;;  %v13595_v30 = vld [vmem:[#allocation7 + $0x308] sm:$0xff]  }
 0x223   : > { %11366 = vmatprep.subr.bf16.mxu1 %v13588_v27  ;;  %v12510_v27 = vpop.permute.xlu1 %12509  ;;  %v3040_v6 = vpack.c.bf16 %v2694_v10, %v2693_v18  ;;  %v13602_v35 = vld [vmem:[#allocation7 + $0x468] sm:$0xff]   ;;  %v15059_v18 = vld [vmem:[#allocation2 + $0x75] sm:$0xff] }
 0x224   : > { %v15061_v10 = vld [vmem:[#allocation2 + $0x85] sm:$0xff] }
 0x226   : > { %11367 = vmatpush3.bf16.msra.mxu1 %v13589_v14  ;;  %v15045_v14 = vpop.permute.xlu0 %12524 }
 0x227   : > { %11368 = vmatprep.subr.bf16.mxu1 %v13590_v31  ;;  %v13597_v31 = vld [vmem:[#allocation7 + $0x300] sm:$0xff]   ;;  %v15047_v32 = vpop.permute.xlu1 %12519 }
 0x229   : > { %5006 = vmatmul.mubr.bf16.gmra.mxu1 %v14702_v25  ;;  %v12492_v25 = vunpack.i.h.bf16 %v12490_v23  ;;  %v13599_v23 = vld [vmem:[#allocation7 + $0x438] sm:$0xff]  }
 0x22a   : > { %5013 = vmatprep.mubr.bf16.mxu1 %v3103_v40  ;;  %11369 = vmatpush3.bf16.msra.mxu1 %v13591_v29  ;;  %v2695_v29 = vsel %vm890_vm2, %v15049_v9, %v12491_v8  ;;  %v15054_v40 = vpop.permute.xlu0 %12534 }
 0x22b   : > { %11370 = vmatprep.subr.bf16.mxu1 %v13592_v53  ;;  %v2696_v53 = vsel %vm890_vm2, %v2062_v17, %v12492_v25  ;;  %v13605_v17 = vld [vmem:[#allocation7 + $0x420] sm:$0xff]  }
 0x22c   : > { %v3062_v46 = vpack.c.bf16 %v2696_v53, %v2695_v29  ;;  %v13606_v29 = vld [vmem:[#allocation7 + $0x458] sm:$0xff]  }
 0x22e   : > { %11371 = vmatpush3.bf16.msra.mxu1 %v13593_v15  ;;  %v12501_v15 = vunpack.i.l.bf16 %v12500_v34  ;;  %v15067_v34 = vpop.permute.xlu0 %12549 }
 0x22f   : > { %11372 = vmatprep.subr.bf16.mxu1 %v13594_v50  ;;  %v15057_v50 = vpop.permute.xlu1 %12529  ;;  %18263 = vst [vmem:[#allocation41_spill] sm:$0xff] %v15067_v34 }
 0x230   : > { %18262 = vst [vmem:[#allocation40_spill] sm:$0xff] %v15057_v50 }
 0x231   : > { %5014 = vmatmul.mubr.bf16.gmra.mxu1 %v14749_v36  ;;  %v13600_v36 = vld [vmem:[#allocation7 + $0x470] sm:$0xff]  }
 0x232   : > { %11373 = vmatpush3.bf16.msra.mxu1 %v13595_v30  ;;  %5119 = vmatprep.mubr.bf16.mxu1 %v3040_v6  ;;  %v2697_v30 = vsel %vm890_vm2, %v15059_v18, %v12501_v15  ;;  %v13604_v6 = vld [vmem:[#allocation7 + $0x460] sm:$0xff]   ;;  %v15072_v53 = vpop.permute.xlu0 %12554 }
 0x233   : > { %11374 = vmatprep.subr.bf16.mxu1 %v13596_v59  ;;  %v2698_v59 = vsel %vm890_vm2, %v15061_v10, %v12502_v47  ;;  %v15069_v25 = vpop.permute.xlu1 %12539 }
 0x234   : > { %v3084_v8 = vpack.c.bf16 %v2698_v59, %v2697_v30  ;;  %v12521_v30 = vunpack.i.l.bf16 %v15047_v32 }
 0x236   : > { %11375 = vmatpush3.bf16.msra.mxu1 %v13597_v31  ;;  %v12512_v31 = vunpack.i.h.bf16 %v12510_v27  ;;  %v15084_v59 = vpop.permute.xlu0 %12564 }
 0x237   : > { %11440 = vmatprep.subr.bf16.mxu1 %v13598_v56  ;;  %v12511_v56 = vunpack.i.l.bf16 %v12510_v27  ;;  %v15079_v15 = vpop.permute.xlu1 %12544  ;;  %v13607_v27 = vld [vmem:[#allocation7 + $0x418] sm:$0xff]   ;;  %v12567_v34 = vunpack.i.h.bf16 %v15084_v59 }
 0x239   : > { %5120 = vmatmul.mubr.bf16.vlgmr.msra.gmra.mxu1 %v14654_v44  ;;  %v13603_v44 = vld [vmem:[#allocation7 + $0x428] sm:$0xff]  }
 0x23a   : > { %5127 = vmatprep.mubr.bf16.mxu1 %v3062_v46  ;;  %11441 = vmatpush3.bf16.msra.mxu1 %v13599_v23  ;;  %v15074_v23 = vld [vmem:[#allocation2 + $0xa5] sm:$0xff] }
 0x23b   : > { %11442 = vmatprep.subr.bf16.mxu1 %v13600_v36  ;;  %v2065_v36 = vld [vmem:[#allocation2 + $0x95] sm:$0xff]  ;;  %v2700_v47 = vsel %vm890_vm2, %v15074_v23, %v12512_v31  ;;  %v2973_v31 = vsel %vm890_vm2, %v14841_v62, %v12521_v30 }
 0x23c   : > { %v2699_v46 = vsel %vm890_vm2, %v2065_v36, %v12511_v56  ;;  %v15094_v36 = vpop.permute.xlu0 %12574 }
 0x23d   : > { %18265 = vst [vmem:[#allocation43_spill] sm:$0xff] %v15094_v36  ;;  %v12556_v36 = vunpack.i.l.bf16 %v15072_v53 }
 0x23e   : > { %11443 = vmatpush3.bf16.msra.mxu1 %v13601_v5  ;;  %v3106_v5 = vpack.c.bf16 %v2700_v47, %v2699_v46  ;;  %v12537_v47 = vunpack.i.h.bf16 %v15054_v40 }
 0x23f   : > { %11444 = vmatprep.subr.bf16.mxu1 %v13602_v35  ;;  %v12522_v35 = vunpack.i.h.bf16 %v15047_v32  ;;  %v13612_v32 = vld [vmem:[#allocation7 + $0x440] sm:$0xff]  }
 0x241   : > { %5128 = vmatmul.mubr.bf16.gmra.mxu1 %v14713_v2  ;;  %v13608_v2 = vld [vmem:[#allocation7 + $0x450] sm:$0xff]   ;;  %v2974_v56 = vsel %vm890_vm2, %v14849_v45, %v12522_v35  ;;  %v13613_v45 = vld [vmem:[#allocation7 + $0x400] sm:$0xff]  }
 0x242   : > { %5135 = vmatprep.mubr.bf16.mxu1 %v3084_v8  ;;  %11445 = vmatpush3.bf16.msra.mxu1 %v13603_v44  ;;  %v13609_v44 = vld [vmem:[#allocation7 + $0x410] sm:$0xff]   ;;  %v15086_v8 = vpop.permute.xlu1 %12559  ;;  %v3043_v46 = vpack.c.bf16 %v2974_v56, %v2973_v31  ;;  %v15111_v31 = vpop.permute.xlu0 %12584  ;;  %v13615_v56 = vld [vmem:[#allocation7 + $0x538] sm:$0xff]  }
 0x243   : > { %11446 = vmatprep.subr.bf16.mxu1 %v13604_v6  ;;  %v13610_v6 = vld [vmem:[#allocation7 + $0x448] sm:$0xff]   ;;  %18264 = vst [vmem:[#allocation42_spill] sm:$0xff] %v15086_v8 }
 0x246   : > { %11447 = vmatpush3.bf16.msra.mxu1 %v13605_v17  ;;  %v13611_v17 = vld [vmem:[#allocation7 + $0x408] sm:$0xff]   ;;  %v15099_v62 = vpop.permute.xlu1 %12569 }
 0x247   : > { %11448 = vmatprep.subr.bf16.mxu1 %v13606_v29  ;;  %v12526_v29 = vunpack.i.l.bf16 %v15045_v14  ;;  %v12572_v28 = vunpack.i.h.bf16 %v15099_v62  ;;  %v12571_v26 = vunpack.i.l.bf16 %v15099_v62  ;;  %v13626_v62 = vld [vmem:[#allocation7 + $0x510] sm:$0xff]  }
 0x249   : > { %5136 = vmatmul.mubr.bf16.gmra.mxu1 %v14759_v39  ;;  %v12527_v39 = vunpack.i.h.bf16 %v15045_v14  ;;  %v13980_v14 = vld [vmem:[#allocation2 + $0x44] sm:$0xff]  ;;  %v2972_v3 = vsel %vm890_vm2, %v13986_v16, %v12572_v28 }
 0x24a   : > { %5143 = vmatprep.mubr.bf16.mxu1 %v3106_v5  ;;  %11449 = vmatpush3.bf16.msra.mxu1 %v13607_v27  ;;  %v12536_v27 = vunpack.i.l.bf16 %v15054_v40  ;;  %v13979_v5 = vld [vmem:[#allocation2 + $0x54] sm:$0xff]  ;;  %v2965_v30 = vsel %vm890_vm2, %v13980_v14, %v12526_v29  ;;  %v12541_v29 = vunpack.i.l.bf16 %v15069_v25  ;;  %v12547_v14 = vunpack.i.h.bf16 %v15079_v15  ;;  %v13629_v16 = vld [vmem:[#allocation7 + $0x540] sm:$0xff]  }
 0x24b   : > { %11450 = vmatprep.subr.bf16.mxu1 %v13608_v2  ;;  %v13614_v2 = vld [vmem:[#allocation7 + $0x578] sm:$0xff]   ;;  %v2966_v35 = vsel %vm890_vm2, %v13979_v5, %v12527_v39  ;;  %v12542_v39 = vunpack.i.h.bf16 %v15069_v25  ;;  %v13981_v25 = vld [vmem:[#allocation2 + $0x64] sm:$0xff] }
 0x24c   : > { %v2967_v11 = vsel %vm890_vm2, %v13981_v25, %v12541_v29 }
 0x24e   : > { %11451 = vmatpush3.bf16.msra.mxu1 %v13609_v44  ;;  %v15103_v44 = vld [vmem:[#allocation2 + $0x66] sm:$0xff] }
 0x24f   : > { %11452 = vmatprep.subr.bf16.mxu1 %v13610_v6  ;;  %v15105_v6 = vld [vmem:[#allocation2 + $0x76] sm:$0xff] }
 0x250   : > { %v2976_v40 = vsel %vm890_vm2, %v15105_v6, %v12537_v47 }
 0x251   : > { %5144 = vmatmul.mubr.bf16.gmra.mxu1 %v14793_v61  ;;  %v2975_v61 = vsel %vm890_vm2, %v15103_v44, %v12536_v27  ;;  %v12546_v27 = vunpack.i.l.bf16 %v15079_v15  ;;  %v15129_v15 = vld [vmem:[#allocation2 + $0x96] sm:$0xff] }
 0x252   : > { %11453 = vmatpush3.bf16.msra.mxu1 %v13611_v17  ;;  %5249 = vmatprep.mubr.bf16.mxu1 %v3043_v46  ;;  %v3042_v17 = vpack.c.bf16 %v2966_v35, %v2965_v30  ;;  %v15115_v46 = vpop.permute.xlu1 %12579  ;;  %v3065_v5 = vpack.c.bf16 %v2976_v40, %v2975_v61  ;;  %v15123_v30 = vpop.permute.xlu0 %12594  ;;  %v13982_v61 = vld [vmem:[#allocation2 + $0x74] sm:$0xff] }
 0x253   : > { %11454 = vmatprep.subr.bf16.mxu1 %v13612_v32  ;;  %v13616_v32 = vld [vmem:[#allocation7 + $0x570] sm:$0xff]   ;;  %18266 = vst [vmem:[#allocation44_spill] sm:$0xff] %v15115_v46  ;;  %18267 = vst [vmem:[#allocation45_spill] sm:$0xff] %v15123_v30  ;;  %v2968_v40 = vsel %vm890_vm2, %v13982_v61, %v12542_v39  ;;  %v15127_v46 = vld [vmem:[#allocation2 + $0x86] sm:$0xff]  ;;  %v12557_v61 = vunpack.i.h.bf16 %v15072_v53 }
 0x254   : > { %v13619_v30 = vld [vmem:[#allocation7 + $0x528] sm:$0xff]   ;;  %v3064_v25 = vpack.c.bf16 %v2968_v40, %v2967_v11  ;;  %v13620_v39 = vld [vmem:[#allocation7 + $0x560] sm:$0xff]   ;;  %v13622_v40 = vld [vmem:[#allocation7 + $0x558] sm:$0xff]  }
 0x256   : > { %11455 = vmatpush3.bf16.msra.mxu1 %v13613_v45  ;;  %v13617_v45 = vld [vmem:[#allocation7 + $0x530] sm:$0xff]   ;;  %v15147_v50 = vpop.permute.xlu0 %12604 }
 0x257   : > { %11520 = vmatprep.subr.bf16.mxu1 %v13614_v2  ;;  %v13618_v2 = vld [vmem:[#allocation7 + $0x568] sm:$0xff]  }
 0x259   : > { %5250 = vmatmul.mubr.bf16.vlgmr.msra.gmra.mxu1 %v3042_v17  ;;  %v15119_v47 = vpop.f32.mrf.mxu1 }
 0x25a   : > { %5257 = vmatprep.mubr.bf16.mxu1 %v3065_v5  ;;  %11521 = vmatpush3.bf16.msra.mxu1 %v13615_v56  ;;  %v2977_v56 = vsel %vm890_vm2, %v15127_v46, %v12546_v27  ;;  %v15137_v5 = vpop.permute.xlu1 %12589  ;;  %v12566_v27 = vunpack.i.l.bf16 %v15084_v59  ;;  %v13984_v59 = vld [vmem:[#allocation2 + $0x94] sm:$0xff]  ;;  %v15175_v42 = vpop.permute.xlu0 %12609 }
 0x25b   : > { %v15121_v35 = vpop.f32.mrf.mxu1  ;;  %11522 = vmatprep.subr.bf16.mxu1 %v13616_v32  ;;  %v2978_v32 = vsel %vm890_vm2, %v15129_v15, %v12547_v14  ;;  %18269 = vst [vmem:[#allocation47_spill] sm:$0xff] %v15175_v42  ;;  %v2196_v42 = vld [vmem:[#allocation2 + $0xd3] sm:$0xff] }
 0x25c   : > { %v3087_v8 = vpack.c.bf16 %v2978_v32, %v2977_v56  ;;  %v13983_v56 = vld [vmem:[#allocation2 + $0x84] sm:$0xff] }
 0x25d   : > { %v15131_v17 = vpop.f32.mrf.mxu1  ;;  %v2969_v32 = vsel %vm890_vm2, %v13983_v56, %v12556_v36 }
 0x25e   : > { %11523 = vmatpush3.bf16.msra.mxu1 %v13617_v45  ;;  %v13621_v45 = vld [vmem:[#allocation7 + $0x520] sm:$0xff]   ;;  %v15153_v53 = vpop.permute.xlu1 %12599 }
 0x25f   : > { %v15139_v29 = vpop.f32.mrf.mxu1  ;;  %11524 = vmatprep.subr.bf16.mxu1 %v13618_v2  ;;  %18268 = vst [vmem:[#allocation46_spill] sm:$0xff] %v15153_v53  ;;  %v2980_v53 = vsel %vm890_vm2, %v15159_v52, %v12567_v34  ;;  %v12586_v34 = vunpack.i.l.bf16 %v15111_v31 }
 0x261   : > { %5258 = vmatmul.mubr.bf16.gmra.mxu1 %v3064_v25  ;;  %v15145_v14 = vpop.f32.mrf.mxu1  ;;  %v2970_v25 = vsel %vm890_vm2, %v13984_v59, %v12557_v61  ;;  %v13625_v59 = vld [vmem:[#allocation7 + $0x550] sm:$0xff]  }
 0x262   : > { %5265 = vmatprep.mubr.bf16.mxu1 %v3087_v8  ;;  %11525 = vmatpush3.bf16.msra.mxu1 %v13619_v30  ;;  %v3086_v61 = vpack.c.bf16 %v2970_v25, %v2969_v32  ;;  %v2212_v32 = vld [vmem:[#allocation2 + $0xd5] sm:$0xff]  ;;  %v15183_v25 = vpop.permute.xlu1 %12614 }
 0x263   : > { %v15149_v11 = vpop.f32.mrf.mxu0  ;;  %v15151_v2 = vpop.f32.mrf.mxu1  ;;  %11526 = vmatprep.subr.bf16.mxu1 %v13620_v39  ;;  %v2979_v39 = vsel %vm890_vm2, %v15157_v7, %v12566_v27  ;;  %v12587_v27 = vunpack.i.h.bf16 %v15111_v31  ;;  %v12683_v54 = vpack.i.bf16 %v2212_v32, %v2211_v63  ;;  %v13627_v31 = vld [vmem:[#allocation7 + $0x548] sm:$0xff]   ;;  %v3005_v63 = vsel %vm890_vm2, %v14924_v41, %v12586_v34 }
 0x264   : > { %v3109_v43 = vpack.c.bf16 %v2980_v53, %v2979_v39  ;;  %v12591_v32 = vunpack.i.l.bf16 %v15137_v5  ;;  %v12606_v41 = vunpack.i.l.bf16 %v15147_v50 }
 0x265   : > { %v15161_v8 = vpop.f32.mrf.mxu0  ;;  %v15163_v30 = vpop.f32.mrf.mxu1  ;;  %12684 = vrot.lane.b32.xlu0 %v12683_v54, %s14104_s1  ;;  %v12592_v54 = vunpack.i.h.bf16 %v15137_v5  ;;  %v13632_v5 = vld [vmem:[#allocation7 + $0x618] sm:$0xff]  }
 0x266   : > { %11527 = vmatpush3.bf16.msra.mxu1 %v13621_v45  ;;  %v15202_v34 = vpop.permute.xlu1 %12619 }
 0x267   : > { %v15169_v36 = vpop.f32.mrf.mxu0  ;;  %v15171_v56 = vpop.f32.mrf.mxu1  ;;  %11528 = vmatprep.subr.bf16.mxu1 %v13622_v40  ;;  %v2195_v40 = vld [vmem:[#allocation2 + $0xc3] sm:$0xff]  ;;  %18270 = vst [vmem:[#allocation48_spill] sm:$0xff] %v15202_v34  ;;  %v2998_v34 = vsel %vm890_vm2, %v13987_v13, %v12592_v54 }
 0x268   : > { %v12688_v4 = vpack.i.bf16 %v2196_v42, %v2195_v40  ;;  %v12625_v42 = vpop.permute.xlu0 %12624 }
 0x269   : > { %v15179_v45 = vpop.f32.mrf.mxu0  ;;  %5266 = vmatmul.mubr.bf16.gmra.mxu1 %v3086_v61  ;;  %v15181_v38 = vpop.f32.mrf.mxu1  ;;  %v2971_v61 = vsel %vm890_vm2, %v13985_v33, %v12571_v26 }
 0x26a   : > { %5273 = vmatprep.mubr.bf16.mxu1 %v3109_v43  ;;  %11529 = vmatpush3.bf16.msra.mxu1 %v13623_v12  ;;  %v3006_v12 = vsel %vm890_vm2, %v14926_v49, %v12587_v27  ;;  %v3108_v28 = vpack.c.bf16 %v2972_v3, %v2971_v61  ;;  %v13630_v3 = vld [vmem:[#allocation7 + $0x500] sm:$0xff]   ;;  %v15222_v13 = vpop.permute.xlu1 %12629 }
 0x26b   : > { %v11088_v53 = vpop.f32.mrf.mxu0  ;;  %v15185_v39 = vpop.f32.mrf.mxu1  ;;  %11530 = vmatprep.subr.bf16.mxu1 %v13625_v59  ;;  %12689 = vrot.lane.b32.xlu1 %v12688_v4, %s14104_s1  ;;  %v13628_v59 = vld [vmem:[#allocation7 + $0x508] sm:$0xff]   ;;  %v3047_v49 = vpack.c.bf16 %v3006_v12, %v3005_v63  ;;  %v12607_v4 = vunpack.i.h.bf16 %v15147_v50  ;;  %v2997_v50 = vsel %vm890_vm2, %v15049_v9, %v12591_v32  ;;  %v12617_v63 = vunpack.i.h.bf16 %v15183_v25 }
 0x26c   : > { %v15214_v12 = vpop.permute.xlu0 %12634  ;;  %v11084_v9 = vadd.f32 %v15161_v8, %v15149_v11  ;;  %v3046_v54 = vpack.c.bf16 %v2998_v34, %v2997_v50  ;;  %v2169_v34 = vld [vmem:[#allocation2 + $0xa0] sm:$0xff] }
 0x26d   : > { %v11089_v20 = vpop.f32.mrf.mxu0  ;;  %v15190_v43 = vpop.f32.mrf.mxu1  ;;  %v3000_v8 = vsel %vm890_vm2, %v15061_v10, %v12617_v63 }
 0x26e   : > { %11531 = vmatpush3.bf16.msra.mxu1 %v13626_v62  ;;  %v12616_v62 = vunpack.i.l.bf16 %v15183_v25  ;;  %v11090_v1 = vadd.f32 %v11089_v20, %v11088_v53  ;;  %v2170_v25 = vld [vmem:[#allocation2 + $0xb0] sm:$0xff] }
 0x26f   : > { %v11091_v33 = vpop.f32.mrf.mxu0  ;;  %v15197_v26 = vpop.f32.mrf.mxu1  ;;  %11532 = vmatprep.subr.bf16.mxu1 %v13627_v31 }
 0x270   : > { %v15232_v53 = vsel %vm890_vm2, %v15059_v18, %v12616_v62  ;;  %v12645_v50 = vpop.permute.xlu0 %12644 }
 0x271   : > { %v11092_v27 = vpop.f32.mrf.mxu0  ;;  %5274 = vmatmul.mubr.bf16.gmra.mxu1 %v3108_v28  ;;  %v15205_v40 = vpop.f32.mrf.mxu1  ;;  %v12627_v28 = vunpack.i.h.bf16 %v12625_v42 }
 0x272   : > { %11533 = vmatpush3.bf16.msra.mxu1 %v13628_v59  ;;  %5379 = vmatprep.mubr.bf16.mxu1 %v3047_v49  ;;  %v3007_v59 = vsel %vm890_vm2, %v14936_v48, %v12606_v41  ;;  %v12626_v49 = vunpack.i.l.bf16 %v12625_v42  ;;  %v11050_v48 = vadd.f32 %v15151_v2, %v15145_v14  ;;  %v11044_v42 = vadd.f32 %v15121_v35, %v15119_v47 }
 0x273   : > { %v11094_v31 = vpop.f32.mrf.mxu0  ;;  %v15208_v61 = vpop.f32.mrf.mxu1  ;;  %11534 = vmatprep.subr.bf16.mxu1 %v13629_v16  ;;  %v3008_v16 = vsel %vm890_vm2, %v14938_v60, %v12607_v4  ;;  %v13635_v60 = vld [vmem:[#allocation7 + $0x610] sm:$0xff]   ;;  %v11093_v41 = vadd.f32 %v11092_v27, %v11091_v33  ;;  %v12632_v14 = vunpack.i.h.bf16 %v15222_v13  ;;  %v3010_v62 = vsel %vm890_vm2, %v2170_v25, %v12627_v28 }
 0x274   : > { %v3069_v11 = vpack.c.bf16 %v3008_v16, %v3007_v59  ;;  %v1621_v4 = vadd.f32 %v11090_v1, %v11050_v48  ;;  %v3009_v18 = vsel %vm890_vm2, %v2169_v34, %v12626_v49  ;;  %v11053_v47 = vadd.f32 %v15171_v56, %v15163_v30  ;;  %v13638_v49 = vld [vmem:[#allocation7 + $0x608] sm:$0xff]   ;;  %v15246_v16 = vpop.permute.xlu1 %12639 }
 0x275   : > { %v11095_v24 = vpop.f32.mrf.mxu0  ;;  %v15218_v19 = vpop.f32.mrf.mxu1  ;;  %v11087_v35 = vadd.f32 %v15179_v45, %v15169_v36  ;;  %v1613_v10 = vadd.f32 %v11084_v9, %v11044_v42  ;;  %v12646_v33 = vunpack.i.l.bf16 %v12645_v50  ;;  %v3068_v1 = vpack.c.bf16 %v3000_v8, %v15232_v53  ;;  %v15253_v36 = vld [vmem:[%s18271_s3] ss:$0 sm:$0xff] }
 0x276   : > { %11535 = vmatpush3.bf16.msra.mxu1 %v13630_v3  ;;  %v12647_v28 = vunpack.i.h.bf16 %v12645_v50  ;;  %v11047_v30 = vadd.f32 %v15139_v29, %v15131_v17  ;;  %v1624_v45 = vadd.f32 %v11093_v41, %v11053_v47  ;;  %v15257_v9 = vsel %vm890_vm2, %v15074_v23, %v12632_v14 }
 0x277   : > { %v15228_v32 = vpop.f32.mrf.mxu0  ;;  %v11064_v20 = vpop.f32.mrf.mxu1  ;;  %12080 = vmatprep.subr.bf16.mxu1 %v13632_v5  ;;  %v12631_v25 = vunpack.i.l.bf16 %v15222_v13  ;;  %v3091_v42 = vpack.c.bf16 %v3010_v62, %v3009_v18  ;;  %v11056_v41 = vadd.f32 %v15185_v39, %v15181_v38  ;;  %v11062_v23 = vadd.f32 %v15208_v61, %v15205_v40 }
 0x278   : > { %v1616_v34 = vadd.f32 %v11087_v35, %v11047_v30 }
 0x279   : > { %v11098_v2 = vpop.f32.mrf.mxu0  ;;  %5380 = vmatmul.mubr.bf16.vlgmr.msra.gmra.mxu1 %v3046_v54  ;;  %v12062_v3 = vpop.f32.mrf.mxu1  ;;  %v11096_v54 = vadd.f32 %v11095_v24, %v11094_v31 }
 0x27a   : > { %5387 = vmatprep.mubr.bf16.mxu1 %v3069_v11  ;;  %12081 = vmatpush3.bf16.msra.mxu1 %v13632_v5  ;;  %v1686_v27 = vadd.f32 %v12062_v3, %v1621_v4  ;;  %v2171_v5 = vld [vmem:[#allocation2 + $0xc0] sm:$0xff]  ;;  %v2172_v11 = vld [vmem:[#allocation2 + $0xd0] sm:$0xff]  ;;  %v11065_v3 = vadd.f32 %v11064_v20, %v15218_v19  ;;  %v11099_v61 = vadd.f32 %v11098_v2, %v15228_v32 }
 0x27b   : > { %v11100_v63 = vpop.f32.mrf.mxu0  ;;  %v1677_v59 = vpop.f32.mrf.mxu1  ;;  %12082 = vmatprep.subr.bf16.mxu1 %v13635_v60  ;;  %v15267_v31 = vsel %vm890_vm2, %v2171_v5, %v12646_v33  ;;  %v13641_v4 = vld [vmem:[#allocation7 + $0x600] sm:$0xff]   ;;  %v3012_v40 = vsel %vm890_vm2, %v2172_v11, %v12647_v28  ;;  %v1629_v35 = vadd.f32 %v11096_v54, %v11056_v41  ;;  %v13988_v33 = vld [vmem:[#allocation2 + $0x95] sm:$0xff]  ;;  %v11059_v32 = vadd.f32 %v15197_v26, %v15190_v43 }
 0x27c   : > { %v1678_v56 = vadd.f32 %v1677_v59, %v1613_v10  ;;  %v1717_v14 = vmul.f32 %v15253_v36, %v1686_v27  ;;  %v3001_v27 = vsel %vm890_vm2, %v13988_v33, %v12631_v25  ;;  %v3113_v25 = vpack.c.bf16 %v3012_v40, %v15267_v31  ;;  %v13634_v31 = vld [vmem:[#allocation7 + $0xb8] sm:$0xff]   ;;  %v13636_v40 = vld [vmem:[#allocation7 + $0xf0] sm:$0xff]  }
 0x27d   : > { %v11101_v48 = vpop.f32.mrf.mxu0  ;;  %v12063_v53 = vpop.f32.mrf.mxu1  ;;  %v3090_v41 = vpack.c.bf16 %v15257_v9, %v3001_v27 }
 0x27e   : > { %v1715_v17 = vmul.f32 %v15253_v36, %v1678_v56  ;;  %v11102_v29 = vadd.f32 %v11101_v48, %v11100_v63  ;;  %v1689_v8 = vadd.f32 %v12063_v53, %v1624_v45  ;;  %12083 = vmatpush3.bf16.msra.mxu1 %v13635_v60  ;;  %v15273_v60 = vld [vmem:[%s18272_s5] ss:$0 sm:$0xff]  ;;  %v12650_v63 = vpop.permute.xlu1 %12649  ;;  %v1632_v48 = vadd.f32 %v11099_v61, %v11059_v32  ;;  %v2154_v53 = vld [vmem:[#allocation2 + $0xb5] sm:$0xff]  ;;  %s14109_s5 = smov 14  }
 0x27f   : > { %v11103_v13 = vpop.f32.mrf.mxu0  ;;  %v1680_v24 = vpop.f32.mrf.mxu1  ;;  %12084 = vmatprep.subr.bf16.mxu1 %v13638_v49  ;;  %v1732_v2 = vadd.f32 %v15273_v60, %v1717_v14  ;;  %v12652_v28 = vunpack.i.h.bf16 %v12650_v63  ;;  %v12651_v5 = vunpack.i.l.bf16 %v12650_v63 }
 0x280   : > { %v1718_v38 = vmul.f32 %v15253_v36, %v1689_v8  ;;  %v1681_v39 = vadd.f32 %v1680_v24, %v1616_v34  ;;  %v1730_v18 = vadd.f32 %v15273_v60, %v1715_v17  ;;  %v1637_v50 = vadd.f32 %v11102_v29, %v11062_v23 }
 0x281   : > { %v11104_v62 = vpop.f32.mrf.mxu0  ;;  %5388 = vmatmul.mubr.bf16.gmra.mxu1 %v3068_v1  ;;  %v12066_v47 = vpop.f32.mrf.mxu1  ;;  %v1740_v29 = vmax.f32 %v1732_v2, 0.0  ;;  %v12337_v23 = vunpack.i.h.bf16 %v14808_v37  ;;  %v3050_v2 = vpack.c.bf16 %v15105_v6, %v15103_v44 }
 0x282   : > { %v1733_v19 = vadd.f32 %v15273_v60, %v1718_v38  ;;  %v1716_v20 = vmul.f32 %v15253_v36, %v1681_v39  ;;  %v11105_v10 = vadd.f32 %v11104_v62, %v11103_v13  ;;  %5395 = vmatprep.mubr.bf16.mxu1 %v3091_v42  ;;  %12085 = vmatpush3.bf16.msra.mxu1 %v13638_v49  ;;  %v2155_v42 = vld [vmem:[#allocation2 + $0xc5] sm:$0xff]  ;;  %v1738_v11 = vmax.f32 %v1730_v18, 0.0 }
 0x283   : > { %v1702_v59 = vadd.f32 %v12066_v47, %v1637_v50  ;;  %v1693_v1 = vpop.f32.mrf.mxu1  ;;  %12086 = vmatprep.subr.bf16.mxu1 %v13641_v4  ;;  %v3004_v38 = vsel %vm890_vm2, %v2155_v42, %v12652_v28  ;;  %v3003_v39 = vsel %vm890_vm2, %v2154_v53, %v12651_v5  ;;  %v1946_v62 = vld [vmem:[#allocation2 + $0x6] sm:$0xff]  ;;  %v1947_v50 = vld [vmem:[#allocation2 + $0x16] sm:$0xff]  ;;  %v3072_v5 = vpack.c.bf16 %v15129_v15, %v15127_v46 }
 0x284   : > { %v1731_v30 = vadd.f32 %v15273_v60, %v1716_v20  ;;  %v1694_v56 = vadd.f32 %v1693_v1, %v1629_v35  ;;  %v1640_v45 = vadd.f32 %v11105_v10, %v11065_v3  ;;  %v1741_v54 = vmax.f32 %v1733_v19, 0.0  ;;  %v13637_v35 = vld [vmem:[#allocation7 + $0xb0] sm:$0xff]   ;;  %v13639_v10 = vld [vmem:[#allocation7 + $0xe8] sm:$0xff]  }
 0x285   : > { %v12067_v49 = vpop.f32.mrf.mxu1  ;;  %v1721_v8 = vmul.f32 %v15253_v36, %v1702_v59  ;;  %v12336_v3 = vunpack.i.l.bf16 %v14808_v37  ;;  %v3112_v20 = vpack.c.bf16 %v3004_v38, %v3003_v39  ;;  %v13640_v1 = vld [vmem:[#allocation7 + $0xa8] sm:$0xff]   ;;  %v13652_v39 = vld [vmem:[#allocation7 + $0x1f8] sm:$0xff]  }
 0x286   : > { %v1739_v43 = vmax.f32 %v1731_v30, 0.0  ;;  %v1719_v26 = vmul.f32 %v15253_v36, %v1694_v56  ;;  %v1705_v17 = vadd.f32 %v12067_v49, %v1640_v45  ;;  %12087 = vmatpush3.bf16.msra.mxu1 %v13641_v4  ;;  %v1747_v4 = vpack.c.bf16 %v1741_v54, %v1740_v29  ;;  %v13642_v30 = vld [vmem:[#allocation7 + $0xe0] sm:$0xff]   ;;  %v13644_v45 = vld [vmem:[#allocation7 + $0xd8] sm:$0xff]   ;;  %v13648_v46 = vld [vmem:[#allocation7 + $0xc8] sm:$0xff]  }
 0x287   : > { %v1696_v34 = vpop.f32.mrf.mxu1  ;;  %v1736_v37 = vadd.f32 %v15273_v60, %v1721_v8  ;;  %v2501_v33 = vsel %vm890_vm2, %v1946_v62, %v12336_v3  ;;  %v13643_v56 = vld [vmem:[#allocation7 + $0xa0] sm:$0xff]   ;;  %v3094_v54 = vpack.c.bf16 %v15159_v52, %v15157_v7  ;;  %v13645_v49 = vld [vmem:[#allocation7 + $0x98] sm:$0xff]   ;;  %v12342_v52 = vunpack.i.h.bf16 %v14803_v55 }
 0x288   : > { %v1722_v14 = vmul.f32 %v15253_v36, %v1705_v17  ;;  %v1697_v13 = vadd.f32 %v1696_v34, %v1632_v48  ;;  %v1746_v24 = vpack.c.bf16 %v1739_v43, %v1738_v11  ;;  %v1734_v61 = vadd.f32 %v15273_v60, %v1719_v26  ;;  %v13647_v11 = vld [vmem:[#allocation7 + $0x90] sm:$0xff]   ;;  %v13649_v26 = vld [vmem:[#allocation7 + $0x88] sm:$0xff]   ;;  %v13650_v34 = vld [vmem:[#allocation7 + $0xc0] sm:$0xff]  }
 0x289   : > { %5396 = vmatmul.mubr.bf16.gmra.mxu1 %v3090_v41  ;;  %v1744_v32 = vmax.f32 %v1736_v37, 0.0  ;;  %v12341_v7 = vunpack.i.l.bf16 %v14803_v55  ;;  %v1930_v17 = vld [vmem:[#allocation2 + $0x4] sm:$0xff]  ;;  %v1931_v29 = vld [vmem:[#allocation2 + $0x14] sm:$0xff]  ;;  %v12357_v41 = vunpack.i.h.bf16 %v14823_v21  ;;  %v12362_v37 = vunpack.i.h.bf16 %v14819_v57 }
 0x28a   : > { %v1737_v9 = vadd.f32 %v15273_v60, %v1722_v14  ;;  %v1720_v18 = vmul.f32 %v15253_v36, %v1697_v13  ;;  %12072 = vmatprep.mubr.msk.bf16.mxu0 %vm929_vm4, %v1746_v24  ;;  %5403 = vmatprep.mubr.bf16.mxu1 %v3113_v25  ;;  %v2502_v36 = vsel %vm890_vm2, %v1947_v50, %v12337_v23  ;;  %v1742_v27 = vmax.f32 %v1734_v61, 0.0  ;;  %v13646_v25 = vld [vmem:[#allocation7 + $0xd0] sm:$0xff]   ;;  %v13651_v55 = vld [vmem:[#allocation7 + $0x80] sm:$0xff]  }
 0x28b   : > { %12073 = vmatmul.mubr.msk.bf16.vlgmr.msra.gmra.mxu0 %vm929_vm4, %v1747_v4  ;;  %v12356_v23 = vunpack.i.l.bf16 %v14823_v21  ;;  %v2494_v13 = vsel %vm890_vm2, %v1931_v29, %v12342_v52  ;;  %v2493_v24 = vsel %vm890_vm2, %v1930_v17, %v12341_v7  ;;  %v1948_v3 = vld [vmem:[#allocation2 + $0x26] sm:$0xff]  ;;  %v1949_v4 = vld [vmem:[#allocation2 + $0x36] sm:$0xff] }
 0x28c   : > { %v1735_v47 = vadd.f32 %v15273_v60, %v1720_v18  ;;  %11161 = vmatpush3.bf16.msra.mxu0 %v13634_v31  ;;  %v1745_v19 = vmax.f32 %v1737_v9, 0.0  ;;  %v3032_v60 = vpack.c.bf16 %v2502_v36, %v2501_v33  ;;  %v2504_v9 = vsel %vm890_vm2, %v1949_v4, %v12357_v41  ;;  %v13653_v18 = vld [vmem:[#allocation7 + $0x1b8] sm:$0xff]   ;;  %v13654_v50 = vld [vmem:[#allocation7 + $0x1f0] sm:$0xff]  }
 0x28d   : > { %11162 = vmatprep.subr.bf16.mxu0 %v13636_v40  ;;  %v3031_v40 = vpack.c.bf16 %v2494_v13, %v2493_v24  ;;  %v2503_v21 = vsel %vm890_vm2, %v1948_v3, %v12356_v23  ;;  %v13655_v33 = vld [vmem:[#allocation7 + $0x1b0] sm:$0xff]  }
 0x28e   : > { %v1743_v63 = vmax.f32 %v1735_v47, 0.0  ;;  %v1749_v28 = vpack.c.bf16 %v1745_v19, %v1744_v32  ;;  %v12361_v47 = vunpack.i.l.bf16 %v14819_v57  ;;  %v13657_v57 = vld [vmem:[#allocation7 + $0x1a8] sm:$0xff]   ;;  %v18275_v13 = vld [vmem:[#allocation26_spill] sm:$0xff] }
 0x28f   : > { %v12412_v24 = vunpack.i.h.bf16 %v18275_v13 }
 0x290   : > { %11163 = vmatpush3.bf16.msra.mxu0 %v13637_v35  ;;  %v1748_v59 = vpack.c.bf16 %v1743_v63, %v1742_v27  ;;  %v3054_v35 = vpack.c.bf16 %v2504_v9, %v2503_v21  ;;  %v1933_v27 = vld [vmem:[#allocation2 + $0x34] sm:$0xff]  ;;  %v13656_v63 = vld [vmem:[#allocation7 + $0x1e8] sm:$0xff]  }
 0x291   : > { %5404 = vmatmul.mubr.bf16.gmra.mxu1 %v3112_v20  ;;  %11164 = vmatprep.subr.bf16.mxu0 %v13639_v10  ;;  %v1932_v20 = vld [vmem:[#allocation2 + $0x24] sm:$0xff]  ;;  %v1937_v21 = vld [vmem:[#allocation2 + $0x74] sm:$0xff] }
 0x292   : > { %12088 = vmatprep.mubr.msk.bf16.mxu1 %vm890_vm2, %v3050_v2  ;;  %12076 = vmatprep.mubr.msk.bf16.mxu0 %vm929_vm4, %v1748_v59  ;;  %v2495_v32 = vsel %vm890_vm2, %v1932_v20, %v12361_v47  ;;  %v2496_v2 = vsel %vm890_vm2, %v1933_v27, %v12362_v37  ;;  %v13664_v9 = vld [vmem:[#allocation7 + $0x1c8] sm:$0xff]  }
 0x293   : > { %12077 = vmatmul.mubr.msk.bf16.gmra.mxu0 %vm929_vm4, %v1749_v28  ;;  %v13658_v28 = vld [vmem:[#allocation7 + $0x1e0] sm:$0xff]   ;;  %v13665_v27 = vld [vmem:[#allocation7 + $0x188] sm:$0xff]  }
 0x294   : > { %11165 = vmatpush3.bf16.msra.mxu0 %v13640_v1  ;;  %4794 = vmatprep.mubr.bf16.mxu0 %v3032_v60  ;;  %v3053_v60 = vpack.c.bf16 %v2496_v2, %v2495_v32  ;;  %v1996_v32 = vld [vmem:[#allocation2 + $0x25] sm:$0xff] }
 0x295   : > { %11166 = vmatprep.subr.bf16.mxu0 %v13642_v30  ;;  %v12382_v30 = vunpack.i.h.bf16 %v14833_v51 }
 0x298   : > { %11167 = vmatpush3.bf16.msra.mxu0 %v13643_v56  ;;  %v12381_v56 = vunpack.i.l.bf16 %v14833_v51  ;;  %v13660_v51 = vld [vmem:[#allocation7 + $0x1d8] sm:$0xff]  }
 0x299   : > { %v11136_v48 = vpop.f32.mrf.mxu1  ;;  %12089 = vmatmul.mubr.msk.bf16.vlgmr.msra.gmra.mxu1 %vm890_vm2, %v3072_v5  ;;  %11168 = vmatprep.subr.bf16.mxu0 %v13644_v45  ;;  %v12402_v45 = vunpack.i.h.bf16 %v14872_v22  ;;  %v12401_v5 = vunpack.i.l.bf16 %v14872_v22 }
 0x29a   : > { %12092 = vmatprep.mubr.msk.bf16.mxu1 %vm890_vm2, %v3094_v54 }
 0x29b   : > { %v11137_v53 = vpop.f32.mrf.mxu1 }
 0x29c   : > { %v15315_v42 = vadd.f32 %v11137_v53, %v11136_v48  ;;  %11169 = vmatpush3.bf16.msra.mxu0 %v13645_v49  ;;  %v18273_v48 = vpack.c.bf16 %v14859_v58, %v14855_v0  ;;  %v2508_v0 = vsel %vm890_vm2, %v15105_v6, %v12402_v45  ;;  %v13661_v58 = vld [vmem:[#allocation7 + $0x198] sm:$0xff]   ;;  %v13663_v6 = vld [vmem:[#allocation7 + $0x190] sm:$0xff]  }
 0x29d   : > { %v15317_v43 = vpop.f32.mrf.mxu1  ;;  %11170 = vmatprep.subr.bf16.mxu0 %v13646_v25  ;;  %v13659_v25 = vld [vmem:[#allocation7 + $0x1a0] sm:$0xff]  }
 0x29f   : > { %v15319_v15 = vpop.f32.mrf.mxu1 }
 0x2a0   : > { %11171 = vmatpush3.bf16.msra.mxu0 %v13647_v11  ;;  %v1934_v11 = vld [vmem:[#allocation2 + $0x44] sm:$0xff] }
 0x2a1   : > { %v11142_v8 = vpop.f32.mrf.mxu1  ;;  %11172 = vmatprep.subr.bf16.mxu0 %v13648_v46  ;;  %v1935_v46 = vld [vmem:[#allocation2 + $0x54] sm:$0xff]  ;;  %v2497_v52 = vsel %vm890_vm2, %v1934_v11, %v12381_v56 }
 0x2a2   : > { %v2498_v22 = vsel %vm890_vm2, %v1935_v46, %v12382_v30  ;;  %v13668_v46 = vld [vmem:[#allocation7 + $0x2f8] sm:$0xff]  }
 0x2a3   : > { %v11143_v14 = vpop.f32.mrf.mxu1  ;;  %v3075_v29 = vpack.c.bf16 %v2498_v22, %v2497_v52  ;;  %v2014_v52 = vld [vmem:[#allocation2 + $0x50] sm:$0xff] }
 0x2a4   : > { %v15327_v31 = vadd.f32 %v11143_v14, %v11142_v8  ;;  %11173 = vmatpush3.bf16.msra.mxu0 %v13649_v26  ;;  %v2507_v26 = vsel %vm890_vm2, %v15103_v44, %v12401_v5  ;;  %v13662_v8 = vld [vmem:[#allocation7 + $0x1d0] sm:$0xff]  }
 0x2a5   : > { %v15329_v38 = vpop.f32.mrf.mxu1  ;;  %11174 = vmatprep.subr.bf16.mxu0 %v13650_v34  ;;  %v18274_v34 = vld [vmem:[#allocation24_spill] sm:$0xff]  ;;  %v3098_v14 = vpack.c.bf16 %v2508_v0, %v2507_v26 }
 0x2a6   : > { %v12397_v41 = vunpack.i.h.bf16 %v18274_v34  ;;  %v12396_v23 = vunpack.i.l.bf16 %v18274_v34  ;;  %v18278_v34 = vld [vmem:[#allocation28_spill] sm:$0xff] }
 0x2a7   : > { %v15331_v61 = vpop.f32.mrf.mxu1 }
 0x2a8   : > { %11175 = vmatpush3.bf16.msra.mxu0 %v13651_v55  ;;  %v12411_v55 = vunpack.i.l.bf16 %v18275_v13 }
 0x2a9   : > { %v11148_v62 = vpop.f32.mrf.mxu1  ;;  %11240 = vmatprep.subr.bf16.mxu0 %v13652_v39  ;;  %v2011_v39 = vld [vmem:[#allocation2 + $0x20] sm:$0xff] }
 0x2aa   : > { %v2533_v47 = vsel %vm890_vm2, %v2011_v39, %v12411_v55  ;;  %v13671_v55 = vld [vmem:[#allocation7 + $0x2b0] sm:$0xff]   ;;  %v1998_v39 = vld [vmem:[#allocation2 + $0x45] sm:$0xff] }
 0x2ab   : > { %v11149_v19 = vpop.f32.mrf.mxu1  ;;  %4795 = vmatmul.mubr.bf16.vlgmr.msra.gmra.mxu0 %v3031_v40  ;;  %v1936_v40 = vld [vmem:[#allocation2 + $0x64] sm:$0xff] }
 0x2ac   : > { %v15337_v10 = vadd.f32 %v11149_v19, %v11148_v62  ;;  %4802 = vmatprep.mubr.bf16.mxu0 %v3054_v35  ;;  %11241 = vmatpush3.bf16.msra.mxu0 %v13653_v18  ;;  %v2499_v18 = vsel %vm890_vm2, %v1936_v40, %v12396_v23  ;;  %v2500_v62 = vsel %vm890_vm2, %v1937_v21, %v12397_v41  ;;  %v18276_v19 = vld [vmem:[#allocation25_spill] sm:$0xff]  ;;  %v12437_v41 = vunpack.i.h.bf16 %v18278_v34 }
 0x2ad   : > { %v15339_v36 = vpop.f32.mrf.mxu1  ;;  %11242 = vmatprep.subr.bf16.mxu0 %v13654_v50  ;;  %v2012_v50 = vld [vmem:[#allocation2 + $0x30] sm:$0xff]  ;;  %v12422_v20 = vunpack.i.h.bf16 %v18276_v19  ;;  %v12436_v23 = vunpack.i.l.bf16 %v18278_v34  ;;  %v18285_v34 = vld [vmem:[#allocation32_spill] sm:$0xff] }
 0x2ae   : > { %v2534_v35 = vsel %vm890_vm2, %v2012_v50, %v12412_v24  ;;  %v13672_v40 = vld [vmem:[#allocation7 + $0x2e8] sm:$0xff]  }
 0x2af   : > { %v15343_v59 = vpop.f32.mrf.mxu1  ;;  %v2526_v5 = vsel %vm890_vm2, %v1996_v32, %v12422_v20  ;;  %v18280_v32 = vld [vmem:[#allocation31_spill] sm:$0xff] }
 0x2b0   : > { %11243 = vmatpush3.bf16.msra.mxu0 %v13655_v33  ;;  %v12421_v33 = vunpack.i.l.bf16 %v18276_v19  ;;  %v18279_v19 = vld [vmem:[#allocation29_spill] sm:$0xff] }
 0x2b1   : > { %v11154_v1 = vpop.f32.mrf.mxu1  ;;  %11244 = vmatprep.subr.bf16.mxu0 %v13656_v63  ;;  %v1995_v63 = vld [vmem:[#allocation2 + $0x15] sm:$0xff]  ;;  %v12452_v20 = vunpack.i.h.bf16 %v18279_v19 }
 0x2b3   : > { %v11155_v54 = vpop.f32.mrf.mxu1  ;;  %4803 = vmatmul.mubr.bf16.gmra.mxu0 %v3053_v60  ;;  %v3036_v60 = vpack.c.bf16 %v2534_v35, %v2533_v47  ;;  %v13674_v35 = vld [vmem:[#allocation7 + $0x2e0] sm:$0xff]  }
 0x2b4   : > { %v15349_v49 = vadd.f32 %v11155_v54, %v11154_v1  ;;  %4810 = vmatprep.mubr.bf16.mxu0 %v18273_v48  ;;  %11245 = vmatpush3.bf16.msra.mxu0 %v13657_v57  ;;  %v3097_v57 = vpack.c.bf16 %v2500_v62, %v2499_v18  ;;  %v13666_v1 = vld [vmem:[#allocation7 + $0x1c0] sm:$0xff]   ;;  %v2525_v54 = vsel %vm890_vm2, %v1995_v63, %v12421_v33  ;;  %v13673_v62 = vld [vmem:[#allocation7 + $0x2a8] sm:$0xff]   ;;  %v12451_v33 = vunpack.i.l.bf16 %v18279_v19 }
 0x2b5   : > { %v15354_v53 = vpop.f32.mrf.mxu1  ;;  %11246 = vmatprep.subr.bf16.mxu0 %v13658_v28  ;;  %v18277_v28 = vld [vmem:[#allocation27_spill] sm:$0xff]  ;;  %v3035_v22 = vpack.c.bf16 %v2526_v5, %v2525_v54 }
 0x2b6   : > { %v12432_v30 = vunpack.i.h.bf16 %v18277_v28  ;;  %v12431_v56 = vunpack.i.l.bf16 %v18277_v28  ;;  %v1999_v28 = vld [vmem:[#allocation2 + $0x55] sm:$0xff] }
 0x2b7   : > { %v15358_v7 = vpop.f32.mrf.mxu1 }
 0x2b8   : > { %11247 = vmatpush3.bf16.msra.mxu0 %v13659_v25  ;;  %v13667_v25 = vld [vmem:[#allocation7 + $0x180] sm:$0xff]  }
 0x2b9   : > { %v11216_v17 = vpop.f32.mrf.mxu1  ;;  %11248 = vmatprep.subr.bf16.mxu0 %v13660_v51  ;;  %v2013_v51 = vld [vmem:[#allocation2 + $0x40] sm:$0xff] }
 0x2ba   : > { %v2535_v0 = vsel %vm890_vm2, %v2013_v51, %v12431_v56  ;;  %v13676_v56 = vld [vmem:[#allocation7 + $0x2d8] sm:$0xff]  }
 0x2bb   : > { %4811 = vmatmul.mubr.bf16.gmra.mxu0 %v3075_v29  ;;  %v11217_v44 = vpop.f32.mrf.mxu1 }
 0x2bc   : > { %v15368_v3 = vadd.f32 %v11217_v44, %v11216_v17  ;;  %4818 = vmatprep.mubr.bf16.mxu0 %v3098_v14  ;;  %11249 = vmatpush3.bf16.msra.mxu0 %v13661_v58  ;;  %v2536_v58 = vsel %vm890_vm2, %v2014_v52, %v12432_v30  ;;  %v13669_v17 = vld [vmem:[#allocation7 + $0x2b8] sm:$0xff]   ;;  %v2000_v30 = vld [vmem:[#allocation2 + $0x65] sm:$0xff]  ;;  %v13678_v52 = vld [vmem:[#allocation7 + $0x2d0] sm:$0xff]  }
 0x2bd   : > { %v15370_v4 = vpop.f32.mrf.mxu1  ;;  %11250 = vmatprep.subr.bf16.mxu0 %v13662_v8  ;;  %v13670_v8 = vld [vmem:[#allocation7 + $0x2f0] sm:$0xff]   ;;  %v3058_v14 = vpack.c.bf16 %v2536_v58, %v2535_v0  ;;  %v2530_v5 = vsel %vm890_vm2, %v2000_v30, %v12452_v20 }
 0x2be   : > { %v2036_v30 = vld [vmem:[#allocation2 + $0x36] sm:$0xff] }
 0x2bf   : > { %v15374_v37 = vpop.f32.mrf.mxu1 }
 0x2c0   : > { %11251 = vmatpush3.bf16.msra.mxu0 %v13663_v6  ;;  %v1997_v6 = vld [vmem:[#allocation2 + $0x35] sm:$0xff] }
 0x2c1   : > { %v11222_v2 = vpop.f32.mrf.mxu1  ;;  %11252 = vmatprep.subr.bf16.mxu0 %v13664_v9  ;;  %v2527_v21 = vsel %vm890_vm2, %v1997_v6, %v12436_v23  ;;  %v2528_v9 = vsel %vm890_vm2, %v1998_v39, %v12437_v41  ;;  %v13679_v23 = vld [vmem:[#allocation7 + $0x290] sm:$0xff]   ;;  %v13680_v6 = vld [vmem:[#allocation7 + $0x2c8] sm:$0xff]  }
 0x2c2   : > { %v3057_v47 = vpack.c.bf16 %v2528_v9, %v2527_v21  ;;  %v13681_v9 = vld [vmem:[#allocation7 + $0x288] sm:$0xff]  }
 0x2c3   : > { %4819 = vmatmul.mubr.bf16.gmra.mxu0 %v3097_v57  ;;  %v11223_v45 = vpop.f32.mrf.mxu1 }
 0x2c4   : > { %v15384_v48 = vadd.f32 %v11223_v45, %v11222_v2  ;;  %11253 = vmatpush3.bf16.msra.mxu0 %v13665_v27  ;;  %4924 = vmatprep.mubr.bf16.mxu0 %v3036_v60  ;;  %v18281_v2 = vld [vmem:[#allocation30_spill] sm:$0xff]  ;;  %v2529_v45 = vsel %vm890_vm2, %v1999_v28, %v12451_v33  ;;  %v2035_v33 = vld [vmem:[#allocation2 + $0x26] sm:$0xff] }
 0x2c5   : > { %v15386_v11 = vpop.f32.mrf.mxu1  ;;  %11254 = vmatprep.subr.bf16.mxu0 %v13666_v1  ;;  %v18282_v57 = vpack.c.bf16 %v18280_v32, %v18281_v2  ;;  %v13675_v1 = vld [vmem:[#allocation7 + $0x2a0] sm:$0xff]   ;;  %v3079_v51 = vpack.c.bf16 %v2530_v5, %v2529_v45  ;;  %v18288_v2 = vld [vmem:[#allocation15_spill] sm:$0xff] }
 0x2c6   : > { %v13683_v28 = vld [vmem:[#allocation7 + $0x280] sm:$0xff]   ;;  %v13684_v45 = vld [vmem:[#allocation7 + $0x3f8] sm:$0xff]  }
 0x2c7   : > { %v15388_v26 = vpop.f32.mrf.mxu1 }
 0x2c8   : > { %11255 = vmatpush3.bf16.msra.mxu0 %v13667_v25  ;;  %v13677_v25 = vld [vmem:[#allocation7 + $0x298] sm:$0xff]  }
 0x2c9   : > { %v11228_v29 = vpop.f32.mrf.mxu1  ;;  %11320 = vmatprep.subr.bf16.mxu0 %v13668_v46 }
 0x2cb   : > { %v11229_v13 = vpop.f32.mrf.mxu1  ;;  %4925 = vmatmul.mubr.bf16.vlgmr.msra.gmra.mxu0 %v3035_v22  ;;  %v18283_v22 = vld [vmem:[#allocation34_spill] sm:$0xff] }
 0x2cc   : > { %v15394_v24 = vadd.f32 %v11229_v13, %v11228_v29  ;;  %4932 = vmatprep.mubr.bf16.mxu0 %v3058_v14  ;;  %11321 = vmatpush3.bf16.msra.mxu0 %v13669_v17  ;;  %v12467_v0 = vunpack.i.h.bf16 %v18283_v22  ;;  %v12466_v58 = vunpack.i.l.bf16 %v18283_v22  ;;  %v2001_v13 = vld [vmem:[#allocation2 + $0x75] sm:$0xff] }
 0x2cd   : > { %v15396_v44 = vpop.f32.mrf.mxu1  ;;  %11322 = vmatprep.subr.bf16.mxu0 %v13670_v8  ;;  %v18284_v8 = vld [vmem:[#allocation33_spill] sm:$0xff] }
 0x2ce   : > { %v18286_v41 = vpack.c.bf16 %v18284_v8, %v18285_v34  ;;  %v2531_v39 = vsel %vm890_vm2, %v2001_v13, %v12466_v58  ;;  %v18291_v58 = vld [vmem:[#allocation36_spill] sm:$0xff] }
 0x2cf   : > { %v15400_v18 = vpop.f32.mrf.mxu1  ;;  %v12486_v8 = vunpack.i.l.bf16 %v18291_v58  ;;  %v18293_v13 = vld [vmem:[#allocation12_spill] sm:$0xff] }
 0x2d0   : > { %11323 = vmatpush3.bf16.msra.mxu0 %v13671_v55  ;;  %v2002_v55 = vld [vmem:[#allocation2 + $0x85] sm:$0xff] }
 0x2d1   : > { %v11234_v50 = vpop.f32.mrf.mxu1  ;;  %11324 = vmatprep.subr.bf16.mxu0 %v13672_v40  ;;  %v2532_v40 = vsel %vm890_vm2, %v2002_v55, %v12467_v0  ;;  %v13686_v0 = vld [vmem:[#allocation7 + $0x3f0] sm:$0xff]  }
 0x2d3   : > { %v11235_v27 = vpop.f32.mrf.mxu1  ;;  %4933 = vmatmul.mubr.bf16.gmra.mxu0 %v3057_v47  ;;  %v13682_v47 = vld [vmem:[#allocation7 + $0x2c0] sm:$0xff]  }
 0x2d4   : > { %v15404_v63 = vadd.f32 %v11235_v27, %v11234_v50  ;;  %4940 = vmatprep.mubr.bf16.mxu0 %v18282_v57  ;;  %11325 = vmatpush3.bf16.msra.mxu0 %v13673_v62  ;;  %v3101_v50 = vpack.c.bf16 %v2532_v40, %v2531_v39  ;;  %v18289_v57 = vld [vmem:[#allocation14_spill] sm:$0xff]  ;;  %v2037_v40 = vld [vmem:[#allocation2 + $0x46] sm:$0xff] }
 0x2d5   : > { %v15409_v60 = vpop.f32.mrf.mxu1  ;;  %11326 = vmatprep.subr.bf16.mxu0 %v13674_v35  ;;  %v18287_v35 = vld [vmem:[#allocation35_spill] sm:$0xff] }
 0x2d6   : > { %v12477_v19 = vunpack.i.h.bf16 %v18287_v35  ;;  %v12476_v20 = vunpack.i.l.bf16 %v18287_v35  ;;  %v2219_v35 = vld [vmem:[#allocation2 + $0xc6] sm:$0xff] }
 0x2d7   : > { %v15413_v54 = vpop.f32.mrf.mxu1 }
 0x2d8   : > { %11327 = vmatpush3.bf16.msra.mxu0 %v13675_v1  ;;  %v18290_v1 = vpack.c.bf16 %v18288_v2, %v18289_v57  ;;  %v2678_v5 = vsel %vm890_vm2, %v2036_v30, %v12477_v19 }
 0x2d9   : > { %v11296_v46 = vpop.f32.mrf.mxu1  ;;  %11328 = vmatprep.subr.bf16.mxu0 %v13676_v56 }
 0x2db   : > { %4941 = vmatmul.mubr.bf16.gmra.mxu0 %v3079_v51  ;;  %v11297_v17 = vpop.f32.mrf.mxu1  ;;  %v13685_v51 = vld [vmem:[#allocation7 + $0x3b8] sm:$0xff]  }
 0x2dc   : > { %v15417_v29 = vadd.f32 %v11297_v17, %v11296_v46  ;;  %4948 = vmatprep.mubr.bf16.mxu0 %v18286_v41  ;;  %11329 = vmatpush3.bf16.msra.mxu0 %v13677_v25  ;;  %v2677_v25 = vsel %vm890_vm2, %v2035_v33, %v12476_v20  ;;  %v12487_v17 = vunpack.i.h.bf16 %v18291_v58  ;;  %v2220_v20 = vld [vmem:[#allocation2 + $0xd6] sm:$0xff]  ;;  %v13689_v33 = vld [vmem:[#allocation7 + $0x3a8] sm:$0xff]  }
 0x2dd   : > { %v15422_v14 = vpop.f32.mrf.mxu1  ;;  %11330 = vmatprep.subr.bf16.mxu0 %v13678_v52  ;;  %v3038_v52 = vpack.c.bf16 %v2678_v5, %v2677_v25 }
 0x2df   : > { %v15426_v21 = vpop.f32.mrf.mxu1 }
 0x2e0   : > { %11331 = vmatpush3.bf16.msra.mxu0 %v13679_v23  ;;  %v18292_v23 = vld [vmem:[#allocation13_spill] sm:$0xff] }
 0x2e1   : > { %v11302_v62 = vpop.f32.mrf.mxu1  ;;  %11332 = vmatprep.subr.bf16.mxu0 %v13680_v6  ;;  %v18294_v55 = vpack.c.bf16 %v18292_v23, %v18293_v13  ;;  %v13687_v6 = vld [vmem:[#allocation7 + $0x3b0] sm:$0xff]  }
 0x2e3   : > { %4949 = vmatmul.mubr.bf16.gmra.mxu0 %v3101_v50  ;;  %v11303_v27 = vpop.f32.mrf.mxu1  ;;  %v2679_v50 = vsel %vm890_vm2, %v2037_v40, %v12486_v8  ;;  %v2040_v8 = vld [vmem:[#allocation2 + $0x76] sm:$0xff] }
 0x2e4   : > { %v15430_v32 = vadd.f32 %v11303_v27, %v11302_v62  ;;  %11333 = vmatpush3.bf16.msra.mxu0 %v13681_v9  ;;  %5054 = vmatprep.mubr.bf16.mxu0 %v18290_v1  ;;  %v2038_v9 = vld [vmem:[#allocation2 + $0x56] sm:$0xff]  ;;  %v13688_v62 = vld [vmem:[#allocation7 + $0x3e8] sm:$0xff]   ;;  %v3116_v27 = vpack.c.bf16 %v2220_v20, %v2219_v35  ;;  %v13690_v1 = vld [vmem:[#allocation7 + $0x3e0] sm:$0xff]  }
 0x2e5   : > { %v15435_v56 = vpop.f32.mrf.mxu1  ;;  %11334 = vmatprep.subr.bf16.mxu0 %v13682_v47  ;;  %v2680_v47 = vsel %vm890_vm2, %v2038_v9, %v12487_v17  ;;  %v2039_v17 = vld [vmem:[#allocation2 + $0x66] sm:$0xff] }
 0x2e6   : > { %v3060_v57 = vpack.c.bf16 %v2680_v47, %v2679_v50  ;;  %12093 = vmatmul.mubr.msk.bf16.gmra.mxu1 %vm890_vm2, %v3116_v27  ;;  %v18299_v50 = vld [vmem:[#allocation38_spill] sm:$0xff]  ;;  %v18300_v27 = vld [vmem:[#allocation20_spill] sm:$0xff] }
 0x2e7   : > { %v15439_v46 = vpop.f32.mrf.mxu1  ;;  %v12507_v47 = vunpack.i.h.bf16 %v18299_v50  ;;  %v12506_v35 = vunpack.i.l.bf16 %v18299_v50  ;;  %v13699_v50 = vld [vmem:[#allocation7 + $0x380] sm:$0xff]  }
 0x2e8   : > { %11335 = vmatpush3.bf16.msra.mxu0 %v13683_v28  ;;  %v18295_v28 = vld [vmem:[#allocation37_spill] sm:$0xff] }
 0x2e9   : > { %v11308_v22 = vpop.f32.mrf.mxu1  ;;  %11400 = vmatprep.subr.bf16.mxu0 %v13684_v45  ;;  %v12497_v30 = vunpack.i.h.bf16 %v18295_v28  ;;  %v12496_v45 = vunpack.i.l.bf16 %v18295_v28 }
 0x2eb   : > { %v11309_v34 = vpop.f32.mrf.mxu1  ;;  %5055 = vmatmul.mubr.bf16.vlgmr.msra.gmra.mxu0 %v3038_v52  ;;  %v18297_v52 = vld [vmem:[#allocation16_spill] sm:$0xff]  ;;  %v2681_v23 = vsel %vm890_vm2, %v2039_v17, %v12496_v45  ;;  %v2682_v13 = vsel %vm890_vm2, %v2040_v8, %v12497_v30  ;;  %v2042_v45 = vld [vmem:[#allocation2 + $0x96] sm:$0xff] }
 0x2ec   : > { %v15443_v41 = vadd.f32 %v11309_v34, %v11308_v22  ;;  %5062 = vmatprep.mubr.bf16.mxu0 %v18294_v55  ;;  %11401 = vmatpush3.bf16.msra.mxu0 %v13685_v51  ;;  %v18296_v51 = vld [vmem:[#allocation17_spill] sm:$0xff]  ;;  %v13692_v34 = vld [vmem:[#allocation7 + $0x3d8] sm:$0xff]   ;;  %v3082_v9 = vpack.c.bf16 %v2682_v13, %v2681_v23 }
 0x2ed   : > { %v15448_v39 = vpop.f32.mrf.mxu1  ;;  %11402 = vmatprep.subr.bf16.mxu0 %v13686_v0  ;;  %v18298_v22 = vpack.c.bf16 %v18296_v51, %v18297_v52  ;;  %v13691_v0 = vld [vmem:[#allocation7 + $0x3a0] sm:$0xff]   ;;  %v2684_v52 = vsel %vm890_vm2, %v2042_v45, %v12507_v47  ;;  %v18303_v23 = vld [vmem:[#allocation39_spill] sm:$0xff] }
 0x2ee   : > { %v2041_v30 = vld [vmem:[#allocation2 + $0x86] sm:$0xff]  ;;  %v12517_v13 = vunpack.i.h.bf16 %v18303_v23 }
 0x2ef   : > { %v15452_v19 = vpop.f32.mrf.mxu1  ;;  %v2683_v51 = vsel %vm890_vm2, %v2041_v30, %v12506_v35  ;;  %v13700_v35 = vld [vmem:[#allocation7 + $0x4f8] sm:$0xff]  }
 0x2f0   : > { %11403 = vmatpush3.bf16.msra.mxu0 %v13687_v6  ;;  %v13693_v6 = vld [vmem:[#allocation7 + $0x398] sm:$0xff]   ;;  %v3104_v8 = vpack.c.bf16 %v2684_v52, %v2683_v51  ;;  %v13702_v51 = vld [vmem:[#allocation7 + $0x4f0] sm:$0xff]   ;;  %v18307_v52 = vld [vmem:[#allocation40_spill] sm:$0xff] }
 0x2f1   : > { %v11314_v2 = vpop.f32.mrf.mxu1  ;;  %11404 = vmatprep.subr.bf16.mxu0 %v13688_v62  ;;  %v13694_v62 = vld [vmem:[#allocation7 + $0x3d0] sm:$0xff]   ;;  %v13701_v30 = vld [vmem:[#allocation7 + $0x4b8] sm:$0xff]  }
 0x2f3   : > { %v11315_v5 = vpop.f32.mrf.mxu1  ;;  %5063 = vmatmul.mubr.bf16.gmra.mxu0 %v3060_v57 }
 0x2f4   : > { %v15457_v25 = vadd.f32 %v11315_v5, %v11314_v2  ;;  %5070 = vmatprep.mubr.bf16.mxu0 %v18298_v22  ;;  %11405 = vmatpush3.bf16.msra.mxu0 %v13689_v33  ;;  %v18301_v2 = vld [vmem:[#allocation19_spill] sm:$0xff]  ;;  %v13696_v5 = vld [vmem:[#allocation7 + $0x3c8] sm:$0xff]  }
 0x2f5   : > { %v15462_v58 = vpop.f32.mrf.mxu1  ;;  %11406 = vmatprep.subr.bf16.mxu0 %v13690_v1  ;;  %v18302_v57 = vpack.c.bf16 %v18300_v27, %v18301_v2  ;;  %v13695_v1 = vld [vmem:[#allocation7 + $0x390] sm:$0xff]   ;;  %v13990_v2 = vld [vmem:[#allocation2 + $0x40] sm:$0xff] }
 0x2f7   : > { %v15466_v55 = vpop.f32.mrf.mxu1 }
 0x2f8   : > { %11407 = vmatpush3.bf16.msra.mxu0 %v13691_v0  ;;  %v13697_v0 = vld [vmem:[#allocation7 + $0x388] sm:$0xff]  }
 0x2f9   : > { %v11376_v40 = vpop.f32.mrf.mxu1  ;;  %11408 = vmatprep.subr.bf16.mxu0 %v13692_v34  ;;  %v13698_v34 = vld [vmem:[#allocation7 + $0x3c0] sm:$0xff]  }
 0x2fb   : > { %5071 = vmatmul.mubr.bf16.gmra.mxu0 %v3082_v9  ;;  %v11377_v20 = vpop.f32.mrf.mxu1 }
 0x2fc   : > { %v15470_v33 = vadd.f32 %v11377_v20, %v11376_v40  ;;  %5078 = vmatprep.mubr.bf16.mxu0 %v18302_v57  ;;  %11409 = vmatpush3.bf16.msra.mxu0 %v13693_v6  ;;  %v12516_v6 = vunpack.i.l.bf16 %v18303_v23  ;;  %v13989_v20 = vld [vmem:[#allocation2 + $0x50] sm:$0xff] }
 0x2fd   : > { %v15475_v28 = vpop.f32.mrf.mxu1  ;;  %11410 = vmatprep.subr.bf16.mxu0 %v13694_v62  ;;  %v18304_v62 = vld [vmem:[#allocation18_spill] sm:$0xff]  ;;  %v2702_v27 = vsel %vm890_vm2, %v13989_v20, %v12517_v13  ;;  %v18309_v23 = vld [vmem:[#allocation21_spill] sm:$0xff] }
 0x2fe   : > { %v2701_v57 = vsel %vm890_vm2, %v13990_v2, %v12516_v6  ;;  %v13703_v13 = vld [vmem:[#allocation7 + $0x4b0] sm:$0xff]   ;;  %v13705_v2 = vld [vmem:[#allocation7 + $0x4a8] sm:$0xff]  }
 0x2ff   : > { %v15479_v22 = vpop.f32.mrf.mxu1  ;;  %v3041_v45 = vpack.c.bf16 %v2702_v27, %v2701_v57 }
 0x300   : > { %11411 = vmatpush3.bf16.msra.mxu0 %v13695_v1 }
 0x301   : > { %v11382_v17 = vpop.f32.mrf.mxu1  ;;  %11412 = vmatprep.subr.bf16.mxu0 %v13696_v5 }
 0x303   : > { %5079 = vmatmul.mubr.bf16.gmra.mxu0 %v3104_v8  ;;  %v11383_v40 = vpop.f32.mrf.mxu1 }
 0x304   : > { %v15483_v9 = vadd.f32 %v11383_v40, %v11382_v17  ;;  %11413 = vmatpush3.bf16.msra.mxu0 %v13697_v0  ;;  %5184 = vmatprep.mubr.bf16.mxu0 %v18304_v62  ;;  %v12532_v0 = vunpack.i.h.bf16 %v18307_v52  ;;  %v12531_v17 = vunpack.i.l.bf16 %v18307_v52  ;;  %v2077_v40 = vld [vmem:[#allocation2 + $0x60] sm:$0xff]  ;;  %v2078_v62 = vld [vmem:[#allocation2 + $0x70] sm:$0xff] }
 0x305   : > { %v15486_v47 = vpop.f32.mrf.mxu1  ;;  %11414 = vmatprep.subr.bf16.mxu0 %v13698_v34 }
 0x306   : > { %18305 = vst [vmem:[#allocation24_spill] sm:$0xff] %v15486_v47  ;;  %v2704_v20 = vsel %vm890_vm2, %v2078_v62, %v12532_v0  ;;  %v13707_v0 = vld [vmem:[#allocation7 + $0x4a0] sm:$0xff]   ;;  %v18319_v47 = vld [vmem:[#allocation45_spill] sm:$0xff] }
 0x307   : > { %v15490_v1 = vpop.f32.mrf.mxu1 }
 0x308   : > { %18306 = vst [vmem:[#allocation26_spill] sm:$0xff] %v15490_v1  ;;  %11415 = vmatpush3.bf16.msra.mxu0 %v13699_v50  ;;  %v13704_v50 = vld [vmem:[#allocation7 + $0x4e8] sm:$0xff]  }
 0x309   : > { %v11388_v5 = vpop.f32.mrf.mxu1  ;;  %11480 = vmatprep.subr.bf16.mxu0 %v13700_v35  ;;  %v2703_v35 = vsel %vm890_vm2, %v2077_v40, %v12531_v17  ;;  %v2079_v17 = vld [vmem:[#allocation2 + $0x80] sm:$0xff] }
 0x30a   : > { %v13708_v40 = vld [vmem:[#allocation7 + $0x4d8] sm:$0xff]  }
 0x30b   : > { %v11389_v8 = vpop.f32.mrf.mxu1  ;;  %5185 = vmatmul.mubr.bf16.vlgmr.msra.gmra.mxu0 %v3041_v45  ;;  %v3063_v45 = vpack.c.bf16 %v2704_v20, %v2703_v35  ;;  %v13709_v35 = vld [vmem:[#allocation7 + $0x498] sm:$0xff]  }
 0x30c   : > { %v15494_v34 = vadd.f32 %v11389_v8, %v11388_v5  ;;  %5192 = vmatprep.mubr.bf16.mxu0 %v18309_v23  ;;  %11481 = vmatpush3.bf16.msra.mxu0 %v13701_v30  ;;  %v13706_v5 = vld [vmem:[#allocation7 + $0x4e0] sm:$0xff]   ;;  %v18312_v30 = vld [vmem:[#allocation41_spill] sm:$0xff] }
 0x30d   : > { %v15497_v6 = vpop.f32.mrf.mxu1  ;;  %11482 = vmatprep.subr.bf16.mxu0 %v13702_v51  ;;  %v12552_v52 = vunpack.i.h.bf16 %v18312_v30  ;;  %v12551_v8 = vunpack.i.l.bf16 %v18312_v30  ;;  %v13710_v30 = vld [vmem:[#allocation7 + $0x4d0] sm:$0xff]  }
 0x30e   : > { %18308 = vst [vmem:[#allocation25_spill] sm:$0xff] %v15494_v34  ;;  %18310 = vst [vmem:[#allocation27_spill] sm:$0xff] %v15497_v6  ;;  %v18314_v6 = vld [vmem:[#allocation22_spill] sm:$0xff] }
 0x30f   : > { %v15501_v27 = vpop.f32.mrf.mxu1  ;;  %v2705_v62 = vsel %vm890_vm2, %v2079_v17, %v12551_v8  ;;  %v13711_v8 = vld [vmem:[#allocation7 + $0x490] sm:$0xff]  }
 0x310   : > { %18311 = vst [vmem:[#allocation28_spill] sm:$0xff] %v15501_v27  ;;  %11483 = vmatpush3.bf16.msra.mxu0 %v13703_v13  ;;  %v2080_v13 = vld [vmem:[#allocation2 + $0x90] sm:$0xff]  ;;  %v18317_v27 = vld [vmem:[#allocation23_spill] sm:$0xff] }
 0x311   : > { %v11394_v57 = vpop.f32.mrf.mxu1  ;;  %11484 = vmatprep.subr.bf16.mxu0 %v13704_v50  ;;  %v2706_v50 = vsel %vm890_vm2, %v2080_v13, %v12552_v52  ;;  %v2081_v52 = vld [vmem:[#allocation2 + $0xa0] sm:$0xff] }
 0x312   : > { %v3085_v20 = vpack.c.bf16 %v2706_v50, %v2705_v62  ;;  %v2133_v62 = vld [vmem:[#allocation2 + $0x63] sm:$0xff] }
 0x313   : > { %v11395_v51 = vpop.f32.mrf.mxu1  ;;  %5193 = vmatmul.mubr.bf16.gmra.mxu0 %v3063_v45  ;;  %v18315_v45 = vld [vmem:[#allocation42_spill] sm:$0xff] }
 0x314   : > { %v15505_v23 = vadd.f32 %v11395_v51, %v11394_v57  ;;  %5200 = vmatprep.mubr.bf16.mxu0 %v18314_v6  ;;  %11485 = vmatpush3.bf16.msra.mxu0 %v13705_v2  ;;  %v12562_v57 = vunpack.i.h.bf16 %v18315_v45  ;;  %v12561_v51 = vunpack.i.l.bf16 %v18315_v45  ;;  %v18316_v6 = vld [vmem:[#allocation43_spill] sm:$0xff] }
 0x315   : > { %11486 = vmatprep.subr.bf16.mxu0 %v13706_v5  ;;  %v12577_v2 = vunpack.i.h.bf16 %v18316_v6  ;;  %v12576_v5 = vunpack.i.l.bf16 %v18316_v6 }
 0x316   : > { %18313 = vst [vmem:[#allocation29_spill] sm:$0xff] %v15505_v23  ;;  %v2082_v23 = vld [vmem:[#allocation2 + $0xb0] sm:$0xff]  ;;  %v2707_v17 = vsel %vm890_vm2, %v2081_v52, %v12561_v51  ;;  %v12597_v51 = vunpack.i.h.bf16 %v18319_v47 }
 0x317   : > { %v2708_v13 = vsel %vm890_vm2, %v2082_v23, %v12562_v57  ;;  %v2990_v45 = vsel %vm890_vm2, %v2133_v62, %v12577_v2  ;;  %v12596_v23 = vunpack.i.l.bf16 %v18319_v47  ;;  %v13715_v57 = vld [vmem:[#allocation7 + $0x480] sm:$0xff]   ;;  %v13716_v2 = vld [vmem:[#allocation7 + $0x5f8] sm:$0xff]   ;;  %v13992_v52 = vld [vmem:[#allocation2 + $0x51] sm:$0xff] }
 0x318   : > { %11487 = vmatpush3.bf16.msra.mxu0 %v13707_v0  ;;  %v13712_v0 = vld [vmem:[#allocation7 + $0x4c8] sm:$0xff]   ;;  %v3107_v6 = vpack.c.bf16 %v2708_v13, %v2707_v17  ;;  %v2134_v17 = vld [vmem:[#allocation2 + $0x73] sm:$0xff] }
 0x319   : > { %11488 = vmatprep.subr.bf16.mxu0 %v13708_v40  ;;  %v2132_v40 = vld [vmem:[#allocation2 + $0x53] sm:$0xff]  ;;  %v2135_v13 = vld [vmem:[#allocation2 + $0x83] sm:$0xff] }
 0x31a   : > { %v2989_v50 = vsel %vm890_vm2, %v2132_v40, %v12576_v5  ;;  %v13991_v5 = vld [vmem:[#allocation2 + $0x61] sm:$0xff]  ;;  %v2991_v40 = vsel %vm890_vm2, %v2134_v17, %v12596_v23  ;;  %v2992_v62 = vsel %vm890_vm2, %v2135_v13, %v12597_v51  ;;  %v13717_v47 = vld [vmem:[#allocation7 + $0x5b8] sm:$0xff]   ;;  %v13719_v23 = vld [vmem:[#allocation7 + $0x5b0] sm:$0xff]  }
 0x31b   : > { %5201 = vmatmul.mubr.bf16.gmra.mxu0 %v3085_v20  ;;  %v13713_v20 = vld [vmem:[#allocation7 + $0x488] sm:$0xff]   ;;  %v3045_v1 = vpack.c.bf16 %v2990_v45, %v2989_v50  ;;  %v18320_v45 = vld [vmem:[#allocation46_spill] sm:$0xff] }
 0x31c   : > { %5208 = vmatprep.mubr.bf16.mxu0 %v18317_v27  ;;  %11489 = vmatpush3.bf16.msra.mxu0 %v13709_v35  ;;  %v13714_v27 = vld [vmem:[#allocation7 + $0x4c0] sm:$0xff]   ;;  %v13720_v51 = vld [vmem:[#allocation7 + $0x5e8] sm:$0xff]  }
 0x31d   : > { %11490 = vmatprep.subr.bf16.mxu0 %v13710_v30  ;;  %v18318_v35 = vld [vmem:[#allocation44_spill] sm:$0xff] }
 0x31e   : > { %v12582_v34 = vunpack.i.h.bf16 %v18318_v35  ;;  %v12581_v30 = vunpack.i.l.bf16 %v18318_v35 }
 0x320   : > { %11491 = vmatpush3.bf16.msra.mxu0 %v13711_v8  ;;  %v2982_v8 = vsel %vm890_vm2, %v13991_v5, %v12582_v34  ;;  %v18321_v34 = vld [vmem:[#allocation47_spill] sm:$0xff] }
 0x321   : > { %11492 = vmatprep.subr.bf16.mxu0 %v13712_v0  ;;  %v2981_v0 = vsel %vm890_vm2, %v13992_v52, %v12581_v30  ;;  %v12612_v35 = vunpack.i.h.bf16 %v18321_v34  ;;  %v12611_v30 = vunpack.i.l.bf16 %v18321_v34  ;;  %v2136_v52 = vld [vmem:[#allocation2 + $0x93] sm:$0xff] }
 0x322   : > { %v3044_v50 = vpack.c.bf16 %v2982_v8, %v2981_v0  ;;  %v2137_v0 = vld [vmem:[#allocation2 + $0xa3] sm:$0xff]  ;;  %v2138_v34 = vld [vmem:[#allocation2 + $0xb3] sm:$0xff] }
 0x323   : > { %5209 = vmatmul.mubr.bf16.gmra.mxu0 %v3107_v6  ;;  %v12601_v6 = vunpack.i.l.bf16 %v18320_v45  ;;  %v2993_v17 = vsel %vm890_vm2, %v2136_v52, %v12611_v30  ;;  %v2994_v13 = vsel %vm890_vm2, %v2137_v0, %v12612_v35  ;;  %v13723_v30 = vld [vmem:[#allocation7 + $0x5a0] sm:$0xff]   ;;  %v13724_v35 = vld [vmem:[#allocation7 + $0x5d8] sm:$0xff]   ;;  %v12642_v52 = vunpack.i.h.bf16 %v15246_v16 }
 0x324   : > { %11493 = vmatpush3.bf16.msra.mxu0 %v13713_v20  ;;  %5314 = vmatprep.mubr.bf16.mxu0 %v3045_v1  ;;  %v13718_v1 = vld [vmem:[#allocation7 + $0x5f0] sm:$0xff]   ;;  %v12602_v20 = vunpack.i.h.bf16 %v18320_v45  ;;  %v18322_v45 = vld [vmem:[#allocation48_spill] sm:$0xff]  ;;  %v12641_v0 = vunpack.i.l.bf16 %v15246_v16  ;;  %v13728_v16 = vld [vmem:[#allocation7 + $0x5c8] sm:$0xff]  }
 0x325   : > { %11494 = vmatprep.subr.bf16.mxu0 %v13714_v27  ;;  %v3067_v27 = vpack.c.bf16 %v2992_v62, %v2991_v40  ;;  %v13721_v40 = vld [vmem:[#allocation7 + $0x5a8] sm:$0xff]   ;;  %v12637_v62 = vunpack.i.h.bf16 %v15214_v12 }
 0x328   : > { %11495 = vmatpush3.bf16.msra.mxu0 %v13715_v57  ;;  %v13993_v57 = vld [vmem:[#allocation2 + $0x71] sm:$0xff] }
 0x329   : > { %11560 = vmatprep.subr.bf16.mxu0 %v13716_v2  ;;  %v2983_v5 = vsel %vm890_vm2, %v13993_v57, %v12601_v6  ;;  %v13994_v2 = vld [vmem:[#allocation2 + $0x81] sm:$0xff]  ;;  %v12622_v6 = vunpack.i.h.bf16 %v18322_v45 }
 0x32a   : > { %v2984_v8 = vsel %vm890_vm2, %v13994_v2, %v12602_v20  ;;  %v3089_v20 = vpack.c.bf16 %v2994_v13, %v2993_v17  ;;  %v13995_v57 = vld [vmem:[#allocation2 + $0xc3] sm:$0xff]  ;;  %v12655_v17 = vpop.permute.xlu0 %12654  ;;  %v13725_v13 = vld [vmem:[#allocation7 + $0x598] sm:$0xff]  }
 0x32b   : > { %5315 = vmatmul.mubr.bf16.vlgmr.msra.gmra.mxu0 %v3044_v50  ;;  %v3066_v50 = vpack.c.bf16 %v2984_v8, %v2983_v5  ;;  %v13996_v5 = vld [vmem:[#allocation2 + $0x91] sm:$0xff]  ;;  %v13997_v2 = vld [vmem:[#allocation2 + $0xa1] sm:$0xff] }
 0x32c   : > { %5322 = vmatprep.mubr.bf16.mxu0 %v3067_v27  ;;  %11561 = vmatpush3.bf16.msra.mxu0 %v13717_v47  ;;  %v12636_v47 = vunpack.i.l.bf16 %v15214_v12  ;;  %v12621_v27 = vunpack.i.l.bf16 %v18322_v45  ;;  %v2996_v12 = vsel %vm890_vm2, %v13995_v57, %v12637_v62  ;;  %v2986_v8 = vsel %vm890_vm2, %v13997_v2, %v12622_v6  ;;  %v2123_v45 = vld [vmem:[#allocation2 + $0xc1] sm:$0xff]  ;;  %v2198_v57 = vld [vmem:[#allocation2 + $0x74] sm:$0xff]  ;;  %v13729_v2 = vld [vmem:[#allocation7 + $0x588] sm:$0xff]  }
 0x32d   : > { %11562 = vmatprep.subr.bf16.mxu0 %v13718_v1  ;;  %v13722_v1 = vld [vmem:[#allocation7 + $0x5e0] sm:$0xff]   ;;  %v12657_v62 = vunpack.i.h.bf16 %v12655_v17 }
 0x330   : > { %11563 = vmatpush3.bf16.msra.mxu0 %v13719_v23  ;;  %v2995_v23 = vsel %vm890_vm2, %v2138_v34, %v12636_v47  ;;  %v13726_v47 = vld [vmem:[#allocation7 + $0x5d0] sm:$0xff]   ;;  %v2988_v34 = vsel %vm890_vm2, %v2123_v45, %v12642_v52 }
 0x331   : > { %11564 = vmatprep.subr.bf16.mxu0 %v13720_v51  ;;  %v2985_v51 = vsel %vm890_vm2, %v13996_v5, %v12621_v27  ;;  %v13727_v27 = vld [vmem:[#allocation7 + $0x590] sm:$0xff]   ;;  %v3022_v5 = vsel %vm890_vm2, %v2198_v57, %v12657_v62 }
 0x333   : > { %5323 = vmatmul.mubr.bf16.gmra.mxu0 %v3066_v50  ;;  %v3088_v50 = vpack.c.bf16 %v2986_v8, %v2985_v51  ;;  %v12665_v51 = vpop.permute.xlu0 %12664  ;;  %v13730_v8 = vld [vmem:[#allocation7 + $0x5c0] sm:$0xff]  }
 0x334   : > { %5330 = vmatprep.mubr.bf16.mxu0 %v3089_v20  ;;  %11565 = vmatpush3.bf16.msra.mxu0 %v13721_v40  ;;  %v3111_v40 = vpack.c.bf16 %v2996_v12, %v2995_v23  ;;  %v12656_v20 = vunpack.i.l.bf16 %v12655_v17  ;;  %v12660_v23 = vpop.permute.xlu1 %12659  ;;  %v12666_v52 = vunpack.i.l.bf16 %v12665_v51 }
 0x335   : > { %11566 = vmatprep.subr.bf16.mxu0 %v13722_v1  ;;  %v2122_v1 = vld [vmem:[#allocation2 + $0xb1] sm:$0xff]  ;;  %v12662_v17 = vunpack.i.h.bf16 %v12660_v23 }
 0x336   : > { %v2987_v6 = vsel %vm890_vm2, %v2122_v1, %v12641_v0  ;;  %v2182_v1 = vld [vmem:[#allocation2 + $0x72] sm:$0xff] }
 0x337   : > { %v3110_v12 = vpack.c.bf16 %v2988_v34, %v2987_v6  ;;  %v3014_v45 = vsel %vm890_vm2, %v2182_v1, %v12662_v17  ;;  %v2184_v17 = vld [vmem:[#allocation2 + $0x92] sm:$0xff] }
 0x338   : > { %11567 = vmatpush3.bf16.msra.mxu0 %v13723_v30  ;;  %v2197_v30 = vld [vmem:[#allocation2 + $0x64] sm:$0xff]  ;;  %v12670_v6 = vpop.permute.xlu1 %12669 }
 0x339   : > { %11568 = vmatprep.subr.bf16.mxu0 %v13724_v35  ;;  %v3021_v35 = vsel %vm890_vm2, %v2197_v30, %v12656_v20  ;;  %v2199_v20 = vld [vmem:[#allocation2 + $0x84] sm:$0xff]  ;;  %v12675_v30 = vpop.permute.xlu0 %12674 }
 0x33a   : > { %v3049_v0 = vpack.c.bf16 %v3022_v5, %v3021_v35  ;;  %v3023_v34 = vsel %vm890_vm2, %v2199_v20, %v12666_v52  ;;  %v12677_v5 = vunpack.i.h.bf16 %v12675_v30 }
 0x33b   : > { %5331 = vmatmul.mubr.bf16.gmra.mxu0 %v3088_v50  ;;  %v13731_v50 = vld [vmem:[#allocation7 + $0x580] sm:$0xff]  }
 0x33c   : > { %11569 = vmatpush3.bf16.msra.mxu0 %v13725_v13  ;;  %5338 = vmatprep.mubr.bf16.mxu0 %v3111_v40  ;;  %v12661_v13 = vunpack.i.l.bf16 %v12660_v23  ;;  %v12667_v40 = vunpack.i.h.bf16 %v12665_v51  ;;  %v12672_v23 = vunpack.i.h.bf16 %v12670_v6  ;;  %v12676_v51 = vunpack.i.l.bf16 %v12675_v30 }
 0x33d   : > { %11570 = vmatprep.subr.bf16.mxu0 %v13726_v47  ;;  %v2181_v47 = vld [vmem:[#allocation2 + $0x62] sm:$0xff] }
 0x33e   : > { %v3013_v62 = vsel %vm890_vm2, %v2181_v47, %v12661_v13  ;;  %v12685_v47 = vpop.permute.xlu0 %12684 }
 0x33f   : > { %v3048_v57 = vpack.c.bf16 %v3014_v45, %v3013_v62 }
 0x340   : > { %11571 = vmatpush3.bf16.msra.mxu0 %v13727_v27  ;;  %v2200_v27 = vld [vmem:[#allocation2 + $0x94] sm:$0xff] }
 0x341   : > { %11572 = vmatprep.subr.bf16.mxu0 %v13728_v16  ;;  %v3024_v16 = vsel %vm890_vm2, %v2200_v27, %v12667_v40  ;;  %v2201_v40 = vld [vmem:[#allocation2 + $0xa4] sm:$0xff]  ;;  %v12687_v27 = vunpack.i.h.bf16 %v12685_v47 }
 0x342   : > { %v3071_v35 = vpack.c.bf16 %v3024_v16, %v3023_v34  ;;  %v3025_v1 = vsel %vm890_vm2, %v2201_v40, %v12676_v51 }
 0x343   : > { %5339 = vmatmul.mubr.bf16.gmra.mxu0 %v3110_v12  ;;  %v12671_v12 = vunpack.i.l.bf16 %v12670_v6  ;;  %v12686_v6 = vunpack.i.l.bf16 %v12685_v47 }
 0x344   : > { %11573 = vmatpush3.bf16.msra.mxu0 %v13729_v2  ;;  %5444 = vmatprep.mubr.bf16.mxu0 %v3049_v0  ;;  %v2202_v2 = vld [vmem:[#allocation2 + $0xb4] sm:$0xff]  ;;  %v3016_v0 = vsel %vm890_vm2, %v2184_v17, %v12672_v23 }
 0x345   : > { %11574 = vmatprep.subr.bf16.mxu0 %v13730_v8  ;;  %v2183_v8 = vld [vmem:[#allocation2 + $0x82] sm:$0xff]  ;;  %v3026_v45 = vsel %vm890_vm2, %v2202_v2, %v12677_v5  ;;  %v2186_v23 = vld [vmem:[#allocation2 + $0xb2] sm:$0xff] }
 0x346   : > { %v3015_v52 = vsel %vm890_vm2, %v2183_v8, %v12671_v12  ;;  %v3093_v30 = vpack.c.bf16 %v3026_v45, %v3025_v1  ;;  %v2185_v12 = vld [vmem:[#allocation2 + $0xa2] sm:$0xff] }
 0x347   : > { %v3070_v20 = vpack.c.bf16 %v3016_v0, %v3015_v52  ;;  %v2187_v45 = vld [vmem:[#allocation2 + $0xc2] sm:$0xff] }
 0x348   : > { %11575 = vmatpush3.bf16.msra.mxu0 %v13731_v50  ;;  %v12680_v50 = vpop.permute.xlu1 %12679 }
 0x349   : > { %v12682_v34 = vunpack.i.h.bf16 %v12680_v50  ;;  %v12681_v16 = vunpack.i.l.bf16 %v12680_v50 }
 0x34b   : > { %5445 = vmatmul.mubr.bf16.vlgmr.msra.gmra.mxu0 %v3048_v57  ;;  %v15553_v13 = vpop.f32.mrf.mxu0  ;;  %v2203_v57 = vld [vmem:[#allocation2 + $0xc4] sm:$0xff]  ;;  %v3018_v2 = vsel %vm890_vm2, %v2186_v23, %v12682_v34  ;;  %v3017_v0 = vsel %vm890_vm2, %v2185_v12, %v12681_v16 }
 0x34c   : > { %5452 = vmatprep.mubr.bf16.mxu0 %v3071_v35  ;;  %18323 = vst [vmem:[#allocation31_spill] sm:$0xff] %v15553_v13  ;;  %v2204_v35 = vld [vmem:[#allocation2 + $0xd4] sm:$0xff]  ;;  %v12690_v17 = vpop.permute.xlu1 %12689  ;;  %v3027_v51 = vsel %vm890_vm2, %v2203_v57, %v12686_v6  ;;  %v3092_v1 = vpack.c.bf16 %v3018_v2, %v3017_v0  ;;  %v11141_v2 = vadd.f32 %v15319_v15, %v15317_v43 }
 0x34d   : > { %v15559_v62 = vpop.f32.mrf.mxu0  ;;  %v3028_v5 = vsel %vm890_vm2, %v2204_v35, %v12687_v27  ;;  %v12692_v52 = vunpack.i.h.bf16 %v12690_v17  ;;  %v12691_v40 = vunpack.i.l.bf16 %v12690_v17  ;;  %v11147_v43 = vadd.f32 %v15331_v61, %v15329_v38 }
 0x34e   : > { %18324 = vst [vmem:[#allocation30_spill] sm:$0xff] %v15559_v62  ;;  %v3115_v47 = vpack.c.bf16 %v3028_v5, %v3027_v51  ;;  %v13741_v62 = vld [vmem:[%s18140_s11 + $0x18] sm:$0xff]  }
 0x34f   : > { %v15561_v8 = vpop.f32.mrf.mxu0 }
 0x350   : > { %18325 = vst [vmem:[#allocation34_spill] sm:$0xff] %v15561_v8  ;;  %v3019_v8 = vsel %vm890_vm2, %v2187_v45, %v12691_v40  ;;  %v11221_v40 = vadd.f32 %v15374_v37, %v15370_v4  ;;  %v11227_v4 = vadd.f32 %v15388_v26, %v15386_v11 }
 0x351   : > { %v15567_v50 = vpop.f32.mrf.mxu0 }
 0x352   : > { %18326 = vst [vmem:[#allocation33_spill] sm:$0xff] %v15567_v50 }
 0x353   : > { %5453 = vmatmul.mubr.bf16.gmra.mxu0 %v3070_v20  ;;  %v2188_v20 = vld [vmem:[#allocation2 + $0xd2] sm:$0xff]  ;;  %v15571_v6 = vpop.f32.mrf.mxu0 }
 0x354   : > { %5460 = vmatprep.mubr.bf16.mxu0 %v3093_v30  ;;  %v3020_v30 = vsel %vm890_vm2, %v2188_v20, %v12692_v52  ;;  %18327 = vst [vmem:[#allocation32_spill] sm:$0xff] %v15571_v6  ;;  %v13739_v6 = vld [vmem:[%s18140_s11 + $0x20] sm:$0xff]  }
 0x355   : > { %v3114_v27 = vpack.c.bf16 %v3020_v30, %v3019_v8  ;;  %v15573_v34 = vpop.f32.mrf.mxu0 }
 0x356   : > { %18328 = vst [vmem:[#allocation35_spill] sm:$0xff] %v15573_v34 }
 0x357   : > { %v15575_v16 = vpop.f32.mrf.mxu0 }
 0x358   : > { %18329 = vst [vmem:[#allocation15_spill] sm:$0xff] %v15575_v16 }
 0x359   : > { %v15577_v57 = vpop.f32.mrf.mxu0 }
 0x35a   : > { %18330 = vst [vmem:[#allocation14_spill] sm:$0xff] %v15577_v57 }
 0x35b   : > { %5461 = vmatmul.mubr.bf16.gmra.mxu0 %v3092_v1 }
 0x35c   : > { %5468 = vmatprep.mubr.bf16.mxu0 %v3115_v47 }
 0x363   : > { %5469 = vmatmul.mubr.bf16.gmra.mxu0 %v3114_v27 }
 0x36b   : > { %v11176_v35 = vpop.f32.mrf.mxu0 }
 0x36d   : > { %v11177_v23 = vpop.f32.mrf.mxu0 }
 0x36e   : > { %v11178_v12 = vadd.f32 %v11177_v23, %v11176_v35 }
 0x36f   : > { %v11179_v17 = vpop.f32.mrf.mxu0 }
 0x370   : > { %v4797_v51 = vadd.f32 %v11178_v12, %v15315_v42  ;;  %v18331_v12 = vmov 0.0  }
 0x371   : > { %v11180_v5 = vpop.f32.mrf.mxu0  ;;  %932 = vst.msk [vmem:[#allocation3 + $0x8] sm:$0x3f] %vm931_vm5, %v18331_v12  ;;  %934 = vst.msk [vmem:[#allocation3 + $0x18] sm:$0x3f] %vm931_vm5, %v18331_v12 }
 0x372   : > { %v11181_v0 = vadd.f32 %v11180_v5, %v11179_v17  ;;  %v15583_v8 = vadd.f32 %v15368_v3, %v4797_v51  ;;  %936 = vst.msk [vmem:[#allocation3 + $0x28] sm:$0x3f] %vm931_vm5, %v18331_v12  ;;  %938 = vst.msk [vmem:[#allocation3 + $0x38] sm:$0x3f] %vm931_vm5, %v18331_v12  ;;  %v11153_v17 = vadd.f32 %v15343_v59, %v15339_v36 }
 0x373   : > { %v11182_v52 = vpop.f32.mrf.mxu0  ;;  %940 = vst.msk [vmem:[#allocation3 + $0x48] sm:$0x3f] %vm931_vm5, %v18331_v12  ;;  %942 = vst.msk [vmem:[#allocation3 + $0x58] sm:$0x3f] %vm931_vm5, %v18331_v12 }
 0x374   : > { %v4800_v47 = vadd.f32 %v11181_v0, %v11141_v2  ;;  %944 = vst.msk [vmem:[#allocation3 + $0x68] sm:$0x3f] %vm931_vm5, %v18331_v12  ;;  %946 = vst.msk [vmem:[#allocation3 + $0x78] sm:$0x3f] %vm931_vm5, %v18331_v12  ;;  %v11233_v0 = vadd.f32 %v15400_v18, %v15396_v44 }
 0x375   : > { %v11183_v1 = vpop.f32.mrf.mxu0  ;;  %948 = vst.msk [vmem:[#allocation3 + $0x88] sm:$0x3f] %vm931_vm5, %v18331_v12  ;;  %950 = vst.msk [vmem:[#allocation3 + $0x98] sm:$0x3f] %vm931_vm5, %v18331_v12 }
 0x376   : > { %v11184_v45 = vadd.f32 %v11183_v1, %v11182_v52  ;;  %v15587_v20 = vadd.f32 %v11221_v40, %v4800_v47  ;;  %952 = vst.msk [vmem:[#allocation3 + $0xa8] sm:$0x3f] %vm931_vm5, %v18331_v12  ;;  %954 = vst.msk [vmem:[#allocation3 + $0xb8] sm:$0x3f] %vm931_vm5, %v18331_v12 }
 0x377   : > { %v11185_v30 = vpop.f32.mrf.mxu0  ;;  %956 = vst.msk [vmem:[#allocation3 + $0xc8] sm:$0x3f] %vm931_vm5, %v18331_v12  ;;  %958 = vst.msk [vmem:[#allocation3 + $0xd8] sm:$0x3f] %vm931_vm5, %v18331_v12  ;;  %v15638_v12 = vld [vmem:[#allocation3 + $0x10] sm:$0xff] }
 0x378   : > { %v4805_v42 = vadd.f32 %v11184_v45, %v15327_v31  ;;  %v5629_v47 = vld [vmem:[#allocation3 + $0x5] sm:$0xff]  ;;  %v5630_v1 = vld [vmem:[#allocation3 + $0x15] sm:$0xff] }
 0x379   : > { %v11186_v27 = vpop.f32.mrf.mxu0  ;;  %v5597_v45 = vld [vmem:[#allocation3 + $0x1] sm:$0xff] }
 0x37a   : > { %v11187_v15 = vadd.f32 %v11186_v27, %v11185_v30  ;;  %v15593_v3 = vadd.f32 %v15384_v48, %v4805_v42  ;;  %v15613_v48 = vpop.f32.mrf.mxu1  ;;  %v5598_v42 = vld [vmem:[#allocation3 + $0x11] sm:$0xff]  ;;  %v5637_v27 = vld [vmem:[#allocation3 + $0x6] sm:$0xff] }
 0x37b   : > { %v11188_v35 = vpop.f32.mrf.mxu0 }
 0x37c   : > { %v4808_v37 = vadd.f32 %v11187_v15, %v11147_v43  ;;  %v15623_v52 = vpop.f32.mrf.mxu1  ;;  %v15625_v43 = vld [vmem:[#allocation3 + $0x16] sm:$0xff]  ;;  %v5605_v15 = vld [vmem:[#allocation3 + $0x2] sm:$0xff] }
 0x37d   : > { %v11189_v23 = vpop.f32.mrf.mxu0  ;;  %v12703_v18 = vpack.i.bf16 %v15625_v43, %v5637_v27 }
 0x37e   : > { %v11190_v31 = vadd.f32 %v11189_v23, %v11188_v35  ;;  %v15611_v38 = vadd.f32 %v11227_v4, %v4808_v37  ;;  %v15629_v35 = vld [vmem:[#allocation3 + $0x12] sm:$0xff]  ;;  %v15633_v4 = vpop.f32.mrf.mxu1 }
 0x37f   : > { %v11191_v61 = vpop.f32.mrf.mxu0  ;;  %v12708_v23 = vpack.i.bf16 %v15629_v35, %v5605_v15 }
 0x380   : > { %v4813_v11 = vadd.f32 %v11190_v31, %v15337_v10  ;;  %v12693_v10 = vpack.i.bf16 %v5630_v1, %v5629_v47  ;;  %v15640_v31 = vld [vmem:[#allocation3 + $0x20] sm:$0xff]  ;;  %v15654_v47 = vpop.f32.mrf.mxu1 }
 0x381   : > { %v11192_v26 = vpop.f32.mrf.mxu0  ;;  %18332 = vst [vmem:[#allocation36_spill] sm:$0xff] %v15640_v31 }
 0x382   : > { %v11193_v51 = vadd.f32 %v11192_v26, %v11191_v61  ;;  %v15619_v5 = vadd.f32 %v15394_v24, %v4813_v11  ;;  %v12698_v24 = vpack.i.bf16 %v5598_v42, %v5597_v45  ;;  %12694 = vrot.lane.b32.xlu0 %v12693_v10, %s14105_s26  ;;  %v5613_v11 = vld [vmem:[#allocation3 + $0x3] sm:$0xff]  ;;  %v15642_v26 = vld [vmem:[#allocation3 + $0x13] sm:$0xff]  ;;  %v15661_v10 = vpop.f32.mrf.mxu1 }
 0x383   : > { %v11194_v2 = vpop.f32.mrf.mxu0 }
 0x384   : > { %v4816_v40 = vadd.f32 %v11193_v51, %v11153_v17  ;;  %12699 = vrot.lane.b32.xlu1 %v12698_v24, %s14105_s26  ;;  %v11159_v17 = vadd.f32 %v15358_v7, %v15354_v53  ;;  %v12718_v53 = vpack.i.bf16 %v15642_v26, %v5613_v11  ;;  %v11301_v24 = vadd.f32 %v15426_v21, %v15422_v14  ;;  %v15670_v15 = vpop.f32.mrf.mxu1  ;;  %v5896_v14 = vld [vmem:[#allocation3 + $0xc2] sm:$0xff] }
 0x385   : > { %v11195_v30 = vpop.f32.mrf.mxu0  ;;  %v15681_v21 = vld [vmem:[#allocation3 + $0x26] sm:$0xff] }
 0x386   : > { %v11196_v36 = vadd.f32 %v11195_v30, %v11194_v2  ;;  %v15627_v59 = vadd.f32 %v11233_v0, %v4816_v40  ;;  %12704 = vrot.lane.b32.xlu0 %v12703_v18, %s14104_s1  ;;  %v12713_v0 = vpack.i.bf16 %v15640_v31, %v15638_v12  ;;  %v11239_v40 = vadd.f32 %v15413_v54, %v15409_v60  ;;  %v13743_v31 = vld [vmem:[%s18140_s11 + $0x10] sm:$0xff]  }
 0x387   : > { %v11197_v44 = vpop.f32.mrf.mxu0  ;;  %18333 = vst [vmem:[#allocation13_spill] sm:$0xff] %v15681_v21 }
 0x388   : > { %v4821_v37 = vadd.f32 %v11196_v36, %v15349_v49  ;;  %12709 = vrot.lane.b32.xlu1 %v12708_v23, %s14104_s1 }
 0x389   : > { %v11198_v61 = vpop.f32.mrf.mxu0 }
 0x38a   : > { %v11199_v51 = vadd.f32 %v11198_v61, %v11197_v44  ;;  %v15647_v2 = vadd.f32 %v15404_v63, %v4821_v37  ;;  %12714 = vrot.lane.b32.xlu0 %v12713_v0, %s14106_s27  ;;  %v15675_v61 = vpop.f32.mrf.mxu1 }
 0x38b   : > { %v11256_v49 = vpop.f32.mrf.mxu0 }
 0x38c   : > { %v4824_v1 = vadd.f32 %v11199_v51, %v11159_v17  ;;  %12719 = vrot.lane.b32.xlu1 %v12718_v53, %s14106_s27  ;;  %v15687_v53 = vpop.f32.mrf.mxu1 }
 0x38d   : > { %v11257_v7 = vpop.f32.mrf.mxu0 }
 0x38e   : > { %v11258_v45 = vadd.f32 %v11257_v7, %v11256_v49  ;;  %v15658_v63 = vadd.f32 %v11239_v40, %v4824_v1  ;;  %v5895_v49 = vld [vmem:[#allocation3 + $0xb2] sm:$0xff]  ;;  %v12723_v40 = vpack.i.bf16 %v15681_v21, %v15625_v43  ;;  %v11307_v1 = vadd.f32 %v15439_v46, %v15435_v56  ;;  %v15698_v46 = vpop.f32.mrf.mxu1  ;;  %v13745_v21 = vld [vmem:[%s18140_s11 + $0x8] sm:$0xff]  }
 0x38f   : > { %v11259_v30 = vpop.f32.mrf.mxu0 }
 0x390   : > { %v4927_v42 = vadd.f32 %v11258_v45, %v15583_v8  ;;  %12724 = vrot.lane.b32.xlu1 %v12723_v40, %s14105_s26  ;;  %v15719_v40 = vld [vmem:[#allocation3 + $0x24] sm:$0xff] }
 0x391   : > { %v11260_v60 = vpop.f32.mrf.mxu0  ;;  %18336 = vst [vmem:[#allocation17_spill] sm:$0xff] %v15719_v40 }
 0x392   : > { %v11261_v54 = vadd.f32 %v11260_v60, %v11259_v30  ;;  %v15666_v27 = vadd.f32 %v15417_v29, %v4927_v42  ;;  %v5903_v30 = vld [vmem:[#allocation3 + $0xb3] sm:$0xff]  ;;  %v5904_v42 = vld [vmem:[#allocation3 + $0xc3] sm:$0xff] }
 0x393   : > { %v11262_v36 = vpop.f32.mrf.mxu0  ;;  %v15694_v60 = vld [vmem:[#allocation3 + $0x22] sm:$0xff] }
 0x394   : > { %v4930_v44 = vadd.f32 %v11261_v54, %v15587_v20  ;;  %v12743_v20 = vpack.i.bf16 %v5896_v14, %v5895_v49  ;;  %18334 = vst [vmem:[#allocation12_spill] sm:$0xff] %v15694_v60  ;;  %v12748_v54 = vpack.i.bf16 %v5904_v42, %v5903_v30  ;;  %v12728_v56 = vpack.i.bf16 %v15694_v60, %v15629_v35 }
 0x395   : > { %v11263_v18 = vpop.f32.mrf.mxu0 }
 0x396   : > { %v11264_v37 = vadd.f32 %v11263_v18, %v11262_v36  ;;  %v15673_v23 = vadd.f32 %v11301_v24, %v4930_v44  ;;  %12744 = vrot.lane.b32.xlu0 %v12743_v20, %s14105_s26  ;;  %12729 = vrot.lane.b32.xlu1 %v12728_v56, %s14105_s26  ;;  %v5911_v18 = vld [vmem:[#allocation3 + $0xb4] sm:$0xff] }
 0x397   : > { %v11265_v8 = vpop.f32.mrf.mxu0  ;;  %v15717_v20 = vld [vmem:[#allocation3 + $0x14] sm:$0xff] }
 0x398   : > { %v4935_v11 = vadd.f32 %v11264_v37, %v15593_v3  ;;  %v5912_v37 = vld [vmem:[#allocation3 + $0xc4] sm:$0xff] }
 0x399   : > { %v11266_v17 = vpop.f32.mrf.mxu0 }
 0x39a   : > { %v11267_v29 = vadd.f32 %v11266_v17, %v11265_v8  ;;  %v15679_v51 = vadd.f32 %v15430_v32, %v4935_v11  ;;  %12749 = vrot.lane.b32.xlu0 %v12748_v54, %s14104_s1  ;;  %v15706_v8 = vld [vmem:[#allocation3 + $0x23] sm:$0xff]  ;;  %v12753_v17 = vpack.i.bf16 %v5912_v37, %v5911_v18  ;;  %v11319_v54 = vadd.f32 %v15466_v55, %v15462_v58 }
 0x39b   : > { %v11268_v0 = vpop.f32.mrf.mxu0  ;;  %18335 = vst [vmem:[#allocation37_spill] sm:$0xff] %v15706_v8  ;;  %v12733_v35 = vpack.i.bf16 %v15706_v8, %v15642_v26  ;;  %v11381_v58 = vadd.f32 %v15479_v22, %v15475_v28  ;;  %v18340_v28 = vld [vmem:[#allocation24_spill] sm:$0xff]  ;;  %v18341_v22 = vld [vmem:[#allocation26_spill] sm:$0xff] }
 0x39c   : > { %v4938_v3 = vadd.f32 %v11267_v29, %v15611_v38  ;;  %v15712_v29 = vpop.f32.mrf.mxu1 }
 0x39d   : > { %v11269_v7 = vpop.f32.mrf.mxu0  ;;  %12734 = vrot.lane.b32.xlu1 %v12733_v35, %s14104_s1 }
 0x39e   : > { %v11270_v32 = vadd.f32 %v11269_v7, %v11268_v0  ;;  %v15692_v45 = vadd.f32 %v11307_v1, %v4938_v3  ;;  %12754 = vrot.lane.b32.xlu0 %v12753_v17, %s14106_s27  ;;  %v5879_v1 = vld [vmem:[#allocation3 + $0xb0] sm:$0xff]  ;;  %v15723_v3 = vpop.f32.mrf.mxu1 }
 0x39f   : > { %v11271_v43 = vpop.f32.mrf.mxu0 }
 0x3a0   : > { %v4943_v38 = vadd.f32 %v11270_v32, %v15619_v5  ;;  %v11313_v5 = vadd.f32 %v15452_v19, %v15448_v39  ;;  %v12738_v39 = vpack.i.bf16 %v15719_v40, %v15717_v20  ;;  %v5880_v19 = vld [vmem:[#allocation3 + $0xc0] sm:$0xff]  ;;  %v15731_v56 = vpop.f32.mrf.mxu1 }
 0x3a1   : > { %v11272_v36 = vpop.f32.mrf.mxu0  ;;  %v12758_v7 = vpack.i.bf16 %v5880_v19, %v5879_v1 }
 0x3a2   : > { %v11273_v24 = vadd.f32 %v11272_v36, %v11271_v43  ;;  %v15704_v44 = vadd.f32 %v15443_v41, %v4943_v38  ;;  %12739 = vrot.lane.b32.xlu1 %v12738_v39, %s14106_s27  ;;  %v15734_v37 = vpop.f32.mrf.mxu1 }
 0x3a3   : > { %v11274_v11 = vpop.f32.mrf.mxu0  ;;  %12759 = vrot.lane.b32.xlu0 %v12758_v7, %s14106_s27  ;;  %18337 = vst [vmem:[#allocation16_spill] sm:$0xff] %v15734_v37  ;;  %v11387_v7 = vadd.f32 %v18341_v22, %v18340_v28  ;;  %v18349_v28 = vld [vmem:[#allocation29_spill] sm:$0xff] }
 0x3a4   : > { %v4946_v49 = vadd.f32 %v11273_v24, %v15627_v59  ;;  %v15742_v55 = vpop.f32.mrf.mxu1 }
 0x3a5   : > { %v11275_v14 = vpop.f32.mrf.mxu0  ;;  %18338 = vst [vmem:[#allocation38_spill] sm:$0xff] %v15742_v55 }
 0x3a6   : > { %v11276_v41 = vadd.f32 %v11275_v14, %v11274_v11  ;;  %v5011_v0 = vadd.f32 %v11313_v5, %v4946_v49 }
 0x3a7   : > { %v11277_v26 = vpop.f32.mrf.mxu0 }
 0x3a8   : > { %v4951_v59 = vadd.f32 %v11276_v41, %v15647_v2 }
 0x3a9   : > { %v11278_v32 = vpop.f32.mrf.mxu0 }
 0x3aa   : > { %v11279_v30 = vadd.f32 %v11278_v32, %v11277_v26  ;;  %v5016_v42 = vadd.f32 %v15457_v25, %v4951_v59  ;;  %v15747_v26 = vpop.f32.mrf.mxu1 }
 0x3ab   : > { %v11336_v43 = vpop.f32.mrf.mxu0  ;;  %18339 = vst [vmem:[#allocation20_spill] sm:$0xff] %v15747_v26 }
 0x3ac   : > { %v4954_v38 = vadd.f32 %v11279_v30, %v15658_v63  ;;  %v15755_v32 = vpop.f32.mrf.mxu1 }
 0x3ad   : > { %v11337_v36 = vpop.f32.mrf.mxu0  ;;  %18342 = vst [vmem:[#allocation19_spill] sm:$0xff] %v15755_v32 }
 0x3ae   : > { %v11338_v24 = vadd.f32 %v11337_v36, %v11336_v43  ;;  %v5019_v2 = vadd.f32 %v11319_v54, %v4954_v38  ;;  %v15760_v36 = vpop.f32.mrf.mxu1 }
 0x3af   : > { %v11339_v18 = vpop.f32.mrf.mxu0  ;;  %18343 = vst [vmem:[#allocation39_spill] sm:$0xff] %v15760_v36 }
 0x3b0   : > { %v5057_v11 = vadd.f32 %v11338_v24, %v15666_v27 }
 0x3b1   : > { %v11340_v17 = vpop.f32.mrf.mxu0 }
 0x3b2   : > { %v11341_v25 = vadd.f32 %v11340_v17, %v11339_v18  ;;  %v15738_v35 = vadd.f32 %v15470_v33, %v5057_v11  ;;  %v18344_v18 = vld [vmem:[#allocation25_spill] sm:$0xff] }
 0x3b3   : > { %v11342_v5 = vpop.f32.mrf.mxu0 }
 0x3b4   : > { %v5060_v63 = vadd.f32 %v11341_v25, %v15673_v23  ;;  %v18345_v25 = vld [vmem:[#allocation27_spill] sm:$0xff] }
 0x3b5   : > { %v11343_v49 = vpop.f32.mrf.mxu0 }
 0x3b6   : > { %v11344_v14 = vadd.f32 %v11343_v49, %v11342_v5  ;;  %v15745_v41 = vadd.f32 %v11381_v58, %v5060_v63  ;;  %v18346_v5 = vld [vmem:[#allocation28_spill] sm:$0xff]  ;;  %v15768_v63 = vpop.f32.mrf.mxu1 }
 0x3b7   : > { %v11345_v1 = vpop.f32.mrf.mxu0  ;;  %v11393_v58 = vadd.f32 %v18346_v5, %v18345_v25  ;;  %18347 = vst [vmem:[#allocation18_spill] sm:$0xff] %v15768_v63 }
 0x3b8   : > { %v5065_v27 = vadd.f32 %v11344_v14, %v15679_v51 }
 0x3b9   : > { %v11346_v39 = vpop.f32.mrf.mxu0 }
 0x3ba   : > { %v11347_v33 = vadd.f32 %v11346_v39, %v11345_v1  ;;  %v15751_v19 = vadd.f32 %v15483_v9, %v5065_v27  ;;  %v15772_v39 = vpop.f32.mrf.mxu1 }
 0x3bb   : > { %v11348_v59 = vpop.f32.mrf.mxu0 }
 0x3bc   : > { %v5068_v23 = vadd.f32 %v11347_v33, %v15692_v45 }
 0x3bd   : > { %v11349_v30 = vpop.f32.mrf.mxu0 }
 0x3be   : > { %v11350_v43 = vadd.f32 %v11349_v30, %v11348_v59  ;;  %v15758_v54 = vadd.f32 %v11387_v7, %v5068_v23  ;;  %v11399_v23 = vadd.f32 %v15623_v52, %v15613_v48  ;;  %v15781_v30 = vpop.f32.mrf.mxu1 }
 0x3bf   : > { %v11351_v38 = vpop.f32.mrf.mxu0 }
 0x3c0   : > { %v5073_v51 = vadd.f32 %v11350_v43, %v15704_v44 }
 0x3c1   : > { %v11352_v24 = vpop.f32.mrf.mxu0 }
 0x3c2   : > { %v11353_v9 = vadd.f32 %v11352_v24, %v11351_v38  ;;  %v15764_v11 = vadd.f32 %v18344_v18, %v5073_v51 }
 0x3c3   : > { %v11354_v17 = vpop.f32.mrf.mxu0 }
 0x3c4   : > { %v5076_v45 = vadd.f32 %v11353_v9, %v5011_v0 }
 0x3c5   : > { %v11355_v49 = vpop.f32.mrf.mxu0 }
 0x3c6   : > { %v11356_v14 = vadd.f32 %v11355_v49, %v11354_v17  ;;  %v15770_v1 = vadd.f32 %v11393_v58, %v5076_v45  ;;  %v13732_v45 = vld [vmem:[%s18140_s11 + $0x78] sm:$0xff]  }
 0x3c7   : > { %v11357_v27 = vpop.f32.mrf.mxu0  ;;  %v13733_v49 = vld [vmem:[%s18140_s11 + $0x38] sm:$0xff]   ;;  %11608 = vmatprep.subr.bf16.mxu0 %v13732_v45  ;;  %v13736_v45 = vld [vmem:[%s18140_s11 + $0x68] sm:$0xff]  }
 0x3c8   : > { %18348 = vst [vmem:[#allocation40_spill] sm:$0xff] %v15770_v1  ;;  %v5081_v44 = vadd.f32 %v11356_v14, %v5016_v42  ;;  %v15789_v42 = vpop.f32.mrf.mxu1  ;;  %11609 = vmatpush3.bf16.msra.mxu0 %v13733_v49  ;;  %v13737_v49 = vld [vmem:[%s18140_s11 + $0x28] sm:$0xff]  }
 0x3c9   : > { %v11358_v33 = vpop.f32.mrf.mxu0 }
 0x3ca   : > { %v11359_v59 = vadd.f32 %v11358_v33, %v11357_v27  ;;  %v15775_v22 = vadd.f32 %v18349_v28, %v5081_v44  ;;  %v15795_v18 = vpop.f32.mrf.mxu1  ;;  %v13734_v33 = vld [vmem:[%s18140_s11 + $0x70] sm:$0xff]  }
 0x3cb   : > { %v15777_v7 = vpop.f32.mrf.mxu0  ;;  %11610 = vmatprep.subr.bf16.mxu0 %v13734_v33 }
 0x3cc   : > { %18350 = vst [vmem:[#allocation21_spill] sm:$0xff] %v15775_v22  ;;  %v5084_v0 = vadd.f32 %v11359_v59, %v5019_v2  ;;  %v15801_v52 = vpop.f32.mrf.mxu1  ;;  %v13735_v59 = vld [vmem:[%s18140_s11 + $0x30] sm:$0xff]  }
 0x3cd   : > { %v15783_v43 = vpop.f32.mrf.mxu0  ;;  %11611 = vmatpush3.bf16.msra.mxu0 %v13735_v59  ;;  %v13738_v59 = vld [vmem:[%s18140_s11 + $0x60] sm:$0xff]  }
 0x3ce   : > { %v15785_v38 = vadd.f32 %v11399_v23, %v5084_v0  ;;  %v15807_v5 = vpop.f32.mrf.mxu1  ;;  %11612 = vmatprep.subr.bf16.mxu0 %v13736_v45 }
 0x3cf   : > { %v15787_v51 = vpop.f32.mrf.mxu0 }
 0x3d0   : > { %18351 = vst [vmem:[#allocation41_spill] sm:$0xff] %v15785_v38  ;;  %v15819_v27 = vpop.f32.mrf.mxu1 }
 0x3d1   : > { %v15791_v24 = vpop.f32.mrf.mxu0  ;;  %18352 = vst [vmem:[#allocation22_spill] sm:$0xff] %v15819_v27  ;;  %11613 = vmatpush3.bf16.msra.mxu0 %v13737_v49  ;;  %v13740_v49 = vld [vmem:[%s18140_s11 + $0x58] sm:$0xff]   ;;  %v11418_v27 = vadd.f32 %v15783_v43, %v15777_v7 }
 0x3d2   : > { %v15831_v23 = vpop.f32.mrf.mxu1  ;;  %11614 = vmatprep.subr.bf16.mxu0 %v13738_v59  ;;  %v11421_v43 = vadd.f32 %v15791_v24, %v15787_v51 }
 0x3d3   : > { %v15793_v9 = vpop.f32.mrf.mxu0  ;;  %18354 = vst [vmem:[#allocation43_spill] sm:$0xff] %v15831_v23  ;;  %v5187_v7 = vadd.f32 %v11418_v27, %v15738_v35 }
 0x3d4   : > { %v15843_v57 = vpop.f32.mrf.mxu1 }
 0x3d5   : > { %v15797_v17 = vpop.f32.mrf.mxu0  ;;  %18357 = vst [vmem:[#allocation45_spill] sm:$0xff] %v15843_v57  ;;  %11615 = vmatpush3.bf16.msra.mxu0 %v13739_v6  ;;  %v13742_v6 = vld [vmem:[%s18140_s11 + $0x50] sm:$0xff]  }
 0x3d6   : > { %v15855_v50 = vpop.f32.mrf.mxu1  ;;  %11616 = vmatprep.subr.bf16.mxu0 %v13740_v49  ;;  %v11424_v24 = vadd.f32 %v15797_v17, %v15793_v9 }
 0x3d7   : > { %v15799_v48 = vpop.f32.mrf.mxu0  ;;  %18359 = vst [vmem:[#allocation47_spill] sm:$0xff] %v15855_v50 }
 0x3d8   : > { %v15867_v40 = vpop.f32.mrf.mxu1  ;;  %v5195_v9 = vadd.f32 %v11424_v24, %v15751_v19  ;;  %v13749_v19 = vld [vmem:[%s18140_s11 + $0xb8] sm:$0xff]  }
 0x3d9   : > { %v15803_v2 = vpop.f32.mrf.mxu0  ;;  %18360 = vst [vmem:[#allocation48_spill] sm:$0xff] %v15867_v40  ;;  %11617 = vmatpush3.bf16.msra.mxu0 %v13741_v62  ;;  %v13744_v62 = vld [vmem:[%s18140_s11 + $0x48] sm:$0xff]  }
 0x3da   : > { %11618 = vmatprep.subr.bf16.mxu0 %v13742_v6  ;;  %v15879_v60 = vpop.f32.mrf.mxu1  ;;  %v11427_v17 = vadd.f32 %v15803_v2, %v15799_v48 }
 0x3db   : > { %v15805_v25 = vpop.f32.mrf.mxu0  ;;  %18361 = vst [vmem:[#allocation24_spill] sm:$0xff] %v15879_v60  ;;  %v13747_v60 = vld [vmem:[%s18140_s11] sm:$0xff]  }
 0x3dc   : > { %v15891_v36 = vpop.f32.mrf.mxu1 }
 0x3dd   : > { %v15809_v58 = vpop.f32.mrf.mxu0  ;;  %11619 = vmatpush3.bf16.msra.mxu0 %v13743_v31  ;;  %18362 = vst [vmem:[#allocation26_spill] sm:$0xff] %v15891_v36  ;;  %v13746_v31 = vld [vmem:[%s18140_s11 + $0x40] sm:$0xff]  }
 0x3de   : > { %11620 = vmatprep.subr.bf16.mxu0 %v13744_v62  ;;  %v5621_v62 = vld [vmem:[#allocation3 + $0x4] sm:$0xff] }
 0x3df   : > { %v15817_v14 = vpop.f32.mrf.mxu0 }
 0x3e1   : > { %v15821_v44 = vpop.f32.mrf.mxu0  ;;  %11621 = vmatpush3.bf16.msra.mxu0 %v13745_v21  ;;  %v15903_v21 = vpop.f32.mrf.mxu1 }
 0x3e2   : > { %11622 = vmatprep.subr.bf16.mxu0 %v13746_v31  ;;  %18363 = vst [vmem:[#allocation25_spill] sm:$0xff] %v15903_v21 }
 0x3e3   : > { %v15829_v28 = vpop.f32.mrf.mxu0  ;;  %v15915_v23 = vpop.f32.mrf.mxu1 }
 0x3e4   : > { %18353 = vst [vmem:[#allocation42_spill] sm:$0xff] %v15829_v28  ;;  %18365 = vst [vmem:[#allocation28_spill] sm:$0xff] %v15915_v23 }
 0x3e5   : > { %v15833_v0 = vpop.f32.mrf.mxu0  ;;  %11623 = vmatpush3.bf16.msra.mxu0 %v13747_v60 }
 0x3e6   : > { %18355 = vst [vmem:[#allocation23_spill] sm:$0xff] %v15833_v0 }
 0x3e7   : > { %v15841_v16 = vpop.f32.mrf.mxu0 }
 0x3e8   : > { %18356 = vst [vmem:[#allocation44_spill] sm:$0xff] %v15841_v16 }
 0x3e9   : > { %v15845_v33 = vpop.f32.mrf.mxu0 }
 0x3ea   : > { %18358 = vst [vmem:[#allocation46_spill] sm:$0xff] %v15845_v33  ;;  %v5589_v33 = vld [vmem:[#allocation3] sm:$0xff] }
 0x3eb   : > { %v15853_v34 = vpop.f32.mrf.mxu0 }
 0x3ed   : > { %v15857_v45 = vpop.f32.mrf.mxu0 }
 0x3ee   : > { %v11498_v35 = vadd.f32 %v15857_v45, %v15853_v34 }
 0x3ef   : > { %v15865_v13 = vpop.f32.mrf.mxu0 }
 0x3f1   : > { %v15869_v59 = vpop.f32.mrf.mxu0 }
 0x3f2   : > { %v11501_v34 = vadd.f32 %v15869_v59, %v15865_v13  ;;  %v13748_v13 = vld [vmem:[%s18140_s11 + $0xf8] sm:$0xff]  }
 0x3f3   : > { %v15877_v8 = vpop.f32.mrf.mxu0  ;;  %11648 = vmatprep.subr.bf16.mxu1 %v13748_v13 }
 0x3f4   : > { %v12695_v38 = vpop.permute.xlu0 %12694  ;;  %11649 = vmatpush3.bf16.msra.mxu1 %v13749_v19 }
 0x3f5   : > { %v15881_v49 = vpop.f32.mrf.mxu0  ;;  %v12697_v40 = vunpack.i.h.bf16 %v12695_v38  ;;  %v12696_v32 = vunpack.i.l.bf16 %v12695_v38 }
 0x3f6   : > { %v12700_v26 = vpop.permute.xlu1 %12699 }
 0x3f7   : > { %v15889_v63 = vpop.f32.mrf.mxu0  ;;  %v12702_v57 = vunpack.i.h.bf16 %v12700_v26  ;;  %v12701_v36 = vunpack.i.l.bf16 %v12700_v26  ;;  %v6396_v55 = vsel %vm929_vm4, %v15717_v20, %v12697_v40  ;;  %v6395_v37 = vsel %vm929_vm4, %v5621_v62, %v12696_v32 }
 0x3f8   : > { %v12705_v22 = vpop.permute.xlu0 %12704 }
 0x3f9   : > { %v15893_v6 = vpop.f32.mrf.mxu0  ;;  %v12707_v38 = vunpack.i.h.bf16 %v12705_v22  ;;  %v12706_v0 = vunpack.i.l.bf16 %v12705_v22  ;;  %v6371_v26 = vsel %vm929_vm4, %v15638_v12, %v12702_v57  ;;  %v6370_v31 = vsel %vm929_vm4, %v5589_v33, %v12701_v36 }
 0x3fa   : > { %v12710_v28 = vpop.permute.xlu1 %12709 }
 0x3fb   : > { %v15901_v50 = vpop.f32.mrf.mxu0  ;;  %v12712_v21 = vunpack.i.h.bf16 %v12710_v28  ;;  %v12711_v60 = vunpack.i.l.bf16 %v12710_v28  ;;  %v6403_v32 = vsel %vm890_vm2, %v6395_v37, %v12706_v0  ;;  %v6404_v22 = vsel %vm890_vm2, %v6396_v55, %v12707_v38  ;;  %v15932_v0 = vpop.f32.mrf.mxu1 }
 0x3fc   : > { %v12715_v40 = vpop.permute.xlu0 %12714 }
 0x3fd   : > { %v15905_v16 = vpop.f32.mrf.mxu0  ;;  %v6378_v62 = vsel %vm890_vm2, %v6370_v31, %v12711_v60  ;;  %v6379_v57 = vsel %vm890_vm2, %v6371_v26, %v12712_v21  ;;  %v12717_v12 = vunpack.i.h.bf16 %v12715_v40  ;;  %v12716_v36 = vunpack.i.l.bf16 %v12715_v40 }
 0x3fe   : > { %v12720_v28 = vpop.permute.xlu1 %12719  ;;  %v11458_v60 = vadd.f32 %v15654_v47, %v15633_v4  ;;  %v5190_v40 = vadd.f32 %v11421_v43, %v15745_v41  ;;  %v11461_v4 = vadd.f32 %v15670_v15, %v15661_v10  ;;  %v11538_v41 = vadd.f32 %v15781_v30, %v15772_v39 }
 0x3ff   : > { %v15910_v1 = vpop.f32.mrf.mxu0  ;;  %v12722_v23 = vunpack.i.h.bf16 %v12720_v28  ;;  %v6411_v37 = vsel %vm6386_vm6, %v6403_v32, %v12716_v36  ;;  %v6412_v55 = vsel %vm6386_vm6, %v6404_v22, %v12717_v12  ;;  %v11504_v10 = vadd.f32 %v15881_v49, %v15877_v8 }
 0x400   : > { %18364 = vst [vmem:[#allocation27_spill] sm:$0xff] %v15910_v1  ;;  %v12721_v1 = vunpack.i.l.bf16 %v12720_v28  ;;  %v7428_v31 = vpack.c.bf16 %v6412_v55, %v6411_v37  ;;  %v5252_v32 = vadd.f32 %v11458_v60, %v5187_v7  ;;  %v5255_v22 = vadd.f32 %v11461_v4, %v5190_v40  ;;  %v15984_v7 = vld [vmem:[%s18138_s9] ss:$0 sm:$0xff] }
 0x401   : > { %v15919_v20 = vpop.f32.mrf.mxu0  ;;  %v6388_v26 = vsel %vm6386_vm6, %v6379_v57, %v12722_v23  ;;  %v5198_v30 = vadd.f32 %v11427_v17, %v15758_v54  ;;  %v11430_v8 = vadd.f32 %v15809_v58, %v15805_v25  ;;  %v11467_v12 = vadd.f32 %v15712_v29, %v15698_v46  ;;  %v13751_v46 = vld [vmem:[%s18140_s11 + $0xb0] sm:$0xff]   ;;  %v15999_v37 = vld [vmem:[%s18139_s10] ss:$0 sm:$0xff] }
 0x402   : > { %v6387_v21 = vsel %vm6386_vm6, %v6378_v62, %v12721_v1  ;;  %8314 = vmatprep.mubr.bf16.mxu0 %v7428_v31  ;;  %v15947_v1 = vpop.f32.mrf.mxu1  ;;  %v5317_v47 = vadd.f32 %v11498_v35, %v5252_v32  ;;  %v11464_v62 = vadd.f32 %v15687_v53, %v15675_v61  ;;  %v5320_v48 = vadd.f32 %v11501_v34, %v5255_v22  ;;  %v13752_v35 = vld [vmem:[%s18140_s11 + $0xe8] sm:$0xff]   ;;  %v18370_v17 = vld [vmem:[#allocation23_spill] sm:$0xff] }
 0x403   : > { %v15925_v33 = vpop.f32.mrf.mxu0  ;;  %v7427_v51 = vpack.c.bf16 %v6388_v26, %v6387_v21  ;;  %v11541_v53 = vadd.f32 %v15795_v18, %v15789_v42  ;;  %v11507_v54 = vadd.f32 %v15893_v6, %v15889_v63  ;;  %v13750_v18 = vld [vmem:[%s18140_s11 + $0xf0] sm:$0xff]   ;;  %v11544_v63 = vadd.f32 %v15807_v5, %v15801_v52 }
 0x404   : > { %v5511_v57 = vpop.f32.mrf.mxu1  ;;  %v5382_v2 = vadd.f32 %v11538_v41, %v5317_v47  ;;  %v5260_v59 = vadd.f32 %v11464_v62, %v5195_v9  ;;  %v11433_v6 = vadd.f32 %v15821_v44, %v15817_v14  ;;  %v5263_v43 = vadd.f32 %v11467_v12, %v5198_v30  ;;  %11650 = vmatprep.subr.bf16.mxu1 %v13750_v18  ;;  %v18368_v47 = vld [vmem:[#allocation40_spill] sm:$0xff]  ;;  %v18369_v9 = vld [vmem:[#allocation42_spill] sm:$0xff]  ;;  %v18374_v12 = vld [vmem:[#allocation21_spill] sm:$0xff] }
 0x405   : > { %v15934_v38 = vpop.f32.mrf.mxu0  ;;  %8315 = vmatmul.mubr.bf16.vlgmr.msra.gmra.mxu0 %v7427_v51  ;;  %v5385_v25 = vadd.f32 %v11541_v53, %v5320_v48  ;;  %v5203_v21 = vadd.f32 %v11430_v8, %v15764_v11  ;;  %11651 = vmatpush3.bf16.msra.mxu1 %v13751_v46  ;;  %v11470_v52 = vadd.f32 %v15731_v56, %v15723_v3  ;;  %v13753_v51 = vld [vmem:[%s18140_s11 + $0xa8] sm:$0xff]   ;;  %v18366_v3 = vld [vmem:[#allocation22_spill] sm:$0xff]  ;;  %v18367_v56 = vld [vmem:[#allocation43_spill] sm:$0xff] }
 0x406   : > { %v15977_v36 = vpop.f32.mrf.mxu1  ;;  %v5325_v28 = vadd.f32 %v11504_v10, %v5260_v59  ;;  %v5328_v60 = vadd.f32 %v11507_v54, %v5263_v43  ;;  %v11510_v11 = vadd.f32 %v15905_v16, %v15901_v50  ;;  %v11547_v4 = vadd.f32 %v18367_v56, %v18366_v3  ;;  %11652 = vmatprep.subr.bf16.mxu1 %v13752_v35  ;;  %v18371_v10 = vld [vmem:[#allocation16_spill] sm:$0xff]  ;;  %v18376_v54 = vld [vmem:[#allocation46_spill] sm:$0xff] }
 0x407   : > { %v15944_v27 = vpop.f32.mrf.mxu0  ;;  %v5206_v34 = vadd.f32 %v11433_v6, %v18368_v47  ;;  %v5268_v62 = vadd.f32 %v11470_v52, %v5203_v21  ;;  %v18373_v19 = vld [vmem:[#allocation27_spill] sm:$0xff]  ;;  %v11516_v52 = vadd.f32 %v15934_v38, %v15925_v33  ;;  %v18382_v33 = vld [vmem:[#allocation24_spill] sm:$0xff] }
 0x408   : > { %v5514_v5 = vpop.f32.mrf.mxu1  ;;  %v5390_v14 = vadd.f32 %v11544_v63, %v5325_v28  ;;  %v11513_v48 = vadd.f32 %v15919_v20, %v18373_v19  ;;  %v13754_v8 = vld [vmem:[%s18140_s11 + $0xe0] sm:$0xff]  }
 0x409   : > { %v15949_v23 = vpop.f32.mrf.mxu0  ;;  %11653 = vmatpush3.bf16.msra.mxu1 %v13753_v51  ;;  %v5333_v30 = vadd.f32 %v11510_v11, %v5268_v62  ;;  %v18375_v28 = vld [vmem:[#allocation44_spill] sm:$0xff]  ;;  %v18380_v21 = vld [vmem:[#allocation19_spill] sm:$0xff] }
 0x40a   : > { %v16019_v22 = vpop.f32.mrf.mxu1  ;;  %11654 = vmatprep.subr.bf16.mxu1 %v13754_v8  ;;  %v13756_v51 = vld [vmem:[%s18140_s11 + $0xd8] sm:$0xff]   ;;  %v16064_v62 = vld [vmem:[#allocation3 + $0x21] sm:$0xff] }
 0x40b   : > { %v11576_v45 = vpop.f32.mrf.mxu0  ;;  %v13757_v11 = vld [vmem:[%s18140_s11 + $0x98] sm:$0xff]  }
 0x40c   : > { %v18384_v47 = vld [vmem:[#allocation39_spill] sm:$0xff] }
 0x40d   : > { %v11577_v15 = vpop.f32.mrf.mxu0 }
 0x40e   : > { %v11578_v39 = vadd.f32 %v11577_v15, %v11576_v45  ;;  %v11436_v45 = vadd.f32 %v18370_v17, %v18369_v9  ;;  %v18372_v15 = vld [vmem:[#allocation38_spill] sm:$0xff] }
 0x40f   : > { %v11579_v61 = vpop.f32.mrf.mxu0  ;;  %v11473_v13 = vadd.f32 %v18372_v15, %v18371_v10  ;;  %v11519_v15 = vadd.f32 %v15949_v23, %v15944_v27 }
 0x410   : > { %v5447_v49 = vadd.f32 %v11578_v39, %v5382_v2  ;;  %v5393_v2 = vadd.f32 %v11547_v4, %v5328_v60  ;;  %v5211_v20 = vadd.f32 %v11436_v45, %v18374_v12  ;;  %v13758_v12 = vld [vmem:[%s18140_s11 + $0xd0] sm:$0xff]  }
 0x411   : > { %v11580_v42 = vpop.f32.mrf.mxu0  ;;  %v5271_v18 = vadd.f32 %v11473_v13, %v5206_v34  ;;  %v18385_v34 = vld [vmem:[#allocation18_spill] sm:$0xff] }
 0x412   : > { %v5512_v29 = vadd.f32 %v5511_v57, %v5447_v49  ;;  %v11581_v58 = vadd.f32 %v11580_v42, %v11579_v61  ;;  %v13755_v49 = vld [vmem:[%s18140_s11 + $0xa0] sm:$0xff]   ;;  %v11439_v42 = vadd.f32 %v18376_v54, %v18375_v28  ;;  %v11479_v9 = vadd.f32 %v18385_v34, %v18384_v47 }
 0x413   : > { %v11582_v55 = vpop.f32.mrf.mxu0  ;;  %11655 = vmatpush3.bf16.msra.mxu1 %v13755_v49  ;;  %v13763_v47 = vld [vmem:[%s18140_s11 + $0x80] sm:$0xff]  }
 0x414   : > { %v5549_v26 = vmul.f32 %v15984_v7, %v5512_v29  ;;  %v5450_v31 = vadd.f32 %v11581_v58, %v5385_v25  ;;  %v5527_v29 = vpop.f32.mrf.mxu1  ;;  %v18377_v25 = vld [vmem:[#allocation45_spill] sm:$0xff]  ;;  %v18378_v58 = vld [vmem:[#allocation47_spill] sm:$0xff]  ;;  %11656 = vmatprep.subr.bf16.mxu1 %v13756_v51 }
 0x415   : > { %v11583_v44 = vpop.f32.mrf.mxu0 }
 0x416   : > { %v5564_v24 = vadd.f32 %v15999_v37, %v5549_v26  ;;  %v5515_v40 = vadd.f32 %v5514_v5, %v5450_v31  ;;  %v11584_v32 = vadd.f32 %v11583_v44, %v11582_v55  ;;  %v18379_v55 = vld [vmem:[#allocation20_spill] sm:$0xff]  ;;  %v5336_v31 = vadd.f32 %v11513_v48, %v5271_v18  ;;  %v16057_v4 = vpop.f32.mrf.mxu1  ;;  %v13759_v18 = vld [vmem:[%s18140_s11 + $0x90] sm:$0xff]  }
 0x417   : > { %v11585_v41 = vpop.f32.mrf.mxu0  ;;  %v11476_v26 = vadd.f32 %v18380_v21, %v18379_v55  ;;  %11657 = vmatpush3.bf16.msra.mxu1 %v13757_v11  ;;  %v18389_v55 = vld [vmem:[#allocation28_spill] sm:$0xff] }
 0x418   : > { %v5572_v57 = vmax.f32 %v5564_v24, 0.0  ;;  %v5550_v50 = vmul.f32 %v15984_v7, %v5515_v40  ;;  %v5455_v16 = vadd.f32 %v11584_v32, %v5390_v14  ;;  %v18381_v24 = vld [vmem:[#allocation48_spill] sm:$0xff]  ;;  %v18383_v40 = vld [vmem:[#allocation41_spill] sm:$0xff]  ;;  %v5530_v23 = vpop.f32.mrf.mxu1  ;;  %11658 = vmatprep.subr.bf16.mxu1 %v13758_v12  ;;  %v11559_v21 = vadd.f32 %v15932_v0, %v18389_v55 }
 0x419   : > { %v11586_v39 = vpop.f32.mrf.mxu0  ;;  %v11553_v38 = vadd.f32 %v18382_v33, %v18381_v24  ;;  %v5214_v32 = vadd.f32 %v11439_v42, %v18383_v40  ;;  %v5276_v3 = vadd.f32 %v11476_v26, %v5211_v20  ;;  %v18391_v40 = vld [vmem:[#allocation37_spill] sm:$0xff] }
 0x41a   : > { %5581 = vst.msk [vmem:[#allocation3 + $0x33] sm:$0xff] %vm929_vm4, %v5572_v57  ;;  %v5565_v59 = vadd.f32 %v15999_v37, %v5550_v50  ;;  %v5520_v61 = vadd.f32 %v15947_v1, %v5455_v16  ;;  %v11587_v53 = vadd.f32 %v11586_v39, %v11585_v41  ;;  %v11550_v1 = vadd.f32 %v18378_v58, %v18377_v25  ;;  %v18386_v57 = vld [vmem:[#allocation26_spill] sm:$0xff]  ;;  %v18387_v50 = vld [vmem:[#allocation25_spill] sm:$0xff] }
 0x41b   : > { %v11588_v46 = vpop.f32.mrf.mxu0  ;;  %v11556_v16 = vadd.f32 %v18387_v50, %v18386_v57  ;;  %v5341_v10 = vadd.f32 %v11516_v52, %v5276_v3  ;;  %11659 = vmatpush3.bf16.msra.mxu1 %v13759_v18  ;;  %v18392_v57 = vld [vmem:[#allocation36_spill] sm:$0xff] }
 0x41c   : > { %v5573_v63 = vmax.f32 %v5565_v59, 0.0  ;;  %v5551_v6 = vmul.f32 %v15984_v7, %v5520_v61  ;;  %v5458_v43 = vadd.f32 %v11587_v53, %v5393_v2  ;;  %v5398_v35 = vadd.f32 %v11550_v1, %v5333_v30 }
 0x41d   : > { %v11589_v5 = vpop.f32.mrf.mxu0  ;;  %v5401_v2 = vadd.f32 %v11553_v38, %v5336_v31  ;;  %v5279_v53 = vadd.f32 %v11479_v9, %v5214_v32  ;;  %v18390_v31 = vld [vmem:[#allocation12_spill] sm:$0xff] }
 0x41e   : > { %5582 = vst.msk [vmem:[#allocation3 + $0x43] sm:$0xff] %vm929_vm4, %v5573_v63  ;;  %v5566_v60 = vadd.f32 %v15999_v37, %v5551_v6  ;;  %v5523_v14 = vadd.f32 %v15977_v36, %v5458_v43  ;;  %v11590_v44 = vadd.f32 %v11589_v5, %v11588_v46  ;;  %v16059_v36 = vld [vmem:[#allocation3 + $0x25] sm:$0xff] }
 0x41f   : > { %v11591_v56 = vpop.f32.mrf.mxu0  ;;  %v5344_v46 = vadd.f32 %v11519_v15, %v5279_v53  ;;  %v18388_v6 = vld [vmem:[#allocation13_spill] sm:$0xff] }
 0x420   : > { %v5574_v17 = vmax.f32 %v5566_v60, 0.0  ;;  %v5552_v45 = vmul.f32 %v15984_v7, %v5523_v14  ;;  %v5463_v41 = vadd.f32 %v11590_v44, %v5398_v35  ;;  %v13760_v60 = vld [vmem:[%s18140_s11 + $0xc8] sm:$0xff]  }
 0x421   : > { %v11592_v13 = vpop.f32.mrf.mxu0  ;;  %v16070_v19 = vld [vmem:[#allocation3 + $0x35] sm:$0xff]  ;;  %v13761_v14 = vld [vmem:[%s18140_s11 + $0x88] sm:$0xff]   ;;  %v5409_v0 = vadd.f32 %v11559_v21, %v5344_v46  ;;  %11660 = vmatprep.subr.bf16.mxu1 %v13760_v60 }
 0x422   : > { %v16072_v48 = vld [vmem:[#allocation3 + $0x31] sm:$0xff]  ;;  %5583 = vst.msk [vmem:[#allocation3 + $0x53] sm:$0xff] %vm929_vm4, %v5574_v17  ;;  %v5567_v39 = vadd.f32 %v15999_v37, %v5552_v45  ;;  %v11593_v30 = vadd.f32 %v11592_v13, %v11591_v56  ;;  %v5528_v59 = vadd.f32 %v5527_v29, %v5463_v41  ;;  %v16078_v61 = vpack.i.bf16 %v16070_v19, %v16059_v36  ;;  %v13762_v56 = vld [vmem:[%s18140_s11 + $0xc0] sm:$0xff]  }
 0x423   : > { %v11594_v8 = vpop.f32.mrf.mxu0  ;;  %v16082_v27 = vpack.i.bf16 %v16072_v48, %v16064_v62  ;;  %v5640_v49 = vld [vmem:[#allocation3 + $0x36] sm:$0xff]  ;;  %v5406_v29 = vadd.f32 %v11556_v16, %v5341_v10  ;;  %11661 = vmatpush3.bf16.msra.mxu1 %v13761_v14 }
 0x424   : > { %v5575_v20 = vmax.f32 %v5567_v39, 0.0  ;;  %v5553_v28 = vmul.f32 %v15984_v7, %v5528_v59  ;;  %12764 = vrot.lane.b32.xlu0 %v16078_v61, %s14105_s26  ;;  %v5466_v54 = vadd.f32 %v11593_v30, %v5401_v2  ;;  %v5608_v42 = vld [vmem:[#allocation3 + $0x32] sm:$0xff]  ;;  %v12773_v43 = vpack.i.bf16 %v5640_v49, %v18388_v6  ;;  %11662 = vmatprep.subr.bf16.mxu1 %v13762_v56 }
 0x425   : > { %12769 = vrot.lane.b32.xlu1 %v16082_v27, %s14105_s26  ;;  %v11595_v25 = vpop.f32.mrf.mxu0  ;;  %v12778_v52 = vpack.i.bf16 %v5608_v42, %v18390_v31  ;;  %v5616_v5 = vld [vmem:[#allocation3 + $0x33] sm:$0xff]  ;;  %v5697_v17 = vld [vmem:[#allocation3 + $0x46] sm:$0xff] }
 0x426   : > { %5584 = vst.msk [vmem:[#allocation3 + $0x63] sm:$0xff] %vm929_vm4, %v5575_v20  ;;  %v5568_v58 = vadd.f32 %v15999_v37, %v5553_v28  ;;  %v11596_v1 = vadd.f32 %v11595_v25, %v11594_v8  ;;  %v5531_v63 = vadd.f32 %v5530_v23, %v5466_v54  ;;  %v12783_v32 = vpack.i.bf16 %v5616_v5, %v18391_v40  ;;  %v16114_v3 = vld [vmem:[#allocation3 + $0x30] sm:$0xff]  ;;  %v5665_v13 = vld [vmem:[#allocation3 + $0x42] sm:$0xff]  ;;  %v16196_v40 = vpop.permute.xlu0 %12744 }
 0x427   : > { %v11597_v26 = vpop.f32.mrf.mxu0  ;;  %v12788_v50 = vpack.i.bf16 %v16114_v3, %v18392_v57  ;;  %11663 = vmatpush3.bf16.msra.mxu1 %v13763_v47  ;;  %v12818_v16 = vpack.i.bf16 %v5697_v17, %v5640_v49  ;;  %v12823_v39 = vpack.i.bf16 %v5665_v13, %v5608_v42  ;;  %v16135_v30 = vld [vmem:[#allocation3 + $0x34] sm:$0xff]  ;;  %v5673_v59 = vld [vmem:[#allocation3 + $0x43] sm:$0xff] }
 0x428   : > { %v5576_v44 = vmax.f32 %v5568_v58, 0.0  ;;  %v5471_v35 = vadd.f32 %v11596_v1, %v5406_v29  ;;  %v5554_v51 = vmul.f32 %v15984_v7, %v5531_v63  ;;  %12774 = vrot.lane.b32.xlu0 %v12773_v43, %s14104_s1  ;;  %v12828_v8 = vpack.i.bf16 %v5673_v59, %v5616_v5  ;;  %v5681_v23 = vld [vmem:[#allocation3 + $0x44] sm:$0xff] }
 0x429   : > { %12779 = vrot.lane.b32.xlu1 %v12778_v52, %s14104_s1  ;;  %v11598_v11 = vpop.f32.mrf.mxu0  ;;  %v5649_v49 = vld [vmem:[#allocation3 + $0x40] sm:$0xff]  ;;  %v5634_v54 = vld [vmem:[#allocation3 + $0x55] sm:$0xff] }
 0x42a   : > { %5585 = vst.msk [vmem:[#allocation3 + $0x73] sm:$0xff] %vm929_vm4, %v5576_v44  ;;  %v5536_v24 = vadd.f32 %v16019_v22, %v5471_v35  ;;  %v5569_v33 = vadd.f32 %v15999_v37, %v5554_v51  ;;  %v11599_v38 = vadd.f32 %v11598_v11, %v11597_v26  ;;  %v16152_v12 = vld [vmem:[#allocation3 + $0x41] sm:$0xff]  ;;  %v5642_v18 = vld [vmem:[#allocation3 + $0x56] sm:$0xff]  ;;  %v16203_v56 = vpop.permute.xlu0 %12749 }
 0x42b   : > { %v16155_v20 = vld [vmem:[#allocation3 + $0x45] sm:$0xff]  ;;  %v12843_v28 = vpack.i.bf16 %v16152_v12, %v16072_v48  ;;  %v5602_v46 = vld [vmem:[#allocation3 + $0x51] sm:$0xff]  ;;  %v12878_v29 = vpack.i.bf16 %v5642_v18, %v5697_v17 }
 0x42c   : > { %v5555_v34 = vmul.f32 %v15984_v7, %v5536_v24  ;;  %v5577_v9 = vmax.f32 %v5569_v33, 0.0  ;;  %v5474_v22 = vadd.f32 %v11599_v38, %v5409_v0  ;;  %12784 = vrot.lane.b32.xlu0 %v12783_v32, %s14106_s27  ;;  %v12868_v42 = vpack.i.bf16 %v5634_v54, %v16155_v20  ;;  %v5618_v48 = vld [vmem:[#allocation3 + $0x53] sm:$0xff] }
 0x42d   : > { %12799 = vrot.lane.b32.xlu1 %v12783_v32, %s14105_s26  ;;  %v12873_v25 = vpack.i.bf16 %v5602_v46, %v16152_v12  ;;  %v5610_v58 = vld [vmem:[#allocation3 + $0x52] sm:$0xff]  ;;  %v12888_v1 = vpack.i.bf16 %v5618_v48, %v5673_v59  ;;  %v5699_v26 = vld [vmem:[#allocation3 + $0x66] sm:$0xff]  ;;  %v16199_v32 = vpop.permute.xlu1 %12724 }
 0x42e   : > { %v5570_v45 = vadd.f32 %v15999_v37, %v5555_v34  ;;  %5586 = vst.msk [vmem:[#allocation3 + $0x83] sm:$0xff] %vm929_vm4, %v5577_v9  ;;  %v5539_v41 = vadd.f32 %v16057_v4, %v5474_v22  ;;  %v12883_v63 = vpack.i.bf16 %v5610_v58, %v5665_v13  ;;  %v5706_v6 = vld [vmem:[#allocation3 + $0x50] sm:$0xff]  ;;  %v12948_v31 = vpack.i.bf16 %v5699_v26, %v5642_v18  ;;  %v5667_v52 = vld [vmem:[#allocation3 + $0x62] sm:$0xff] }
 0x42f   : > { %v12893_v43 = vpack.i.bf16 %v5706_v6, %v5649_v49  ;;  %v5738_v55 = vld [vmem:[#allocation3 + $0x54] sm:$0xff]  ;;  %v12953_v5 = vpack.i.bf16 %v5667_v52, %v5610_v58  ;;  %v5651_v60 = vld [vmem:[#allocation3 + $0x60] sm:$0xff] }
 0x430   : > { %v5578_v10 = vmax.f32 %v5570_v45, 0.0  ;;  %v5556_v15 = vmul.f32 %v15984_v7, %v5539_v41  ;;  %12789 = vrot.lane.b32.xlu0 %v12788_v50, %s14104_s1  ;;  %v18393_v7 = vld [vmem:[#allocation17_spill] sm:$0xff]  ;;  %v12908_v21 = vpack.i.bf16 %v5738_v55, %v5681_v23  ;;  %v12943_v44 = vpack.i.bf16 %v5651_v60, %v5706_v6  ;;  %v5770_v11 = vld [vmem:[#allocation3 + $0x61] sm:$0xff]  ;;  %v16220_v41 = vpop.permute.xlu0 %12754  ;;  %v13998_v6 = vld [vmem:[#allocation3 + $0x11] sm:$0xff] }
 0x431   : > { %12819 = vrot.lane.b32.xlu1 %v12818_v16, %s14105_s26  ;;  %v12803_v53 = vpack.i.bf16 %v16135_v30, %v18393_v7  ;;  %v5675_v14 = vld [vmem:[#allocation3 + $0x63] sm:$0xff]  ;;  %v12973_v24 = vpack.i.bf16 %v5770_v11, %v5602_v46  ;;  %v12730_v47 = vpop.permute.xlu1 %12729  ;;  %v16205_v34 = vld [vmem:[#allocation3 + $0x75] sm:$0xff]  ;;  %18394 = vst [vmem:[#allocation29_spill] sm:$0xff] %v16220_v41 }
 0x432   : > { %5587 = vst.msk [vmem:[#allocation3 + $0x93] sm:$0xff] %vm929_vm4, %v5578_v10  ;;  %v5571_v2 = vadd.f32 %v15999_v37, %v5556_v15  ;;  %v12833_v37 = vpack.i.bf16 %v5681_v23, %v16135_v30  ;;  %v12958_v35 = vpack.i.bf16 %v5675_v14, %v5618_v48  ;;  %v5683_v51 = vld [vmem:[#allocation3 + $0x64] sm:$0xff]  ;;  %v16208_v9 = vld [vmem:[#allocation3 + $0x71] sm:$0xff]  ;;  %v12731_v18 = vunpack.i.l.bf16 %v12730_v47 }
 0x433   : > { %v12963_v0 = vpack.i.bf16 %v5683_v51, %v5738_v55  ;;  %v16189_v33 = vld [vmem:[#allocation3 + $0x65] sm:$0xff]  ;;  %v16216_v17 = vpack.i.bf16 %v16208_v9, %v5770_v11  ;;  %v16218_v45 = vld [vmem:[#allocation3 + $0x76] sm:$0xff] }
 0x434   : > { %v5579_v4 = vmax.f32 %v5571_v2, 0.0  ;;  %12794 = vrot.lane.b32.xlu0 %v16082_v27, %s14106_s27  ;;  %v12813_v27 = vpack.i.bf16 %v5649_v49, %v16114_v3  ;;  %v12988_v38 = vpack.i.bf16 %v16189_v33, %v5634_v54  ;;  %v16213_v22 = vpack.i.bf16 %v16205_v34, %v16189_v33  ;;  %v16224_v57 = vld [vmem:[#allocation3 + $0x72] sm:$0xff]  ;;  %v16233_v13 = vpop.permute.xlu0 %12759 }
 0x435   : > { %12824 = vrot.lane.b32.xlu1 %v12823_v39, %s14105_s26  ;;  %v12735_v50 = vpop.permute.xlu1 %12734  ;;  %v13038_v10 = vpack.i.bf16 %v16224_v57, %v5667_v52  ;;  %v16230_v15 = vld [vmem:[#allocation3 + $0x73] sm:$0xff]  ;;  %18395 = vst [vmem:[#allocation22_spill] sm:$0xff] %v16233_v13  ;;  %v13770_v52 = vld [vmem:[%s18140_s11 + $0x160] sm:$0xff]  }
 0x436   : > { %5588 = vst.msk [vmem:[#allocation3 + $0xa3] sm:$0xff] %vm929_vm4, %v5579_v4  ;;  %v16237_v2 = vpack.i.bf16 %v16230_v15, %v5675_v14  ;;  %v16241_v4 = vld [vmem:[#allocation3 + $0x70] sm:$0xff]  ;;  %v13765_v49 = vld [vmem:[%s18140_s11 + $0x138] sm:$0xff]   ;;  %v12737_v58 = vunpack.i.h.bf16 %v12735_v50 }
 0x437   : > { %v16245_v59 = vld [vmem:[#allocation3 + $0x74] sm:$0xff] }
 0x438   : > { %12804 = vrot.lane.b32.xlu0 %v12803_v53, %s14104_s1  ;;  %v16252_v53 = vpack.i.bf16 %v16241_v4, %v5651_v60  ;;  %v5961_v13 = vld [vmem:[#allocation3 + $0xd3] sm:$0xff] }
 0x439   : > { %12829 = vrot.lane.b32.xlu1 %v12828_v8, %s14104_s1  ;;  %v13764_v8 = vld [vmem:[%s18140_s11 + $0x178] sm:$0xff]  }
 0x43a   : > { %11688 = vmatprep.subr.bf16.mxu0 %v13764_v8 }
 0x43b   : > { %11689 = vmatpush3.bf16.msra.mxu0 %v13765_v49  ;;  %v13773_v49 = vld [vmem:[%s18140_s11 + $0x118] sm:$0xff]  }
 0x43c   : > { %12809 = vrot.lane.b32.xlu0 %v16078_v61, %s14106_s27  ;;  %v12858_v61 = vpack.i.bf16 %v16155_v20, %v16070_v19 }
 0x43d   : > { %12834 = vrot.lane.b32.xlu1 %v12833_v37, %s14106_s27 }
 0x440   : > { %12814 = vrot.lane.b32.xlu0 %v12813_v27, %s14106_s27 }
 0x441   : > { %12849 = vrot.lane.b32.xlu1 %v12823_v39, %s14106_s27  ;;  %v16239_v39 = vpop.permute.xlu1 %12739 }
 0x442   : > { %v12741_v60 = vunpack.i.l.bf16 %v16239_v39 }
 0x444   : > { %12839 = vrot.lane.b32.xlu0 %v12813_v27, %s14105_s26 }
 0x445   : > { %12854 = vrot.lane.b32.xlu1 %v12833_v37, %s14105_s26  ;;  %v16260_v37 = vpack.i.bf16 %v16245_v59, %v5683_v51 }
 0x448   : > { %12844 = vrot.lane.b32.xlu0 %v12843_v28, %s14104_s1  ;;  %v13766_v28 = vld [vmem:[%s18140_s11 + $0x170] sm:$0xff]  }
 0x449   : > { %12859 = vrot.lane.b32.xlu1 %v12858_v61, %s14104_s1  ;;  %v13767_v61 = vld [vmem:[%s18140_s11 + $0x130] sm:$0xff]   ;;  %11690 = vmatprep.subr.bf16.mxu0 %v13766_v28 }
 0x44a   : > { %11691 = vmatpush3.bf16.msra.mxu0 %v13767_v61 }
 0x44c   : > { %12869 = vrot.lane.b32.xlu0 %v12868_v42, %s14105_s26 }
 0x44d   : > { %12864 = vrot.lane.b32.xlu1 %v12818_v16, %s14106_s27  ;;  %v13033_v16 = vpack.i.bf16 %v16218_v45, %v5699_v26  ;;  %v12726_v26 = vunpack.i.l.bf16 %v16199_v32 }
 0x450   : > { %12879 = vrot.lane.b32.xlu0 %v12878_v29, %s14104_s1 }
 0x451   : > { %12874 = vrot.lane.b32.xlu1 %v12873_v25, %s14105_s26 }
 0x454   : > { %12889 = vrot.lane.b32.xlu0 %v12888_v1, %s14106_s27 }
 0x455   : > { %12884 = vrot.lane.b32.xlu1 %v12883_v63, %s14104_s1 }
 0x458   : > { %12894 = vrot.lane.b32.xlu0 %v12893_v43, %s14104_s1  ;;  %v6419_v43 = vsel %vm929_vm4, %v13998_v6, %v12731_v18 }
 0x459   : > { %12904 = vrot.lane.b32.xlu1 %v12888_v1, %s14105_s26 }
 0x45c   : > { %12899 = vrot.lane.b32.xlu0 %v12873_v25, %s14106_s27 }
 0x45d   : > { %12909 = vrot.lane.b32.xlu1 %v12908_v21, %s14104_s1  ;;  %v12727_v21 = vunpack.i.h.bf16 %v16199_v32 }
 0x45f   : > { %v6444_v11 = vsel %vm929_vm4, %v16059_v36, %v12727_v21  ;;  %v13772_v36 = vld [vmem:[%s18140_s11 + $0x158] sm:$0xff]   ;;  %v16357_v21 = vld [vmem:[#allocation3 + $0x80] sm:$0xff] }
 0x460   : > { %12919 = vrot.lane.b32.xlu0 %v12868_v42, %s14106_s27 }
 0x461   : > { %12914 = vrot.lane.b32.xlu1 %v12873_v25, %s14105_s26  ;;  %v13769_v25 = vld [vmem:[%s18140_s11 + $0x128] sm:$0xff]  }
 0x464   : > { %12924 = vrot.lane.b32.xlu0 %v12883_v63, %s14104_s1 }
 0x465   : > { %12934 = vrot.lane.b32.xlu1 %v12868_v42, %s14105_s26  ;;  %v12732_v42 = vunpack.i.h.bf16 %v12730_v47 }
 0x467   : > { %v6420_v63 = vsel %vm929_vm4, %v16064_v62, %v12732_v42  ;;  %v12742_v62 = vunpack.i.h.bf16 %v16239_v39 }
 0x468   : > { %12929 = vrot.lane.b32.xlu0 %v12888_v1, %s14106_s27  ;;  %v12736_v1 = vunpack.i.l.bf16 %v12735_v50  ;;  %v6428_v51 = vsel %vm890_vm2, %v6420_v63, %v12737_v58 }
 0x469   : > { %12949 = vrot.lane.b32.xlu1 %v12948_v31, %s14105_s26  ;;  %v6436_v39 = vsel %vm6386_vm6, %v6428_v51, %v12742_v62 }
 0x46c   : > { %12939 = vrot.lane.b32.xlu0 %v12878_v29, %s14104_s1  ;;  %v13768_v29 = vld [vmem:[%s18140_s11 + $0x168] sm:$0xff]  }
 0x46d   : > { %12954 = vrot.lane.b32.xlu1 %v12953_v5, %s14105_s26  ;;  %11692 = vmatprep.subr.bf16.mxu0 %v13768_v29  ;;  %v13774_v29 = vld [vmem:[%s18140_s11 + $0x150] sm:$0xff]  }
 0x46e   : > { %11693 = vmatpush3.bf16.msra.mxu0 %v13769_v25 }
 0x46f   : > { %11694 = vmatprep.subr.bf16.mxu0 %v13770_v52 }
 0x470   : > { %12944 = vrot.lane.b32.xlu0 %v12943_v44, %s14106_s27 }
 0x471   : > { %12959 = vrot.lane.b32.xlu1 %v12958_v35, %s14104_s1 }
 0x474   : > { %12969 = vrot.lane.b32.xlu0 %v12943_v44, %s14105_s26 }
 0x475   : > { %12964 = vrot.lane.b32.xlu1 %v12963_v0, %s14106_s27 }
 0x478   : > { %12974 = vrot.lane.b32.xlu0 %v12973_v24, %s14104_s1  ;;  %v13999_v24 = vld [vmem:[#allocation3 + $0x15] sm:$0xff] }
 0x479   : > { %12984 = vrot.lane.b32.xlu1 %v12963_v0, %s14105_s26 }
 0x47c   : > { %12979 = vrot.lane.b32.xlu0 %v12953_v5, %s14106_s27 }
 0x47d   : > { %12989 = vrot.lane.b32.xlu1 %v12988_v38, %s14104_s1  ;;  %v6443_v38 = vsel %vm929_vm4, %v13999_v24, %v12726_v26  ;;  %v16359_v26 = vld [vmem:[#allocation3 + $0x86] sm:$0xff] }
 0x480   : > { %12999 = vrot.lane.b32.xlu0 %v12953_v5, %s14105_s26  ;;  %v13771_v5 = vld [vmem:[%s18140_s11 + $0x120] sm:$0xff]  }
 0x481   : > { %12994 = vrot.lane.b32.xlu1 %v12948_v31, %s14106_s27  ;;  %11695 = vmatpush3.bf16.msra.mxu0 %v13771_v5 }
 0x482   : > { %11696 = vmatprep.subr.bf16.mxu0 %v13772_v36 }
 0x484   : > { %13004 = vrot.lane.b32.xlu0 %v12958_v35, %s14104_s1  ;;  %v6427_v35 = vsel %vm890_vm2, %v6419_v43, %v12736_v1 }
 0x485   : > { %13009 = vrot.lane.b32.xlu1 %v12963_v0, %s14106_s27  ;;  %11697 = vmatpush3.bf16.msra.mxu0 %v13773_v49 }
 0x486   : > { %11698 = vmatprep.subr.bf16.mxu0 %v13774_v29 }
 0x488   : > { %13014 = vrot.lane.b32.xlu0 %v12943_v44, %s14106_s27 }
 0x489   : > { %13019 = vrot.lane.b32.xlu1 %v12948_v31, %s14105_s26 }
 0x48c   : > { %13024 = vrot.lane.b32.xlu0 %v16213_v22, %s14105_s26 }
 0x48d   : > { %13029 = vrot.lane.b32.xlu1 %v16216_v17, %s14105_s26 }
 0x490   : > { %13034 = vrot.lane.b32.xlu0 %v13033_v16, %s14104_s1 }
 0x491   : > { %13039 = vrot.lane.b32.xlu1 %v13038_v10, %s14104_s1 }
 0x494   : > { %13044 = vrot.lane.b32.xlu0 %v16237_v2, %s14106_s27 }
 0x495   : > { %13059 = vrot.lane.b32.xlu1 %v16237_v2, %s14105_s26 }
 0x496   : > { %v16249_v7 = vpop.permute.xlu0 %12764 }
 0x497   : > { %v16257_v23 = vpop.permute.xlu1 %12769  ;;  %v12767_v1 = vunpack.i.h.bf16 %v16249_v7  ;;  %v12766_v63 = vunpack.i.l.bf16 %v16249_v7 }
 0x498   : > { %13049 = vrot.lane.b32.xlu0 %v16252_v53, %s14104_s1  ;;  %v12772_v6 = vunpack.i.h.bf16 %v16257_v23  ;;  %v12771_v43 = vunpack.i.l.bf16 %v16257_v23  ;;  %v13777_v23 = vld [vmem:[%s18140_s11 + $0x108] sm:$0xff]  }
 0x499   : > { %13064 = vrot.lane.b32.xlu1 %v16260_v37, %s14104_s1 }
 0x49a   : > { %v16269_v27 = vpop.permute.xlu0 %12774 }
 0x49b   : > { %v16277_v54 = vpop.permute.xlu1 %12779  ;;  %v12777_v62 = vunpack.i.h.bf16 %v16269_v27 }
 0x49c   : > { %13054 = vrot.lane.b32.xlu0 %v16216_v17, %s14106_s27  ;;  %v12782_v52 = vunpack.i.h.bf16 %v16277_v54  ;;  %v12781_v7 = vunpack.i.l.bf16 %v16277_v54  ;;  %v16381_v54 = vpack.i.bf16 %v16357_v21, %v16241_v4 }
 0x49d   : > { %13069 = vrot.lane.b32.xlu1 %v16216_v17, %s14105_s26 }
 0x49e   : > { %v16283_v46 = vpop.permute.xlu0 %12784 }
 0x49f   : > { %v16291_v48 = vpop.permute.xlu1 %12799 }
 0x4a0   : > { %13074 = vrot.lane.b32.xlu0 %v16213_v22, %s14106_s27 }
 0x4a1   : > { %13089 = vrot.lane.b32.xlu1 %v16213_v22, %s14105_s26 }
 0x4a2   : > { %v12790_v55 = vpop.permute.xlu0 %12789 }
 0x4a3   : > { %v16302_v31 = vpop.permute.xlu1 %12819  ;;  %v12792_v14 = vunpack.i.h.bf16 %v12790_v55  ;;  %v12791_v44 = vunpack.i.l.bf16 %v12790_v55 }
 0x4a4   : > { %13079 = vrot.lane.b32.xlu0 %v13038_v10, %s14104_s1  ;;  %v6435_v10 = vsel %vm6386_vm6, %v6427_v35, %v12741_v60  ;;  %v12776_v60 = vunpack.i.l.bf16 %v16269_v27  ;;  %v16385_v35 = vpack.i.bf16 %v16359_v26, %v16218_v45  ;;  %v14000_v27 = vld [vmem:[#allocation3 + $0x24] sm:$0xff] }
 0x4a5   : > { %13094 = vrot.lane.b32.xlu1 %v13033_v16, %s14104_s1  ;;  %v6451_v16 = vsel %vm890_vm2, %v6443_v38, %v12791_v44  ;;  %v6452_v8 = vsel %vm890_vm2, %v6444_v11, %v12792_v14  ;;  %v7429_v25 = vpack.c.bf16 %v6436_v39, %v6435_v10  ;;  %v12787_v14 = vunpack.i.h.bf16 %v16283_v46 }
 0x4a6   : > { %v12795_v0 = vpop.permute.xlu0 %12794  ;;  %v12786_v44 = vunpack.i.l.bf16 %v16283_v46  ;;  %v6397_v51 = vsel %vm929_vm4, %v14000_v27, %v12766_v63  ;;  %v6398_v46 = vsel %vm929_vm4, %v16135_v30, %v12767_v1  ;;  %v13778_v30 = vld [vmem:[%s18140_s11 + $0x140] sm:$0xff]   ;;  %v13785_v27 = vld [vmem:[%s18140_s11 + $0x1a8] sm:$0xff]  }
 0x4a7   : > { %v12797_v32 = vunpack.i.h.bf16 %v12795_v0  ;;  %v12796_v47 = vunpack.i.l.bf16 %v12795_v0  ;;  %v16319_v50 = vpop.permute.xlu1 %12824  ;;  %v6373_v0 = vsel %vm929_vm4, %v16114_v3, %v12772_v6  ;;  %v13779_v3 = vld [vmem:[%s18140_s11 + $0x100] sm:$0xff]   ;;  %v6405_v39 = vsel %vm890_vm2, %v6397_v51, %v12776_v60  ;;  %v13784_v60 = vld [vmem:[%s18140_s11 + $0x1e8] sm:$0xff]  }
 0x4a8   : > { %13084 = vrot.lane.b32.xlu0 %v16237_v2, %s14106_s27  ;;  %v6381_v4 = vsel %vm890_vm2, %v6373_v0, %v12782_v52  ;;  %v16426_v1 = vld [vmem:[#allocation3 + $0x84] sm:$0xff]  ;;  %v12826_v0 = vunpack.i.l.bf16 %v16319_v50 }
 0x4a9   : > { %13099 = vrot.lane.b32.xlu1 %v16237_v2, %s14105_s26  ;;  %v6459_v28 = vsel %vm6386_vm6, %v6451_v16, %v12796_v47  ;;  %v6460_v61 = vsel %vm6386_vm6, %v6452_v8, %v12797_v32  ;;  %v13775_v2 = vld [vmem:[%s18140_s11 + $0x110] sm:$0xff]   ;;  %v16397_v32 = vld [vmem:[#allocation3 + $0x82] sm:$0xff]  ;;  %v6390_v10 = vsel %vm6386_vm6, %v6381_v4, %v12787_v14  ;;  %v6406_v16 = vsel %vm890_vm2, %v6398_v46, %v12777_v62 }
 0x4aa   : > { %v16337_v42 = vpop.permute.xlu0 %12804  ;;  %v7430_v18 = vpack.c.bf16 %v6460_v61, %v6459_v28  ;;  %11699 = vmatpush3.bf16.msra.mxu0 %v13775_v2  ;;  %v16411_v8 = vld [vmem:[#allocation3 + $0x83] sm:$0xff]  ;;  %v13133_v61 = vpack.i.bf16 %v16397_v32, %v16224_v57  ;;  %v13780_v57 = vld [vmem:[%s18140_s11 + $0x1f8] sm:$0xff]   ;;  %v13783_v62 = vld [vmem:[%s18140_s11 + $0x1b0] sm:$0xff]   ;;  %v12827_v4 = vunpack.i.h.bf16 %v16319_v50 }
 0x4ab   : > { %v16342_v58 = vpop.permute.xlu1 %12829  ;;  %11728 = vmatprep.subr.bf16.mxu1 %v13780_v57  ;;  %v13786_v46 = vld [vmem:[%s18140_s11 + $0x1e0] sm:$0xff]  }
 0x4ac   : > { %13104 = vrot.lane.b32.xlu0 %v16260_v37, %s14104_s1  ;;  %8379 = vmatprep.mubr.bf16.mxu1 %v7430_v18  ;;  %v5591_v37 = vld [vmem:[#allocation3 + $0x20] sm:$0xff] }
 0x4ad   : > { %13109 = vrot.lane.b32.xlu1 %v16252_v53, %s14104_s1  ;;  %8380 = vmatmul.mubr.bf16.vlgmr.msra.gmra.mxu1 %v7429_v25  ;;  %v13776_v53 = vld [vmem:[%s18140_s11 + $0x148] sm:$0xff]   ;;  %v13138_v25 = vpack.i.bf16 %v16411_v8, %v16230_v15  ;;  %v16438_v15 = vpack.i.bf16 %v16426_v1, %v16245_v59 }
 0x4ae   : > { %v16355_v55 = vpop.permute.xlu0 %12809  ;;  %11700 = vmatprep.subr.bf16.mxu0 %v13776_v53  ;;  %v13781_v53 = vld [vmem:[%s18140_s11 + $0x1b8] sm:$0xff]  }
 0x4af   : > { %v16366_v5 = vpop.permute.xlu1 %12834  ;;  %11701 = vmatpush3.bf16.msra.mxu0 %v13777_v23  ;;  %11729 = vmatpush3.bf16.msra.mxu1 %v13781_v53  ;;  %v16459_v23 = vld [vmem:[#allocation3 + $0x85] sm:$0xff]  ;;  %v6422_v53 = vsel %vm929_vm4, %v16152_v12, %v12827_v4  ;;  %v16538_v12 = vld [vmem:[#allocation3 + $0x93] sm:$0xff] }
 0x4b0   : > { %13114 = vrot.lane.b32.xlu0 %v16213_v22, %s14106_s27  ;;  %v6372_v22 = vsel %vm929_vm4, %v5591_v37, %v12771_v43  ;;  %11702 = vmatprep.subr.bf16.mxu0 %v13778_v30  ;;  %v16440_v43 = vld [vmem:[#allocation3 + $0x81] sm:$0xff]  ;;  %v16495_v30 = vld [vmem:[#allocation3 + $0x90] sm:$0xff] }
 0x4b1   : > { %13119 = vrot.lane.b32.xlu1 %v16216_v17, %s14106_s27  ;;  %v6380_v11 = vsel %vm890_vm2, %v6372_v22, %v12781_v7  ;;  %v13153_v52 = vpack.i.bf16 %v16440_v43, %v16208_v9  ;;  %v13782_v7 = vld [vmem:[%s18140_s11 + $0x1f0] sm:$0xff]   ;;  %v16519_v57 = vpack.i.bf16 %v16495_v30, %v16357_v21 }
 0x4b2   : > { %v12815_v17 = vpop.permute.xlu0 %12814  ;;  %v6389_v47 = vsel %vm6386_vm6, %v6380_v11, %v12786_v44  ;;  %11730 = vmatprep.subr.bf16.mxu1 %v13782_v7  ;;  %v13168_v44 = vpack.i.bf16 %v16459_v23, %v16205_v34  ;;  %v12821_v11 = vunpack.i.l.bf16 %v16302_v31 }
 0x4b3   : > { %v12817_v24 = vunpack.i.h.bf16 %v12815_v17  ;;  %v12816_v38 = vunpack.i.l.bf16 %v12815_v17  ;;  %v16395_v45 = vpop.permute.xlu1 %12849  ;;  %v7440_v2 = vpack.c.bf16 %v6390_v10, %v6389_v47  ;;  %11703 = vmatpush3.bf16.msra.mxu0 %v13779_v3  ;;  %11731 = vmatpush3.bf16.msra.mxu1 %v13783_v62  ;;  %v12822_v17 = vunpack.i.h.bf16 %v16302_v31  ;;  %v13787_v3 = vld [vmem:[%s18140_s11 + $0x1a0] sm:$0xff]   ;;  %v13788_v47 = vld [vmem:[%s18140_s11 + $0x1d8] sm:$0xff]  }
 0x4b4   : > { %13124 = vrot.lane.b32.xlu0 %v16381_v54, %s14106_s27  ;;  %11732 = vmatprep.subr.bf16.mxu1 %v13784_v60  ;;  %v12832_v10 = vunpack.i.h.bf16 %v16342_v58 }
 0x4b5   : > { %13129 = vrot.lane.b32.xlu1 %v16385_v35, %s14105_s26  ;;  %v6413_v36 = vsel %vm6386_vm6, %v6405_v39, %v12816_v38  ;;  %v6414_v49 = vsel %vm6386_vm6, %v6406_v16, %v12817_v24  ;;  %v12831_v24 = vunpack.i.l.bf16 %v16342_v58  ;;  %v12836_v39 = vunpack.i.l.bf16 %v16366_v5  ;;  %v5656_v16 = vld [vmem:[#allocation3 + $0x31] sm:$0xff] }
 0x4b6   : > { %v16417_v28 = vpop.permute.xlu0 %12839  ;;  %v7441_v18 = vpack.c.bf16 %v6414_v49, %v6413_v36  ;;  %v12837_v36 = vunpack.i.h.bf16 %v16366_v5  ;;  %v6421_v58 = vsel %vm929_vm4, %v5656_v16, %v12826_v0  ;;  %v6446_v5 = vsel %vm929_vm4, %v16155_v20, %v12822_v17 }
 0x4b7   : > { %v16421_v29 = vpop.permute.xlu1 %12854  ;;  %11733 = vmatpush3.bf16.msra.mxu1 %v13785_v27  ;;  %v6430_v21 = vsel %vm890_vm2, %v6422_v53, %v12832_v10  ;;  %v16562_v10 = vld [vmem:[#allocation3 + $0x94] sm:$0xff] }
 0x4b8   : > { %13134 = vrot.lane.b32.xlu0 %v13133_v61, %s14105_s26  ;;  %8322 = vmatprep.mubr.bf16.mxu0 %v7441_v18 }
 0x4b9   : > { %13139 = vrot.lane.b32.xlu1 %v13138_v25, %s14104_s1  ;;  %8323 = vmatmul.mubr.bf16.gmra.mxu0 %v7440_v2  ;;  %v13789_v2 = vld [vmem:[%s18140_s11 + $0x198] sm:$0xff]  }
 0x4ba   : > { %v16429_v63 = vpop.permute.xlu0 %12844  ;;  %11734 = vmatprep.subr.bf16.mxu1 %v13786_v46 }
 0x4bb   : > { %v16434_v6 = vpop.permute.xlu1 %12859  ;;  %11735 = vmatpush3.bf16.msra.mxu1 %v13787_v3  ;;  %v16555_v3 = vld [vmem:[#allocation3 + $0x91] sm:$0xff] }
 0x4bc   : > { %13149 = vrot.lane.b32.xlu0 %v16381_v54, %s14105_s26  ;;  %11736 = vmatprep.subr.bf16.mxu1 %v13788_v47  ;;  %v13792_v47 = vld [vmem:[%s18140_s11 + $0x1c8] sm:$0xff]  }
 0x4bd   : > { %13144 = vrot.lane.b32.xlu1 %v16438_v15, %s14106_s27 }
 0x4be   : > { %v16449_v37 = vpop.permute.xlu0 %12869 }
 0x4bf   : > { %v16453_v59 = vpop.permute.xlu1 %12864  ;;  %11737 = vmatpush3.bf16.msra.mxu1 %v13789_v2 }
 0x4c0   : > { %13154 = vrot.lane.b32.xlu0 %v13153_v52, %s14104_s1  ;;  %v6429_v52 = vsel %vm890_vm2, %v6421_v58, %v12831_v24  ;;  %v16553_v24 = vpack.i.bf16 %v16538_v12, %v16411_v8  ;;  %v16568_v8 = vpack.i.bf16 %v16555_v3, %v16440_v43  ;;  %v13794_v43 = vld [vmem:[%s18140_s11 + $0x1c0] sm:$0xff]  }
 0x4c1   : > { %13164 = vrot.lane.b32.xlu1 %v16438_v15, %s14105_s26  ;;  %v6437_v62 = vsel %vm6386_vm6, %v6429_v52, %v12836_v39  ;;  %v13795_v52 = vld [vmem:[%s18140_s11 + $0x180] sm:$0xff]  }
 0x4c2   : > { %v16466_v9 = vpop.permute.xlu0 %12879 }
 0x4c3   : > { %v16471_v14 = vpop.permute.xlu1 %12874 }
 0x4c4   : > { %13159 = vrot.lane.b32.xlu0 %v13133_v61, %s14106_s27 }
 0x4c5   : > { %13169 = vrot.lane.b32.xlu1 %v13168_v44, %s14104_s1  ;;  %v11624_v34 = vpop.f32.mrf.mxu0 }
 0x4c6   : > { %v16480_v51 = vpop.permute.xlu0 %12889 }
 0x4c7   : > { %v16485_v22 = vpop.permute.xlu1 %12884  ;;  %v11625_v50 = vpop.f32.mrf.mxu0 }
 0x4c8   : > { %13179 = vrot.lane.b32.xlu0 %v13133_v61, %s14105_s26  ;;  %v16509_v18 = vadd.f32 %v11625_v50, %v11624_v34  ;;  %v13793_v50 = vld [vmem:[%s18140_s11 + $0x188] sm:$0xff]  }
 0x4c9   : > { %13174 = vrot.lane.b32.xlu1 %v16385_v35, %s14106_s27 }
 0x4ca   : > { %v12895_v38 = vpop.permute.xlu0 %12894 }
 0x4cb   : > { %v16505_v31 = vpop.permute.xlu1 %12904  ;;  %v12897_v49 = vunpack.i.h.bf16 %v12895_v38  ;;  %v12896_v61 = vunpack.i.l.bf16 %v12895_v38 }
 0x4cc   : > { %13184 = vrot.lane.b32.xlu0 %v13138_v25, %s14104_s1  ;;  %v6445_v25 = vsel %vm929_vm4, %v16070_v19, %v12821_v11  ;;  %v6438_v19 = vsel %vm6386_vm6, %v6430_v21, %v12837_v36 }
 0x4cd   : > { %13199 = vrot.lane.b32.xlu1 %v16385_v35, %s14105_s26  ;;  %v13790_v35 = vld [vmem:[%s18140_s11 + $0x1d0] sm:$0xff]   ;;  %v6453_v27 = vsel %vm890_vm2, %v6445_v25, %v12896_v61  ;;  %v6454_v46 = vsel %vm890_vm2, %v6446_v5, %v12897_v49  ;;  %v7442_v38 = vpack.c.bf16 %v6438_v19, %v6437_v62  ;;  %v16577_v49 = vpack.i.bf16 %v16562_v10, %v16426_v1  ;;  %v5593_v5 = vld [vmem:[#allocation3 + $0x40] sm:$0xff] }
 0x4ce   : > { %v12900_v7 = vpop.permute.xlu0 %12899  ;;  %11738 = vmatprep.subr.bf16.mxu1 %v13790_v35  ;;  %v16579_v61 = vld [vmem:[#allocation3 + $0x95] sm:$0xff] }
 0x4cf   : > { %v12902_v60 = vunpack.i.h.bf16 %v12900_v7  ;;  %v12901_v44 = vunpack.i.l.bf16 %v12900_v7  ;;  %v16533_v20 = vpop.permute.xlu1 %12909  ;;  %v5594_v25 = vld [vmem:[#allocation3 + $0x50] sm:$0xff]  ;;  %v16590_v1 = vpack.i.bf16 %v16579_v61, %v16459_v23  ;;  %v13796_v7 = vld [vmem:[%s18140_s11 + $0x278] sm:$0xff]   ;;  %v12877_v23 = vunpack.i.h.bf16 %v16471_v14 }
 0x4d0   : > { %13189 = vrot.lane.b32.xlu0 %v16438_v15, %s14106_s27  ;;  %v13791_v15 = vld [vmem:[%s18140_s11 + $0x190] sm:$0xff]   ;;  %11768 = vmatprep.subr.bf16.mxu0 %v13796_v7 }
 0x4d1   : > { %13204 = vrot.lane.b32.xlu1 %v16519_v57, %s14104_s1  ;;  %v6461_v34 = vsel %vm6386_vm6, %v6453_v27, %v12901_v44  ;;  %v6462_v0 = vsel %vm6386_vm6, %v6454_v46, %v12902_v60  ;;  %11739 = vmatpush3.bf16.msra.mxu1 %v13791_v15  ;;  %v16602_v19 = vld [vmem:[#allocation3 + $0x92] sm:$0xff]  ;;  %v12876_v27 = vunpack.i.l.bf16 %v16471_v14 }
 0x4d2   : > { %v16546_v17 = vpop.permute.xlu0 %12919  ;;  %v7443_v11 = vpack.c.bf16 %v6462_v0, %v6461_v34  ;;  %11740 = vmatprep.subr.bf16.mxu1 %v13792_v47  ;;  %v12887_v0 = vunpack.i.h.bf16 %v16485_v22  ;;  %v13233_v47 = vpack.i.bf16 %v16602_v19, %v16397_v32  ;;  %v12892_v32 = vunpack.i.h.bf16 %v16480_v51  ;;  %v16645_v7 = vld [vmem:[#allocation3 + $0x54] sm:$0xff] }
 0x4d3   : > { %v12915_v4 = vpop.permute.xlu1 %12914 }
 0x4d4   : > { %13194 = vrot.lane.b32.xlu0 %v16381_v54, %s14106_s27  ;;  %8387 = vmatprep.mubr.bf16.mxu1 %v7443_v11  ;;  %v12917_v16 = vunpack.i.h.bf16 %v12915_v4  ;;  %v12916_v36 = vunpack.i.l.bf16 %v12915_v4  ;;  %v12886_v11 = vunpack.i.l.bf16 %v16485_v22  ;;  %v12871_v4 = vunpack.i.l.bf16 %v16449_v37 }
 0x4d5   : > { %13214 = vrot.lane.b32.xlu1 %v16553_v24, %s14105_s26  ;;  %8388 = vmatmul.mubr.bf16.gmra.mxu1 %v7442_v38  ;;  %v12872_v22 = vunpack.i.h.bf16 %v16449_v37 }
 0x4d6   : > { %v12925_v39 = vpop.permute.xlu0 %12924  ;;  %11741 = vmatpush3.bf16.msra.mxu1 %v13793_v50  ;;  %v6924_v35 = vsel %vm929_vm4, %v5594_v25, %v12917_v16  ;;  %v6923_v21 = vsel %vm929_vm4, %v5593_v5, %v12916_v36  ;;  %v12882_v50 = vunpack.i.h.bf16 %v16466_v9  ;;  %v12881_v16 = vunpack.i.l.bf16 %v16466_v9 }
 0x4d7   : > { %v16573_v54 = vpop.permute.xlu1 %12934  ;;  %v12927_v2 = vunpack.i.h.bf16 %v12925_v39  ;;  %v12926_v58 = vunpack.i.l.bf16 %v12925_v39  ;;  %11742 = vmatprep.subr.bf16.mxu1 %v13794_v43  ;;  %v16632_v43 = vld [vmem:[#allocation3 + $0x96] sm:$0xff] }
 0x4d8   : > { %13209 = vrot.lane.b32.xlu0 %v16568_v8, %s14106_s27 }
 0x4d9   : > { %13219 = vrot.lane.b32.xlu1 %v16577_v49, %s14104_s1  ;;  %v6931_v46 = vsel %vm890_vm2, %v6923_v21, %v12926_v58  ;;  %v6932_v34 = vsel %vm890_vm2, %v6924_v35, %v12927_v2  ;;  %v6375_v2 = vsel %vm929_vm4, %v5594_v25, %v12877_v23  ;;  %v6374_v58 = vsel %vm929_vm4, %v5593_v5, %v12876_v27  ;;  %v13801_v35 = vld [vmem:[%s18140_s11 + $0x2f8] sm:$0xff]  }
 0x4da   : > { %v12930_v53 = vpop.permute.xlu0 %12929  ;;  %11743 = vmatpush3.bf16.msra.mxu1 %v13795_v52  ;;  %v16639_v52 = vld [vmem:[#allocation3 + $0x44] sm:$0xff]  ;;  %v6382_v37 = vsel %vm890_vm2, %v6374_v58, %v12886_v11  ;;  %v6383_v9 = vsel %vm890_vm2, %v6375_v2, %v12887_v0  ;;  %v6400_v21 = vsel %vm929_vm4, %v16645_v7, %v12872_v22 }
 0x4db   : > { %v12932_v62 = vunpack.i.h.bf16 %v12930_v53  ;;  %v12931_v60 = vunpack.i.l.bf16 %v12930_v53  ;;  %v16600_v44 = vpop.permute.xlu1 %12949  ;;  %v12891_v53 = vunpack.i.l.bf16 %v16480_v51  ;;  %v6399_v5 = vsel %vm929_vm4, %v16639_v52, %v12871_v4  ;;  %11808 = vmatprep.subr.bf16.mxu1 %v13801_v35  ;;  %v16679_v58 = vld [vmem:[#allocation3 + $0xa0] sm:$0xff] }
 0x4dc   : > { %13229 = vrot.lane.b32.xlu0 %v16590_v1, %s14106_s27  ;;  %v13248_v51 = vpack.i.bf16 %v16632_v43, %v16359_v26  ;;  %v6407_v27 = vsel %vm890_vm2, %v6399_v5, %v12881_v16 }
 0x4dd   : > { %13224 = vrot.lane.b32.xlu1 %v16568_v8, %s14105_s26  ;;  %v16615_v15 = vsel %vm6386_vm6, %v6931_v46, %v12931_v60  ;;  %v16618_v14 = vsel %vm6386_vm6, %v6932_v34, %v12932_v62  ;;  %v6408_v46 = vsel %vm890_vm2, %v6400_v21, %v12882_v50  ;;  %v6391_v26 = vsel %vm6386_vm6, %v6382_v37, %v12891_v53  ;;  %v5774_v53 = vld [vmem:[#allocation3 + $0xa1] sm:$0xff]  ;;  %v5831_v37 = vld [vmem:[#allocation3 + $0xb1] sm:$0xff] }
 0x4de   : > { %v16621_v38 = vpop.permute.xlu0 %12939  ;;  %v6392_v34 = vsel %vm6386_vm6, %v6383_v9, %v12892_v32  ;;  %v13283_v9 = vpack.i.bf16 %v5774_v53, %v16555_v3  ;;  %v16700_v5 = vpack.i.bf16 %v5831_v37, %v5774_v53  ;;  %v12937_v21 = vunpack.i.h.bf16 %v16573_v54  ;;  %v5806_v53 = vld [vmem:[#allocation3 + $0xa5] sm:$0xff] }
 0x4df   : > { %v16630_v36 = vpop.permute.xlu1 %12954  ;;  %v7453_v16 = vpack.c.bf16 %v6392_v34, %v6391_v26  ;;  %v12941_v26 = vunpack.i.l.bf16 %v16621_v38  ;;  %v16712_v34 = vld [vmem:[#allocation3 + $0x51] sm:$0xff] }
 0x4e0   : > { %13234 = vrot.lane.b32.xlu0 %v13233_v47, %s14104_s1 }
 0x4e1   : > { %13244 = vrot.lane.b32.xlu1 %v16590_v1, %s14105_s26 }
 0x4e2   : > { %v12945_v25 = vpop.permute.xlu0 %12944 }
 0x4e3   : > { %v12947_v62 = vunpack.i.h.bf16 %v12945_v25  ;;  %v12946_v60 = vunpack.i.l.bf16 %v12945_v25  ;;  %v16656_v23 = vpop.permute.xlu1 %12959  ;;  %v5782_v25 = vld [vmem:[#allocation3 + $0xa2] sm:$0xff] }
 0x4e4   : > { %13239 = vrot.lane.b32.xlu0 %v16553_v24, %s14106_s27  ;;  %v13288_v3 = vpack.i.bf16 %v5782_v25, %v16602_v19 }
 0x4e5   : > { %13249 = vrot.lane.b32.xlu1 %v13248_v51, %s14104_s1  ;;  %v6415_v0 = vsel %vm6386_vm6, %v6407_v27, %v12946_v60  ;;  %v6416_v11 = vsel %vm6386_vm6, %v6408_v46, %v12947_v62  ;;  %v16708_v27 = vld [vmem:[#allocation3 + $0xa4] sm:$0xff]  ;;  %v12942_v46 = vunpack.i.h.bf16 %v16621_v38 }
 0x4e6   : > { %v16667_v4 = vpop.permute.xlu0 %12969  ;;  %v7454_v47 = vpack.c.bf16 %v6416_v11, %v6415_v0  ;;  %v16714_v0 = vld [vmem:[#allocation3 + $0x61] sm:$0xff]  ;;  %v13298_v38 = vpack.i.bf16 %v16708_v27, %v16562_v10 }
 0x4e7   : > { %v16669_v22 = vpop.permute.xlu1 %12964 }
 0x4e8   : > { %13259 = vrot.lane.b32.xlu0 %v16577_v49, %s14104_s1  ;;  %8330 = vmatprep.mubr.bf16.mxu0 %v7454_v47  ;;  %v16689_v49 = vpack.i.bf16 %v16679_v58, %v16495_v30  ;;  %v5839_v30 = vld [vmem:[#allocation3 + $0xb2] sm:$0xff]  ;;  %v12966_v41 = vunpack.i.l.bf16 %v16669_v22 }
 0x4e9   : > { %13254 = vrot.lane.b32.xlu1 %v16553_v24, %s14105_s26  ;;  %8331 = vmatmul.mubr.bf16.gmra.mxu0 %v7453_v16  ;;  %v13303_v60 = vpack.i.bf16 %v5839_v30, %v5782_v25  ;;  %v7332_v30 = vsel %vm929_vm4, %v16645_v7, %v12937_v21  ;;  %v5960_v7 = vld [vmem:[#allocation3 + $0xc3] sm:$0xff] }
 0x4ea   : > { %v16675_v50 = vpop.permute.xlu0 %12974  ;;  %v7340_v21 = vsel %vm890_vm2, %v7332_v30, %v12942_v46 }
 0x4eb   : > { %v16677_v2 = vpop.permute.xlu1 %12984 }
 0x4ec   : > { %13269 = vrot.lane.b32.xlu0 %v16590_v1, %s14106_s27 }
 0x4ed   : > { %13264 = vrot.lane.b32.xlu1 %v16519_v57, %s14104_s1 }
 0x4ee   : > { %v16685_v32 = vpop.permute.xlu0 %12979 }
 0x4ef   : > { %v16691_v24 = vpop.permute.xlu1 %12989 }
 0x4f0   : > { %13279 = vrot.lane.b32.xlu0 %v16689_v49, %s14105_s26 }
 0x4f1   : > { %13274 = vrot.lane.b32.xlu1 %v16568_v8, %s14106_s27  ;;  %v12936_v8 = vunpack.i.l.bf16 %v16573_v54 }
 0x4f2   : > { %v13000_v1 = vpop.permute.xlu0 %12999 }
 0x4f3   : > { %v16698_v57 = vpop.permute.xlu1 %12994  ;;  %v13002_v51 = vunpack.i.h.bf16 %v13000_v1  ;;  %v13001_v35 = vunpack.i.l.bf16 %v13000_v1 }
 0x4f4   : > { %13284 = vrot.lane.b32.xlu0 %v13283_v9, %s14104_s1 }
 0x4f5   : > { %13294 = vrot.lane.b32.xlu1 %v16700_v5, %s14105_s26  ;;  %v7356_v54 = vsel %vm929_vm4, %v16714_v0, %v13002_v51  ;;  %v7355_v19 = vsel %vm929_vm4, %v16712_v34, %v13001_v35 }
 0x4f6   : > { %v13005_v62 = vpop.permute.xlu0 %13004 }
 0x4f7   : > { %v13007_v11 = vunpack.i.h.bf16 %v13005_v62  ;;  %v13006_v47 = vunpack.i.l.bf16 %v13005_v62  ;;  %v13010_v16 = vpop.permute.xlu1 %13009  ;;  %v13308_v62 = vpack.i.bf16 %v5806_v53, %v16579_v61 }
 0x4f8   : > { %v13012_v37 = vunpack.i.h.bf16 %v13010_v16  ;;  %v13011_v1 = vunpack.i.l.bf16 %v13010_v16  ;;  %13289 = vrot.lane.b32.xlu0 %v13288_v3, %s14106_s27 }
 0x4f9   : > { %13304 = vrot.lane.b32.xlu1 %v13303_v60, %s14104_s1  ;;  %v7363_v9 = vsel %vm890_vm2, %v7355_v19, %v13006_v47  ;;  %v7364_v25 = vsel %vm890_vm2, %v7356_v54, %v13007_v11  ;;  %v7331_v60 = vsel %vm929_vm4, %v16639_v52, %v12936_v8  ;;  %v5846_v11 = vld [vmem:[#allocation3 + $0xa3] sm:$0xff]  ;;  %v5847_v54 = vld [vmem:[#allocation3 + $0xb3] sm:$0xff]  ;;  %v12956_v8 = vunpack.i.l.bf16 %v16630_v36 }
 0x4fa   : > { %v13015_v51 = vpop.permute.xlu0 %13014  ;;  %v16730_v35 = vsel %vm6386_vm6, %v7363_v9, %v13011_v1  ;;  %v16733_v16 = vsel %vm6386_vm6, %v7364_v25, %v13012_v37  ;;  %v7339_v61 = vsel %vm890_vm2, %v7331_v60, %v12941_v26  ;;  %v5814_v19 = vld [vmem:[#allocation3 + $0xa6] sm:$0xff]  ;;  %v13313_v9 = vpack.i.bf16 %v5847_v54, %v5846_v11  ;;  %v5863_v60 = vld [vmem:[#allocation3 + $0xb5] sm:$0xff] }
 0x4fb   : > { %18396 = vst [vmem:[#allocation43_spill] sm:$0xff] %v16730_v35  ;;  %18397 = vst [vmem:[#allocation40_spill] sm:$0xff] %v16733_v16  ;;  %v13017_v10 = vunpack.i.h.bf16 %v13015_v51  ;;  %v13016_v39 = vunpack.i.l.bf16 %v13015_v51  ;;  %v16737_v47 = vpop.permute.xlu1 %13019  ;;  %v5928_v26 = vld [vmem:[#allocation3 + $0xc6] sm:$0xff]  ;;  %v13318_v46 = vpack.i.bf16 %v5814_v19, %v16632_v43  ;;  %v13328_v54 = vpack.i.bf16 %v5846_v11, %v16538_v12 }
 0x4fc   : > { %13299 = vrot.lane.b32.xlu0 %v13298_v38, %s14105_s26  ;;  %v12962_v12 = vunpack.i.h.bf16 %v16656_v23  ;;  %v12961_v11 = vunpack.i.l.bf16 %v16656_v23 }
 0x4fd   : > { %v16745_v37 = vsel %vm6386_vm6, %v7339_v61, %v13016_v39  ;;  %v16748_v52 = vsel %vm6386_vm6, %v7340_v21, %v13017_v10  ;;  %13309 = vrot.lane.b32.xlu1 %v13308_v62, %s14104_s1  ;;  %v5927_v39 = vld [vmem:[#allocation3 + $0xb6] sm:$0xff]  ;;  %v13353_v61 = vpack.i.bf16 %v5863_v60, %v5806_v53  ;;  %v12952_v21 = vunpack.i.h.bf16 %v16600_v44 }
 0x4fe   : > { %18398 = vst [vmem:[#allocation42_spill] sm:$0xff] %v16745_v37  ;;  %18399 = vst [vmem:[#allocation23_spill] sm:$0xff] %v16748_v52  ;;  %v16753_v1 = vpop.permute.xlu0 %13024  ;;  %v13348_v30 = vpack.i.bf16 %v5928_v26, %v5927_v39  ;;  %v12951_v26 = vunpack.i.l.bf16 %v16600_v44  ;;  %v13358_v60 = vpack.i.bf16 %v5927_v39, %v5814_v19  ;;  %v16784_v52 = vld [vmem:[#allocation3 + $0x55] sm:$0xff] }
 0x4ff   : > { %v16755_v25 = vpop.permute.xlu1 %13029  ;;  %18400 = vst [vmem:[#allocation16_spill] sm:$0xff] %v16784_v52  ;;  %v6448_v35 = vsel %vm929_vm4, %v16189_v33, %v12952_v21 }
 0x500   : > { %13314 = vrot.lane.b32.xlu0 %v13313_v9, %s14106_s27  ;;  %v6447_v23 = vsel %vm929_vm4, %v16784_v52, %v12951_v26 }
 0x501   : > { %13319 = vrot.lane.b32.xlu1 %v13318_v46, %s14106_s27 }
 0x502   : > { %v16760_v51 = vpop.permute.xlu0 %13034 }
 0x503   : > { %v16762_v62 = vpop.permute.xlu1 %13039 }
 0x504   : > { %13324 = vrot.lane.b32.xlu0 %v13288_v3, %s14105_s26  ;;  %v12957_v3 = vunpack.i.h.bf16 %v16630_v36  ;;  %v13343_v36 = vpack.i.bf16 %v5961_v13, %v5960_v7 }
 0x505   : > { %13349 = vrot.lane.b32.xlu1 %v13348_v30, %s14105_s26 }
 0x506   : > { %v16766_v10 = vpop.permute.xlu0 %13044  ;;  %v6424_v19 = vsel %vm929_vm4, %v16714_v0, %v12957_v3 }
 0x507   : > { %v16769_v43 = vpop.permute.xlu1 %13059 }
 0x508   : > { %13329 = vrot.lane.b32.xlu0 %v13328_v54, %s14104_s1  ;;  %v12967_v54 = vunpack.i.h.bf16 %v16669_v22  ;;  %v6423_v22 = vsel %vm929_vm4, %v16712_v34, %v12956_v8 }
 0x509   : > { %13354 = vrot.lane.b32.xlu1 %v13353_v61, %s14105_s26 }
 0x50a   : > { %v13050_v30 = vpop.permute.xlu0 %13049 }
 0x50b   : > { %v16779_v53 = vpop.permute.xlu1 %13064  ;;  %v13052_v37 = vunpack.i.h.bf16 %v13050_v30  ;;  %v13051_v44 = vunpack.i.l.bf16 %v13050_v30  ;;  %v6432_v30 = vsel %vm890_vm2, %v6424_v19, %v12962_v12  ;;  %v5937_v19 = vld [vmem:[#allocation3 + $0xd0] sm:$0xff] }
 0x50c   : > { %13334 = vrot.lane.b32.xlu0 %v13298_v38, %s14106_s27  ;;  %v6431_v38 = vsel %vm890_vm2, %v6423_v22, %v12961_v11  ;;  %v6440_v7 = vsel %vm6386_vm6, %v6432_v30, %v12967_v54  ;;  %v5967_v11 = vld [vmem:[#allocation3 + $0xb4] sm:$0xff]  ;;  %v5968_v54 = vld [vmem:[#allocation3 + $0xc4] sm:$0xff] }
 0x50d   : > { %13359 = vrot.lane.b32.xlu1 %v13358_v60, %s14104_s1  ;;  %v6439_v33 = vsel %vm6386_vm6, %v6431_v38, %v12966_v41  ;;  %v6455_v0 = vsel %vm890_vm2, %v6447_v23, %v13051_v44  ;;  %v6456_v34 = vsel %vm890_vm2, %v6448_v35, %v13052_v37  ;;  %v13373_v37 = vpack.i.bf16 %v5967_v11, %v16708_v27  ;;  %v5969_v44 = vld [vmem:[#allocation3 + $0xd4] sm:$0xff]  ;;  %v5936_v23 = vld [vmem:[#allocation3 + $0xc0] sm:$0xff] }
 0x50e   : > { %v13055_v39 = vpop.permute.xlu0 %13054  ;;  %v7455_v41 = vpack.c.bf16 %v6440_v7, %v6439_v33  ;;  %v16826_v22 = vld [vmem:[#allocation2 + $0x23] sm:$0xff]  ;;  %v13388_v27 = vpack.i.bf16 %v5969_v44, %v5968_v54  ;;  %v13398_v30 = vpack.i.bf16 %v5937_v19, %v5936_v23  ;;  %v5977_v33 = vld [vmem:[#allocation3 + $0xd5] sm:$0xff]  ;;  %v12847_v19 = vunpack.i.h.bf16 %v16429_v63 }
 0x50f   : > { %v13057_v16 = vunpack.i.h.bf16 %v13055_v39  ;;  %v13056_v60 = vunpack.i.l.bf16 %v13055_v39  ;;  %v16797_v13 = vpop.permute.xlu1 %13069  ;;  %v16829_v39 = vld [vmem:[#allocation2 + $0x42] sm:$0xff]  ;;  %v13046_v44 = vunpack.i.l.bf16 %v16766_v10 }
 0x510   : > { %13339 = vrot.lane.b32.xlu0 %v16689_v49, %s14106_s27  ;;  %v5935_v49 = vld [vmem:[#allocation3 + $0xb0] sm:$0xff]  ;;  %v16833_v38 = vld [vmem:[#allocation2 + $0x62] sm:$0xff] }
 0x511   : > { %13364 = vrot.lane.b32.xlu1 %v13313_v9, %s14105_s26  ;;  %v6463_v8 = vsel %vm6386_vm6, %v6455_v0, %v13056_v60  ;;  %v6464_v21 = vsel %vm6386_vm6, %v6456_v34, %v13057_v16  ;;  %v13378_v16 = vpack.i.bf16 %v5935_v49, %v16679_v58  ;;  %v16831_v58 = vld [vmem:[#allocation2 + $0x33] sm:$0xff]  ;;  %v5976_v60 = vld [vmem:[#allocation3 + $0xc5] sm:$0xff] }
 0x512   : > { %v16808_v26 = vpop.permute.xlu0 %13074  ;;  %v7456_v3 = vpack.c.bf16 %v6464_v21, %v6463_v8  ;;  %v8747_v7 = vld [vmem:[#allocation2 + $0x43] sm:$0xff]  ;;  %v5945_v8 = vld [vmem:[#allocation3 + $0xd1] sm:$0xff]  ;;  %v13418_v54 = vpack.i.bf16 %v16831_v58, %v16826_v22  ;;  %v13032_v22 = vunpack.i.h.bf16 %v16755_v25  ;;  %v13031_v58 = vunpack.i.l.bf16 %v16755_v25 }
 0x513   : > { %v16810_v12 = vpop.permute.xlu1 %13089  ;;  %v5944_v34 = vld [vmem:[#allocation3 + $0xc1] sm:$0xff]  ;;  %v8761_v21 = vld [vmem:[#allocation2 + $0x32] sm:$0xff]  ;;  %v13047_v25 = vunpack.i.h.bf16 %v16766_v10 }
 0x514   : > { %13344 = vrot.lane.b32.xlu0 %v13343_v36, %s14105_s26  ;;  %8395 = vmatprep.mubr.bf16.mxu1 %v7456_v3  ;;  %v12841_v3 = vunpack.i.l.bf16 %v16417_v28  ;;  %v13413_v11 = vpack.i.bf16 %v16829_v39, %v8761_v21  ;;  %v16844_v49 = vld [vmem:[#allocation2 + $0x52] sm:$0xff]  ;;  %v12846_v39 = vunpack.i.l.bf16 %v16429_v63  ;;  %v13408_v21 = vpack.i.bf16 %v5945_v8, %v5944_v34  ;;  %v16869_v8 = vld [vmem:[#allocation3 + $0x64] sm:$0xff] }
 0x515   : > { %13369 = vrot.lane.b32.xlu1 %v13318_v46, %s14105_s26  ;;  %8396 = vmatmul.mubr.bf16.gmra.mxu1 %v7455_v41  ;;  %v13042_v63 = vunpack.i.h.bf16 %v16762_v62  ;;  %s14108_s26 = smov 12  }
 0x516   : > { %v16814_v35 = vpop.permute.xlu0 %13079 }
 0x517   : > { %v16817_v9 = vpop.permute.xlu1 %13094 }
 0x518   : > { %13374 = vrot.lane.b32.xlu0 %v13373_v37, %s14104_s1  ;;  %v5751_v37 = vld [vmem:[#allocation3 + $0x26] sm:$0xff] }
 0x519   : > { %13379 = vrot.lane.b32.xlu1 %v13378_v16, %s14104_s1  ;;  %v13403_v16 = vpack.i.bf16 %v5977_v33, %v5976_v60  ;;  %v13026_v60 = vunpack.i.l.bf16 %v16753_v1 }
 0x51a   : > { %v16822_v36 = vpop.permute.xlu0 %13084 }
 0x51b   : > { %v16824_v46 = vpop.permute.xlu1 %13099 }
 0x51c   : > { %13384 = vrot.lane.b32.xlu0 %v13353_v61, %s14106_s27  ;;  %v12842_v61 = vunpack.i.h.bf16 %v16417_v28  ;;  %v13036_v28 = vunpack.i.l.bf16 %v16760_v51 }
 0x51d   : > { %13394 = vrot.lane.b32.xlu1 %v16700_v5, %s14106_s27  ;;  %v8748_v5 = vld [vmem:[#allocation2 + $0x53] sm:$0xff] }
 0x51e   : > { %v16837_v0 = vpop.permute.xlu0 %13104  ;;  %v16851_v23 = vpack.i.bf16 %v8748_v5, %v8747_v7  ;;  %v6875_v5 = vsel %vm929_vm4, %v5751_v37, %v12841_v3  ;;  %v12851_v3 = vunpack.i.l.bf16 %v16395_v45  ;;  %v16882_v37 = vld [vmem:[#allocation3 + $0x70] sm:$0xff] }
 0x51f   : > { %18401 = vst [vmem:[#allocation38_spill] sm:$0xff] %v16837_v0  ;;  %v16841_v41 = vpop.permute.xlu1 %13109 }
 0x520   : > { %18402 = vst [vmem:[#allocation27_spill] sm:$0xff] %v16841_v41  ;;  %13389 = vrot.lane.b32.xlu0 %v13388_v27, %s14104_s1  ;;  %v5752_v41 = vld [vmem:[#allocation3 + $0x36] sm:$0xff]  ;;  %v13027_v27 = vunpack.i.h.bf16 %v16753_v1  ;;  %v13037_v1 = vunpack.i.h.bf16 %v16760_v51  ;;  %v6883_v51 = vsel %vm890_vm2, %v6875_v5, %v12846_v39 }
 0x521   : > { %13399 = vrot.lane.b32.xlu1 %v13398_v30, %s14104_s1  ;;  %v6876_v7 = vsel %vm929_vm4, %v5752_v41, %v12842_v61  ;;  %v13041_v30 = vunpack.i.l.bf16 %v16762_v62  ;;  %v12852_v61 = vunpack.i.h.bf16 %v16395_v45  ;;  %v16878_v41 = vld [vmem:[#allocation3 + $0x74] sm:$0xff]  ;;  %v16880_v62 = vld [vmem:[#allocation3 + $0x60] sm:$0xff]  ;;  %v6377_v45 = vsel %vm929_vm4, %v16882_v37, %v13032_v22 }
 0x522   : > { %v16861_v33 = vpop.permute.xlu0 %13114  ;;  %v6402_v10 = vsel %vm929_vm4, %v16878_v41, %v13027_v27 }
 0x523   : > { %18403 = vst [vmem:[#allocation21_spill] sm:$0xff] %v16861_v33  ;;  %v16867_v34 = vpop.permute.xlu1 %13119  ;;  %v6376_v33 = vsel %vm929_vm4, %v16880_v62, %v13031_v58  ;;  %v6410_v22 = vsel %vm890_vm2, %v6402_v10, %v13037_v1  ;;  %v8765_v1 = vld [vmem:[#allocation2 + $0x72] sm:$0xff]  ;;  %v12972_v10 = vunpack.i.h.bf16 %v16667_v4 }
 0x524   : > { %18404 = vst [vmem:[#allocation44_spill] sm:$0xff] %v16867_v34  ;;  %13404 = vrot.lane.b32.xlu0 %v13403_v16, %s14106_s27  ;;  %v6884_v34 = vsel %vm890_vm2, %v6876_v7, %v12847_v19  ;;  %v6401_v16 = vsel %vm929_vm4, %v16869_v8, %v13026_v60  ;;  %v6384_v52 = vsel %vm890_vm2, %v6376_v33, %v13041_v30 }
 0x525   : > { %13409 = vrot.lane.b32.xlu1 %v13408_v21, %s14106_s27  ;;  %v6385_v21 = vsel %vm890_vm2, %v6377_v45, %v13042_v63  ;;  %v6393_v27 = vsel %vm6386_vm6, %v6384_v52, %v13046_v44  ;;  %v6409_v60 = vsel %vm890_vm2, %v6401_v16, %v13036_v28  ;;  %v6892_v63 = vsel %vm6386_vm6, %v6884_v34, %v12852_v61  ;;  %v8766_v61 = vld [vmem:[#allocation2 + $0x82] sm:$0xff] }
 0x526   : > { %v13125_v0 = vpop.permute.xlu0 %13124  ;;  %v6394_v7 = vsel %vm6386_vm6, %v6385_v21, %v13047_v25  ;;  %v12801_v52 = vunpack.i.l.bf16 %v16291_v48  ;;  %v12807_v44 = vunpack.i.h.bf16 %v16337_v42  ;;  %v5719_v25 = vld [vmem:[#allocation3 + $0x22] sm:$0xff]  ;;  %v12971_v16 = vunpack.i.l.bf16 %v16667_v4 }
 0x527   : > { %v13127_v39 = vunpack.i.h.bf16 %v13125_v0  ;;  %v13126_v5 = vunpack.i.l.bf16 %v13125_v0  ;;  %v16897_v19 = vpop.permute.xlu1 %13129  ;;  %v6891_v0 = vsel %vm6386_vm6, %v6883_v51, %v12851_v3  ;;  %v7466_v34 = vpack.c.bf16 %v6394_v7, %v6393_v27  ;;  %v8750_v51 = vld [vmem:[#allocation2 + $0x73] sm:$0xff] }
 0x528   : > { %13414 = vrot.lane.b32.xlu0 %v13413_v11, %s14104_s1  ;;  %v12806_v11 = vunpack.i.l.bf16 %v16337_v42  ;;  %v12811_v45 = vunpack.i.l.bf16 %v16355_v55  ;;  %v12977_v42 = vunpack.i.h.bf16 %v16675_v50  ;;  %v12976_v21 = vunpack.i.l.bf16 %v16675_v50  ;;  %v14001_v27 = vld [vmem:[#allocation3 + $0x32] sm:$0xff] }
 0x529   : > { %13419 = vrot.lane.b32.xlu1 %v13418_v54, %s14104_s1  ;;  %v6417_v58 = vsel %vm6386_vm6, %v6409_v60, %v13126_v5  ;;  %v6418_v33 = vsel %vm6386_vm6, %v6410_v22, %v13127_v39  ;;  %v12812_v54 = vunpack.i.h.bf16 %v16355_v55  ;;  %v18405_v39 = vpack.i.bf16 %v16833_v38, %v16844_v49  ;;  %v8749_v55 = vld [vmem:[#allocation2 + $0x63] sm:$0xff]  ;;  %v5754_v49 = vld [vmem:[#allocation3 + $0x56] sm:$0xff] }
 0x52a   : > { %v16912_v30 = vpop.permute.xlu0 %13134  ;;  %v7467_v28 = vpack.c.bf16 %v6418_v33, %v6417_v58  ;;  %v7432_v5 = vpack.c.bf16 %v6892_v63, %v6891_v0  ;;  %v12982_v4 = vunpack.i.h.bf16 %v16685_v32  ;;  %v12981_v60 = vunpack.i.l.bf16 %v16685_v32  ;;  %v5753_v38 = vld [vmem:[#allocation3 + $0x46] sm:$0xff] }
 0x52b   : > { %v16917_v3 = vpop.permute.xlu1 %13139  ;;  %v18406_v7 = vunpack.i.h.bf16 %v16291_v48  ;;  %v6851_v22 = vsel %vm929_vm4, %v5719_v25, %v12801_v52  ;;  %v13433_v33 = vpack.i.bf16 %v8766_v61, %v8765_v1  ;;  %v16934_v0 = vpack.i.bf16 %v8750_v51, %v8749_v55  ;;  %v8767_v55 = vld [vmem:[#allocation2 + $0x92] sm:$0xff] }
 0x52c   : > { %13424 = vrot.lane.b32.xlu0 %v18405_v39, %s14104_s1  ;;  %8338 = vmatprep.mubr.bf16.mxu0 %v7467_v28  ;;  %v6859_v32 = vsel %vm890_vm2, %v6851_v22, %v12806_v11  ;;  %v6878_v28 = vsel %vm929_vm4, %v5754_v49, %v12972_v10  ;;  %v8778_v39 = vld [vmem:[#allocation2 + $0x44] sm:$0xff]  ;;  %v12907_v11 = vunpack.i.h.bf16 %v16505_v31  ;;  %v8777_v10 = vld [vmem:[#allocation2 + $0x34] sm:$0xff] }
 0x52d   : > { %13429 = vrot.lane.b32.xlu1 %v16851_v23, %s14104_s1  ;;  %8339 = vmatmul.mubr.bf16.gmra.mxu0 %v7466_v34  ;;  %v6852_v50 = vsel %vm929_vm4, %v14001_v27, %v18406_v7  ;;  %v6877_v34 = vsel %vm929_vm4, %v5753_v38, %v12971_v16  ;;  %v6867_v52 = vsel %vm6386_vm6, %v6859_v32, %v12811_v45  ;;  %v12911_v45 = vunpack.i.l.bf16 %v16533_v20  ;;  %v8752_v38 = vld [vmem:[#allocation2 + $0x93] sm:$0xff]  ;;  %v5721_v49 = vld [vmem:[#allocation3 + $0x42] sm:$0xff] }
 0x52e   : > { %v13150_v58 = vpop.permute.xlu0 %13149  ;;  %8444 = vmatprep.mubr.bf16.mxu0 %v7432_v5  ;;  %v6860_v63 = vsel %vm890_vm2, %v6852_v50, %v12807_v44  ;;  %v6885_v1 = vsel %vm890_vm2, %v6877_v34, %v12976_v21  ;;  %v6886_v61 = vsel %vm890_vm2, %v6878_v28, %v12977_v42  ;;  %v12906_v44 = vunpack.i.l.bf16 %v16505_v31  ;;  %v8768_v42 = vld [vmem:[#allocation2 + $0xa2] sm:$0xff]  ;;  %v13797_v31 = vld [vmem:[%s18140_s11 + $0x238] sm:$0xff]  }
 0x52f   : > { %v16940_v48 = vpop.permute.xlu1 %13144  ;;  %v6868_v25 = vsel %vm6386_vm6, %v6860_v63, %v12812_v54  ;;  %v6893_v16 = vsel %vm6386_vm6, %v6885_v1, %v12981_v60  ;;  %v6894_v51 = vsel %vm6386_vm6, %v6886_v61, %v12982_v4  ;;  %v12912_v54 = vunpack.i.h.bf16 %v16533_v20  ;;  %v8751_v4 = vld [vmem:[#allocation2 + $0x83] sm:$0xff]  ;;  %v13798_v20 = vld [vmem:[%s18140_s11 + $0x270] sm:$0xff]  }
 0x530   : > { %13434 = vrot.lane.b32.xlu0 %v13433_v33, %s14104_s1  ;;  %v13448_v21 = vpack.i.bf16 %v8778_v39, %v8777_v10  ;;  %v7431_v27 = vpack.c.bf16 %v6868_v25, %v6867_v52  ;;  %v12922_v7 = vunpack.i.h.bf16 %v16546_v17  ;;  %v13152_v50 = vunpack.i.h.bf16 %v13150_v58  ;;  %v5722_v33 = vld [vmem:[#allocation3 + $0x52] sm:$0xff]  ;;  %v5755_v61 = vld [vmem:[#allocation3 + $0x66] sm:$0xff] }
 0x531   : > { %13439 = vrot.lane.b32.xlu1 %v16934_v0, %s14104_s1  ;;  %v13151_v22 = vunpack.i.l.bf16 %v13150_v58  ;;  %v12921_v32 = vunpack.i.l.bf16 %v16546_v17  ;;  %v7445_v34 = vpack.c.bf16 %v6894_v51, %v6893_v16  ;;  %v6854_v58 = vsel %vm929_vm4, %v5722_v33, %v12907_v11  ;;  %v5756_v17 = vld [vmem:[#allocation3 + $0x76] sm:$0xff] }
 0x532   : > { %v13155_v5 = vpop.permute.xlu0 %13154  ;;  %v6853_v39 = vsel %vm929_vm4, %v5721_v49, %v12906_v44  ;;  %v13453_v52 = vpack.i.bf16 %v8768_v42, %v8767_v55  ;;  %v6862_v1 = vsel %vm890_vm2, %v6854_v58, %v12912_v54  ;;  %v6880_v11 = vsel %vm929_vm4, %v5756_v17, %v13152_v50  ;;  %v13800_v54 = vld [vmem:[%s18140_s11 + $0x268] sm:$0xff]  }
 0x533   : > { %v16959_v60 = vpop.permute.xlu1 %13164  ;;  %v13157_v63 = vunpack.i.h.bf16 %v13155_v5  ;;  %v13156_v28 = vunpack.i.l.bf16 %v13155_v5  ;;  %v6861_v25 = vsel %vm890_vm2, %v6853_v39, %v12911_v45  ;;  %v13458_v5 = vpack.i.bf16 %v8752_v38, %v8751_v4  ;;  %v13802_v49 = vld [vmem:[%s18140_s11 + $0x228] sm:$0xff]  }
 0x534   : > { %13444 = vrot.lane.b32.xlu0 %v16851_v23, %s14104_s1  ;;  %v13799_v23 = vld [vmem:[%s18140_s11 + $0x230] sm:$0xff]   ;;  %v6879_v44 = vsel %vm929_vm4, %v5755_v61, %v13151_v22  ;;  %v6869_v45 = vsel %vm6386_vm6, %v6861_v25, %v12921_v32  ;;  %v6870_v55 = vsel %vm6386_vm6, %v6862_v1, %v12922_v7  ;;  %v13062_v4 = vunpack.i.h.bf16 %v16769_v43  ;;  %v8782_v1 = vld [vmem:[#allocation2 + $0x84] sm:$0xff] }
 0x535   : > { %13449 = vrot.lane.b32.xlu1 %v13448_v21, %s14104_s1  ;;  %8445 = vmatmul.mubr.bf16.vlgmr.msra.gmra.mxu0 %v7431_v27  ;;  %v6887_v42 = vsel %vm890_vm2, %v6879_v44, %v13156_v28  ;;  %v8780_v27 = vld [vmem:[#allocation2 + $0x64] sm:$0xff]  ;;  %v13061_v38 = vunpack.i.l.bf16 %v16769_v43  ;;  %v8779_v7 = vld [vmem:[#allocation2 + $0x54] sm:$0xff]  ;;  %v13067_v33 = vunpack.i.h.bf16 %v16779_v53  ;;  %v13066_v32 = vunpack.i.l.bf16 %v16779_v53 }
 0x536   : > { %v13160_v10 = vpop.permute.xlu0 %13159  ;;  %8452 = vmatprep.mubr.bf16.mxu0 %v7445_v34  ;;  %11769 = vmatpush3.bf16.msra.mxu0 %v13797_v31  ;;  %v6888_v31 = vsel %vm890_vm2, %v6880_v11, %v13157_v63  ;;  %v13468_v28 = vpack.i.bf16 %v8780_v27, %v8779_v7  ;;  %v7444_v34 = vpack.c.bf16 %v6870_v55, %v6869_v45  ;;  %v13804_v43 = vld [vmem:[%s18140_s11 + $0x260] sm:$0xff]   ;;  %v13077_v58 = vunpack.i.h.bf16 %v16808_v26  ;;  %v8781_v25 = vld [vmem:[#allocation2 + $0x74] sm:$0xff] }
 0x537   : > { %v13162_v16 = vunpack.i.h.bf16 %v13160_v10  ;;  %v13161_v51 = vunpack.i.l.bf16 %v13160_v10  ;;  %v16977_v21 = vpop.permute.xlu1 %13169  ;;  %11770 = vmatprep.subr.bf16.mxu0 %v13798_v20  ;;  %v13076_v39 = vunpack.i.l.bf16 %v16808_v26  ;;  %v17008_v53 = vld [vmem:[#allocation3 + $0x62] sm:$0xff]  ;;  %v17010_v61 = vld [vmem:[#allocation3 + $0x72] sm:$0xff]  ;;  %v13091_v27 = vunpack.i.l.bf16 %v16810_v12 }
 0x538   : > { %13454 = vrot.lane.b32.xlu0 %v13453_v52, %s14104_s1  ;;  %v6856_v17 = vsel %vm929_vm4, %v17010_v61, %v13062_v4  ;;  %v6855_v10 = vsel %vm929_vm4, %v17008_v53, %v13061_v38  ;;  %v13808_v45 = vld [vmem:[%s18140_s11 + $0x258] sm:$0xff]   ;;  %v12856_v4 = vunpack.i.l.bf16 %v16421_v29  ;;  %v13097_v38 = vunpack.i.h.bf16 %v16817_v9 }
 0x539   : > { %13459 = vrot.lane.b32.xlu1 %v13458_v5, %s14104_s1  ;;  %v6895_v50 = vsel %vm6386_vm6, %v6887_v42, %v13161_v51  ;;  %v6896_v22 = vsel %vm6386_vm6, %v6888_v31, %v13162_v16  ;;  %v6864_v11 = vsel %vm890_vm2, %v6856_v17, %v13067_v33  ;;  %v13478_v16 = vpack.i.bf16 %v8782_v1, %v8781_v25  ;;  %v8799_v51 = vld [vmem:[#allocation2 + $0xa3] sm:$0xff] }
 0x53a   : > { %v16992_v20 = vpop.permute.xlu0 %13179  ;;  %11771 = vmatpush3.bf16.msra.mxu0 %v13799_v23  ;;  %v7458_v52 = vpack.c.bf16 %v6896_v22, %v6895_v50  ;;  %v6863_v23 = vsel %vm890_vm2, %v6855_v10, %v13066_v32  ;;  %v6872_v42 = vsel %vm6386_vm6, %v6864_v11, %v13077_v58  ;;  %v13092_v31 = vunpack.i.h.bf16 %v16810_v12  ;;  %v8783_v50 = vld [vmem:[#allocation2 + $0x94] sm:$0xff]  ;;  %v8784_v22 = vld [vmem:[#allocation2 + $0xa4] sm:$0xff] }
 0x53b   : > { %v16999_v63 = vpop.permute.xlu1 %13174  ;;  %11772 = vmatprep.subr.bf16.mxu0 %v13800_v54  ;;  %v8800_v54 = vld [vmem:[#allocation2 + $0xb3] sm:$0xff]  ;;  %v6871_v55 = vsel %vm6386_vm6, %v6863_v23, %v13076_v39  ;;  %v13096_v7 = vunpack.i.l.bf16 %v16817_v9  ;;  %v13136_v32 = vunpack.i.l.bf16 %v16912_v30  ;;  %v12747_v58 = vunpack.i.h.bf16 %v16196_v40 }
 0x53c   : > { %13464 = vrot.lane.b32.xlu0 %v16934_v0, %s14104_s1  ;;  %v13806_v0 = vld [vmem:[%s18140_s11 + $0x220] sm:$0xff]   ;;  %v13483_v33 = vpack.i.bf16 %v8800_v54, %v8799_v51  ;;  %v13810_v12 = vld [vmem:[%s18140_s11 + $0x218] sm:$0xff]   ;;  %v13812_v9 = vld [vmem:[%s18140_s11 + $0x250] sm:$0xff]   ;;  %v7334_v25 = vsel %vm929_vm4, %v16878_v41, %v13092_v31  ;;  %v12862_v17 = vunpack.i.h.bf16 %v16434_v6  ;;  %v13131_v41 = vunpack.i.l.bf16 %v16897_v19 }
 0x53d   : > { %13469 = vrot.lane.b32.xlu1 %v13468_v28, %s14104_s1  ;;  %8453 = vmatmul.mubr.bf16.gmra.mxu0 %v7444_v34  ;;  %v13488_v34 = vpack.i.bf16 %v8784_v22, %v8783_v50  ;;  %v5783_v39 = vld [vmem:[#allocation3 + $0x33] sm:$0xff]  ;;  %v13142_v11 = vunpack.i.h.bf16 %v16917_v3  ;;  %v13146_v50 = vunpack.i.l.bf16 %v16940_v48 }
 0x53e   : > { %v17017_v26 = vpop.permute.xlu0 %13184  ;;  %8460 = vmatprep.mubr.bf16.mxu0 %v7458_v52  ;;  %11773 = vmatpush3.bf16.msra.mxu0 %v13802_v49  ;;  %v12857_v52 = vunpack.i.h.bf16 %v16421_v29  ;;  %v6899_v1 = vsel %vm929_vm4, %v5783_v39, %v12856_v4  ;;  %v13132_v29 = vunpack.i.h.bf16 %v16897_v19  ;;  %v17064_v23 = vld [vmem:[#allocation3 + $0x71] sm:$0xff] }
 0x53f   : > { %v17024_v44 = vpop.permute.xlu1 %13199  ;;  %11774 = vmatprep.subr.bf16.mxu0 %v13804_v43  ;;  %v7457_v43 = vpack.c.bf16 %v6872_v42, %v6871_v55  ;;  %v13814_v54 = vld [vmem:[%s18140_s11 + $0x210] sm:$0xff]   ;;  %v6425_v19 = vsel %vm929_vm4, %v17064_v23, %v13136_v32  ;;  %v12866_v32 = vunpack.i.l.bf16 %v16453_v59 }
 0x540   : > { %13474 = vrot.lane.b32.xlu0 %v13458_v5, %s14104_s1  ;;  %v13137_v5 = vunpack.i.h.bf16 %v16912_v30  ;;  %v7333_v30 = vsel %vm929_vm4, %v16869_v8, %v13091_v27  ;;  %v17066_v8 = vld [vmem:[#allocation3 + $0x81] sm:$0xff]  ;;  %v13147_v27 = vunpack.i.h.bf16 %v16940_v48 }
 0x541   : > { %13479 = vrot.lane.b32.xlu1 %v13478_v16, %s14104_s1  ;;  %v7341_v10 = vsel %vm890_vm2, %v7333_v30, %v13096_v7  ;;  %v13141_v16 = vunpack.i.l.bf16 %v16917_v3  ;;  %v13816_v3 = vld [vmem:[%s18140_s11 + $0x248] sm:$0xff]   ;;  %v12867_v7 = vunpack.i.h.bf16 %v16453_v59 }
 0x542   : > { %v17038_v49 = vpop.permute.xlu0 %13189  ;;  %11775 = vmatpush3.bf16.msra.mxu0 %v13806_v0  ;;  %v7342_v0 = vsel %vm890_vm2, %v7334_v25, %v13097_v38  ;;  %v12861_v38 = vunpack.i.l.bf16 %v16434_v6 }
 0x543   : > { %v17045_v28 = vpop.permute.xlu1 %13204  ;;  %11776 = vmatprep.subr.bf16.mxu0 %v13808_v45  ;;  %v6426_v45 = vsel %vm929_vm4, %v17066_v8, %v13137_v5  ;;  %v6433_v25 = vsel %vm890_vm2, %v6425_v19, %v13141_v16 }
 0x544   : > { %13484 = vrot.lane.b32.xlu0 %v13483_v33, %s14104_s1  ;;  %v13207_v22 = vunpack.i.h.bf16 %v17045_v28  ;;  %v13206_v4 = vunpack.i.l.bf16 %v17045_v28  ;;  %v17088_v33 = vld [vmem:[#allocation3 + $0x75] sm:$0xff]  ;;  %v6434_v39 = vsel %vm890_vm2, %v6426_v45, %v13142_v11  ;;  %v6907_v45 = vsel %vm890_vm2, %v6899_v1, %v12861_v38  ;;  %v5888_v1 = vld [vmem:[#allocation3 + $0xc1] sm:$0xff] }
 0x545   : > { %13489 = vrot.lane.b32.xlu1 %v13488_v34, %s14104_s1  ;;  %8461 = vmatmul.mubr.bf16.gmra.mxu0 %v7457_v43  ;;  %v14002_v34 = vld [vmem:[#allocation3 + $0x85] sm:$0xff]  ;;  %v6449_v28 = vsel %vm929_vm4, %v17088_v33, %v13131_v41  ;;  %v6441_v41 = vsel %vm6386_vm6, %v6433_v25, %v13146_v50  ;;  %v17123_v50 = vsel %vm6386_vm6, %v6907_v45, %v12866_v32  ;;  %v13072_v38 = vunpack.i.h.bf16 %v16797_v13 }
 0x546   : > { %v13195_v51 = vpop.permute.xlu0 %13194  ;;  %11777 = vmatpush3.bf16.msra.mxu0 %v13810_v12  ;;  %v6450_v48 = vsel %vm929_vm4, %v14002_v34, %v13132_v29  ;;  %v5784_v29 = vld [vmem:[#allocation3 + $0x43] sm:$0xff]  ;;  %v13071_v34 = vunpack.i.l.bf16 %v16797_v13  ;;  %v13081_v25 = vunpack.i.l.bf16 %v16814_v35  ;;  %v12992_v13 = vunpack.i.h.bf16 %v16691_v24 }
 0x547   : > { %v13197_v55 = vunpack.i.h.bf16 %v13195_v51  ;;  %v13196_v42 = vunpack.i.l.bf16 %v13195_v51  ;;  %v17077_v31 = vpop.permute.xlu1 %13214  ;;  %11778 = vmatprep.subr.bf16.mxu0 %v13812_v9  ;;  %v13818_v9 = vld [vmem:[%s18140_s11 + $0x208] sm:$0xff]   ;;  %v6442_v51 = vsel %vm6386_vm6, %v6434_v39, %v13147_v27  ;;  %v6458_v11 = vsel %vm890_vm2, %v6450_v48, %v13207_v22  ;;  %v11627_v48 = vpop.f32.mrf.mxu0 }
 0x548   : > { %v6900_v16 = vsel %vm929_vm4, %v5784_v29, %v12857_v52  ;;  %v13822_v52 = vld [vmem:[%s18140_s11 + $0x200] sm:$0xff]   ;;  %v13082_v39 = vunpack.i.h.bf16 %v16814_v35  ;;  %v17153_v29 = vsel %vm929_vm4, %v5888_v1, %v12747_v58 }
 0x549   : > { %v17091_v12 = vsel %vm6386_vm6, %v7341_v10, %v13196_v42  ;;  %v17094_v5 = vsel %vm6386_vm6, %v7342_v0, %v13197_v55  ;;  %v13820_v0 = vld [vmem:[%s18140_s11 + $0x240] sm:$0xff]   ;;  %v12746_v42 = vunpack.i.l.bf16 %v16196_v40 }
 0x54a   : > { %v7448_v6 = vpack.c.bf16 %v17094_v5, %v17091_v12  ;;  %v13210_v43 = vpop.permute.xlu0 %13209  ;;  %11779 = vmatpush3.bf16.msra.mxu0 %v13814_v54  ;;  %v6457_v54 = vsel %vm890_vm2, %v6449_v28, %v13206_v4  ;;  %v17140_v28 = vld [vmem:[%s18140_s11 + $0x308] sm:$0xff]  }
 0x54b   : > { %v13212_v59 = vunpack.i.h.bf16 %v13210_v43  ;;  %v13211_v30 = vunpack.i.l.bf16 %v13210_v43  ;;  %v17107_v10 = vpop.permute.xlu1 %13219  ;;  %11780 = vmatprep.subr.bf16.mxu0 %v13816_v3  ;;  %v6908_v3 = vsel %vm890_vm2, %v6900_v16, %v12862_v17  ;;  %v7468_v17 = vpack.c.bf16 %v6442_v51, %v6441_v41  ;;  %v5887_v43 = vld [vmem:[#allocation3 + $0xb1] sm:$0xff]  ;;  %v5786_v58 = vld [vmem:[#allocation3 + $0x63] sm:$0xff] }
 0x54c   : > { %v17131_v22 = vsel %vm6386_vm6, %v6908_v3, %v12867_v7  ;;  %v12986_v7 = vunpack.i.l.bf16 %v16677_v2  ;;  %v12996_v41 = vunpack.i.l.bf16 %v16698_v57  ;;  %v18407_v51 = vpack.c.bf16 %v16618_v14, %v16615_v15 }
 0x54d   : > { %v6465_v19 = vsel %vm6386_vm6, %v6457_v54, %v13211_v30  ;;  %v6466_v55 = vsel %vm6386_vm6, %v6458_v11, %v13212_v59  ;;  %v12991_v59 = vunpack.i.l.bf16 %v16691_v24  ;;  %v13087_v30 = vunpack.i.h.bf16 %v16822_v36  ;;  %v11628_v11 = vpop.f32.mrf.mxu0 }
 0x54e   : > { %v17125_v27 = vpop.permute.xlu0 %13229  ;;  %v7469_v4 = vpack.c.bf16 %v6466_v55, %v6465_v19  ;;  %11781 = vmatpush3.bf16.msra.mxu0 %v13818_v9  ;;  %v12987_v9 = vunpack.i.h.bf16 %v16677_v2  ;;  %v12997_v2 = vunpack.i.h.bf16 %v16698_v57  ;;  %v17163_v24 = vsel %vm929_vm4, %v5887_v43, %v12746_v42 }
 0x54f   : > { %v17135_v32 = vpop.permute.xlu1 %13224  ;;  %11782 = vmatprep.subr.bf16.mxu0 %v13820_v0  ;;  %v13086_v0 = vunpack.i.l.bf16 %v16822_v36  ;;  %v7433_v40 = vpack.c.bf16 %v17131_v22, %v17123_v50  ;;  %v5785_v36 = vld [vmem:[#allocation3 + $0x53] sm:$0xff]  ;;  %v6926_v54 = vsel %vm929_vm4, %v16882_v37, %v13072_v38  ;;  %v6925_v57 = vsel %vm929_vm4, %v16880_v62, %v13071_v34 }
 0x550   : > { %8403 = vmatprep.mubr.bf16.mxu1 %v7469_v4  ;;  %v6902_v15 = vsel %vm929_vm4, %v5786_v58, %v12987_v9  ;;  %v6901_v14 = vsel %vm929_vm4, %v5785_v36, %v12986_v7  ;;  %v6933_v45 = vsel %vm890_vm2, %v6925_v57, %v13081_v25  ;;  %v6934_v19 = vsel %vm890_vm2, %v6926_v54, %v13082_v39  ;;  %v13803_v38 = vld [vmem:[%s18140_s11 + $0x2b8] sm:$0xff]   ;;  %v13805_v39 = vld [vmem:[%s18140_s11 + $0x2f0] sm:$0xff]   ;;  %v5820_v58 = vld [vmem:[#allocation3 + $0x80] sm:$0xff] }
 0x551   : > { %8404 = vmatmul.mubr.bf16.gmra.mxu1 %v7468_v17  ;;  %v6909_v55 = vsel %vm890_vm2, %v6901_v14, %v12991_v59  ;;  %v6910_v37 = vsel %vm890_vm2, %v6902_v15, %v12992_v13  ;;  %v6941_v42 = vsel %vm6386_vm6, %v6933_v45, %v13086_v0  ;;  %v6942_v62 = vsel %vm6386_vm6, %v6934_v19, %v13087_v30  ;;  %v5914_v30 = vld [vmem:[#allocation3 + $0x65] sm:$0xff]  ;;  %v5821_v54 = vld [vmem:[#allocation3 + $0x90] sm:$0xff] }
 0x552   : > { %v17157_v35 = vpop.permute.xlu0 %13234  ;;  %8509 = vmatprep.mubr.bf16.mxu1 %v18407_v51  ;;  %11783 = vmatpush3.bf16.msra.mxu0 %v13822_v52  ;;  %v17183_v3 = vsel %vm6386_vm6, %v6909_v55, %v12996_v41  ;;  %v17186_v50 = vsel %vm6386_vm6, %v6910_v37, %v12997_v2  ;;  %v13022_v4 = vunpack.i.h.bf16 %v16737_v47  ;;  %v10808_v52 = vld [vmem:[%s18141_s12] ss:$0 sm:$0xff]  ;;  %v11629_v1 = vadd.f32 %v11628_v11, %v11627_v48  ;;  %v13809_v19 = vld [vmem:[%s18140_s11 + $0x2e8] sm:$0xff]   ;;  %v18409_v55 = vld [vmem:[#allocation38_spill] sm:$0xff] }
 0x553   : > { %v17171_v16 = vpop.permute.xlu1 %13244  ;;  %12096 = vmatprep.subr.bf16.mxu0 %v17140_v28  ;;  %v13021_v34 = vunpack.i.l.bf16 %v16737_v47  ;;  %v13102_v17 = vunpack.i.h.bf16 %v16824_v46  ;;  %v13227_v43 = vunpack.i.h.bf16 %v17135_v32  ;;  %v13226_v9 = vunpack.i.l.bf16 %v17135_v32 }
 0x554   : > { %v12752_v48 = vunpack.i.h.bf16 %v16203_v56  ;;  %v13237_v25 = vunpack.i.h.bf16 %v17157_v35  ;;  %v13236_v13 = vunpack.i.l.bf16 %v17157_v35  ;;  %v7447_v59 = vpack.c.bf16 %v6942_v62, %v6941_v42 }
 0x555   : > { %v12751_v47 = vunpack.i.l.bf16 %v16203_v56  ;;  %v17209_v0 = vadd.f32 %v16509_v18, %v10808_v52  ;;  %v7380_v41 = vsel %vm929_vm4, %v5914_v30, %v13022_v4  ;;  %v13101_v51 = vunpack.i.l.bf16 %v16824_v46  ;;  %v13807_v18 = vld [vmem:[%s18140_s11 + $0x2b0] sm:$0xff]  }
 0x556   : > { %v13240_v22 = vpop.permute.xlu0 %13239  ;;  %v17213_v36 = vadd.f32 %v11629_v1, %v10808_v52  ;;  %v7446_v35 = vpack.c.bf16 %v17186_v50, %v17183_v3  ;;  %v7404_v46 = vsel %vm929_vm4, %v17010_v61, %v13102_v17  ;;  %v6928_v15 = vsel %vm929_vm4, %v5821_v54, %v13227_v43 }
 0x557   : > { %v17199_v7 = vpop.permute.xlu1 %13249  ;;  %v13242_v32 = vunpack.i.h.bf16 %v13240_v22  ;;  %v13241_v2 = vunpack.i.l.bf16 %v13240_v22  ;;  %v6927_v14 = vsel %vm929_vm4, %v5820_v58, %v13226_v9  ;;  %v13107_v37 = vunpack.i.h.bf16 %v18409_v55  ;;  %v18410_v22 = vld [vmem:[#allocation27_spill] sm:$0xff]  ;;  %v5788_v58 = vld [vmem:[#allocation3 + $0x83] sm:$0xff] }
 0x558   : > { %v13106_v42 = vunpack.i.l.bf16 %v18409_v55  ;;  %v6935_v62 = vsel %vm890_vm2, %v6927_v14, %v13236_v13  ;;  %v6936_v3 = vsel %vm890_vm2, %v6928_v15, %v13237_v25  ;;  %v13167_v61 = vunpack.i.h.bf16 %v16959_v60 }
 0x559   : > { %8510 = vmatmul.mubr.bf16.vlgmr.msra.gmra.mxu1 %v7433_v40  ;;  %v18408_v40 = vld [vmem:[#allocation16_spill] sm:$0xff]  ;;  %v13166_v50 = vunpack.i.l.bf16 %v16959_v60  ;;  %v6943_v4 = vsel %vm6386_vm6, %v6935_v62, %v13241_v2  ;;  %v6944_v52 = vsel %vm6386_vm6, %v6936_v3, %v13242_v32  ;;  %v7403_v1 = vsel %vm929_vm4, %v17008_v53, %v13101_v51  ;;  %v5787_v51 = vld [vmem:[#allocation3 + $0x73] sm:$0xff] }
 0x55a   : > { %v17215_v57 = vpop.permute.xlu0 %13259  ;;  %8517 = vmatprep.mubr.bf16.mxu1 %v7447_v59  ;;  %11809 = vmatpush3.bf16.msra.mxu1 %v13803_v38  ;;  %v7379_v11 = vsel %vm929_vm4, %v18408_v40, %v13021_v34  ;;  %v13111_v38 = vunpack.i.l.bf16 %v18410_v22  ;;  %v13172_v34 = vunpack.i.h.bf16 %v16977_v21  ;;  %v13171_v17 = vunpack.i.l.bf16 %v16977_v21  ;;  %v13811_v60 = vld [vmem:[%s18140_s11 + $0x2a8] sm:$0xff]   ;;  %v13813_v21 = vld [vmem:[%s18140_s11 + $0x2e0] sm:$0xff]  }
 0x55b   : > { %v17228_v45 = vpop.permute.xlu1 %13254  ;;  %11810 = vmatprep.subr.bf16.mxu1 %v13805_v39  ;;  %v13112_v9 = vunpack.i.h.bf16 %v18410_v22  ;;  %v18411_v39 = vld [vmem:[#allocation21_spill] sm:$0xff]  ;;  %v13177_v13 = vunpack.i.h.bf16 %v16999_v63  ;;  %v13176_v53 = vunpack.i.l.bf16 %v16999_v63  ;;  %v18412_v32 = vld [vmem:[#allocation44_spill] sm:$0xff]  ;;  %v7460_v54 = vpack.c.bf16 %v6944_v52, %v6943_v4 }
 0x55c   : > { %v13116_v25 = vunpack.i.l.bf16 %v18411_v39  ;;  %v13117_v30 = vunpack.i.h.bf16 %v18411_v39  ;;  %v13121_v2 = vunpack.i.l.bf16 %v18412_v32  ;;  %v13122_v40 = vunpack.i.h.bf16 %v18412_v32 }
 0x55d   : > { %v6904_v63 = vsel %vm929_vm4, %v5788_v58, %v13167_v61  ;;  %v6903_v15 = vsel %vm929_vm4, %v5787_v51, %v13166_v50  ;;  %v7412_v14 = vsel %vm890_vm2, %v7404_v46, %v13107_v37  ;;  %v13182_v3 = vunpack.i.h.bf16 %v16992_v20  ;;  %v13817_v37 = vld [vmem:[%s18140_s11 + $0x2d8] sm:$0xff]  }
 0x55e   : > { %v17246_v43 = vpop.permute.xlu0 %13269  ;;  %11811 = vmatpush3.bf16.msra.mxu1 %v13807_v18  ;;  %v7411_v18 = vsel %vm890_vm2, %v7403_v1, %v13106_v42  ;;  %v6911_v55 = vsel %vm890_vm2, %v6903_v15, %v13171_v17  ;;  %v6912_v62 = vsel %vm890_vm2, %v6904_v63, %v13172_v34  ;;  %v13815_v42 = vld [vmem:[%s18140_s11 + $0x2a0] sm:$0xff]   ;;  %v7388_v61 = vsel %vm890_vm2, %v7380_v41, %v13112_v9 }
 0x55f   : > { %v17255_v59 = vpop.permute.xlu1 %13264  ;;  %11812 = vmatprep.subr.bf16.mxu1 %v13809_v19  ;;  %v7387_v19 = vsel %vm890_vm2, %v7379_v11, %v13111_v38  ;;  %v6920_v46 = vsel %vm6386_vm6, %v6912_v62, %v13177_v13  ;;  %v17283_v50 = vsel %vm6386_vm6, %v7411_v18, %v13116_v25  ;;  %v13217_v1 = vunpack.i.h.bf16 %v17077_v31 }
 0x560   : > { %v17286_v52 = vsel %vm6386_vm6, %v7387_v19, %v13121_v2  ;;  %v13216_v41 = vunpack.i.l.bf16 %v17077_v31  ;;  %v17291_v22 = vsel %vm6386_vm6, %v7412_v14, %v13117_v30  ;;  %v17294_v38 = vsel %vm6386_vm6, %v7388_v61, %v13122_v40  ;;  %v17308_v30 = vld [vmem:[#allocation3 + $0x82] sm:$0xff] }
 0x561   : > { %8518 = vmatmul.mubr.bf16.gmra.mxu1 %v7446_v35  ;;  %v6919_v35 = vsel %vm6386_vm6, %v6911_v55, %v13176_v53  ;;  %v13181_v34 = vunpack.i.l.bf16 %v16992_v20  ;;  %v13222_v17 = vunpack.i.h.bf16 %v17107_v10  ;;  %v7358_v9 = vsel %vm929_vm4, %v17066_v8, %v13182_v3  ;;  %v13819_v53 = vld [vmem:[%s18140_s11 + $0x298] sm:$0xff]   ;;  %v17330_v3 = vld [vmem:[#allocation3 + $0x86] sm:$0xff] }
 0x562   : > { %v13280_v4 = vpop.permute.xlu0 %13279  ;;  %8525 = vmatprep.mubr.bf16.mxu1 %v7460_v54  ;;  %11813 = vmatpush3.bf16.msra.mxu1 %v13811_v60  ;;  %v13221_v60 = vunpack.i.l.bf16 %v17107_v10  ;;  %v7459_v39 = vpack.c.bf16 %v6920_v46, %v6919_v35  ;;  %v13232_v25 = vunpack.i.h.bf16 %v17125_v27  ;;  %v13231_v31 = vunpack.i.l.bf16 %v17125_v27  ;;  %v17310_v10 = vld [vmem:[#allocation3 + $0x92] sm:$0xff] }
 0x563   : > { %v17277_v11 = vpop.permute.xlu1 %13274  ;;  %11814 = vmatprep.subr.bf16.mxu1 %v13813_v21  ;;  %v13187_v20 = vunpack.i.h.bf16 %v17017_v26  ;;  %v13186_v21 = vunpack.i.l.bf16 %v17017_v26  ;;  %v13282_v8 = vunpack.i.h.bf16 %v13280_v4  ;;  %v13281_v32 = vunpack.i.l.bf16 %v13280_v4  ;;  %v13821_v27 = vld [vmem:[%s18140_s11 + $0x2d0] sm:$0xff]  }
 0x564   : > { %v6858_v51 = vsel %vm929_vm4, %v17310_v10, %v13217_v1  ;;  %v6857_v58 = vsel %vm929_vm4, %v17308_v30, %v13216_v41  ;;  %v7357_v18 = vsel %vm929_vm4, %v17064_v23, %v13181_v34  ;;  %v13202_v40 = vunpack.i.h.bf16 %v17024_v44  ;;  %v17332_v4 = vld [vmem:[#allocation3 + $0x96] sm:$0xff]  ;;  %v13824_v1 = vld [vmem:[%s18140_s11 + $0x2c8] sm:$0xff]  }
 0x565   : > { %v6865_v63 = vsel %vm890_vm2, %v6857_v58, %v13221_v60  ;;  %v6866_v15 = vsel %vm890_vm2, %v6858_v51, %v13222_v17  ;;  %v13192_v14 = vunpack.i.h.bf16 %v17038_v49  ;;  %v13191_v19 = vunpack.i.l.bf16 %v17038_v49 }
 0x566   : > { %v13285_v13 = vpop.permute.xlu0 %13284  ;;  %11815 = vmatpush3.bf16.msra.mxu1 %v13815_v42  ;;  %v6873_v55 = vsel %vm6386_vm6, %v6865_v63, %v13231_v31  ;;  %v6874_v62 = vsel %vm6386_vm6, %v6866_v15, %v13232_v25  ;;  %v13823_v42 = vld [vmem:[%s18140_s11 + $0x290] sm:$0xff]   ;;  %v6882_v61 = vsel %vm929_vm4, %v17332_v4, %v13282_v8  ;;  %v6881_v49 = vsel %vm929_vm4, %v17330_v3, %v13281_v32  ;;  %v13827_v15 = vld [vmem:[%s18140_s11 + $0x2c0] sm:$0xff]  }
 0x567   : > { %v17312_v2 = vpop.permute.xlu1 %13294  ;;  %11816 = vmatprep.subr.bf16.mxu1 %v13817_v37  ;;  %v13287_v26 = vunpack.i.h.bf16 %v13285_v13  ;;  %v13286_v54 = vunpack.i.l.bf16 %v13285_v13  ;;  %v7365_v41 = vsel %vm890_vm2, %v7357_v18, %v13186_v21  ;;  %v7366_v34 = vsel %vm890_vm2, %v7358_v9, %v13187_v20  ;;  %v13825_v20 = vld [vmem:[%s18140_s11 + $0x288] sm:$0xff]  }
 0x568   : > { %v13296_v25 = vunpack.i.l.bf16 %v17312_v2  ;;  %v7470_v8 = vpack.c.bf16 %v6874_v62, %v6873_v55  ;;  %v17353_v21 = vsel %vm6386_vm6, %v7365_v41, %v13191_v19  ;;  %v17356_v9 = vsel %vm6386_vm6, %v7366_v34, %v13192_v14  ;;  %v5822_v55 = vld [vmem:[#allocation3 + $0xa0] sm:$0xff]  ;;  %v5823_v62 = vld [vmem:[#allocation3 + $0xb0] sm:$0xff] }
 0x569   : > { %8526 = vmatmul.mubr.bf16.gmra.mxu1 %v7459_v39  ;;  %v6889_v17 = vsel %vm890_vm2, %v6881_v49, %v13286_v54  ;;  %v6890_v60 = vsel %vm890_vm2, %v6882_v61, %v13287_v26  ;;  %v13257_v39 = vunpack.i.h.bf16 %v17228_v45  ;;  %v13297_v51 = vunpack.i.h.bf16 %v17312_v2  ;;  %v5789_v49 = vld [vmem:[#allocation3 + $0x93] sm:$0xff] }
 0x56a   : > { %v13290_v23 = vpop.permute.xlu0 %13289  ;;  %11817 = vmatpush3.bf16.msra.mxu1 %v13819_v53  ;;  %v13262_v19 = vunpack.i.h.bf16 %v17215_v57  ;;  %v13261_v14 = vunpack.i.l.bf16 %v17215_v57  ;;  %v6929_v61 = vsel %vm929_vm4, %v5822_v55, %v13296_v25  ;;  %v13256_v34 = vunpack.i.l.bf16 %v17228_v45  ;;  %v13828_v25 = vld [vmem:[%s18140_s11 + $0x280] sm:$0xff]  }
 0x56b   : > { %v13292_v35 = vunpack.i.h.bf16 %v13290_v23  ;;  %v13291_v46 = vunpack.i.l.bf16 %v13290_v23  ;;  %v13305_v37 = vpop.permute.xlu1 %13304  ;;  %11818 = vmatprep.subr.bf16.mxu1 %v13821_v27  ;;  %v17369_v2 = vsel %vm929_vm4, %v17310_v10, %v13257_v39  ;;  %v18413_v10 = vld [vmem:[#allocation40_spill] sm:$0xff]  ;;  %v18414_v39 = vld [vmem:[#allocation43_spill] sm:$0xff] }
 0x56c   : > { %v13306_v58 = vunpack.i.l.bf16 %v13305_v37  ;;  %v13307_v23 = vunpack.i.h.bf16 %v13305_v37  ;;  %v7414_v56 = vsel %vm890_vm2, %v17369_v2, %v13262_v19  ;;  %v13840_v19 = vld [vmem:[#allocation9 + $0xf8] sm:$0xff]  }
 0x56d   : > { %v11664_v31 = vpop.f32.mrf.mxu1  ;;  %v6897_v13 = vsel %vm6386_vm6, %v6889_v17, %v13291_v46  ;;  %v6898_v53 = vsel %vm6386_vm6, %v6890_v60, %v13292_v35  ;;  %v5790_v35 = vld [vmem:[#allocation3 + $0xa3] sm:$0xff] }
 0x56e   : > { %v13300_v32 = vpop.permute.xlu0 %13299  ;;  %v7471_v27 = vpack.c.bf16 %v6898_v53, %v6897_v13  ;;  %11819 = vmatpush3.bf16.msra.mxu1 %v13823_v42  ;;  %v18415_v13 = vpack.c.bf16 %v18413_v10, %v18414_v39  ;;  %v6930_v53 = vsel %vm929_vm4, %v5823_v62, %v13297_v51  ;;  %v6937_v45 = vsel %vm890_vm2, %v6929_v61, %v13306_v58  ;;  %v5916_v10 = vld [vmem:[#allocation3 + $0x85] sm:$0xff] }
 0x56f   : > { %v13302_v26 = vunpack.i.h.bf16 %v13300_v32  ;;  %v13301_v54 = vunpack.i.l.bf16 %v13300_v32  ;;  %v13310_v18 = vpop.permute.xlu1 %13309  ;;  %v11665_v63 = vpop.f32.mrf.mxu1  ;;  %11820 = vmatprep.subr.bf16.mxu1 %v13824_v1  ;;  %v13247_v39 = vunpack.i.h.bf16 %v17171_v16 }
 0x570   : > { %v11666_v42 = vadd.f32 %v11665_v63, %v11664_v31  ;;  %8468 = vmatprep.mubr.bf16.mxu0 %v7471_v27  ;;  %v13312_v46 = vunpack.i.h.bf16 %v13310_v18  ;;  %v13311_v1 = vunpack.i.l.bf16 %v13310_v18 }
 0x571   : > { %v11667_v41 = vpop.f32.mrf.mxu1  ;;  %8469 = vmatmul.mubr.bf16.gmra.mxu0 %v7470_v8  ;;  %v6906_v17 = vsel %vm929_vm4, %v5790_v35, %v13302_v26  ;;  %v6905_v37 = vsel %vm929_vm4, %v5789_v49, %v13301_v54  ;;  %v6938_v54 = vsel %vm890_vm2, %v6930_v53, %v13307_v23  ;;  %v7405_v35 = vsel %vm929_vm4, %v17308_v30, %v13256_v34 }
 0x572   : > { %v17376_v60 = vadd.f32 %v11666_v42, %v17209_v0  ;;  %v13315_v31 = vpop.permute.xlu0 %13314  ;;  %8574 = vmatprep.mubr.bf16.mxu0 %v18415_v13  ;;  %11821 = vmatpush3.bf16.msra.mxu1 %v13825_v20  ;;  %v13829_v0 = vld [vmem:[#allocation9 + $0x78] sm:$0xff]   ;;  %v6914_v20 = vsel %vm890_vm2, %v6906_v17, %v13312_v46  ;;  %v6913_v42 = vsel %vm890_vm2, %v6905_v37, %v13311_v1  ;;  %v13272_v46 = vunpack.i.h.bf16 %v17246_v43 }
 0x573   : > { %v13317_v8 = vunpack.i.h.bf16 %v13315_v31  ;;  %v13316_v32 = vunpack.i.l.bf16 %v13315_v31  ;;  %v13320_v27 = vpop.permute.xlu1 %13319  ;;  %v11668_v26 = vpop.f32.mrf.mxu1  ;;  %11822 = vmatprep.subr.bf16.mxu1 %v13827_v15  ;;  %v13271_v1 = vunpack.i.l.bf16 %v17246_v43  ;;  %v13201_v37 = vunpack.i.l.bf16 %v17024_v44  ;;  %v13833_v43 = vld [vmem:[%s18140_s11 + $0x300] sm:$0xff]  }
 0x574   : > { %v13322_v18 = vunpack.i.h.bf16 %v13320_v27  ;;  %v13321_v63 = vunpack.i.l.bf16 %v13320_v27  ;;  %v11669_v55 = vadd.f32 %v11668_v26, %v11667_v41  ;;  %v7438_v31 = vpack.c.bf16 %v17291_v22, %v17283_v50  ;;  %v18416_v50 = vld [vmem:[#allocation23_spill] sm:$0xff]  ;;  %v18417_v22 = vld [vmem:[#allocation42_spill] sm:$0xff] }
 0x575   : > { %v6945_v49 = vsel %vm6386_vm6, %v6937_v45, %v13316_v32  ;;  %v6946_v51 = vsel %vm6386_vm6, %v6938_v54, %v13317_v8  ;;  %v17411_v30 = vsel %vm890_vm2, %v17163_v24, %v12751_v47  ;;  %v7437_v34 = vpack.c.bf16 %v17294_v38, %v17286_v52  ;;  %v18419_v47 = vld [vmem:[#allocation29_spill] sm:$0xff]  ;;  %v5853_v32 = vld [vmem:[#allocation3 + $0x94] sm:$0xff] }
 0x576   : > { %v6921_v58 = vsel %vm6386_vm6, %v6913_v42, %v13321_v63  ;;  %v6922_v62 = vsel %vm6386_vm6, %v6914_v20, %v13322_v18  ;;  %v17394_v15 = vadd.f32 %v11669_v55, %v17213_v36  ;;  %v13325_v61 = vpop.permute.xlu0 %13324  ;;  %v7473_v23 = vpack.c.bf16 %v6946_v51, %v6945_v49  ;;  %11823 = vmatpush3.bf16.msra.mxu1 %v13828_v25  ;;  %v5885_v20 = vld [vmem:[#allocation3 + $0x91] sm:$0xff]  ;;  %v5886_v42 = vld [vmem:[#allocation3 + $0xa1] sm:$0xff] }
 0x577   : > { %v7472_v41 = vpack.c.bf16 %v6922_v62, %v6921_v58  ;;  %v17400_v17 = vpop.permute.xlu1 %13349  ;;  %11854 = vmatprep.subr.bf16.mxu1 %v13829_v0  ;;  %v7449_v36 = vpack.c.bf16 %v17356_v9, %v17353_v21  ;;  %v13246_v21 = vunpack.i.l.bf16 %v17171_v16  ;;  %v18418_v13 = vpack.c.bf16 %v18416_v50, %v18417_v22 }
 0x578   : > { %8533 = vmatprep.mubr.bf16.mxu1 %v7473_v23  ;;  %v17427_v24 = vsel %vm890_vm2, %v17153_v29, %v12752_v48  ;;  %v12757_v25 = vunpack.i.h.bf16 %v18419_v47  ;;  %v7382_v52 = vsel %vm929_vm4, %v5916_v10, %v13202_v40  ;;  %v7413_v16 = vsel %vm890_vm2, %v7405_v35, %v13261_v14  ;;  %v5852_v14 = vld [vmem:[#allocation3 + $0x84] sm:$0xff] }
 0x579   : > { %v11630_v9 = vpop.f32.mrf.mxu0  ;;  %8534 = vmatmul.mubr.bf16.gmra.mxu1 %v7472_v41  ;;  %8575 = vmatmul.mubr.bf16.vlgmr.msra.gmra.mxu0 %v18418_v13  ;;  %v13327_v29 = vunpack.i.h.bf16 %v13325_v61  ;;  %v13326_v48 = vunpack.i.l.bf16 %v13325_v61  ;;  %v7421_v44 = vsel %vm6386_vm6, %v7413_v16, %v13271_v1  ;;  %v7422_v40 = vsel %vm6386_vm6, %v7414_v56, %v13272_v46 }
 0x57a   : > { %v13330_v38 = vpop.permute.xlu0 %13329  ;;  %8582 = vmatprep.mubr.bf16.mxu0 %v7449_v36  ;;  %8639 = vmatprep.mubr.bf16.mxu1 %v7438_v31  ;;  %v7381_v8 = vsel %vm929_vm4, %v17088_v33, %v13201_v37  ;;  %v7336_v2 = vsel %vm929_vm4, %v5853_v32, %v13247_v39  ;;  %v7335_v0 = vsel %vm929_vm4, %v5852_v14, %v13246_v21  ;;  %v13251_v54 = vunpack.i.l.bf16 %v17199_v7  ;;  %v13831_v36 = vld [vmem:[#allocation9 + $0x70] sm:$0xff]   ;;  %v5854_v14 = vld [vmem:[#allocation3 + $0xa4] sm:$0xff] }
 0x57b   : > { %v17440_v53 = vpop.permute.xlu1 %13354  ;;  %v11631_v45 = vpop.f32.mrf.mxu0  ;;  %12097 = vmatpush3.bf16.msra.mxu0 %v17140_v28  ;;  %v13332_v57 = vunpack.i.h.bf16 %v13330_v38  ;;  %v13331_v27 = vunpack.i.l.bf16 %v13330_v38  ;;  %v13252_v28 = vunpack.i.h.bf16 %v17199_v7  ;;  %v13267_v63 = vunpack.i.h.bf16 %v17255_v59  ;;  %v13830_v7 = vld [vmem:[#allocation9 + $0x38] sm:$0xff]  }
 0x57c   : > { %v17447_v26 = vadd.f32 %v11631_v45, %v11630_v9  ;;  %12098 = vmatprep.subr.bf16.mxu0 %v13833_v43  ;;  %v13266_v33 = vunpack.i.l.bf16 %v17255_v59  ;;  %v13277_v55 = vunpack.i.h.bf16 %v17277_v11  ;;  %v7451_v51 = vpack.c.bf16 %v7422_v40, %v7421_v44 }
 0x57d   : > { %v11633_v18 = vpop.f32.mrf.mxu0  ;;  %v7360_v58 = vsel %vm929_vm4, %v5886_v42, %v13327_v29  ;;  %v7359_v62 = vsel %vm929_vm4, %v5885_v20, %v13326_v48  ;;  %v13276_v1 = vunpack.i.l.bf16 %v17277_v11  ;;  %v12756_v31 = vunpack.i.l.bf16 %v18419_v47  ;;  %v5855_v29 = vld [vmem:[#allocation3 + $0xb4] sm:$0xff] }
 0x57e   : > { %v13335_v49 = vpop.permute.xlu0 %13334  ;;  %v7367_v59 = vsel %vm890_vm2, %v7359_v62, %v13331_v27  ;;  %v7368_v41 = vsel %vm890_vm2, %v7360_v58, %v13332_v57  ;;  %v7343_v10 = vsel %vm890_vm2, %v7335_v0, %v13251_v54  ;;  %v7344_v39 = vsel %vm890_vm2, %v7336_v2, %v13252_v28  ;;  %v13835_v28 = vld [vmem:[#allocation9 + $0x28] sm:$0xff]   ;;  %v5979_v42 = vld [vmem:[#allocation3 + $0x76] sm:$0xff] }
 0x57f   : > { %v13337_v61 = vunpack.i.h.bf16 %v13335_v49  ;;  %v13336_v23 = vunpack.i.l.bf16 %v13335_v49  ;;  %v13360_v35 = vpop.permute.xlu1 %13359  ;;  %v11634_v46 = vpop.f32.mrf.mxu0  ;;  %12099 = vmatpush3.bf16.msra.mxu0 %v13833_v43  ;;  %v7389_v21 = vsel %vm890_vm2, %v7381_v8, %v13266_v33  ;;  %v7390_v9 = vsel %vm890_vm2, %v7382_v52, %v13267_v63  ;;  %v13834_v52 = vld [vmem:[#allocation9 + $0x68] sm:$0xff]   ;;  %v5951_v49 = vld [vmem:[#allocation3 + $0xb2] sm:$0xff] }
 0x580   : > { %v17461_v37 = vadd.f32 %v11634_v46, %v11633_v18  ;;  %11894 = vmatprep.subr.bf16.mxu0 %v13840_v19  ;;  %v13357_v13 = vunpack.i.h.bf16 %v17440_v53  ;;  %v13356_v38 = vunpack.i.l.bf16 %v17440_v53  ;;  %v7397_v16 = vsel %vm6386_vm6, %v7389_v21, %v13276_v1  ;;  %v13836_v18 = vld [vmem:[#allocation9 + $0x60] sm:$0xff]   ;;  %v5917_v21 = vld [vmem:[#allocation3 + $0x95] sm:$0xff] }
 0x581   : > { %8583 = vmatmul.mubr.bf16.gmra.mxu0 %v7448_v6  ;;  %8640 = vmatmul.mubr.bf16.vlgmr.msra.gmra.mxu1 %v7437_v34  ;;  %v7375_v43 = vsel %vm6386_vm6, %v7367_v59, %v13336_v23  ;;  %v7376_v11 = vsel %vm6386_vm6, %v7368_v41, %v13337_v61  ;;  %v13832_v34 = vld [vmem:[#allocation9 + $0x30] sm:$0xff]   ;;  %v7398_v56 = vsel %vm6386_vm6, %v7390_v9, %v13277_v55  ;;  %v13362_v48 = vunpack.i.h.bf16 %v13360_v35  ;;  %v5978_v1 = vld [vmem:[#allocation3 + $0x66] sm:$0xff]  ;;  %v13838_v59 = vld [vmem:[#allocation9 + $0x58] sm:$0xff]  }
 0x582   : > { %v13340_v50 = vpop.permute.xlu0 %13339  ;;  %8647 = vmatprep.mubr.bf16.mxu1 %v7451_v51  ;;  %v7462_v22 = vpack.c.bf16 %v7376_v11, %v7375_v43  ;;  %11855 = vmatpush3.bf16.msra.mxu1 %v13830_v7  ;;  %v13361_v45 = vunpack.i.l.bf16 %v13360_v35  ;;  %v7377_v53 = vsel %vm6386_vm6, %v17411_v30, %v12756_v31  ;;  %v7378_v8 = vsel %vm6386_vm6, %v17427_v24, %v12757_v25  ;;  %v18420_v24 = vld [vmem:[#allocation22_spill] sm:$0xff]  ;;  %v13837_v35 = vld [vmem:[#allocation9 + $0x20] sm:$0xff]  }
 0x583   : > { %v13342_v12 = vunpack.i.h.bf16 %v13340_v50  ;;  %v13341_v5 = vunpack.i.l.bf16 %v13340_v50  ;;  %v13365_v6 = vpop.permute.xlu1 %13364  ;;  %11856 = vmatprep.subr.bf16.mxu1 %v13831_v36  ;;  %v7450_v27 = vpack.c.bf16 %v7398_v56, %v7397_v16  ;;  %v7338_v19 = vsel %vm929_vm4, %v5855_v29, %v13357_v13  ;;  %v5950_v41 = vld [vmem:[#allocation3 + $0xa2] sm:$0xff] }
 0x584   : > { %8590 = vmatprep.mubr.bf16.mxu0 %v7462_v22  ;;  %v7337_v2 = vsel %vm929_vm4, %v5854_v14, %v13356_v38  ;;  %v7346_v30 = vsel %vm890_vm2, %v7338_v19, %v13362_v48  ;;  %v7475_v47 = vpack.c.bf16 %v7378_v8, %v7377_v53  ;;  %v12762_v25 = vunpack.i.h.bf16 %v18420_v24  ;;  %v5918_v9 = vld [vmem:[#allocation3 + $0xa5] sm:$0xff] }
 0x585   : > { %v7351_v44 = vsel %vm6386_vm6, %v7343_v10, %v13341_v5  ;;  %v7352_v40 = vsel %vm6386_vm6, %v7344_v39, %v13342_v12  ;;  %v7345_v54 = vsel %vm890_vm2, %v7337_v2, %v13361_v45  ;;  %v12761_v63 = vunpack.i.l.bf16 %v18420_v24  ;;  %v13841_v45 = vld [vmem:[#allocation9 + $0x50] sm:$0xff]   ;;  %v5982_v2 = vld [vmem:[#allocation3 + $0xa6] sm:$0xff] }
 0x586   : > { %v7461_v32 = vpack.c.bf16 %v7352_v40, %v7351_v44  ;;  %v17485_v57 = vpop.permute.xlu0 %13344  ;;  %11857 = vmatpush3.bf16.msra.mxu1 %v13832_v34  ;;  %v13367_v33 = vunpack.i.h.bf16 %v13365_v6  ;;  %v13366_v55 = vunpack.i.l.bf16 %v13365_v6  ;;  %v7354_v23 = vsel %vm6386_vm6, %v7346_v30, %v12762_v25  ;;  %v13839_v34 = vld [vmem:[#allocation9 + $0x18] sm:$0xff]   ;;  %v5952_v25 = vld [vmem:[#allocation3 + $0xc2] sm:$0xff] }
 0x587   : > { %v13370_v0 = vpop.permute.xlu1 %13369  ;;  %11858 = vmatprep.subr.bf16.mxu1 %v13834_v52  ;;  %v7353_v61 = vsel %vm6386_vm6, %v7345_v54, %v12761_v63  ;;  %v7439_v10 = vpack.c.bf16 %v5979_v42, %v5978_v1  ;;  %v13352_v43 = vunpack.i.h.bf16 %v17400_v17  ;;  %v13351_v8 = vunpack.i.l.bf16 %v17400_v17  ;;  %v5920_v54 = vld [vmem:[#allocation3 + $0xc5] sm:$0xff]  ;;  %v13843_v17 = vld [vmem:[#allocation9 + $0x10] sm:$0xff]  }
 0x588   : > { %v13372_v51 = vunpack.i.h.bf16 %v13370_v0  ;;  %v13371_v58 = vunpack.i.l.bf16 %v13370_v0  ;;  %v7408_v11 = vsel %vm929_vm4, %v5951_v49, %v13367_v33  ;;  %v7407_v39 = vsel %vm929_vm4, %v5950_v41, %v13366_v55  ;;  %v5983_v0 = vld [vmem:[#allocation3 + $0xb6] sm:$0xff] }
 0x589   : > { %8591 = vmatmul.mubr.bf16.gmra.mxu0 %v7461_v32  ;;  %8648 = vmatmul.mubr.bf16.gmra.mxu1 %v7450_v27  ;;  %v7474_v22 = vpack.c.bf16 %v7354_v23, %v7353_v61  ;;  %v13347_v30 = vunpack.i.h.bf16 %v17485_v57  ;;  %v5953_v63 = vld [vmem:[#allocation3 + $0xd2] sm:$0xff]  ;;  %v7465_v23 = vpack.c.bf16 %v5983_v0, %v5982_v2  ;;  %v13850_v0 = vld [vmem:[#allocation9 + $0xa8] sm:$0xff]  }
 0x58a   : > { %v13375_v20 = vpop.permute.xlu0 %13374  ;;  %8598 = vmatprep.mubr.bf16.mxu0 %v7475_v47  ;;  %11859 = vmatpush3.bf16.msra.mxu1 %v13835_v28  ;;  %v7384_v13 = vsel %vm929_vm4, %v5918_v9, %v13372_v51  ;;  %v7383_v38 = vsel %vm929_vm4, %v5917_v21, %v13371_v58  ;;  %v5919_v28 = vld [vmem:[#allocation3 + $0xb5] sm:$0xff]  ;;  %v13346_v47 = vunpack.i.l.bf16 %v17485_v57  ;;  %v7386_v51 = vsel %vm929_vm4, %v5920_v54, %v13352_v43 }
 0x58b   : > { %v13380_v62 = vpop.permute.xlu1 %13379  ;;  %v13377_v46 = vunpack.i.h.bf16 %v13375_v20  ;;  %v13376_v7 = vunpack.i.l.bf16 %v13375_v20  ;;  %11860 = vmatprep.subr.bf16.mxu1 %v13836_v18  ;;  %v13845_v20 = vld [vmem:[#allocation9 + $0x48] sm:$0xff]   ;;  %v7385_v58 = vsel %vm929_vm4, %v5919_v28, %v13351_v8  ;;  %v7452_v57 = vpack.c.bf16 %v17332_v4, %v17330_v3  ;;  %v13842_v61 = vld [vmem:[#allocation9 + $0xb8] sm:$0xff]   ;;  %v13844_v41 = vld [vmem:[#allocation9 + $0xf0] sm:$0xff]  }
 0x58c   : > { %v13382_v36 = vunpack.i.h.bf16 %v13380_v62  ;;  %v13381_v31 = vunpack.i.l.bf16 %v13380_v62  ;;  %v13849_v3 = vld [vmem:[#allocation9 + $0x40] sm:$0xff]  }
 0x58d   : > { %v7415_v16 = vsel %vm890_vm2, %v7407_v39, %v13376_v7  ;;  %v7416_v56 = vsel %vm890_vm2, %v7408_v11, %v13377_v46  ;;  %v7409_v46 = vsel %vm929_vm4, %v5952_v25, %v13346_v47 }
 0x58e   : > { %v13385_v50 = vpop.permute.xlu0 %13384  ;;  %11861 = vmatpush3.bf16.msra.mxu1 %v13837_v35  ;;  %v7391_v52 = vsel %vm890_vm2, %v7383_v38, %v13381_v31  ;;  %v7392_v44 = vsel %vm890_vm2, %v7384_v13, %v13382_v36  ;;  %v7410_v35 = vsel %vm929_vm4, %v5953_v63, %v13347_v30  ;;  %v13847_v36 = vld [vmem:[#allocation9 + $0x8] sm:$0xff]  }
 0x58f   : > { %v13387_v12 = vunpack.i.h.bf16 %v13385_v50  ;;  %v13386_v5 = vunpack.i.l.bf16 %v13385_v50  ;;  %v13395_v6 = vpop.permute.xlu1 %13394  ;;  %11862 = vmatprep.subr.bf16.mxu1 %v13838_v59  ;;  %v5984_v50 = vld [vmem:[#allocation3 + $0xc6] sm:$0xff] }
 0x590   : > { %v13397_v29 = vunpack.i.h.bf16 %v13395_v6  ;;  %v13396_v48 = vunpack.i.l.bf16 %v13395_v6  ;;  %v8753_v6 = vld [vmem:[#allocation2 + $0x24] sm:$0xff] }
 0x591   : > { %8599 = vmatmul.mubr.bf16.gmra.mxu0 %v7474_v22  ;;  %v7423_v40 = vsel %vm6386_vm6, %v7415_v16, %v13386_v5  ;;  %v7424_v53 = vsel %vm6386_vm6, %v7416_v56, %v13387_v12  ;;  %v5985_v22 = vld [vmem:[#allocation3 + $0xd6] sm:$0xff]  ;;  %v17536_v63 = vld [vmem:[#allocation2 + $0x44] sm:$0xff] }
 0x592   : > { %v7399_v14 = vsel %vm6386_vm6, %v7391_v52, %v13396_v48  ;;  %v7400_v32 = vsel %vm6386_vm6, %v7392_v44, %v13397_v29  ;;  %v13390_v27 = vpop.permute.xlu0 %13389  ;;  %12100 = vmatprep.mubr.msk.bf16.mxu0 %vm929_vm4, %v7439_v10  ;;  %v7464_v19 = vpack.c.bf16 %v7424_v53, %v7423_v40  ;;  %11863 = vmatpush3.bf16.msra.mxu1 %v13839_v34  ;;  %v13846_v5 = vld [vmem:[#allocation9 + $0xb0] sm:$0xff]   ;;  %v13851_v52 = vld [vmem:[#allocation9] sm:$0xff]   ;;  %v13854_v53 = vld [vmem:[#allocation9 + $0x118] sm:$0xff]  }
 0x593   : > { %v7463_v18 = vpack.c.bf16 %v7400_v32, %v7399_v14  ;;  %v13400_v24 = vpop.permute.xlu1 %13399  ;;  %v13392_v33 = vunpack.i.h.bf16 %v13390_v27  ;;  %v13391_v55 = vunpack.i.l.bf16 %v13390_v27  ;;  %11864 = vmatprep.subr.bf16.mxu1 %v13841_v45  ;;  %v13848_v45 = vld [vmem:[#allocation9 + $0xe8] sm:$0xff]   ;;  %v8754_v44 = vld [vmem:[#allocation2 + $0x34] sm:$0xff]  ;;  %v7478_v40 = vpack.c.bf16 %v5985_v22, %v5984_v50 }
 0x594   : > { %8655 = vmatprep.mubr.bf16.mxu1 %v7464_v19  ;;  %v13402_v42 = vunpack.i.h.bf16 %v13400_v24  ;;  %v13401_v49 = vunpack.i.l.bf16 %v13400_v24  ;;  %v8737_v19 = vld [vmem:[#allocation2 + $0x22] sm:$0xff]  ;;  %v8738_v24 = vld [vmem:[#allocation2 + $0x32] sm:$0xff] }
 0x595   : > { %8656 = vmatmul.mubr.bf16.gmra.mxu1 %v7463_v18  ;;  %v7417_v31 = vsel %vm890_vm2, %v7409_v46, %v13391_v55  ;;  %v7418_v10 = vsel %vm890_vm2, %v7410_v35, %v13392_v33  ;;  %v13852_v18 = vld [vmem:[#allocation9 + $0xe0] sm:$0xff]   ;;  %v17538_v33 = vld [vmem:[#allocation2 + $0x54] sm:$0xff] }
 0x596   : > { %v13405_v62 = vpop.permute.xlu0 %13404  ;;  %11865 = vmatpush3.bf16.msra.mxu1 %v13843_v17  ;;  %v7393_v4 = vsel %vm890_vm2, %v7385_v58, %v13401_v49  ;;  %v7394_v39 = vsel %vm890_vm2, %v7386_v51, %v13402_v42  ;;  %v17556_v22 = vld [vmem:[#allocation2 + $0x64] sm:$0xff] }
 0x597   : > { %v13407_v7 = vunpack.i.h.bf16 %v13405_v62  ;;  %v13406_v1 = vunpack.i.l.bf16 %v13405_v62  ;;  %v13410_v59 = vpop.permute.xlu1 %13409  ;;  %11866 = vmatprep.subr.bf16.mxu1 %v13845_v20  ;;  %v13853_v20 = vld [vmem:[#allocation9 + $0xa0] sm:$0xff]   ;;  %v13855_v62 = vld [vmem:[#allocation9 + $0xd8] sm:$0xff]  }
 0x598   : > { %v13412_v43 = vunpack.i.h.bf16 %v13410_v59  ;;  %v13411_v11 = vunpack.i.l.bf16 %v13410_v59  ;;  %v13856_v59 = vld [vmem:[#allocation9 + $0x98] sm:$0xff]  }
 0x599   : > { %12101 = vmatmul.mubr.msk.bf16.vlgmr.msra.gmra.mxu0 %vm929_vm4, %v7452_v57  ;;  %v7425_v21 = vsel %vm6386_vm6, %v7417_v31, %v13406_v1  ;;  %v7426_v9 = vsel %vm6386_vm6, %v7418_v10, %v13407_v7  ;;  %v13859_v57 = vld [vmem:[#allocation9 + $0x110] sm:$0xff]   ;;  %v8739_v10 = vld [vmem:[#allocation2 + $0x42] sm:$0xff] }
 0x59a   : > { %v7401_v13 = vsel %vm6386_vm6, %v7393_v4, %v13411_v11  ;;  %v7402_v38 = vsel %vm6386_vm6, %v7394_v39, %v13412_v43  ;;  %11895 = vmatpush3.bf16.msra.mxu0 %v13842_v61  ;;  %v13415_v12 = vpop.permute.xlu0 %13414  ;;  %12104 = vmatprep.mubr.msk.bf16.mxu0 %vm929_vm4, %v7465_v23  ;;  %v7477_v48 = vpack.c.bf16 %v7426_v9, %v7425_v21  ;;  %v13857_v31 = vld [vmem:[#allocation9 + $0xd0] sm:$0xff]   ;;  %v13864_v11 = vld [vmem:[#allocation9 + $0x108] sm:$0xff]  }
 0x59b   : > { %v7476_v34 = vpack.c.bf16 %v7402_v38, %v7401_v13  ;;  %v13417_v16 = vunpack.i.h.bf16 %v13415_v12  ;;  %v13416_v56 = vunpack.i.l.bf16 %v13415_v12  ;;  %v13420_v29 = vpop.permute.xlu1 %13419  ;;  %11896 = vmatprep.subr.bf16.mxu0 %v13844_v41  ;;  %11867 = vmatpush3.bf16.msra.mxu1 %v13847_v36  ;;  %v8740_v43 = vld [vmem:[#allocation2 + $0x52] sm:$0xff] }
 0x59c   : > { %11868 = vmatprep.subr.bf16.mxu1 %v13849_v3  ;;  %v13422_v8 = vunpack.i.h.bf16 %v13420_v29  ;;  %v13421_v14 = vunpack.i.l.bf16 %v13420_v29  ;;  %8663 = vmatprep.mubr.bf16.mxu1 %v7477_v48  ;;  %v17558_v13 = vld [vmem:[#allocation2 + $0x74] sm:$0xff] }
 0x59d   : > { %v8945_v32 = vsel %vm890_vm2, %v8753_v6, %v13416_v56  ;;  %v8946_v27 = vsel %vm890_vm2, %v8754_v44, %v13417_v16  ;;  %8664 = vmatmul.mubr.bf16.gmra.mxu1 %v7476_v34  ;;  %v13860_v56 = vld [vmem:[#allocation9 + $0xc8] sm:$0xff]  }
 0x59e   : > { %11897 = vmatpush3.bf16.msra.mxu0 %v13846_v5  ;;  %v13425_v2 = vpop.permute.xlu0 %13424  ;;  %v17530_v47 = vpack.c.bf16 %v8946_v27, %v8945_v32  ;;  %v8938_v17 = vsel %vm890_vm2, %v8738_v24, %v13422_v8  ;;  %v8937_v25 = vsel %vm890_vm2, %v8737_v19, %v13421_v14  ;;  %v13858_v5 = vld [vmem:[#allocation9 + $0x90] sm:$0xff]   ;;  %v13861_v27 = vld [vmem:[#allocation9 + $0x88] sm:$0xff]  }
 0x59f   : > { %v13427_v28 = vunpack.i.h.bf16 %v13425_v2  ;;  %v13426_v54 = vunpack.i.l.bf16 %v13425_v2  ;;  %v13430_v30 = vpop.permute.xlu1 %13429  ;;  %11898 = vmatprep.subr.bf16.mxu0 %v13848_v45  ;;  %11869 = vmatpush3.bf16.msra.mxu1 %v13851_v52  ;;  %v17546_v58 = vpack.c.bf16 %v8938_v17, %v8937_v25 }
 0x5a0   : > { %12108 = vmatprep.subr.bf16.mxu1 %v13854_v53  ;;  %9321 = vmatprep.mubr.bf16.mxu1 %v17530_v47  ;;  %v13432_v61 = vunpack.i.h.bf16 %v13430_v30  ;;  %v13431_v23 = vunpack.i.l.bf16 %v13430_v30 }
 0x5a1   : > { %12105 = vmatmul.mubr.msk.bf16.gmra.mxu0 %vm929_vm4, %v7478_v40  ;;  %v8947_v42 = vsel %vm890_vm2, %v17536_v63, %v13426_v54  ;;  %v8948_v49 = vsel %vm890_vm2, %v17538_v33, %v13427_v28  ;;  %v8741_v28 = vld [vmem:[#allocation2 + $0x62] sm:$0xff]  ;;  %v8742_v54 = vld [vmem:[#allocation2 + $0x72] sm:$0xff] }
 0x5a2   : > { %11899 = vmatpush3.bf16.msra.mxu0 %v13850_v0  ;;  %v13435_v55 = vpop.permute.xlu0 %13434  ;;  %v17548_v35 = vpack.c.bf16 %v8948_v49, %v8947_v42  ;;  %v8940_v3 = vsel %vm890_vm2, %v8740_v43, %v13432_v61  ;;  %v8939_v4 = vsel %vm890_vm2, %v8739_v10, %v13431_v23  ;;  %v13862_v0 = vld [vmem:[#allocation9 + $0xc0] sm:$0xff]   ;;  %v17583_v49 = vld [vmem:[#allocation2 + $0x94] sm:$0xff] }
 0x5a3   : > { %v17544_v51 = vpop.permute.xlu1 %13439  ;;  %11900 = vmatprep.subr.bf16.mxu0 %v13852_v18  ;;  %v13437_v46 = vunpack.i.h.bf16 %v13435_v55  ;;  %v13436_v7 = vunpack.i.l.bf16 %v13435_v55  ;;  %v17566_v29 = vpack.c.bf16 %v8940_v3, %v8939_v4  ;;  %v17581_v42 = vld [vmem:[#allocation2 + $0x84] sm:$0xff]  ;;  %v8769_v23 = vld [vmem:[#allocation2 + $0x33] sm:$0xff] }
 0x5a4   : > { %v13442_v45 = vunpack.i.h.bf16 %v17544_v51  ;;  %v13441_v52 = vunpack.i.l.bf16 %v17544_v51  ;;  %v13866_v51 = vld [vmem:[%s18147_s18 + $0x78] sm:$0xff]  }
 0x5a5   : > { %9322 = vmatmul.mubr.bf16.vlgmr.msra.gmra.mxu1 %v17546_v58  ;;  %v8949_v6 = vsel %vm890_vm2, %v17556_v22, %v13436_v7  ;;  %v8950_v34 = vsel %vm890_vm2, %v17558_v13, %v13437_v46  ;;  %v8770_v46 = vld [vmem:[#allocation2 + $0x43] sm:$0xff] }
 0x5a6   : > { %11901 = vmatpush3.bf16.msra.mxu0 %v13853_v20  ;;  %v13445_v1 = vpop.permute.xlu0 %13444  ;;  %9329 = vmatprep.mubr.bf16.mxu1 %v17548_v35  ;;  %v17573_v40 = vpack.c.bf16 %v8950_v34, %v8949_v6  ;;  %v8942_v17 = vsel %vm890_vm2, %v8742_v54, %v13442_v45  ;;  %v8941_v25 = vsel %vm890_vm2, %v8741_v28, %v13441_v52  ;;  %v8772_v45 = vld [vmem:[#allocation2 + $0x63] sm:$0xff] }
 0x5a7   : > { %v13447_v41 = vunpack.i.h.bf16 %v13445_v1  ;;  %v13446_v36 = vunpack.i.l.bf16 %v13445_v1  ;;  %12109 = vmatpush3.bf16.msra.mxu1 %v13854_v53  ;;  %11902 = vmatprep.subr.bf16.mxu0 %v13855_v62  ;;  %v13450_v39 = vpop.permute.xlu1 %13449  ;;  %v13865_v53 = vld [vmem:[#allocation9 + $0x100] sm:$0xff]   ;;  %v17592_v7 = vpack.c.bf16 %v8942_v17, %v8941_v25  ;;  %v13867_v25 = vld [vmem:[%s18147_s18 + $0x38] sm:$0xff]  }
 0x5a8   : > { %12110 = vmatprep.subr.bf16.mxu1 %v13859_v57  ;;  %v13452_v30 = vunpack.i.h.bf16 %v13450_v39  ;;  %v13451_v18 = vunpack.i.l.bf16 %v13450_v39  ;;  %v13863_v62 = vld [vmem:[#allocation9 + $0x80] sm:$0xff]  }
 0x5a9   : > { %v11636_v21 = vpop.f32.mrf.mxu0  ;;  %v8961_v9 = vsel %vm890_vm2, %v8739_v10, %v13446_v36  ;;  %v8962_v50 = vsel %vm890_vm2, %v8740_v43, %v13447_v41  ;;  %v8743_v39 = vld [vmem:[#allocation2 + $0x82] sm:$0xff] }
 0x5aa   : > { %11903 = vmatpush3.bf16.msra.mxu0 %v13856_v59  ;;  %v13455_v38 = vpop.permute.xlu0 %13454  ;;  %v17560_v12 = vpack.c.bf16 %v8962_v50, %v8961_v9  ;;  %v8954_v1 = vsel %vm890_vm2, %v8770_v46, %v13452_v30  ;;  %v8953_v59 = vsel %vm890_vm2, %v8769_v23, %v13451_v18  ;;  %v8774_v17 = vld [vmem:[#allocation2 + $0x83] sm:$0xff]  ;;  %v17643_v23 = vpack.c.bf16 %v17583_v49, %v17581_v42 }
 0x5ab   : > { %v11637_v16 = vpop.f32.mrf.mxu0  ;;  %11904 = vmatprep.subr.bf16.mxu0 %v13857_v31  ;;  %12111 = vmatpush3.bf16.msra.mxu1 %v13859_v57  ;;  %v13457_v8 = vunpack.i.h.bf16 %v13455_v38  ;;  %v13456_v14 = vunpack.i.l.bf16 %v13455_v38  ;;  %v13460_v19 = vpop.permute.xlu1 %13459  ;;  %v17601_v4 = vpack.c.bf16 %v8954_v1, %v8953_v59 }
 0x5ac   : > { %18421 = vst [vmem:[#allocation46_spill] sm:$0xff] %v17560_v12  ;;  %v17568_v48 = vadd.f32 %v11637_v16, %v11636_v21  ;;  %9386 = vmatprep.mubr.bf16.mxu0 %v17560_v12  ;;  %12112 = vmatprep.subr.bf16.mxu1 %v13864_v11  ;;  %v13462_v41 = vunpack.i.h.bf16 %v13460_v19  ;;  %v13461_v36 = vunpack.i.l.bf16 %v13460_v19  ;;  %v8744_v21 = vld [vmem:[#allocation2 + $0x92] sm:$0xff]  ;;  %v17649_v59 = vpop.f32.mrf.mxu1 }
 0x5ad   : > { %v11639_v44 = vpop.f32.mrf.mxu0  ;;  %9330 = vmatmul.mubr.bf16.gmra.mxu1 %v17566_v29  ;;  %v8951_v57 = vsel %vm890_vm2, %v17581_v42, %v13456_v14  ;;  %v8952_v61 = vsel %vm890_vm2, %v17583_v49, %v13457_v8  ;;  %18422 = vst [vmem:[#allocation45_spill] sm:$0xff] %v17601_v4  ;;  %v17616_v14 = vpack.c.bf16 %v17538_v33, %v17536_v63  ;;  %v8792_v63 = vld [vmem:[#allocation2 + $0xb2] sm:$0xff] }
 0x5ae   : > { %11905 = vmatpush3.bf16.msra.mxu0 %v13858_v5  ;;  %v13465_v32 = vpop.permute.xlu0 %13464  ;;  %9337 = vmatprep.mubr.bf16.mxu1 %v17573_v40  ;;  %v17596_v10 = vpack.c.bf16 %v8952_v61, %v8951_v57  ;;  %v8944_v5 = vsel %vm890_vm2, %v8744_v21, %v13462_v41  ;;  %v8943_v6 = vsel %vm890_vm2, %v8743_v39, %v13461_v36  ;;  %v8773_v33 = vld [vmem:[#allocation2 + $0x73] sm:$0xff]  ;;  %v8791_v57 = vld [vmem:[#allocation2 + $0xa2] sm:$0xff] }
 0x5af   : > { %v11640_v2 = vpop.f32.mrf.mxu0  ;;  %11906 = vmatprep.subr.bf16.mxu0 %v13860_v56  ;;  %12113 = vmatpush3.bf16.msra.mxu1 %v13864_v11  ;;  %v13467_v55 = vunpack.i.h.bf16 %v13465_v32  ;;  %v13466_v20 = vunpack.i.l.bf16 %v13465_v32  ;;  %v13470_v31 = vpop.permute.xlu1 %13469  ;;  %v8771_v56 = vld [vmem:[#allocation2 + $0x53] sm:$0xff]  ;;  %v17610_v52 = vpack.c.bf16 %v8944_v5, %v8943_v6  ;;  %v13870_v36 = vld [vmem:[%s18147_s18 + $0x68] sm:$0xff]   ;;  %v13872_v6 = vld [vmem:[%s18147_s18 + $0x60] sm:$0xff]  }
 0x5b0   : > { %v17577_v24 = vadd.f32 %v11640_v2, %v11639_v44  ;;  %12114 = vmatprep.subr.bf16.mxu1 %v13865_v53  ;;  %v13472_v9 = vunpack.i.h.bf16 %v13470_v31  ;;  %v13471_v50 = vunpack.i.l.bf16 %v13470_v31  ;;  %v8807_v31 = vld [vmem:[#allocation2 + $0xa4] sm:$0xff] }
 0x5b1   : > { %v8963_v43 = vsel %vm890_vm2, %v8741_v28, %v13466_v20  ;;  %v8964_v11 = vsel %vm890_vm2, %v8742_v54, %v13467_v55 }
 0x5b2   : > { %11907 = vmatpush3.bf16.msra.mxu0 %v13861_v27  ;;  %v13475_v3 = vpop.permute.xlu0 %13474  ;;  %v17604_v38 = vpack.c.bf16 %v8964_v11, %v8963_v43  ;;  %v8956_v44 = vsel %vm890_vm2, %v8772_v45, %v13472_v9  ;;  %v8808_v43 = vld [vmem:[#allocation2 + $0xb4] sm:$0xff]  ;;  %v17665_v11 = vpop.f32.mrf.mxu1 }
 0x5b3   : > { %11908 = vmatprep.subr.bf16.mxu0 %v13862_v0  ;;  %12115 = vmatpush3.bf16.msra.mxu1 %v13865_v53  ;;  %v13477_v34 = vunpack.i.h.bf16 %v13475_v3  ;;  %v13476_v16 = vunpack.i.l.bf16 %v13475_v3  ;;  %v8955_v53 = vsel %vm890_vm2, %v8771_v56, %v13471_v50  ;;  %v13480_v8 = vpop.permute.xlu1 %13479  ;;  %v8775_v3 = vld [vmem:[#allocation2 + $0x93] sm:$0xff]  ;;  %v17672_v5 = vpack.c.bf16 %v8808_v43, %v8807_v31  ;;  %v13873_v56 = vld [vmem:[%s18147_s18 + $0x20] sm:$0xff]  }
 0x5b4   : > { %11948 = vmatprep.subr.bf16.mxu1 %v13866_v51  ;;  %18423 = vst [vmem:[#allocation47_spill] sm:$0xff] %v17604_v38  ;;  %v17621_v2 = vpack.c.bf16 %v8956_v44, %v8955_v53  ;;  %v13482_v0 = vunpack.i.h.bf16 %v13480_v8  ;;  %v13481_v28 = vunpack.i.l.bf16 %v13480_v8  ;;  %v17636_v51 = vpack.c.bf16 %v17558_v13, %v17556_v22  ;;  %v13869_v13 = vld [vmem:[%s18147_s18 + $0x30] sm:$0xff]   ;;  %v13874_v45 = vld [vmem:[%s18147_s18 + $0x58] sm:$0xff]  }
 0x5b5   : > { %9338 = vmatmul.mubr.bf16.gmra.mxu1 %v17592_v7  ;;  %v8965_v32 = vsel %vm890_vm2, %v8743_v39, %v13476_v16  ;;  %v8966_v27 = vsel %vm890_vm2, %v8744_v21, %v13477_v34  ;;  %v8776_v39 = vld [vmem:[#allocation2 + $0xa3] sm:$0xff]  ;;  %v17679_v34 = vpop.f32.mrf.mxu1  ;;  %v13875_v53 = vld [vmem:[%s18147_s18 + $0x18] sm:$0xff]  }
 0x5b6   : > { %11909 = vmatpush3.bf16.msra.mxu0 %v13863_v62  ;;  %9345 = vmatprep.mubr.bf16.mxu1 %v17596_v10  ;;  %v13485_v19 = vpop.permute.xlu0 %13484  ;;  %18424 = vst [vmem:[#allocation20_spill] sm:$0xff] %v17621_v2  ;;  %v17625_v54 = vpack.c.bf16 %v8966_v27, %v8965_v32  ;;  %v8958_v55 = vsel %vm890_vm2, %v8774_v17, %v13482_v0  ;;  %v13868_v62 = vld [vmem:[%s18147_s18 + $0x70] sm:$0xff]   ;;  %v13871_v21 = vld [vmem:[%s18147_s18 + $0x28] sm:$0xff]  }
 0x5b7   : > { %v13487_v30 = vunpack.i.h.bf16 %v13485_v19  ;;  %v13486_v18 = vunpack.i.l.bf16 %v13485_v19  ;;  %v8957_v20 = vsel %vm890_vm2, %v8773_v33, %v13481_v28  ;;  %v13490_v61 = vpop.permute.xlu1 %13489  ;;  %v17691_v44 = vpop.f32.mrf.mxu1  ;;  %v13877_v27 = vld [vmem:[%s18147_s18 + $0x10] sm:$0xff]   ;;  %v17705_v19 = vld [vmem:[%s18141_s12] ss:$0 sm:$0xff]  ;;  %v13879_v17 = vld [vmem:[%s18147_s18 + $0x8] sm:$0xff]  }
 0x5b8   : > { %18425 = vst [vmem:[#allocation19_spill] sm:$0xff] %v17625_v54  ;;  %v17651_v22 = vpack.c.bf16 %v8958_v55, %v8957_v20  ;;  %v13492_v42 = vunpack.i.h.bf16 %v13490_v61  ;;  %v13491_v49 = vunpack.i.l.bf16 %v13490_v61  ;;  %v8333_v0 = vadd.f32 %v17705_v19, %v17568_v48  ;;  %v13880_v48 = vld [vmem:[%s18147_s18 + $0x40] sm:$0xff]   ;;  %v13884_v61 = vld [vmem:[%s18147_s18 + $0x108] sm:$0xff]  }
 0x5b9   : > { %9387 = vmatmul.mubr.bf16.vlgmr.msra.gmra.mxu0 %v17601_v4  ;;  %v8967_v46 = vsel %vm890_vm2, %v8791_v57, %v13486_v18  ;;  %v8968_v1 = vsel %vm890_vm2, %v8792_v63, %v13487_v30  ;;  %v13878_v30 = vld [vmem:[%s18147_s18 + $0x48] sm:$0xff]   ;;  %v13882_v57 = vld [vmem:[%s18147_s18 + $0x118] sm:$0xff]  }
 0x5ba   : > { %9394 = vmatprep.mubr.bf16.mxu0 %v17604_v38  ;;  %18426 = vst [vmem:[#allocation48_spill] sm:$0xff] %v17651_v22  ;;  %v17658_v41 = vpack.c.bf16 %v8968_v1, %v8967_v46  ;;  %v8960_v9 = vsel %vm890_vm2, %v8776_v39, %v13492_v42  ;;  %v8959_v50 = vsel %vm890_vm2, %v8775_v3, %v13491_v49  ;;  %v13885_v46 = vld [vmem:[%s18147_s18 + $0x100] sm:$0xff]  }
 0x5bb   : > { %v17681_v16 = vpack.c.bf16 %v8960_v9, %v8959_v50 }
 0x5bc   : > { %18427 = vst [vmem:[#allocation24_spill] sm:$0xff] %v17658_v41 }
 0x5bd   : > { %9346 = vmatmul.mubr.bf16.gmra.mxu1 %v17610_v52  ;;  %18428 = vst [vmem:[#allocation41_spill] sm:$0xff] %v17681_v16 }
 0x5be   : > { %12116 = vmatprep.mubr.msk.bf16.mxu1 %vm890_vm2, %v17616_v14 }
 0x5c1   : > { %9395 = vmatmul.mubr.bf16.gmra.mxu0 %v17621_v2 }
 0x5c2   : > { %9402 = vmatprep.mubr.bf16.mxu0 %v17625_v54 }
 0x5c5   : > { %12117 = vmatmul.mubr.msk.bf16.vlgmr.msra.gmra.mxu1 %vm890_vm2, %v17636_v51 }
 0x5c6   : > { %11949 = vmatpush3.bf16.msra.mxu1 %v13867_v25  ;;  %12120 = vmatprep.mubr.msk.bf16.mxu1 %vm890_vm2, %v17643_v23  ;;  %v8336_v25 = vadd.f32 %v17705_v19, %v17577_v24  ;;  %v13883_v24 = vld [vmem:[%s18147_s18 + $0x110] sm:$0xff]  }
 0x5c7   : > { %11950 = vmatprep.subr.bf16.mxu1 %v13868_v62  ;;  %v13881_v62 = vld [vmem:[%s18147_s18] sm:$0xff]  }
 0x5c9   : > { %9403 = vmatmul.mubr.bf16.gmra.mxu0 %v17651_v22 }
 0x5ca   : > { %9410 = vmatprep.mubr.bf16.mxu0 %v17658_v41  ;;  %11951 = vmatpush3.bf16.msra.mxu1 %v13869_v13 }
 0x5cb   : > { %11952 = vmatprep.subr.bf16.mxu1 %v13870_v36 }
 0x5cd   : > { %12121 = vmatmul.mubr.msk.bf16.gmra.mxu1 %vm890_vm2, %v17672_v5 }
 0x5ce   : > { %11953 = vmatpush3.bf16.msra.mxu1 %v13871_v21  ;;  %9946 = vmatprep.mubr.bf16.mxu1 %v17530_v47  ;;  %v13876_v47 = vld [vmem:[%s18147_s18 + $0x50] sm:$0xff]  }
 0x5cf   : > { %11954 = vmatprep.subr.bf16.mxu1 %v13872_v6 }
 0x5d1   : > { %9411 = vmatmul.mubr.bf16.gmra.mxu0 %v17681_v16 }
 0x5d2   : > { %11955 = vmatpush3.bf16.msra.mxu1 %v13873_v56 }
 0x5d3   : > { %11956 = vmatprep.subr.bf16.mxu1 %v13874_v45 }
 0x5d5   : > { %v11676_v8 = vpop.f32.mrf.mxu1 }
 0x5d6   : > { %11957 = vmatpush3.bf16.msra.mxu1 %v13875_v53 }
 0x5d7   : > { %v11677_v32 = vpop.f32.mrf.mxu1  ;;  %11958 = vmatprep.subr.bf16.mxu1 %v13876_v47  ;;  %v13888_v47 = vld [vmem:[%s18147_s18 + $0xf8] sm:$0xff]  }
 0x5d8   : > { %v11678_v28 = vadd.f32 %v11677_v32, %v11676_v8 }
 0x5d9   : > { %v11679_v18 = vpop.f32.mrf.mxu1 }
 0x5da   : > { %v17712_v63 = vadd.f32 %v11678_v28, %v8333_v0  ;;  %11959 = vmatpush3.bf16.msra.mxu1 %v13877_v27 }
 0x5db   : > { %v11680_v33 = vpop.f32.mrf.mxu1  ;;  %11960 = vmatprep.subr.bf16.mxu1 %v13878_v30 }
 0x5dc   : > { %18429 = vst [vmem:[#allocation39_spill] sm:$0xff] %v17712_v63  ;;  %v11681_v55 = vadd.f32 %v11680_v33, %v11679_v18 }
 0x5de   : > { %v17722_v20 = vadd.f32 %v11681_v55, %v8336_v25  ;;  %11961 = vmatpush3.bf16.msra.mxu1 %v13879_v17 }
 0x5df   : > { %11962 = vmatprep.subr.bf16.mxu1 %v13880_v48 }
 0x5e0   : > { %18430 = vst [vmem:[#allocation18_spill] sm:$0xff] %v17722_v20 }
 0x5e2   : > { %11963 = vmatpush3.bf16.msra.mxu1 %v13881_v62 }
 0x5e3   : > { %12136 = vmatprep.subr.bf16.mxu1 %v13882_v57 }
 0x5e5   : > { %9947 = vmatmul.mubr.bf16.vlgmr.msra.gmra.mxu1 %v17546_v58 }
 0x5e6   : > { %9954 = vmatprep.mubr.bf16.mxu1 %v17548_v35  ;;  %12137 = vmatpush3.bf16.msra.mxu1 %v13882_v57 }
 0x5e7   : > { %12138 = vmatprep.subr.bf16.mxu1 %v13883_v24 }
 0x5ea   : > { %12139 = vmatpush3.bf16.msra.mxu1 %v13883_v24 }
 0x5eb   : > { %12140 = vmatprep.subr.bf16.mxu1 %v13884_v61 }
 0x5ed   : > { %v11642_v1 = vpop.f32.mrf.mxu0  ;;  %9955 = vmatmul.mubr.bf16.gmra.mxu1 %v17566_v29  ;;  %v13886_v29 = vld [vmem:[%s18145_s16 + $0x8] sm:$0xff]  }
 0x5ee   : > { %9962 = vmatprep.mubr.bf16.mxu1 %v17573_v40  ;;  %12141 = vmatpush3.bf16.msra.mxu1 %v13884_v61 }
 0x5ef   : > { %v11643_v58 = vpop.f32.mrf.mxu0  ;;  %12142 = vmatprep.subr.bf16.mxu1 %v13885_v46  ;;  %12124 = vmatprep.subr.bf16.mxu0 %v13886_v29 }
 0x5f0   : > { %v17743_v35 = vadd.f32 %v11643_v58, %v11642_v1  ;;  %12125 = vmatpush3.bf16.msra.mxu0 %v13886_v29 }
 0x5f1   : > { %v11645_v13 = vpop.f32.mrf.mxu0 }
 0x5f2   : > { %12143 = vmatpush3.bf16.msra.mxu1 %v13885_v46 }
 0x5f3   : > { %v11646_v42 = vpop.f32.mrf.mxu0 }
 0x5f4   : > { %v17745_v49 = vadd.f32 %v11646_v42, %v11645_v13 }
 0x5f5   : > { %9963 = vmatmul.mubr.bf16.gmra.mxu1 %v17592_v7  ;;  %v17755_v40 = vpop.f32.mrf.mxu0 }
 0x5f6   : > { %9970 = vmatprep.mubr.bf16.mxu1 %v17596_v10 }
 0x5f7   : > { %v17759_v36 = vpop.f32.mrf.mxu0 }
 0x5f9   : > { %v17763_v7 = vpop.f32.mrf.mxu0 }
 0x5fb   : > { %v17767_v10 = vpop.f32.mrf.mxu0 }
 0x5fd   : > { %9971 = vmatmul.mubr.bf16.gmra.mxu1 %v17610_v52  ;;  %v13887_v52 = vld [vmem:[%s18145_s16] sm:$0xff]  }
 0x5fe   : > { %12144 = vmatprep.mubr.msk.bf16.mxu1 %vm890_vm2, %v17616_v14  ;;  %12126 = vmatprep.subr.bf16.mxu0 %v13887_v52 }
 0x5ff   : > { %12127 = vmatpush3.bf16.msra.mxu0 %v13887_v52 }
 0x600   : > { %11988 = vmatprep.subr.bf16.mxu0 %v13888_v47 }
 0x605   : > { %12145 = vmatmul.mubr.msk.bf16.vlgmr.msra.gmra.mxu1 %vm890_vm2, %v17636_v51  ;;  %v11710_v51 = vpop.f32.mrf.mxu0 }
 0x606   : > { %12148 = vmatprep.mubr.msk.bf16.mxu1 %vm890_vm2, %v17643_v23 }
 0x607   : > { %v11711_v23 = vpop.f32.mrf.mxu0 }
 0x609   : > { %v11713_v21 = vpop.f32.mrf.mxu0 }
 0x60d   : > { %12149 = vmatmul.mubr.msk.bf16.gmra.mxu1 %vm890_vm2, %v17672_v5  ;;  %v11714_v5 = vpop.f32.mrf.mxu0 }
 0x60f   : > { %v17784_v45 = vpop.f32.mrf.mxu0 }
 0x611   : > { %v17772_v14 = vpop.f32.mrf.mxu1  ;;  %v17789_v32 = vpop.f32.mrf.mxu0 }
 0x613   : > { %v17774_v31 = vpop.f32.mrf.mxu1  ;;  %v17791_v0 = vpop.f32.mrf.mxu0 }
 0x614   : > { %18431 = vst [vmem:[#allocation26_spill] sm:$0xff] %v17791_v0  ;;  %v11712_v0 = vadd.f32 %v11711_v23, %v11710_v51 }
 0x615   : > { %v17776_v43 = vpop.f32.mrf.mxu1  ;;  %v17795_v30 = vpop.f32.mrf.mxu0 }
 0x616   : > { %18433 = vst [vmem:[#allocation13_spill] sm:$0xff] %v17795_v30  ;;  %v8325_v30 = vadd.f32 %v17705_v19, %v17447_v26 }
 0x617   : > { %v17778_v3 = vpop.f32.mrf.mxu1 }
 0x619   : > { %v11744_v39 = vpop.f32.mrf.mxu1 }
 0x61b   : > { %v11745_v9 = vpop.f32.mrf.mxu1 }
 0x61c   : > { %v11746_v26 = vadd.f32 %v11745_v9, %v11744_v39  ;;  %v11684_v39 = vadd.f32 %v17774_v31, %v17772_v14 }
 0x61d   : > { %v17780_v50 = vpop.f32.mrf.mxu1 }
 0x61f   : > { %v17782_v6 = vpop.f32.mrf.mxu1 }
 0x621   : > { %v11750_v56 = vpop.f32.mrf.mxu1 }
 0x623   : > { %v11751_v53 = vpop.f32.mrf.mxu1 }
 0x625   : > { %v11753_v8 = vpop.f32.mrf.mxu1 }
 0x627   : > { %v11754_v27 = vpop.f32.mrf.mxu1 }
 0x629   : > { %v17793_v28 = vpop.f32.mrf.mxu1 }
 0x62a   : > { %18432 = vst [vmem:[#allocation25_spill] sm:$0xff] %v17793_v28 }
 0x62b   : > { %v17797_v18 = vpop.f32.mrf.mxu1 }
 0x62c   : > { %18434 = vst [vmem:[#allocation28_spill] sm:$0xff] %v17797_v18  ;;  %v11752_v18 = vadd.f32 %v11751_v53, %v11750_v56 }
 0x62d   : > { %v17801_v17 = vpop.f32.mrf.mxu1 }
 0x62e   : > { %18435 = vst [vmem:[#allocation12_spill] sm:$0xff] %v17801_v17 }
 0x62f   : > { %v17807_v48 = vpop.f32.mrf.mxu1 }
 0x630   : > { %18437 = vst [vmem:[#allocation36_spill] sm:$0xff] %v17807_v48  ;;  %v11672_v48 = vadd.f32 %v17665_v11, %v17649_v59  ;;  %v8328_v59 = vadd.f32 %v17705_v19, %v17461_v37 }
 0x631   : > { %v17799_v33 = vpop.f32.mrf.mxu0 }
 0x632   : > { %v8390_v63 = vadd.f32 %v11672_v48, %v8325_v30  ;;  %v11755_v30 = vadd.f32 %v11754_v27, %v11753_v8 }
 0x633   : > { %v17803_v25 = vpop.f32.mrf.mxu0 }
 0x634   : > { %v8455_v11 = vadd.f32 %v11712_v0, %v8390_v63  ;;  %v11687_v0 = vadd.f32 %v17778_v3, %v17776_v43 }
 0x635   : > { %v17805_v55 = vpop.f32.mrf.mxu0 }
 0x636   : > { %18436 = vst [vmem:[#allocation37_spill] sm:$0xff] %v17805_v55 }
 0x637   : > { %v17809_v62 = vpop.f32.mrf.mxu0 }
 0x638   : > { %18438 = vst [vmem:[#allocation17_spill] sm:$0xff] %v17809_v62 }
 0x639   : > { %v17811_v57 = vpop.f32.mrf.mxu1  ;;  %v11784_v24 = vpop.f32.mrf.mxu0 }
 0x63b   : > { %v17813_v61 = vpop.f32.mrf.mxu1  ;;  %v11785_v46 = vpop.f32.mrf.mxu0 }
 0x63c   : > { %v11786_v37 = vadd.f32 %v11785_v46, %v11784_v24 }
 0x63d   : > { %v17815_v1 = vpop.f32.mrf.mxu1  ;;  %v11787_v58 = vpop.f32.mrf.mxu0 }
 0x63e   : > { %18439 = vst [vmem:[#allocation16_spill] sm:$0xff] %v17815_v1 }
 0x63f   : > { %v17817_v13 = vpop.f32.mrf.mxu1  ;;  %v11788_v42 = vpop.f32.mrf.mxu0  ;;  %v18446_v24 = vld [vmem:[#allocation17_spill] sm:$0xff] }
 0x640   : > { %18440 = vst [vmem:[#allocation38_spill] sm:$0xff] %v17817_v13  ;;  %v11789_v8 = vadd.f32 %v11788_v42, %v11787_v58  ;;  %v18449_v42 = vld [vmem:[#allocation39_spill] sm:$0xff] }
 0x641   : > { %v11790_v29 = vpop.f32.mrf.mxu0  ;;  %v11824_v52 = vpop.f32.mrf.mxu1 }
 0x643   : > { %v11791_v47 = vpop.f32.mrf.mxu0  ;;  %v11825_v16 = vpop.f32.mrf.mxu1 }
 0x644   : > { %v11792_v62 = vadd.f32 %v11791_v47, %v11790_v29 }
 0x645   : > { %v11793_v41 = vpop.f32.mrf.mxu0  ;;  %v11827_v22 = vpop.f32.mrf.mxu1 }
 0x647   : > { %v11794_v54 = vpop.f32.mrf.mxu0  ;;  %v11828_v2 = vpop.f32.mrf.mxu1 }
 0x649   : > { %v17819_v38 = vpop.f32.mrf.mxu0  ;;  %v11830_v4 = vpop.f32.mrf.mxu1 }
 0x64a   : > { %18441 = vst [vmem:[#allocation27_spill] sm:$0xff] %v17819_v38  ;;  %v11675_v38 = vadd.f32 %v17691_v44, %v17679_v34  ;;  %v11709_v44 = vadd.f32 %v17767_v10, %v17763_v7  ;;  %v8341_v10 = vadd.f32 %v17705_v19, %v17743_v35 }
 0x64b   : > { %v17821_v12 = vpop.f32.mrf.mxu0  ;;  %v11831_v20 = vpop.f32.mrf.mxu1 }
 0x64c   : > { %18442 = vst [vmem:[#allocation21_spill] sm:$0xff] %v17821_v12  ;;  %v11706_v12 = vadd.f32 %v17759_v36, %v17755_v40  ;;  %v8393_v55 = vadd.f32 %v11675_v38, %v8328_v59  ;;  %v11832_v48 = vadd.f32 %v11831_v20, %v11830_v4  ;;  %v11749_v38 = vadd.f32 %v17782_v6, %v17780_v50  ;;  %v18450_v59 = vld [vmem:[#allocation16_spill] sm:$0xff] }
 0x64d   : > { %v17825_v17 = vpop.f32.mrf.mxu0  ;;  %v11833_v13 = vpop.f32.mrf.mxu1  ;;  %v8450_v53 = vadd.f32 %v11709_v44, %v17394_v15  ;;  %v8406_v27 = vadd.f32 %v11684_v39, %v8341_v10  ;;  %v11764_v15 = vadd.f32 %v17813_v61, %v17811_v57  ;;  %v18448_v57 = vld [vmem:[#allocation28_spill] sm:$0xff] }
 0x64e   : > { %18443 = vst [vmem:[#allocation44_spill] sm:$0xff] %v17825_v17  ;;  %v11715_v17 = vadd.f32 %v11714_v5, %v11713_v21  ;;  %v8447_v34 = vadd.f32 %v11706_v12, %v17376_v60  ;;  %v11795_v21 = vadd.f32 %v11794_v54, %v11793_v41  ;;  %v11826_v12 = vadd.f32 %v11825_v16, %v11824_v52 }
 0x64f   : > { %v17829_v1 = vpop.f32.mrf.mxu0  ;;  %v11834_v51 = vpop.f32.mrf.mxu1  ;;  %v11724_v54 = vadd.f32 %v17803_v25, %v17799_v33  ;;  %v11718_v16 = vadd.f32 %v17789_v32, %v17784_v45  ;;  %v8515_v33 = vadd.f32 %v11749_v38, %v8450_v53  ;;  %v18445_v32 = vld [vmem:[#allocation37_spill] sm:$0xff] }
 0x650   : > { %18444 = vst [vmem:[#allocation40_spill] sm:$0xff] %v17829_v1  ;;  %v8520_v1 = vadd.f32 %v11752_v18, %v8455_v11  ;;  %v8458_v56 = vadd.f32 %v11715_v17, %v8393_v55  ;;  %v8512_v9 = vadd.f32 %v11746_v26, %v8447_v34  ;;  %v11835_v5 = vadd.f32 %v11834_v51, %v11833_v13  ;;  %v18451_v11 = vld [vmem:[#allocation38_spill] sm:$0xff]  ;;  %v18453_v51 = vld [vmem:[#allocation13_spill] sm:$0xff] }
 0x651   : > { %v11802_v28 = vpop.f32.mrf.mxu0  ;;  %v11829_v17 = vadd.f32 %v11828_v2, %v11827_v22  ;;  %v8471_v45 = vadd.f32 %v11724_v54, %v8406_v27  ;;  %v11727_v46 = vadd.f32 %v18446_v24, %v18445_v32  ;;  %v8580_v58 = vadd.f32 %v11789_v8, %v8515_v33  ;;  %v18452_v26 = vld [vmem:[#allocation26_spill] sm:$0xff] }
 0x652   : > { %v8585_v63 = vadd.f32 %v11792_v62, %v8520_v1  ;;  %v8523_v60 = vadd.f32 %v11755_v30, %v8458_v56  ;;  %v8577_v31 = vadd.f32 %v11786_v37, %v8512_v9  ;;  %v8344_v62 = vadd.f32 %v17705_v19, %v17745_v49  ;;  %v18447_v1 = vld [vmem:[#allocation25_spill] sm:$0xff] }
 0x653   : > { %v11803_v23 = vpop.f32.mrf.mxu0  ;;  %v11758_v61 = vadd.f32 %v18448_v57, %v18447_v1  ;;  %v8463_v29 = vadd.f32 %v11718_v16, %v18449_v42  ;;  %v8536_v47 = vadd.f32 %v11764_v15, %v8471_v45  ;;  %v11767_v19 = vadd.f32 %v18451_v11, %v18450_v59 }
 0x654   : > { %v8650_v7 = vadd.f32 %v11832_v48, %v8585_v63  ;;  %v8588_v50 = vadd.f32 %v11795_v21, %v8523_v60  ;;  %v8642_v25 = vadd.f32 %v11826_v12, %v8577_v31  ;;  %v11804_v43 = vadd.f32 %v11803_v23, %v11802_v28  ;;  %v18454_v28 = vld [vmem:[#allocation27_spill] sm:$0xff]  ;;  %v18455_v23 = vld [vmem:[#allocation21_spill] sm:$0xff]  ;;  %v18456_v12 = vld [vmem:[#allocation12_spill] sm:$0xff] }
 0x655   : > { %v11805_v40 = vpop.f32.mrf.mxu0  ;;  %v17840_v36 = vpop.f32.mrf.mxu1  ;;  %v8409_v52 = vadd.f32 %v11687_v0, %v8344_v62  ;;  %v11721_v30 = vadd.f32 %v18453_v51, %v18452_v26  ;;  %v11798_v48 = vadd.f32 %v18455_v23, %v18454_v28  ;;  %v8645_v44 = vadd.f32 %v11829_v17, %v8580_v58  ;;  %v18458_v31 = vld [vmem:[#allocation18_spill] sm:$0xff] }
 0x656   : > { %v8653_v55 = vadd.f32 %v11835_v5, %v8588_v50  ;;  %v8601_v37 = vadd.f32 %v11804_v43, %v8536_v47  ;;  %v8528_v9 = vadd.f32 %v11758_v61, %v8463_v29  ;;  %v18457_v5 = vld [vmem:[#allocation36_spill] sm:$0xff] }
 0x657   : > { %v11806_v4 = vpop.f32.mrf.mxu0  ;;  %v11837_v20 = vpop.f32.mrf.mxu1  ;;  %v8474_v56 = vadd.f32 %v11727_v46, %v8409_v52  ;;  %v8466_v8 = vadd.f32 %v11721_v30, %v18458_v31 }
 0x658   : > { %v11807_v63 = vadd.f32 %v11806_v4, %v11805_v40  ;;  %v11838_v53 = vadd.f32 %v11837_v20, %v17840_v36  ;;  %v8593_v50 = vadd.f32 %v11798_v48, %v8528_v9  ;;  %v18459_v40 = vld [vmem:[#allocation44_spill] sm:$0xff] }
 0x659   : > { %v17851_v41 = vpop.f32.mrf.mxu1  ;;  %v12102_v14 = vpop.f32.mrf.mxu0  ;;  %v8539_v10 = vadd.f32 %v11767_v19, %v8474_v56  ;;  %v18460_v4 = vld [vmem:[#allocation40_spill] sm:$0xff] }
 0x65a   : > { %v8715_v6 = vadd.f32 %v12102_v14, %v8650_v7  ;;  %v11761_v7 = vadd.f32 %v18457_v5, %v18456_v12  ;;  %v11801_v16 = vadd.f32 %v18460_v4, %v18459_v40  ;;  %v8658_v36 = vadd.f32 %v11838_v53, %v8593_v50  ;;  %v17901_v40 = vld [vmem:[%s18144_s15] ss:$0 sm:$0xff] }
 0x65b   : > { %v11840_v35 = vpop.f32.mrf.mxu1  ;;  %v8706_v18 = vpop.f32.mrf.mxu0  ;;  %v8604_v27 = vadd.f32 %v11807_v63, %v8539_v10 }
 0x65c   : > { %10311 = vrot.lane.b32.xlu0 %v8715_v6, %s14107_s7  ;;  %v8707_v13 = vadd.f32 %v8706_v18, %v8642_v25  ;;  %v8531_v17 = vadd.f32 %v11761_v7, %v8466_v8  ;;  %v11841_v25 = vadd.f32 %v11840_v35, %v17851_v41 }
 0x65d   : > { %v12103_v3 = vpop.f32.mrf.mxu0  ;;  %v11842_v2 = vpop.f32.mrf.mxu1 }
 0x65e   : > { %v8718_v22 = vadd.f32 %v12103_v3, %v8653_v55  ;;  %v8596_v62 = vadd.f32 %v11801_v16, %v8531_v17 }
 0x65f   : > { %v8709_v49 = vpop.f32.mrf.mxu0  ;;  %v11843_v34 = vpop.f32.mrf.mxu1 }
 0x660   : > { %10313 = vrot.lane.b32.xlu1 %v8718_v22, %s14107_s7  ;;  %10307 = vrot.lane.b32.xlu0 %v8707_v13, %s14107_s7  ;;  %v11844_v21 = vadd.f32 %v11843_v34, %v11842_v2  ;;  %v8710_v38 = vadd.f32 %v8709_v49, %v8645_v44  ;;  %v8661_v43 = vadd.f32 %v11841_v25, %v8596_v62 }
 0x661   : > { %v12106_v39 = vpop.f32.mrf.mxu0  ;;  %v11845_v60 = vpop.f32.mrf.mxu1 }
 0x662   : > { %v8666_v54 = vadd.f32 %v11844_v21, %v8601_v37 }
 0x663   : > { %v8722_v14 = vpop.f32.mrf.mxu0  ;;  %v11846_v6 = vpop.f32.mrf.mxu1 }
 0x664   : > { %10309 = vrot.lane.b32.xlu1 %v8710_v38, %s14107_s7  ;;  %v8731_v0 = vadd.f32 %v12106_v39, %v8666_v54  ;;  %v11847_v15 = vadd.f32 %v11846_v6, %v11845_v60  ;;  %v8723_v45 = vadd.f32 %v8722_v14, %v8658_v36  ;;  %v17894_v38 = vld [vmem:[%s18143_s14] ss:$0 sm:$0xff] }
 0x665   : > { %v12107_v18 = vpop.f32.mrf.mxu0  ;;  %v11870_v33 = vpop.f32.mrf.mxu1 }
 0x666   : > { %v8669_v20 = vadd.f32 %v11847_v15, %v8604_v27  ;;  %10319 = vrot.lane.b32.xlu0 %v8731_v0, %s14107_s7 }
 0x667   : > { %v11871_v55 = vpop.f32.mrf.mxu1  ;;  %v8725_v24 = vpop.f32.mrf.mxu0 }
 0x668   : > { %v8734_v32 = vadd.f32 %v12107_v18, %v8669_v20  ;;  %v8726_v1 = vadd.f32 %v8725_v24, %v8661_v43  ;;  %v11872_v48 = vadd.f32 %v11871_v55, %v11870_v33 }
 0x669   : > { %v11873_v46 = vpop.f32.mrf.mxu1 }
 0x66a   : > { %10321 = vrot.lane.b32.xlu1 %v8734_v32, %s14107_s7  ;;  %10315 = vrot.lane.b32.xlu0 %v8723_v45, %s14107_s7 }
 0x66b   : > { %v11874_v3 = vpop.f32.mrf.mxu1 }
 0x66c   : > { %v11875_v5 = vadd.f32 %v11874_v3, %v11873_v46 }
 0x66d   : > { %v11876_v57 = vpop.f32.mrf.mxu1 }
 0x66e   : > { %10317 = vrot.lane.b32.xlu1 %v8726_v1, %s14107_s7 }
 0x66f   : > { %v11877_v41 = vpop.f32.mrf.mxu1 }
 0x670   : > { %v11878_v30 = vadd.f32 %v11877_v41, %v11876_v57 }
 0x671   : > { %v11879_v35 = vpop.f32.mrf.mxu1 }
 0x673   : > { %v11880_v61 = vpop.f32.mrf.mxu1 }
 0x674   : > { %v11881_v39 = vadd.f32 %v11880_v61, %v11879_v35 }
 0x675   : > { %v11882_v58 = vpop.f32.mrf.mxu1 }
 0x677   : > { %v11883_v13 = vpop.f32.mrf.mxu1 }
 0x678   : > { %v11884_v50 = vadd.f32 %v11883_v13, %v11882_v58 }
 0x679   : > { %v11910_v2 = vpop.f32.mrf.mxu0  ;;  %v11885_v22 = vpop.f32.mrf.mxu1 }
 0x67b   : > { %v11911_v42 = vpop.f32.mrf.mxu0  ;;  %v11886_v29 = vpop.f32.mrf.mxu1 }
 0x67c   : > { %v11912_v26 = vadd.f32 %v11911_v42, %v11910_v2  ;;  %v11887_v55 = vadd.f32 %v11886_v29, %v11885_v22 }
 0x67d   : > { %v11913_v52 = vpop.f32.mrf.mxu0  ;;  %v11888_v47 = vpop.f32.mrf.mxu1 }
 0x67e   : > { %v9389_v21 = vadd.f32 %v11912_v26, %v11872_v48  ;;  %v13889_v26 = vld [vmem:[%s18147_s18 + $0xb8] sm:$0xff]  }
 0x67f   : > { %v11914_v59 = vpop.f32.mrf.mxu0  ;;  %v11889_v11 = vpop.f32.mrf.mxu1 }
 0x680   : > { %v11915_v37 = vadd.f32 %v11914_v59, %v11913_v52  ;;  %v11890_v2 = vadd.f32 %v11889_v11, %v11888_v47 }
 0x681   : > { %v11916_v19 = vpop.f32.mrf.mxu0  ;;  %v17887_v49 = vpop.f32.mrf.mxu1 }
 0x682   : > { %v9392_v8 = vadd.f32 %v11915_v37, %v11875_v5  ;;  %v13893_v5 = vld [vmem:[%s18147_s18 + $0xa8] sm:$0xff]  }
 0x683   : > { %v11917_v51 = vpop.f32.mrf.mxu0  ;;  %v17889_v23 = vpop.f32.mrf.mxu1 }
 0x684   : > { %v11918_v28 = vadd.f32 %v11917_v51, %v11916_v19 }
 0x685   : > { %v11919_v34 = vpop.f32.mrf.mxu0  ;;  %v12118_v56 = vpop.f32.mrf.mxu1 }
 0x686   : > { %v9397_v44 = vadd.f32 %v11918_v28, %v11878_v30  ;;  %v13890_v28 = vld [vmem:[%s18147_s18 + $0xf0] sm:$0xff]  }
 0x687   : > { %v11920_v63 = vpop.f32.mrf.mxu0  ;;  %v9453_v12 = vpop.f32.mrf.mxu1 }
 0x688   : > { %v9462_v9 = vadd.f32 %v12118_v56, %v9397_v44  ;;  %v11921_v60 = vadd.f32 %v11920_v63, %v11919_v34  ;;  %v9454_v7 = vadd.f32 %v9453_v12, %v9389_v21  ;;  %v11893_v34 = vadd.f32 %v17889_v23, %v17887_v49  ;;  %v13891_v63 = vld [vmem:[%s18147_s18 + $0xb0] sm:$0xff]  }
 0x689   : > { %v11922_v10 = vpop.f32.mrf.mxu0  ;;  %v12119_v54 = vpop.f32.mrf.mxu1 }
 0x68a   : > { %v9400_v53 = vadd.f32 %v11921_v60, %v11881_v39  ;;  %v9491_v14 = vmul.f32 %v17894_v38, %v9454_v7  ;;  %v9493_v6 = vmul.f32 %v17894_v38, %v9462_v9  ;;  %v13892_v9 = vld [vmem:[%s18147_s18 + $0xe8] sm:$0xff]  }
 0x68b   : > { %v11923_v31 = vpop.f32.mrf.mxu0  ;;  %v9456_v27 = vpop.f32.mrf.mxu1 }
 0x68c   : > { %v9465_v4 = vadd.f32 %v12119_v54, %v9400_v53  ;;  %v11924_v16 = vadd.f32 %v11923_v31, %v11922_v10  ;;  %v9457_v0 = vadd.f32 %v9456_v27, %v9392_v8  ;;  %v9506_v25 = vadd.f32 %v17901_v40, %v9491_v14  ;;  %v13894_v53 = vld [vmem:[%s18147_s18 + $0xe0] sm:$0xff]   ;;  %v13900_v27 = vld [vmem:[%s18147_s18 + $0xc8] sm:$0xff]  }
 0x68d   : > { %v11925_v15 = vpop.f32.mrf.mxu0  ;;  %v12122_v33 = vpop.f32.mrf.mxu1  ;;  %v9508_v62 = vadd.f32 %v17901_v40, %v9493_v6  ;;  %v13895_v14 = vld [vmem:[%s18147_s18 + $0xa0] sm:$0xff]   ;;  %v13897_v6 = vld [vmem:[%s18147_s18 + $0x98] sm:$0xff]  }
 0x68e   : > { %v9494_v18 = vmul.f32 %v17894_v38, %v9465_v4  ;;  %v9405_v17 = vadd.f32 %v11924_v16, %v11884_v50  ;;  %v9492_v36 = vmul.f32 %v17894_v38, %v9457_v0  ;;  %v9514_v35 = vmax.f32 %v9506_v25, 0.0  ;;  %v18461_v4 = vld [vmem:[#allocation46_spill] sm:$0xff]  ;;  %v13901_v0 = vld [vmem:[%s18147_s18 + $0x88] sm:$0xff]  }
 0x68f   : > { %v11926_v20 = vpop.f32.mrf.mxu0  ;;  %v9469_v24 = vpop.f32.mrf.mxu1  ;;  %v9516_v22 = vmax.f32 %v9508_v62, 0.0  ;;  %v13899_v16 = vld [vmem:[%s18147_s18 + $0x90] sm:$0xff]   ;;  %v18464_v25 = vld [vmem:[#allocation20_spill] sm:$0xff] }
 0x690   : > { %v9509_v45 = vadd.f32 %v17901_v40, %v9494_v18  ;;  %v11927_v32 = vadd.f32 %v11926_v20, %v11925_v15  ;;  %v9507_v46 = vadd.f32 %v17901_v40, %v9492_v36  ;;  %v9470_v43 = vadd.f32 %v9469_v24, %v9405_v17  ;;  %v13902_v15 = vld [vmem:[%s18147_s18 + $0xc0] sm:$0xff]   ;;  %v18468_v62 = vld [vmem:[#allocation41_spill] sm:$0xff] }
 0x691   : > { %v11928_v3 = vpop.f32.mrf.mxu0  ;;  %v12123_v57 = vpop.f32.mrf.mxu1  ;;  %v13903_v18 = vld [vmem:[%s18147_s18 + $0x80] sm:$0xff]  }
 0x692   : > { %v9517_v1 = vmax.f32 %v9509_v45, 0.0  ;;  %v9408_v41 = vadd.f32 %v11927_v32, %v11887_v55  ;;  %v9515_v61 = vmax.f32 %v9507_v46, 0.0  ;;  %v9495_v58 = vmul.f32 %v17894_v38, %v9470_v43  ;;  %v18463_v17 = vld [vmem:[#allocation47_spill] sm:$0xff]  ;;  %v18466_v20 = vld [vmem:[#allocation48_spill] sm:$0xff] }
 0x693   : > { %v11929_v13 = vpop.f32.mrf.mxu0  ;;  %v9472_v29 = vpop.f32.mrf.mxu1  ;;  %v18465_v36 = vld [vmem:[#allocation19_spill] sm:$0xff]  ;;  %v18467_v55 = vld [vmem:[#allocation24_spill] sm:$0xff] }
 0x694   : > { %v11930_v42 = vadd.f32 %v11929_v13, %v11928_v3  ;;  %v9522_v52 = vpack.c.bf16 %v9515_v61, %v9514_v35  ;;  %v9473_v59 = vadd.f32 %v9472_v29, %v9408_v41  ;;  %v9523_v51 = vpack.c.bf16 %v9517_v1, %v9516_v22  ;;  %v13904_v45 = vld [vmem:[%s18150_s21 + $0x8] sm:$0xff]   ;;  %v13905_v32 = vld [vmem:[%s18150_s21] sm:$0xff]  }
 0x695   : > { %v11931_v19 = vpop.f32.mrf.mxu0  ;;  %v9510_v48 = vadd.f32 %v17901_v40, %v9495_v58  ;;  %v10953_v58 = vld [vmem:[%s18146_s17] ss:$0 sm:$0xff] }
 0x696   : > { %v9413_v30 = vadd.f32 %v11930_v42, %v11890_v2  ;;  %v9496_v47 = vmul.f32 %v17894_v38, %v9473_v59  ;;  %12128 = vmatprep.mubr.msk.bf16.mxu0 %vm929_vm4, %v9522_v52 }
 0x697   : > { %v11932_v11 = vpop.f32.mrf.mxu0  ;;  %12129 = vmatmul.mubr.msk.bf16.vlgmr.msra.gmra.mxu0 %vm929_vm4, %v9523_v51  ;;  %v9518_v49 = vmax.f32 %v9510_v48, 0.0 }
 0x698   : > { %v9478_v44 = vadd.f32 %v12122_v33, %v9413_v30  ;;  %v11933_v56 = vadd.f32 %v11932_v11, %v11931_v19  ;;  %v9511_v37 = vadd.f32 %v17901_v40, %v9496_v47  ;;  %11989 = vmatpush3.bf16.msra.mxu0 %v13889_v26  ;;  %v18462_v33 = vld [vmem:[#allocation45_spill] sm:$0xff] }
 0x699   : > { %11990 = vmatprep.subr.bf16.mxu0 %v13890_v28 }
 0x69a   : > { %v9497_v21 = vmul.f32 %v17894_v38, %v9478_v44  ;;  %v9416_v39 = vadd.f32 %v11933_v56, %v11893_v34  ;;  %v9519_v23 = vmax.f32 %v9511_v37, 0.0 }
 0x69c   : > { %v9481_v60 = vadd.f32 %v12123_v57, %v9416_v39  ;;  %v9524_v12 = vpack.c.bf16 %v9519_v23, %v9518_v49  ;;  %11991 = vmatpush3.bf16.msra.mxu0 %v13891_v63  ;;  %v9512_v7 = vadd.f32 %v17901_v40, %v9497_v21 }
 0x69d   : > { %11992 = vmatprep.subr.bf16.mxu0 %v13892_v9 }
 0x69e   : > { %v9498_v10 = vmul.f32 %v17894_v38, %v9481_v60  ;;  %12132 = vmatprep.mubr.msk.bf16.mxu0 %vm929_vm4, %v9524_v12  ;;  %v9520_v31 = vmax.f32 %v9512_v7, 0.0  ;;  %v13896_v38 = vld [vmem:[%s18147_s18 + $0xd8] sm:$0xff]  }
 0x6a0   : > { %v9513_v54 = vadd.f32 %v17901_v40, %v9498_v10  ;;  %11993 = vmatpush3.bf16.msra.mxu0 %v13893_v5  ;;  %v13898_v40 = vld [vmem:[%s18147_s18 + $0xd0] sm:$0xff]  }
 0x6a1   : > { %11994 = vmatprep.subr.bf16.mxu0 %v13894_v53 }
 0x6a2   : > { %v9521_v8 = vmax.f32 %v9513_v54, 0.0 }
 0x6a4   : > { %v9525_v50 = vpack.c.bf16 %v9521_v8, %v9520_v31  ;;  %11995 = vmatpush3.bf16.msra.mxu0 %v13895_v14  ;;  %v18008_v14 = vld [vmem:[%s18148_s19] ss:$0 sm:$0xff] }
 0x6a5   : > { %11996 = vmatprep.subr.bf16.mxu0 %v13896_v38  ;;  %v11964_v24 = vpop.f32.mrf.mxu1 }
 0x6a6   : > { %12133 = vmatmul.mubr.msk.bf16.gmra.mxu0 %vm929_vm4, %v9525_v50 }
 0x6a7   : > { %10011 = vmatprep.mubr.bf16.mxu0 %v18461_v4  ;;  %v11965_v46 = vpop.f32.mrf.mxu1 }
 0x6a8   : > { %11997 = vmatpush3.bf16.msra.mxu0 %v13897_v6  ;;  %v11966_v5 = vadd.f32 %v11965_v46, %v11964_v24 }
 0x6a9   : > { %11998 = vmatprep.subr.bf16.mxu0 %v13898_v40  ;;  %v11967_v43 = vpop.f32.mrf.mxu1 }
 0x6ab   : > { %v11968_v3 = vpop.f32.mrf.mxu1 }
 0x6ac   : > { %11999 = vmatpush3.bf16.msra.mxu0 %v13899_v16  ;;  %v11969_v8 = vadd.f32 %v11968_v3, %v11967_v43 }
 0x6ad   : > { %12000 = vmatprep.subr.bf16.mxu0 %v13900_v27  ;;  %v11970_v1 = vpop.f32.mrf.mxu1  ;;  %v18014_v27 = vld [vmem:[%s18149_s20] ss:$0 sm:$0xff] }
 0x6af   : > { %v11971_v57 = vpop.f32.mrf.mxu1 }
 0x6b0   : > { %12001 = vmatpush3.bf16.msra.mxu0 %v13901_v0 }
 0x6b1   : > { %12002 = vmatprep.subr.bf16.mxu0 %v13902_v15  ;;  %v17982_v41 = vpop.f32.mrf.mxu1  ;;  %v11972_v15 = vadd.f32 %v11971_v57, %v11970_v1 }
 0x6b3   : > { %v17984_v35 = vpop.f32.mrf.mxu1 }
 0x6b4   : > { %12003 = vmatpush3.bf16.msra.mxu0 %v13903_v18 }
 0x6b5   : > { %12152 = vmatprep.subr.bf16.mxu0 %v13904_v45  ;;  %v17986_v61 = vpop.f32.mrf.mxu1 }
 0x6b7   : > { %10012 = vmatmul.mubr.bf16.vlgmr.msra.gmra.mxu0 %v18462_v33  ;;  %v17991_v22 = vpop.f32.mrf.mxu1 }
 0x6b8   : > { %10019 = vmatprep.mubr.bf16.mxu0 %v18463_v17  ;;  %12153 = vmatpush3.bf16.msra.mxu0 %v13904_v45  ;;  %v11975_v45 = vadd.f32 %v17984_v35, %v17982_v41 }
 0x6b9   : > { %12154 = vmatprep.subr.bf16.mxu0 %v13905_v32  ;;  %v17993_v19 = vpop.f32.mrf.mxu1 }
 0x6bb   : > { %v17995_v30 = vpop.f32.mrf.mxu1 }
 0x6bc   : > { %12155 = vmatpush3.bf16.msra.mxu0 %v13905_v32 }
 0x6bd   : > { %v17997_v28 = vpop.f32.mrf.mxu1 }
 0x6bf   : > { %10020 = vmatmul.mubr.bf16.gmra.mxu0 %v18464_v25  ;;  %v17999_v34 = vpop.f32.mrf.mxu1 }
 0x6c0   : > { %10027 = vmatprep.mubr.bf16.mxu0 %v18465_v36 }
 0x6c1   : > { %v18001_v21 = vpop.f32.mrf.mxu1 }
 0x6c3   : > { %v18003_v9 = vpop.f32.mrf.mxu1 }
 0x6c5   : > { %v12146_v49 = vpop.f32.mrf.mxu1 }
 0x6c7   : > { %10028 = vmatmul.mubr.bf16.gmra.mxu0 %v18466_v20  ;;  %v10078_v60 = vpop.f32.mrf.mxu1 }
 0x6c8   : > { %10035 = vmatprep.mubr.bf16.mxu0 %v18467_v55 }
 0x6c9   : > { %v12147_v54 = vpop.f32.mrf.mxu1 }
 0x6cb   : > { %v10081_v16 = vpop.f32.mrf.mxu1 }
 0x6cd   : > { %v12150_v55 = vpop.f32.mrf.mxu1 }
 0x6cf   : > { %10036 = vmatmul.mubr.bf16.gmra.mxu0 %v18468_v62 }
 0x757   : > { %v12130_v13 = vpop.f32.mrf.mxu0 }
 0x758   : > { %v9604_v2 = vadd.f32 %v12130_v13, %v10953_v58  ;;  %v10094_v13 = vpop.f32.mrf.mxu1 }
 0x759   : > { %v9595_v42 = vpop.f32.mrf.mxu0 }
 0x75a   : > { %10343 = vrot.lane.b32.xlu0 %v9604_v2, %s14108_s26  ;;  %v9596_v52 = vadd.f32 %v10953_v58, %v9595_v42  ;;  %v11978_v42 = vadd.f32 %v17991_v22, %v17986_v61 }
 0x75b   : > { %v12131_v29 = vpop.f32.mrf.mxu0 }
 0x75c   : > { %v9607_v59 = vadd.f32 %v12131_v29, %v10953_v58 }
 0x75d   : > { %v9598_v26 = vpop.f32.mrf.mxu0 }
 0x75e   : > { %10345 = vrot.lane.b32.xlu1 %v9607_v59, %s14108_s26  ;;  %10339 = vrot.lane.b32.xlu0 %v9596_v52, %s14108_s26  ;;  %v9599_v51 = vadd.f32 %v10953_v58, %v9598_v26 }
 0x762   : > { %10341 = vrot.lane.b32.xlu1 %v9599_v51, %s14108_s26 }
 0x766   : > { %v12134_v48 = vpop.f32.mrf.mxu0 }
 0x767   : > { %v9620_v47 = vadd.f32 %v12134_v48, %v10953_v58  ;;  %v12151_v48 = vpop.f32.mrf.mxu1 }
 0x768   : > { %v9611_v11 = vpop.f32.mrf.mxu0 }
 0x769   : > { %10351 = vrot.lane.b32.xlu0 %v9620_v47, %s14108_s26  ;;  %v9612_v56 = vadd.f32 %v10953_v58, %v9611_v11  ;;  %v11981_v11 = vadd.f32 %v17995_v30, %v17993_v19 }
 0x76a   : > { %v12135_v44 = vpop.f32.mrf.mxu0 }
 0x76b   : > { %v9623_v37 = vadd.f32 %v12135_v44, %v10953_v58 }
 0x76c   : > { %v9614_v63 = vpop.f32.mrf.mxu0 }
 0x76d   : > { %10353 = vrot.lane.b32.xlu1 %v9623_v37, %s14108_s26  ;;  %10347 = vrot.lane.b32.xlu0 %v9612_v56, %s14108_s26  ;;  %v9615_v39 = vadd.f32 %v10953_v58, %v9614_v63 }
 0x771   : > { %10349 = vrot.lane.b32.xlu1 %v9615_v39, %s14108_s26 }
 0x777   : > { %v12004_v23 = vpop.f32.mrf.mxu0 }
 0x779   : > { %v12005_v12 = vpop.f32.mrf.mxu0 }
 0x77a   : > { %v12006_v7 = vadd.f32 %v12005_v12, %v12004_v23  ;;  %v10097_v23 = vpop.f32.mrf.mxu1  ;;  %v11984_v12 = vadd.f32 %v17999_v34, %v17997_v28 }
 0x77b   : > { %v12007_v10 = vpop.f32.mrf.mxu0 }
 0x77c   : > { %v10014_v53 = vadd.f32 %v12006_v7, %v11966_v5 }
 0x77d   : > { %v12008_v31 = vpop.f32.mrf.mxu0 }
 0x77e   : > { %v10079_v38 = vadd.f32 %v10078_v60, %v10014_v53  ;;  %v12009_v50 = vadd.f32 %v12008_v31, %v12007_v10 }
 0x77f   : > { %v12010_v6 = vpop.f32.mrf.mxu0 }
 0x780   : > { %v10116_v40 = vmul.f32 %v18008_v14, %v10079_v38  ;;  %v10017_v4 = vadd.f32 %v12009_v50, %v11969_v8  ;;  %v11987_v8 = vadd.f32 %v18003_v9, %v18001_v21 }
 0x781   : > { %v12011_v0 = vpop.f32.mrf.mxu0 }
 0x782   : > { %v10082_v18 = vadd.f32 %v10081_v16, %v10017_v4  ;;  %v12012_v33 = vadd.f32 %v12011_v0, %v12010_v6  ;;  %v10131_v25 = vadd.f32 %v18014_v27, %v10116_v40 }
 0x783   : > { %v12013_v17 = vpop.f32.mrf.mxu0 }
 0x784   : > { %v10117_v36 = vmul.f32 %v18008_v14, %v10082_v18  ;;  %v10022_v20 = vadd.f32 %v12012_v33, %v11972_v15  ;;  %v10139_v3 = vmax.f32 %v10131_v25, 0.0  ;;  %v11002_v25 = vld [vmem:[#allocation4] ss:$0 sm:$0xff] }
 0x785   : > { %v12014_v62 = vpop.f32.mrf.mxu0 }
 0x786   : > { %v10132_v32 = vadd.f32 %v18014_v27, %v10117_v36  ;;  %v10087_v24 = vadd.f32 %v12146_v49, %v10022_v20  ;;  %v12015_v46 = vadd.f32 %v12014_v62, %v12013_v17 }
 0x787   : > { %v12016_v43 = vpop.f32.mrf.mxu0 }
 0x788   : > { %v10140_v1 = vmax.f32 %v10132_v32, 0.0  ;;  %v10118_v57 = vmul.f32 %v18008_v14, %v10087_v24  ;;  %v10025_v58 = vadd.f32 %v12015_v46, %v11975_v45 }
 0x789   : > { %v12017_v2 = vpop.f32.mrf.mxu0 }
 0x78a   : > { %v10090_v29 = vadd.f32 %v12147_v54, %v10025_v58  ;;  %v12018_v52 = vadd.f32 %v12017_v2, %v12016_v43  ;;  %v10147_v59 = vpack.c.bf16 %v10140_v1, %v10139_v3  ;;  %v10133_v41 = vadd.f32 %v18014_v27, %v10118_v57 }
 0x78b   : > { %v12019_v26 = vpop.f32.mrf.mxu0 }
 0x78c   : > { %v10119_v35 = vmul.f32 %v18008_v14, %v10090_v29  ;;  %v10030_v51 = vadd.f32 %v12018_v52, %v11978_v42  ;;  %12156 = vmatprep.mubr.msk.bf16.mxu0 %vm929_vm4, %v10147_v59  ;;  %v10141_v37 = vmax.f32 %v10133_v41, 0.0 }
 0x78d   : > { %v12020_v47 = vpop.f32.mrf.mxu0 }
 0x78e   : > { %v10134_v44 = vadd.f32 %v18014_v27, %v10119_v35  ;;  %v10095_v56 = vadd.f32 %v10094_v13, %v10030_v51  ;;  %v12021_v61 = vadd.f32 %v12020_v47, %v12019_v26 }
 0x78f   : > { %v12022_v22 = vpop.f32.mrf.mxu0 }
 0x790   : > { %v10142_v63 = vmax.f32 %v10134_v44, 0.0  ;;  %v10120_v39 = vmul.f32 %v18008_v14, %v10095_v56  ;;  %v10033_v49 = vadd.f32 %v12021_v61, %v11981_v11 }
 0x791   : > { %v12023_v60 = vpop.f32.mrf.mxu0 }
 0x792   : > { %v10148_v5 = vpack.c.bf16 %v10142_v63, %v10141_v37  ;;  %v10098_v7 = vadd.f32 %v10097_v23, %v10033_v49  ;;  %v12024_v10 = vadd.f32 %v12023_v60, %v12022_v22  ;;  %v10135_v19 = vadd.f32 %v18014_v27, %v10120_v39 }
 0x793   : > { %v12025_v53 = vpop.f32.mrf.mxu0 }
 0x794   : > { %v10121_v30 = vmul.f32 %v18008_v14, %v10098_v7  ;;  %v10038_v54 = vadd.f32 %v12024_v10, %v11984_v12  ;;  %12157 = vmatmul.mubr.msk.bf16.vlgmr.msra.gmra.mxu0 %vm929_vm4, %v10148_v5  ;;  %v10143_v28 = vmax.f32 %v10135_v19, 0.0 }
 0x795   : > { %v12026_v31 = vpop.f32.mrf.mxu0 }
 0x796   : > { %v10136_v38 = vadd.f32 %v18014_v27, %v10121_v30  ;;  %v10103_v50 = vadd.f32 %v12150_v55, %v10038_v54  ;;  %v12027_v6 = vadd.f32 %v12026_v31, %v12025_v53 }
 0x798   : > { %v10144_v34 = vmax.f32 %v10136_v38, 0.0  ;;  %v10122_v40 = vmul.f32 %v18008_v14, %v10103_v50  ;;  %v10041_v4 = vadd.f32 %v12027_v6, %v11987_v8  ;;  %v10591_v38 = vld [vmem:[%s18469_s2] ss:$0 sm:$0xff] }
 0x799   : > { %v18470_v50 = vld [vmem:[#allocation31_spill] sm:$0xff] }
 0x79a   : > { %v10106_v16 = vadd.f32 %v12151_v48, %v10041_v4  ;;  %v10149_v0 = vpack.c.bf16 %v10144_v34, %v10143_v28  ;;  %v10137_v15 = vadd.f32 %v18014_v27, %v10122_v40  ;;  %v1828_v6 = vadd.f32 %v18470_v50, %v10591_v38  ;;  %v18471_v28 = vld [vmem:[#allocation30_spill] sm:$0xff]  ;;  %v10312_v40 = vpop.permute.xlu0 %10311 }
 0x79b   : > { %v1820_v34 = vadd.f32 %v10591_v38, %v18471_v28 }
 0x79c   : > { %v10123_v18 = vmul.f32 %v18008_v14, %v10106_v16  ;;  %12160 = vmatprep.mubr.msk.bf16.mxu0 %vm929_vm4, %v10149_v0  ;;  %v10145_v21 = vmax.f32 %v10137_v15, 0.0  ;;  %v10600_v4 = vmul.f32 -1.442695, %v1828_v6  ;;  %v18472_v16 = vld [vmem:[#allocation34_spill] sm:$0xff] }
 0x79d   : > { %v1831_v0 = vadd.f32 %v18472_v16, %v10591_v38  ;;  %v10598_v15 = vmul.f32 -1.442695, %v1820_v34 }
 0x79e   : > { %v10138_v33 = vadd.f32 %v18014_v27, %v10123_v18  ;;  %v18051_v18 = vpop.permute.xlu1 %10313 }
 0x7a0   : > { %v10146_v9 = vmax.f32 %v10138_v33, 0.0  ;;  %v10601_v33 = vmul.f32 -1.442695, %v1831_v0 }
 0x7a2   : > { %v10150_v17 = vpack.c.bf16 %v10146_v9, %v10145_v21  ;;  %v18473_v21 = vld [vmem:[#allocation33_spill] sm:$0xff] }
 0x7a3   : > { %v1823_v9 = vadd.f32 %v10591_v38, %v18473_v21 }
 0x7a4   : > { %12161 = vmatmul.mubr.msk.bf16.gmra.mxu0 %vm929_vm4, %v10150_v17  ;;  %v10308_v17 = vpop.permute.xlu0 %10307 }
 0x854   : > { %v12158_v36 = vpop.f32.mrf.mxu0 }
 0x855   : > { %v10229_v20 = vadd.f32 %v12158_v36, %v11002_v25  ;;  %v18054_v36 = vpop.permute.xlu1 %10309 }
 0x856   : > { %v10220_v55 = vpop.f32.mrf.mxu0 }
 0x857   : > { %v11011_v62 = vmul.f32 -1.442695, %v10229_v20  ;;  %v10221_v45 = vadd.f32 %v11002_v25, %v10220_v55  ;;  %v18056_v20 = vpop.permute.xlu0 %10319 }
 0x858   : > { %v12159_v32 = vpop.f32.mrf.mxu0 }
 0x859   : > { %13906 = vpow2.f32 %v11011_v62  ;;  %v11009_v24 = vmul.f32 -1.442695, %v10221_v45  ;;  %v10232_v46 = vadd.f32 %v12159_v32, %v11002_v25  ;;  %v18058_v55 = vpop.permute.xlu1 %10321  ;;  %v18474_v62 = vld [vmem:[#allocation35_spill] sm:$0xff] }
 0x85a   : > { %v10223_v14 = vpop.f32.mrf.mxu0  ;;  %v1836_v45 = vadd.f32 %v10591_v38, %v18474_v62 }
 0x85b   : > { %13908 = vpow2.f32 %v11009_v24  ;;  %v11012_v43 = vmul.f32 -1.442695, %v10232_v46  ;;  %v10224_v3 = vadd.f32 %v11002_v25, %v10223_v14  ;;  %v18061_v32 = vpop.permute.xlu0 %10315  ;;  %v18475_v46 = vld [vmem:[#allocation32_spill] sm:$0xff] }
 0x85c   : > { %v1844_v14 = vadd.f32 %v18475_v46, %v10591_v38 }
 0x85d   : > { %13910 = vpow2.f32 %v11012_v43  ;;  %v11010_v27 = vmul.f32 -1.442695, %v10224_v3  ;;  %v18476_v43 = vld [vmem:[#allocation14_spill] sm:$0xff] }
 0x85e   : > { %v1839_v3 = vadd.f32 %v10591_v38, %v18476_v43 }
 0x85f   : > { %13912 = vpow2.f32 %v11010_v27  ;;  %v10602_v27 = vmul.f32 -1.442695, %v1836_v45 }
 0x864   : > { %v12162_v1 = vpop.f32.mrf.mxu0 }
 0x865   : > { %v10245_v57 = vadd.f32 %v12162_v1, %v11002_v25  ;;  %v18065_v1 = vpop.permute.xlu1 %10317 }
 0x866   : > { %v13907_v58 = vpop.eup %13906  ;;  %v10236_v13 = vpop.f32.mrf.mxu0 }
 0x867   : > { %v10277_v2 = vadd.f32 1.0, %v13907_v58  ;;  %v11015_v42 = vmul.f32 -1.442695, %v10245_v57  ;;  %v10237_v29 = vadd.f32 %v11002_v25, %v10236_v13  ;;  %v10344_v57 = vpop.permute.xlu0 %10343 }
 0x868   : > { %v13909_v52 = vpop.eup %13908  ;;  %v12163_v59 = vpop.f32.mrf.mxu0 }
 0x869   : > { %13914 = vrcp.f32 %v10277_v2  ;;  %v10275_v26 = vadd.f32 1.0, %v13909_v52  ;;  %v11013_v41 = vmul.f32 -1.442695, %v10237_v29  ;;  %v10248_v35 = vadd.f32 %v12163_v59, %v11002_v25  ;;  %v18477_v59 = vld [vmem:[#allocation15_spill] sm:$0xff] }
 0x86a   : > { %v13911_v51 = vpop.eup %13910  ;;  %13916 = vpow2.f32 %v11015_v42  ;;  %v10239_v48 = vpop.f32.mrf.mxu0  ;;  %v10604_v42 = vmul.f32 -1.442695, %v1844_v14  ;;  %v10603_v29 = vmul.f32 -1.442695, %v1839_v3 }
 0x86b   : > { %13918 = vrcp.f32 %v10275_v26  ;;  %v10278_v47 = vadd.f32 1.0, %v13911_v51  ;;  %v11016_v11 = vmul.f32 -1.442695, %v10248_v35  ;;  %v10240_v44 = vadd.f32 %v11002_v25, %v10239_v48  ;;  %v10340_v48 = vpop.permute.xlu0 %10339 }
 0x86c   : > { %v13913_v56 = vpop.eup %13912  ;;  %13920 = vpow2.f32 %v11013_v41  ;;  %v10599_v25 = vmul.f32 -1.442695, %v1823_v9  ;;  %v1847_v26 = vadd.f32 %v18477_v59, %v10591_v38  ;;  %v10346_v41 = vpop.permute.xlu1 %10345 }
 0x86d   : > { %13922 = vrcp.f32 %v10278_v47  ;;  %v10276_v61 = vadd.f32 1.0, %v13913_v56  ;;  %v11014_v22 = vmul.f32 -1.442695, %v10240_v44 }
 0x86e   : > { %13924 = vpow2.f32 %v11016_v11  ;;  %v10605_v47 = vmul.f32 -1.442695, %v1847_v26 }
 0x86f   : > { %13926 = vpow2.f32 %v11014_v22  ;;  %v18068_v56 = vpop.permute.xlu0 %10351 }
 0x870   : > { %13928 = vrcp.f32 %v10276_v61  ;;  %v10342_v44 = vpop.permute.xlu1 %10341 }
 0x873   : > { %v10348_v22 = vpop.permute.xlu0 %10347 }
 0x874   : > { %v18070_v61 = vpop.permute.xlu1 %10353 }
 0x876   : > { %v13915_v37 = vpop.eup %13914 }
 0x877   : > { %v13917_v63 = vpop.eup %13916  ;;  %10375 = vrot.lane.b32.xlu0 %v13915_v37, %s14109_s5 }
 0x878   : > { %v13919_v39 = vpop.eup %13918  ;;  %v10281_v12 = vadd.f32 1.0, %v13917_v63 }
 0x879   : > { %v13921_v49 = vpop.eup %13920 }
 0x87a   : > { %v13923_v23 = vpop.eup %13922  ;;  %v10279_v60 = vadd.f32 1.0, %v13921_v49 }
 0x87b   : > { %10377 = vrot.lane.b32.xlu1 %v13923_v23, %s14109_s5  ;;  %10371 = vrot.lane.b32.xlu0 %v13919_v39, %s14109_s5  ;;  %v13925_v5 = vpop.eup %13924 }
 0x87c   : > { %13930 = vrcp.f32 %v10279_v60  ;;  %v13927_v7 = vpop.eup %13926  ;;  %v10282_v19 = vadd.f32 1.0, %v13925_v5  ;;  %v10350_v5 = vpop.permute.xlu1 %10349 }
 0x87d   : > { %v13929_v10 = vpop.eup %13928  ;;  %v10280_v53 = vadd.f32 1.0, %v13927_v7  ;;  %13932 = vrcp.f32 %v10281_v12 }
 0x87f   : > { %10373 = vrot.lane.b32.xlu1 %v13929_v10, %s14109_s5  ;;  %13934 = vrcp.f32 %v10280_v53 }
 0x880   : > { %13936 = vrcp.f32 %v10282_v19 }
 0x881   : > { %13938 = vpow2.f32 %v10600_v4 }
 0x882   : > { %13940 = vpow2.f32 %v10598_v15 }
 0x883   : > { %13942 = vpow2.f32 %v10601_v33 }
 0x884   : > { %13944 = vpow2.f32 %v10599_v25 }
 0x885   : > { %13946 = vpow2.f32 %v10602_v27 }
 0x889   : > { %v13931_v30 = vpop.eup %13930 }
 0x88a   : > { %10379 = vrot.lane.b32.xlu0 %v13931_v30, %s14109_s5  ;;  %v13933_v54 = vpop.eup %13932 }
 0x88c   : > { %v13935_v31 = vpop.eup %13934 }
 0x88d   : > { %10381 = vrot.lane.b32.xlu1 %v13935_v31, %s14109_s5  ;;  %v13937_v8 = vpop.eup %13936 }
 0x88e   : > { %10383 = vrot.lane.b32.xlu0 %v13933_v54, %s14109_s5  ;;  %v13939_v24 = vpop.eup %13938 }
 0x88f   : > { %v13941_v58 = vpop.eup %13940  ;;  %v1876_v13 = vadd.f32 1.0, %v13939_v24 }
 0x890   : > { %v13943_v2 = vpop.eup %13942  ;;  %v1874_v52 = vadd.f32 1.0, %v13941_v58 }
 0x891   : > { %10385 = vrot.lane.b32.xlu1 %v13937_v8, %s14109_s5  ;;  %13948 = vrcp.f32 %v1876_v13  ;;  %v1877_v35 = vadd.f32 1.0, %v13943_v2  ;;  %v13945_v51 = vpop.eup %13944 }
 0x892   : > { %13950 = vpow2.f32 %v10604_v42  ;;  %v1875_v11 = vadd.f32 1.0, %v13945_v51  ;;  %v13947_v37 = vpop.eup %13946 }
 0x893   : > { %13952 = vpow2.f32 %v10603_v29  ;;  %v1878_v60 = vadd.f32 1.0, %v13947_v37 }
 0x894   : > { %13954 = vrcp.f32 %v1874_v52 }
 0x895   : > { %13956 = vrcp.f32 %v1877_v35 }
 0x896   : > { %13958 = vpow2.f32 %v10605_v47 }
 0x897   : > { %13960 = vrcp.f32 %v1875_v11 }
 0x898   : > { %13962 = vrcp.f32 %v1878_v60 }
 0x89e   : > { %v13949_v63 = vpop.eup %13948 }
 0x89f   : > { %v13951_v39 = vpop.eup %13950  ;;  %v10398_v49 = vsel %vm10395_vm7, %v13949_v63, %v10312_v40 }
 0x8a0   : > { %v13953_v23 = vpop.eup %13952  ;;  %v10406_v12 = vsel %vm800_vm1, %v10398_v49, %v10344_v57  ;;  %v1880_v54 = vadd.f32 1.0, %v13951_v39 }
 0x8a1   : > { %v13955_v10 = vpop.eup %13954  ;;  %v1879_v38 = vadd.f32 1.0, %v13953_v23 }
 0x8a2   : > { %v13957_v19 = vpop.eup %13956  ;;  %v10396_v8 = vsel %vm10395_vm7, %v13955_v10, %v10308_v17  ;;  %13964 = vrcp.f32 %v1880_v54 }
 0x8a3   : > { %v10399_v31 = vsel %vm10395_vm7, %v13957_v19, %v18051_v18  ;;  %v10404_v6 = vsel %vm800_vm1, %v10396_v8, %v10340_v48  ;;  %v13959_v40 = vpop.eup %13958  ;;  %13966 = vrcp.f32 %v1879_v38 }
 0x8a4   : > { %v10407_v50 = vsel %vm800_vm1, %v10399_v31, %v10346_v41  ;;  %v13961_v0 = vpop.eup %13960  ;;  %v1881_v21 = vadd.f32 1.0, %v13959_v40 }
 0x8a5   : > { %v10397_v33 = vsel %vm10395_vm7, %v13961_v0, %v18054_v36  ;;  %v13963_v45 = vpop.eup %13962 }
 0x8a6   : > { %v10405_v9 = vsel %vm800_vm1, %v10397_v33, %v10342_v44  ;;  %13968 = vrcp.f32 %v1881_v21  ;;  %v10400_v24 = vsel %vm10395_vm7, %v13963_v45, %v18061_v32 }
 0x8a7   : > { %v10408_v36 = vsel %vm800_vm1, %v10400_v24, %v10348_v22 }
 0x8af   : > { %v13965_v14 = vpop.eup %13964 }
 0x8b0   : > { %v13967_v3 = vpop.eup %13966  ;;  %v10402_v57 = vsel %vm10395_vm7, %v13965_v14, %v18056_v20 }
 0x8b1   : > { %v10401_v58 = vsel %vm10395_vm7, %v13967_v3, %v18065_v1  ;;  %v10410_v32 = vsel %vm800_vm1, %v10402_v57, %v18068_v56 }
 0x8b2   : > { %v10409_v13 = vsel %vm800_vm1, %v10401_v58, %v10350_v5 }
 0x8b3   : > { %v13969_v59 = vpop.eup %13968 }
 0x8b4   : > { %v10403_v1 = vsel %vm10395_vm7, %v13969_v59, %v18058_v55 }
 0x8b5   : > { %v10411_v41 = vsel %vm800_vm1, %v10403_v1, %v18070_v61 }
 0x8e9   : > { %v10376_v7 = vpop.permute.xlu0 %10375 }
 0x8ea   : > { %v10415_v53 = vsel %vm10412_vm8, %v10406_v12, %v10376_v7 }
 0x8eb   : > { %v10424_v30 = vsel %vm10421_vm9, %v10415_v53, 0.0 }
 0x8ec   : > { %10432 = vst [vmem:[%s18078_s29 + $0x10] sm:$0xff] %v10424_v30 }
 0x8ed   : > { %v10378_v28 = vpop.permute.xlu1 %10377  ;;  %v10372_v34 = vpop.permute.xlu0 %10371 }
 0x8ee   : > { %v10416_v4 = vsel %vm10412_vm8, %v10407_v50, %v10378_v28  ;;  %v10413_v16 = vsel %vm10412_vm8, %v10404_v6, %v10372_v34 }
 0x8ef   : > { %v10425_v15 = vsel %vm10421_vm9, %v10416_v4, 0.0  ;;  %v10422_v18 = vsel %vm10421_vm9, %v10413_v16, 0.0 }
 0x8f0   : > { %10433 = vst [vmem:[%s18078_s29 + $0x18] sm:$0xff] %v10425_v15  ;;  %10430 = vst [vmem:[%s18078_s29] sm:$0xff] %v10422_v18 }
 0x8f1   : > { %v10374_v17 = vpop.permute.xlu1 %10373 }
 0x8f2   : > { %v10414_v25 = vsel %vm10412_vm8, %v10405_v9, %v10374_v17 }
 0x8f3   : > { %v10423_v62 = vsel %vm10421_vm9, %v10414_v25, 0.0 }
 0x8f4   : > { %10431 = vst [vmem:[%s18078_s29 + $0x8] sm:$0xff] %v10423_v62 }
 0x8fc   : > { %v10380_v46 = vpop.permute.xlu0 %10379 }
 0x8fd   : > { %v10417_v43 = vsel %vm10412_vm8, %v10408_v36, %v10380_v46 }
 0x8fe   : > { %v10426_v27 = vsel %vm10421_vm9, %v10417_v43, 0.0 }
 0x8ff   : > { %10434 = vst [vmem:[%s18078_s29 + $0x20] sm:$0xff] %v10426_v27  ;;  %v10382_v2 = vpop.permute.xlu1 %10381 }
 0x900   : > { %v10384_v42 = vpop.permute.xlu0 %10383  ;;  %v10418_v29 = vsel %vm10412_vm8, %v10409_v13, %v10382_v2 }
 0x901   : > { %v10419_v52 = vsel %vm10412_vm8, %v10410_v32, %v10384_v42  ;;  %v10427_v26 = vsel %vm10421_vm9, %v10418_v29, 0.0 }
 0x902   : > { %v10428_v20 = vsel %vm10421_vm9, %v10419_v52, 0.0  ;;  %10435 = vst [vmem:[%s18078_s29 + $0x28] sm:$0xff] %v10427_v26 }
 0x903   : > { %10436 = vst [vmem:[%s18078_s29 + $0x30] sm:$0xff] %v10428_v20  ;;  %v10386_v35 = vpop.permute.xlu1 %10385 }
 0x904   : > { %v10420_v51 = vsel %vm10412_vm8, %v10411_v41, %v10386_v35 }
 0x905   : > { %v10429_v48 = vsel %vm10421_vm9, %v10420_v51, 0.0 }
 0x906   : > { %10437 = vst [vmem:[%s18078_s29 + $0x38] sm:$0xff] %v10429_v48 }
 0x907 PF: > { %s37_s24 = sadd.s32 1, %s14096_s24  }
 0x908   : > { %p34_p2 = scmp.ge.s32.totalorder %s37_s24, 4  }
 0x90a   :  { %36 = sbr.rel (!%p34_p2) target bundleno = 11 (0xb), region = 167 }
 0x90f   :  { %10459 = vsyncpa [#allocation6], 1 }
 0x910   :  { %10461 = vsyncpa [#allocation6 + $0x1], 1 }
 0x911   :  { %10462 = vsyncpa [#allocation8], 1 }

</bundles_post_ra>
